<compile_context>
chip_gen: v6e
topology: v6e:2x2x1
jax: 0.10.0
libtpu: 0.0.40
codegen_flags: <defaults>
</compile_context>

<pallas_src>
import functools

import jax
import jax.numpy as jnp
from jax.experimental import pallas as pl
from jax.experimental.pallas import tpu as pltpu


# -----------------------------------------------------------------------------
# Pallas kernel: transposed conv-matmul with fused bias / InstanceNorm / LReLU
# -----------------------------------------------------------------------------
def _conv_kernel(p_ref, w_ref, b_ref, o_ref, *, negative_slope,
                 apply_instance_norm, eps):
    """(Cout, K) @ (K, hw) + bias [+ InstanceNorm over hw] [+ LeakyReLU]."""
    y = jnp.dot(w_ref[...], p_ref[...], preferred_element_type=jnp.float32)
    y = y + b_ref[...]                        # (Cout, 1) broadcast over lanes
    if apply_instance_norm:
        # One full (n, c) spatial plane lives in this block: reduce over lanes.
        mean = jnp.mean(y, axis=1, keepdims=True)
        var = jnp.mean(jnp.square(y - mean), axis=1, keepdims=True)
        y = (y - mean) * jax.lax.rsqrt(var + eps)
    if negative_slope is not None:
        y = jnp.where(y > 0, y, negative_slope * y)
    o_ref[...] = y.astype(o_ref.dtype)


# -----------------------------------------------------------------------------
# Layer wrapper (im2col / padding in plain JAX glue, matmul+epilogue in Pallas)
# -----------------------------------------------------------------------------
def conv_block(x_nchw, w, b, *, stride, pad, lrelu_slope=None,
               instance_norm=False, hw_tile=None, out_dtype=jnp.bfloat16,
               eps=1e-5):
    """x: (N,Cin,H,W); w: (Cout,Cin,k,k) [PyTorch layout]; b: (Cout,)."""
    N, Cin, H, W = x_nchw.shape
    Cout, _, k, _ = w.shape
    Ho = (H + 2 * pad - k) // stride + 1
    Wo = (W + 2 * pad - k) // stride + 1
    HW = Ho * Wo
    K = k * k * Cin

    x = x_nchw.astype(jnp.bfloat16)
    xp = jnp.pad(x, ((0, 0), (0, 0), (pad, pad), (pad, pad)))

    # Transposed im2col: per image, rows K = (kh, kw, cin), columns = H*W.
    cols = []
    for kh in range(k):
        for kw in range(k):
            cols.append(
                xp[:, :, kh:kh + stride * Ho:stride, kw:kw + stride * Wo:stride]
                .reshape(N, Cin, HW))
    patches = jnp.stack(cols, axis=1).reshape(N, K, HW)          # (N, K, HW) bf16

    # (Cout, Cin, kh, kw) -> (Cout, kh, kw, Cin) -> (Cout, K): matches patches.
    w2 = jnp.transpose(w, (0, 2, 3, 1)).reshape(Cout, K).astype(jnp.bfloat16)
    b2 = b.reshape(Cout, 1).astype(jnp.float32)

    # InstanceNorm needs the whole (n, c) spatial plane inside one block.
    if hw_tile is None or instance_norm:
        hw_tile = HW
    assert HW % hw_tile == 0
    n_hw = HW // hw_tile

    kernel = functools.partial(
        _conv_kernel, negative_slope=lrelu_slope,
        apply_instance_norm=instance_norm, eps=eps)

    out = pl.pallas_call(
        kernel,
        out_shape=jax.ShapeDtypeStruct((N, Cout, HW), out_dtype),
        grid=(N, n_hw),
        in_specs=[
            pl.BlockSpec((None, K, hw_tile), lambda n, j: (n, 0, j)),
            pl.BlockSpec((Cout, K), lambda n, j: (0, 0)),
            pl.BlockSpec((Cout, 1), lambda n, j: (0, 0)),
        ],
        out_specs=pl.BlockSpec((None, Cout, hw_tile), lambda n, j: (n, 0, j)),
        compiler_params=pltpu.CompilerParams(
            dimension_semantics=("parallel", "parallel"),
            vmem_limit_bytes=32 * 1024 * 1024),
    )(patches, w2, b2)

    return out.reshape(N, Cout, Ho, Wo)


# -----------------------------------------------------------------------------
# Discriminator
# -----------------------------------------------------------------------------
def init_params(key, channels_img, features):
    def init_conv(k, cout, cin, ksz):
        kw, kb = jax.random.split(k)
        fan_in = cin * ksz * ksz
        w = jax.random.normal(kw, (cout, cin, ksz, ksz), jnp.float32) / jnp.sqrt(fan_in)
        b = jax.random.normal(kb, (cout,), jnp.float32) * 0.01
        return {"w": w, "b": b}

    ks = jax.random.split(key, 5)
    f = features
    return [
        init_conv(ks[0], f, channels_img, 4),
        init_conv(ks[1], 2 * f, f, 4),
        init_conv(ks[2], 4 * f, 2 * f, 4),
        init_conv(ks[3], 8 * f, 4 * f, 4),
        init_conv(ks[4], 1, 8 * f, 4),
    ]


def discriminator_forward(params, x_nchw, channels_img):
    assert tuple(x_nchw.shape[1:]) == (channels_img, 256, 256)
    x = x_nchw
    # Conv(c->f, s2, p1) + LeakyReLU(0.2)            (H*W = 16384, tiled)
    x = conv_block(x, params[0]["w"], params[0]["b"], stride=2, pad=1,
                   lrelu_slope=0.2, hw_tile=8192)
    # Conv(f->2f, s2) + InstanceNorm + LeakyReLU     (fused epilogue)
    x = conv_block(x, params[1]["w"], params[1]["b"], stride=2, pad=1,
                   lrelu_slope=0.2, instance_norm=True)
    # Conv(2f->4f, s2) + InstanceNorm + LeakyReLU
    x = conv_block(x, params[2]["w"], params[2]["b"], stride=2, pad=1,
                   lrelu_slope=0.2, instance_norm=True)
    # Conv(4f->8f, s1) + InstanceNorm + LeakyReLU
    x = conv_block(x, params[3]["w"], params[3]["b"], stride=1, pad=1,
                   lrelu_slope=0.2, instance_norm=True)
    # Conv(8f->1, s1)  (Cout=1 is lane-dense thanks to the transposed output)
    x = conv_block(x, params[4]["w"], params[4]["b"], stride=1, pad=1,
                   lrelu_slope=None, instance_norm=False, out_dtype=jnp.float32)
    return x   # NCHW, (N, 1, 30, 30)


# -----------------------------------------------------------------------------
if __name__ == "__main__":
    channels_img = 3
    features = 4      # small features; spatial must be 256 per the module's assert
    batch = 2

    key = jax.random.PRNGKey(0)
    kx, kp = jax.random.split(key)
    x = jax.random.normal(kx, (batch, channels_img, 256, 256), jnp.float32)
    params = init_params(kp, channels_img, features)

    fwd = jax.jit(functools.partial(discriminator_forward, channels_img=channels_img))
    out = fwd(params, x)
    out = jax.block_until_ready(out)

    assert out.shape == (batch, 1, 30, 30), out.shape
    assert jnp.all(jnp.isfinite(out))
    print("KERNEL_OK")
</pallas_src>

<mosaic_0001>
module attributes {stable_mosaic.version = 11 : i64} {
  func.func @_conv_kernel(%arg0: i32, %arg1: i32, %arg2: memref<1x48x8192xbf16, #tpu.memory_space<vmem>>, %arg3: memref<4x48xbf16, #tpu.memory_space<vmem>>, %arg4: memref<4x1xf32, #tpu.memory_space<vmem>>, %arg5: memref<1x4x8192xbf16, #tpu.memory_space<vmem>>) attributes {dimension_semantics = [#tpu.dimension_semantics<parallel>, #tpu.dimension_semantics<parallel>], iteration_bounds = array<i64: 2, 2>, scalar_prefetch = 0 : i64, scratch_operands = 0 : i64, tpu.core_type = #tpu.core_type<tc>, window_params = [{transform_indices = @transform_0, window_bounds = array<i64: 1, 48, 8192>}, {pipeline_mode = #tpu.pipeline_mode<synchronous>, transform_indices = @transform_1, window_bounds = array<i64: 4, 48>}, {pipeline_mode = #tpu.pipeline_mode<synchronous>, transform_indices = @transform_2, window_bounds = array<i64: 4, 1>}, {transform_indices = @transform_3, window_bounds = array<i64: 1, 4, 8192>}]} {
    %c0 = arith.constant 0 : index
    %c0_0 = arith.constant 0 : index
    %0 = vector.load %arg3[%c0, %c0_0] : memref<4x48xbf16, #tpu.memory_space<vmem>>, vector<4x48xbf16>
    %c0_1 = arith.constant 0 : index
    %c0_2 = arith.constant 0 : index
    %c0_3 = arith.constant 0 : index
    %1 = vector.load %arg2[%c0_1, %c0_2, %c0_3] : memref<1x48x8192xbf16, #tpu.memory_space<vmem>>, vector<1x48x8192xbf16>
    %2 = vector.shape_cast %1 : vector<1x48x8192xbf16> to vector<48x8192xbf16>
    %cst = arith.constant dense<0.000000e+00> : vector<4x8192xf32>
    %3 = tpu.matmul %0, %2, %cst {dimension_numbers = #tpu.dot_dimension_numbers<[1], [0], [0], [1], [0, 0, 1, 1], [], []>} : vector<4x48xbf16>, vector<48x8192xbf16>, vector<4x8192xf32> -> vector<4x8192xf32>
    %c0_4 = arith.constant 0 : index
    %c0_5 = arith.constant 0 : index
    %4 = vector.load %arg4[%c0_4, %c0_5] : memref<4x1xf32, #tpu.memory_space<vmem>>, vector<4x1xf32>
    %5 = vector.broadcast %4 : vector<4x1xf32> to vector<4x8192xf32>
    %6 = arith.addf %3, %5 : vector<4x8192xf32>
    %cst_6 = arith.constant 0.000000e+00 : f32
    %7 = vector.broadcast %cst_6 : f32 to vector<4x8192xf32>
    %8 = arith.cmpf ogt, %6, %7 : vector<4x8192xf32>
    %cst_7 = arith.constant 2.000000e-01 : f32
    %9 = vector.broadcast %cst_7 : f32 to vector<4x8192xf32>
    %10 = arith.mulf %9, %6 : vector<4x8192xf32>
    %11 = arith.select %8, %6, %10 : vector<4x8192xi1>, vector<4x8192xf32>
    %12 = arith.truncf %11 : vector<4x8192xf32> to vector<4x8192xbf16>
    %c0_8 = arith.constant 0 : index
    %c0_9 = arith.constant 0 : index
    %c0_10 = arith.constant 0 : index
    %13 = vector.load %arg5[%c0_8, %c0_9, %c0_10] : memref<1x4x8192xbf16, #tpu.memory_space<vmem>>, vector<1x4x8192xbf16>
    %14 = vector.shape_cast %13 : vector<1x4x8192xbf16> to vector<4x8192xbf16>
    %15 = vector.shape_cast %12 : vector<4x8192xbf16> to vector<1x4x8192xbf16>
    tpu.vector_store %arg5[%c0_8, %c0_9, %c0_10], %15 {strides = array<i32>} : memref<1x4x8192xbf16, #tpu.memory_space<vmem>>, vector<1x4x8192xbf16>,
    return
  }
  func.func @transform_0(%arg0: i32, %arg1: i32) -> (i32, i32, i32) {
    %c0_i32 = arith.constant 0 : i32
    %c0_i32_0 = arith.constant 0 : i32
    return %arg0, %c0_i32, %arg1 : i32, i32, i32
  }
  func.func @transform_1(%arg0: i32, %arg1: i32) -> (i32, i32) {
    %c0_i32 = arith.constant 0 : i32
    %c0_i32_0 = arith.constant 0 : i32
    %c0_i32_1 = arith.constant 0 : i32
    return %c0_i32, %c0_i32_0 : i32, i32
  }
  func.func @transform_2(%arg0: i32, %arg1: i32) -> (i32, i32) {
    %c0_i32 = arith.constant 0 : i32
    %c0_i32_0 = arith.constant 0 : i32
    %c0_i32_1 = arith.constant 0 : i32
    return %c0_i32, %c0_i32_0 : i32, i32
  }
  func.func @transform_3(%arg0: i32, %arg1: i32) -> (i32, i32, i32) {
    %c0_i32 = arith.constant 0 : i32
    %c0_i32_0 = arith.constant 0 : i32
    return %arg0, %c0_i32, %arg1 : i32, i32, i32
  }
}

module attributes {stable_mosaic.version = 11 : i64} {
  func.func @_conv_kernel(%arg0: i32, %arg1: i32, %arg2: memref<1x64x4096xbf16, #tpu.memory_space<vmem>>, %arg3: memref<8x64xbf16, #tpu.memory_space<vmem>>, %arg4: memref<8x1xf32, #tpu.memory_space<vmem>>, %arg5: memref<1x8x4096xbf16, #tpu.memory_space<vmem>>) attributes {dimension_semantics = [#tpu.dimension_semantics<parallel>, #tpu.dimension_semantics<parallel>], iteration_bounds = array<i64: 2, 1>, scalar_prefetch = 0 : i64, scratch_operands = 0 : i64, tpu.core_type = #tpu.core_type<tc>, window_params = [{transform_indices = @transform_0, window_bounds = array<i64: 1, 64, 4096>}, {pipeline_mode = #tpu.pipeline_mode<synchronous>, transform_indices = @transform_1, window_bounds = array<i64: 8, 64>}, {pipeline_mode = #tpu.pipeline_mode<synchronous>, transform_indices = @transform_2, window_bounds = array<i64: 8, 1>}, {transform_indices = @transform_3, window_bounds = array<i64: 1, 8, 4096>}]} {
    %c0 = arith.constant 0 : index
    %c0_0 = arith.constant 0 : index
    %0 = vector.load %arg3[%c0, %c0_0] : memref<8x64xbf16, #tpu.memory_space<vmem>>, vector<8x64xbf16>
    %c0_1 = arith.constant 0 : index
    %c0_2 = arith.constant 0 : index
    %c0_3 = arith.constant 0 : index
    %1 = vector.load %arg2[%c0_1, %c0_2, %c0_3] : memref<1x64x4096xbf16, #tpu.memory_space<vmem>>, vector<1x64x4096xbf16>
    %2 = vector.shape_cast %1 : vector<1x64x4096xbf16> to vector<64x4096xbf16>
    %cst = arith.constant dense<0.000000e+00> : vector<8x4096xf32>
    %3 = tpu.matmul %0, %2, %cst {dimension_numbers = #tpu.dot_dimension_numbers<[1], [0], [0], [1], [0, 0, 1, 1], [], []>} : vector<8x64xbf16>, vector<64x4096xbf16>, vector<8x4096xf32> -> vector<8x4096xf32>
    %c0_4 = arith.constant 0 : index
    %c0_5 = arith.constant 0 : index
    %4 = vector.load %arg4[%c0_4, %c0_5] : memref<8x1xf32, #tpu.memory_space<vmem>>, vector<8x1xf32>
    %5 = vector.broadcast %4 : vector<8x1xf32> to vector<8x4096xf32>
    %6 = arith.addf %3, %5 : vector<8x4096xf32>
    %cst_6 = arith.constant dense<0.000000e+00> : vector<8xf32>
    %7 = vector.multi_reduction <add>, %6, %cst_6 [1] : vector<8x4096xf32> to vector<8xf32>
    %8 = vector.shape_cast %7 : vector<8xf32> to vector<8x1xf32>
    %cst_7 = arith.constant 4.096000e+03 : f32
    %9 = vector.broadcast %cst_7 : f32 to vector<8x1xf32>
    %10 = arith.divf %8, %9 : vector<8x1xf32>
    %11 = vector.broadcast %10 : vector<8x1xf32> to vector<8x4096xf32>
    %12 = arith.subf %6, %11 : vector<8x4096xf32>
    %13 = arith.mulf %12, %12 : vector<8x4096xf32>
    %cst_8 = arith.constant dense<0.000000e+00> : vector<8xf32>
    %14 = vector.multi_reduction <add>, %13, %cst_8 [1] : vector<8x4096xf32> to vector<8xf32>
    %15 = vector.shape_cast %14 : vector<8xf32> to vector<8x1xf32>
    %cst_9 = arith.constant 4.096000e+03 : f32
    %16 = vector.broadcast %cst_9 : f32 to vector<8x1xf32>
    %17 = arith.divf %15, %16 : vector<8x1xf32>
    %18 = vector.broadcast %10 : vector<8x1xf32> to vector<8x4096xf32>
    %19 = arith.subf %6, %18 : vector<8x4096xf32>
    %cst_10 = arith.constant 9.99999974E-6 : f32
    %20 = vector.broadcast %cst_10 : f32 to vector<8x1xf32>
    %21 = arith.addf %17, %20 : vector<8x1xf32>
    %22 = math.rsqrt %21 : vector<8x1xf32>
    %23 = vector.broadcast %22 : vector<8x1xf32> to vector<8x4096xf32>
    %24 = arith.mulf %19, %23 : vector<8x4096xf32>
    %cst_11 = arith.constant 0.000000e+00 : f32
    %25 = vector.broadcast %cst_11 : f32 to vector<8x4096xf32>
    %26 = arith.cmpf ogt, %24, %25 : vector<8x4096xf32>
    %cst_12 = arith.constant 2.000000e-01 : f32
    %27 = vector.broadcast %cst_12 : f32 to vector<8x4096xf32>
    %28 = arith.mulf %27, %24 : vector<8x4096xf32>
    %29 = arith.select %26, %24, %28 : vector<8x4096xi1>, vector<8x4096xf32>
    %30 = arith.truncf %29 : vector<8x4096xf32> to vector<8x4096xbf16>
    %c0_13 = arith.constant 0 : index
    %c0_14 = arith.constant 0 : index
    %c0_15 = arith.constant 0 : index
    %31 = vector.load %arg5[%c0_13, %c0_14, %c0_15] : memref<1x8x4096xbf16, #tpu.memory_space<vmem>>, vector<1x8x4096xbf16>
    %32 = vector.shape_cast %31 : vector<1x8x4096xbf16> to vector<8x4096xbf16>
    %33 = vector.shape_cast %30 : vector<8x4096xbf16> to vector<1x8x4096xbf16>
    tpu.vector_store %arg5[%c0_13, %c0_14, %c0_15], %33 {strides = array<i32>} : memref<1x8x4096xbf16, #tpu.memory_space<vmem>>, vector<1x8x4096xbf16>,
    return
  }
  func.func @transform_0(%arg0: i32, %arg1: i32) -> (i32, i32, i32) {
    %c0_i32 = arith.constant 0 : i32
    %c0_i32_0 = arith.constant 0 : i32
    return %arg0, %c0_i32, %arg1 : i32, i32, i32
  }
  func.func @transform_1(%arg0: i32, %arg1: i32) -> (i32, i32) {
    %c0_i32 = arith.constant 0 : i32
    %c0_i32_0 = arith.constant 0 : i32
    %c0_i32_1 = arith.constant 0 : i32
    return %c0_i32, %c0_i32_0 : i32, i32
  }
  func.func @transform_2(%arg0: i32, %arg1: i32) -> (i32, i32) {
    %c0_i32 = arith.constant 0 : i32
    %c0_i32_0 = arith.constant 0 : i32
    %c0_i32_1 = arith.constant 0 : i32
    return %c0_i32, %c0_i32_0 : i32, i32
  }
  func.func @transform_3(%arg0: i32, %arg1: i32) -> (i32, i32, i32) {
    %c0_i32 = arith.constant 0 : i32
    %c0_i32_0 = arith.constant 0 : i32
    return %arg0, %c0_i32, %arg1 : i32, i32, i32
  }
}

module attributes {stable_mosaic.version = 11 : i64} {
  func.func @_conv_kernel(%arg0: i32, %arg1: i32, %arg2: memref<1x128x1024xbf16, #tpu.memory_space<vmem>>, %arg3: memref<16x128xbf16, #tpu.memory_space<vmem>>, %arg4: memref<16x1xf32, #tpu.memory_space<vmem>>, %arg5: memref<1x16x1024xbf16, #tpu.memory_space<vmem>>) attributes {dimension_semantics = [#tpu.dimension_semantics<parallel>, #tpu.dimension_semantics<parallel>], iteration_bounds = array<i64: 2, 1>, scalar_prefetch = 0 : i64, scratch_operands = 0 : i64, tpu.core_type = #tpu.core_type<tc>, window_params = [{transform_indices = @transform_0, window_bounds = array<i64: 1, 128, 1024>}, {pipeline_mode = #tpu.pipeline_mode<synchronous>, transform_indices = @transform_1, window_bounds = array<i64: 16, 128>}, {pipeline_mode = #tpu.pipeline_mode<synchronous>, transform_indices = @transform_2, window_bounds = array<i64: 16, 1>}, {transform_indices = @transform_3, window_bounds = array<i64: 1, 16, 1024>}]} {
    %c0 = arith.constant 0 : index
    %c0_0 = arith.constant 0 : index
    %0 = vector.load %arg3[%c0, %c0_0] : memref<16x128xbf16, #tpu.memory_space<vmem>>, vector<16x128xbf16>
    %c0_1 = arith.constant 0 : index
    %c0_2 = arith.constant 0 : index
    %c0_3 = arith.constant 0 : index
    %1 = vector.load %arg2[%c0_1, %c0_2, %c0_3] : memref<1x128x1024xbf16, #tpu.memory_space<vmem>>, vector<1x128x1024xbf16>
    %2 = vector.shape_cast %1 : vector<1x128x1024xbf16> to vector<128x1024xbf16>
    %cst = arith.constant dense<0.000000e+00> : vector<16x1024xf32>
    %3 = tpu.matmul %0, %2, %cst {dimension_numbers = #tpu.dot_dimension_numbers<[1], [0], [0], [1], [0, 0, 1, 1], [], []>} : vector<16x128xbf16>, vector<128x1024xbf16>, vector<16x1024xf32> -> vector<16x1024xf32>
    %c0_4 = arith.constant 0 : index
    %c0_5 = arith.constant 0 : index
    %4 = vector.load %arg4[%c0_4, %c0_5] : memref<16x1xf32, #tpu.memory_space<vmem>>, vector<16x1xf32>
    %5 = vector.broadcast %4 : vector<16x1xf32> to vector<16x1024xf32>
    %6 = arith.addf %3, %5 : vector<16x1024xf32>
    %cst_6 = arith.constant dense<0.000000e+00> : vector<16xf32>
    %7 = vector.multi_reduction <add>, %6, %cst_6 [1] : vector<16x1024xf32> to vector<16xf32>
    %8 = vector.shape_cast %7 : vector<16xf32> to vector<16x1xf32>
    %cst_7 = arith.constant 1.024000e+03 : f32
    %9 = vector.broadcast %cst_7 : f32 to vector<16x1xf32>
    %10 = arith.divf %8, %9 : vector<16x1xf32>
    %11 = vector.broadcast %10 : vector<16x1xf32> to vector<16x1024xf32>
    %12 = arith.subf %6, %11 : vector<16x1024xf32>
    %13 = arith.mulf %12, %12 : vector<16x1024xf32>
    %cst_8 = arith.constant dense<0.000000e+00> : vector<16xf32>
    %14 = vector.multi_reduction <add>, %13, %cst_8 [1] : vector<16x1024xf32> to vector<16xf32>
    %15 = vector.shape_cast %14 : vector<16xf32> to vector<16x1xf32>
    %cst_9 = arith.constant 1.024000e+03 : f32
    %16 = vector.broadcast %cst_9 : f32 to vector<16x1xf32>
    %17 = arith.divf %15, %16 : vector<16x1xf32>
    %18 = vector.broadcast %10 : vector<16x1xf32> to vector<16x1024xf32>
    %19 = arith.subf %6, %18 : vector<16x1024xf32>
    %cst_10 = arith.constant 9.99999974E-6 : f32
    %20 = vector.broadcast %cst_10 : f32 to vector<16x1xf32>
    %21 = arith.addf %17, %20 : vector<16x1xf32>
    %22 = math.rsqrt %21 : vector<16x1xf32>
    %23 = vector.broadcast %22 : vector<16x1xf32> to vector<16x1024xf32>
    %24 = arith.mulf %19, %23 : vector<16x1024xf32>
    %cst_11 = arith.constant 0.000000e+00 : f32
    %25 = vector.broadcast %cst_11 : f32 to vector<16x1024xf32>
    %26 = arith.cmpf ogt, %24, %25 : vector<16x1024xf32>
    %cst_12 = arith.constant 2.000000e-01 : f32
    %27 = vector.broadcast %cst_12 : f32 to vector<16x1024xf32>
    %28 = arith.mulf %27, %24 : vector<16x1024xf32>
    %29 = arith.select %26, %24, %28 : vector<16x1024xi1>, vector<16x1024xf32>
    %30 = arith.truncf %29 : vector<16x1024xf32> to vector<16x1024xbf16>
    %c0_13 = arith.constant 0 : index
    %c0_14 = arith.constant 0 : index
    %c0_15 = arith.constant 0 : index
    %31 = vector.load %arg5[%c0_13, %c0_14, %c0_15] : memref<1x16x1024xbf16, #tpu.memory_space<vmem>>, vector<1x16x1024xbf16>
    %32 = vector.shape_cast %31 : vector<1x16x1024xbf16> to vector<16x1024xbf16>
    %33 = vector.shape_cast %30 : vector<16x1024xbf16> to vector<1x16x1024xbf16>
    tpu.vector_store %arg5[%c0_13, %c0_14, %c0_15], %33 {strides = array<i32>} : memref<1x16x1024xbf16, #tpu.memory_space<vmem>>, vector<1x16x1024xbf16>,
    return
  }
  func.func @transform_0(%arg0: i32, %arg1: i32) -> (i32, i32, i32) {
    %c0_i32 = arith.constant 0 : i32
    %c0_i32_0 = arith.constant 0 : i32
    return %arg0, %c0_i32, %arg1 : i32, i32, i32
  }
  func.func @transform_1(%arg0: i32, %arg1: i32) -> (i32, i32) {
    %c0_i32 = arith.constant 0 : i32
    %c0_i32_0 = arith.constant 0 : i32
    %c0_i32_1 = arith.constant 0 : i32
    return %c0_i32, %c0_i32_0 : i32, i32
  }
  func.func @transform_2(%arg0: i32, %arg1: i32) -> (i32, i32) {
    %c0_i32 = arith.constant 0 : i32
    %c0_i32_0 = arith.constant 0 : i32
    %c0_i32_1 = arith.constant 0 : i32
    return %c0_i32, %c0_i32_0 : i32, i32
  }
  func.func @transform_3(%arg0: i32, %arg1: i32) -> (i32, i32, i32) {
    %c0_i32 = arith.constant 0 : i32
    %c0_i32_0 = arith.constant 0 : i32
    return %arg0, %c0_i32, %arg1 : i32, i32, i32
  }
}

module attributes {stable_mosaic.version = 11 : i64} {
  func.func @_conv_kernel(%arg0: i32, %arg1: i32, %arg2: memref<1x256x961xbf16, #tpu.memory_space<vmem>>, %arg3: memref<32x256xbf16, #tpu.memory_space<vmem>>, %arg4: memref<32x1xf32, #tpu.memory_space<vmem>>, %arg5: memref<1x32x961xbf16, #tpu.memory_space<vmem>>) attributes {dimension_semantics = [#tpu.dimension_semantics<parallel>, #tpu.dimension_semantics<parallel>], iteration_bounds = array<i64: 2, 1>, scalar_prefetch = 0 : i64, scratch_operands = 0 : i64, tpu.core_type = #tpu.core_type<tc>, window_params = [{transform_indices = @transform_0, window_bounds = array<i64: 1, 256, 961>}, {pipeline_mode = #tpu.pipeline_mode<synchronous>, transform_indices = @transform_1, window_bounds = array<i64: 32, 256>}, {pipeline_mode = #tpu.pipeline_mode<synchronous>, transform_indices = @transform_2, window_bounds = array<i64: 32, 1>}, {transform_indices = @transform_3, window_bounds = array<i64: 1, 32, 961>}]} {
    %c0 = arith.constant 0 : index
    %c0_0 = arith.constant 0 : index
    %0 = vector.load %arg3[%c0, %c0_0] : memref<32x256xbf16, #tpu.memory_space<vmem>>, vector<32x256xbf16>
    %c0_1 = arith.constant 0 : index
    %c0_2 = arith.constant 0 : index
    %c0_3 = arith.constant 0 : index
    %1 = vector.load %arg2[%c0_1, %c0_2, %c0_3] : memref<1x256x961xbf16, #tpu.memory_space<vmem>>, vector<1x256x961xbf16>
    %2 = vector.shape_cast %1 : vector<1x256x961xbf16> to vector<256x961xbf16>
    %cst = arith.constant dense<0.000000e+00> : vector<32x961xf32>
    %3 = tpu.matmul %0, %2, %cst {dimension_numbers = #tpu.dot_dimension_numbers<[1], [0], [0], [1], [0, 0, 1, 1], [], []>} : vector<32x256xbf16>, vector<256x961xbf16>, vector<32x961xf32> -> vector<32x961xf32>
    %c0_4 = arith.constant 0 : index
    %c0_5 = arith.constant 0 : index
    %4 = vector.load %arg4[%c0_4, %c0_5] : memref<32x1xf32, #tpu.memory_space<vmem>>, vector<32x1xf32>
    %5 = vector.broadcast %4 : vector<32x1xf32> to vector<32x961xf32>
    %6 = arith.addf %3, %5 : vector<32x961xf32>
    %cst_6 = arith.constant dense<0.000000e+00> : vector<32xf32>
    %7 = vector.multi_reduction <add>, %6, %cst_6 [1] : vector<32x961xf32> to vector<32xf32>
    %8 = vector.shape_cast %7 : vector<32xf32> to vector<32x1xf32>
    %cst_7 = arith.constant 9.610000e+02 : f32
    %9 = vector.broadcast %cst_7 : f32 to vector<32x1xf32>
    %10 = arith.divf %8, %9 : vector<32x1xf32>
    %11 = vector.broadcast %10 : vector<32x1xf32> to vector<32x961xf32>
    %12 = arith.subf %6, %11 : vector<32x961xf32>
    %13 = arith.mulf %12, %12 : vector<32x961xf32>
    %cst_8 = arith.constant dense<0.000000e+00> : vector<32xf32>
    %14 = vector.multi_reduction <add>, %13, %cst_8 [1] : vector<32x961xf32> to vector<32xf32>
    %15 = vector.shape_cast %14 : vector<32xf32> to vector<32x1xf32>
    %cst_9 = arith.constant 9.610000e+02 : f32
    %16 = vector.broadcast %cst_9 : f32 to vector<32x1xf32>
    %17 = arith.divf %15, %16 : vector<32x1xf32>
    %18 = vector.broadcast %10 : vector<32x1xf32> to vector<32x961xf32>
    %19 = arith.subf %6, %18 : vector<32x961xf32>
    %cst_10 = arith.constant 9.99999974E-6 : f32
    %20 = vector.broadcast %cst_10 : f32 to vector<32x1xf32>
    %21 = arith.addf %17, %20 : vector<32x1xf32>
    %22 = math.rsqrt %21 : vector<32x1xf32>
    %23 = vector.broadcast %22 : vector<32x1xf32> to vector<32x961xf32>
    %24 = arith.mulf %19, %23 : vector<32x961xf32>
    %cst_11 = arith.constant 0.000000e+00 : f32
    %25 = vector.broadcast %cst_11 : f32 to vector<32x961xf32>
    %26 = arith.cmpf ogt, %24, %25 : vector<32x961xf32>
    %cst_12 = arith.constant 2.000000e-01 : f32
    %27 = vector.broadcast %cst_12 : f32 to vector<32x961xf32>
    %28 = arith.mulf %27, %24 : vector<32x961xf32>
    %29 = arith.select %26, %24, %28 : vector<32x961xi1>, vector<32x961xf32>
    %30 = arith.truncf %29 : vector<32x961xf32> to vector<32x961xbf16>
    %c0_13 = arith.constant 0 : index
    %c0_14 = arith.constant 0 : index
    %c0_15 = arith.constant 0 : index
    %31 = vector.load %arg5[%c0_13, %c0_14, %c0_15] : memref<1x32x961xbf16, #tpu.memory_space<vmem>>, vector<1x32x961xbf16>
    %32 = vector.shape_cast %31 : vector<1x32x961xbf16> to vector<32x961xbf16>
    %33 = vector.shape_cast %30 : vector<32x961xbf16> to vector<1x32x961xbf16>
    tpu.vector_store %arg5[%c0_13, %c0_14, %c0_15], %33 {strides = array<i32>} : memref<1x32x961xbf16, #tpu.memory_space<vmem>>, vector<1x32x961xbf16>,
    return
  }
  func.func @transform_0(%arg0: i32, %arg1: i32) -> (i32, i32, i32) {
    %c0_i32 = arith.constant 0 : i32
    %c0_i32_0 = arith.constant 0 : i32
    return %arg0, %c0_i32, %arg1 : i32, i32, i32
  }
  func.func @transform_1(%arg0: i32, %arg1: i32) -> (i32, i32) {
    %c0_i32 = arith.constant 0 : i32
    %c0_i32_0 = arith.constant 0 : i32
    %c0_i32_1 = arith.constant 0 : i32
    return %c0_i32, %c0_i32_0 : i32, i32
  }
  func.func @transform_2(%arg0: i32, %arg1: i32) -> (i32, i32) {
    %c0_i32 = arith.constant 0 : i32
    %c0_i32_0 = arith.constant 0 : i32
    %c0_i32_1 = arith.constant 0 : i32
    return %c0_i32, %c0_i32_0 : i32, i32
  }
  func.func @transform_3(%arg0: i32, %arg1: i32) -> (i32, i32, i32) {
    %c0_i32 = arith.constant 0 : i32
    %c0_i32_0 = arith.constant 0 : i32
    return %arg0, %c0_i32, %arg1 : i32, i32, i32
  }
}

module attributes {stable_mosaic.version = 11 : i64} {
  func.func @_conv_kernel(%arg0: i32, %arg1: i32, %arg2: memref<1x512x900xbf16, #tpu.memory_space<vmem>>, %arg3: memref<1x512xbf16, #tpu.memory_space<vmem>>, %arg4: memref<1x1xf32, #tpu.memory_space<vmem>>, %arg5: memref<1x1x900xf32, #tpu.memory_space<vmem>>) attributes {dimension_semantics = [#tpu.dimension_semantics<parallel>, #tpu.dimension_semantics<parallel>], iteration_bounds = array<i64: 2, 1>, scalar_prefetch = 0 : i64, scratch_operands = 0 : i64, tpu.core_type = #tpu.core_type<tc>, window_params = [{transform_indices = @transform_0, window_bounds = array<i64: 1, 512, 900>}, {pipeline_mode = #tpu.pipeline_mode<synchronous>, transform_indices = @transform_1, window_bounds = array<i64: 1, 512>}, {pipeline_mode = #tpu.pipeline_mode<synchronous>, transform_indices = @transform_2, window_bounds = array<i64: 1, 1>}, {transform_indices = @transform_3, window_bounds = array<i64: 1, 1, 900>}]} {
    %c0 = arith.constant 0 : index
    %c0_0 = arith.constant 0 : index
    %0 = vector.load %arg3[%c0, %c0_0] : memref<1x512xbf16, #tpu.memory_space<vmem>>, vector<1x512xbf16>
    %c0_1 = arith.constant 0 : index
    %c0_2 = arith.constant 0 : index
    %c0_3 = arith.constant 0 : index
    %1 = vector.load %arg2[%c0_1, %c0_2, %c0_3] : memref<1x512x900xbf16, #tpu.memory_space<vmem>>, vector<1x512x900xbf16>
    %2 = vector.shape_cast %1 : vector<1x512x900xbf16> to vector<512x900xbf16>
    %cst = arith.constant dense<0.000000e+00> : vector<1x900xf32>
    %3 = tpu.matmul %0, %2, %cst {dimension_numbers = #tpu.dot_dimension_numbers<[1], [0], [0], [1], [0, 0, 1, 1], [], []>} : vector<1x512xbf16>, vector<512x900xbf16>, vector<1x900xf32> -> vector<1x900xf32>
    %c0_4 = arith.constant 0 : index
    %c0_5 = arith.constant 0 : index
    %4 = vector.load %arg4[%c0_4, %c0_5] : memref<1x1xf32, #tpu.memory_space<vmem>>, vector<1x1xf32>
    %5 = vector.broadcast %4 : vector<1x1xf32> to vector<1x900xf32>
    %6 = arith.addf %3, %5 : vector<1x900xf32>
    %c0_6 = arith.constant 0 : index
    %c0_7 = arith.constant 0 : index
    %c0_8 = arith.constant 0 : index
    %7 = vector.load %arg5[%c0_6, %c0_7, %c0_8] : memref<1x1x900xf32, #tpu.memory_space<vmem>>, vector<1x1x900xf32>
    %8 = vector.shape_cast %7 : vector<1x1x900xf32> to vector<1x900xf32>
    %9 = vector.shape_cast %6 : vector<1x900xf32> to vector<1x1x900xf32>
    tpu.vector_store %arg5[%c0_6, %c0_7, %c0_8], %9 {strides = array<i32>} : memref<1x1x900xf32, #tpu.memory_space<vmem>>, vector<1x1x900xf32>,
    return
  }
  func.func @transform_0(%arg0: i32, %arg1: i32) -> (i32, i32, i32) {
    %c0_i32 = arith.constant 0 : i32
    %c0_i32_0 = arith.constant 0 : i32
    return %arg0, %c0_i32, %arg1 : i32, i32, i32
  }
  func.func @transform_1(%arg0: i32, %arg1: i32) -> (i32, i32) {
    %c0_i32 = arith.constant 0 : i32
    %c0_i32_0 = arith.constant 0 : i32
    %c0_i32_1 = arith.constant 0 : i32
    return %c0_i32, %c0_i32_0 : i32, i32
  }
  func.func @transform_2(%arg0: i32, %arg1: i32) -> (i32, i32) {
    %c0_i32 = arith.constant 0 : i32
    %c0_i32_0 = arith.constant 0 : i32
    %c0_i32_1 = arith.constant 0 : i32
    return %c0_i32, %c0_i32_0 : i32, i32
  }
  func.func @transform_3(%arg0: i32, %arg1: i32) -> (i32, i32, i32) {
    %c0_i32 = arith.constant 0 : i32
    %c0_i32_0 = arith.constant 0 : i32
    return %arg0, %c0_i32, %arg1 : i32, i32, i32
  }
}

</mosaic_0001>

<bundles_post_ra>
// kernel: discriminator_forward.5
= control target key start
LH: loop header
LB: loop body
LE: loop exit
PB: predicated region body
PF: predicated region fallthrough
CT: control target
= control target key end

     0   :  { %s4203_s12 = smov 0   ;;  %s4205_s13 = smov 0   ;;  %s5103_s0 = inlined_call_operand.vmem [shape: bf16[2,48,16384], index: 0, kind: input, shape index: {}]   ;;  %s5104_s1 = inlined_call_operand.vmem [shape: bf16[4,48], index: 1, kind: input, shape index: {}]   ;;  %s5105_s2 = inlined_call_operand.vmem [shape: f32[4,1], index: 2, kind: input, shape index: {}]   ;;  %s5106_s3 = inlined_call_operand.vmem [shape: bf16[2,4,16384], index: 3, kind: output, shape index: {}]  }
   0x1   :  { %s4207_s14 = smov 0   ;;  %s4209_s15 = smov 0  }
   0x2   :  { %s4211_s16 = smov 0   ;;  %s4213_s17 = smov 0  }
   0x3   :  { %s4215_s18 = smov 0  }
   0x4 LB: > { %s22_s19 = sadd.s32 1, %s4171_s16  ;;  %s25_s20 = sadd.s32 1, %s4175_s17  ;;  %s4179_s18 = sphi %s4215_s18, %s13_s18   ;;  %s4175_s17 = sphi %s4213_s17, %s5112_s17   ;;  %s4171_s16 = sphi %s4211_s16, %s5111_s16   ;;  %s4167_s15 = sphi %s4209_s15, %s5110_s15   ;;  %s4163_s14 = sphi %s4207_s14, %s5109_s14   ;;  %s4159_s13 = sphi %s4205_s13, %s5108_s13   ;;  %s4155_s12 = sphi %s4203_s12, %s5107_s12  }
   0x5   : > { %p23_p0 = scmp.ge.s32.totalorder %s22_s19, 2  ;;  %p41_p1 = scmp.ne.s32.totalorder %s4159_s13, %s4155_s12 }
   0x6   : > { %p42_p2 = scmp.eq.s32.totalorder %s4179_s18, 0  ;;  %s34_s24 = sadd.s32 1, %s4159_s13 }
   0x7   : > { %s5114_s19 = smov (%p23_p0, %s22_s19), 0  ;;  %s5116_s20 = smov (!%p23_p0, %s25_s20), %s4175_s17 }
   0x8   : > { %p43_p3 = por %p42_p2, %p41_p1  ;;  %p27_p4 = scmp.ge.s32.totalorder %s5116_s20, 2 }
   0x9   : > { %s30_s21 = ssub.s32 %s4171_s16, %s5114_s19  ;;  %p3797_p6 = scmp.ge.s32.totalorder %s4179_s18, 4 }
   0xa   : > { %s5118_s20 = smov (%p27_p4, %s5116_s20), 0 }
   0xb   : > { %s29_s22 = ssub.s32 %s4175_s17, %s5118_s20  ;;  %143 = sbr.rel (%p3797_p6) target bundleno = 120 (0x78), region = 24 }
   0xc   : > { %s31_s23 = sor.u32 %s30_s21, %s29_s22 }
   0xd   : > { %p32_p5 = scmp.eq.s32.totalorder %s31_s23, 0 }
   0xf   : > { %s4254_s25 = scalar_select %p32_p5, %s4159_s13, %s34_s24  }
  0x10   : > { %146 = sbr.rel (!%p43_p3) target bundleno = 120 (0x78), region = 28  ;;  %s148_s26 = sand.u32 (%p43_p3), 1, %s4159_s13  }
  0x11   : > { %s4062_s27 = smul.u32 (%p43_p3), 1536, %s148_s26  ;;  %s3798_s28 = sshll.u32 (%p43_p3), %s4171_s16, 6 }
  0x12   : > { %s4063_s29 = smul.u32 (%p43_p3), 768, %s4175_s17 }
  0x13   : > { %s4268_s8 = scalar_lea.vmem (%p43_p3), [#allocation2], %s4062_s27 }
  0x14   : > { %s153_s30 = sadd.s32 (%p43_p3), %s4063_s29, %s3798_s28 }
  0x15   : > { %s3799_s4 = sshll.u32 %s153_s30, 2 }
  0x16   : > { %s4263_s7 = scalar_lea.vmem %s5103_s0, %s3799_s4 }
  0x17   : > { %v168_v0 = vld [vmem:[%s4263_s7] sm:$0xff]  ;;  %v170_v1 = vld [vmem:[%s4263_s7 + $0x8] sm:$0xff]  ;;  %v172_v2 = vld [vmem:[%s4263_s7 + $0x10] sm:$0xff] }
  0x18   : > { %169 = vst [vmem:[%s4268_s8] sm:$0xff] %v168_v0  ;;  %171 = vst [vmem:[%s4268_s8 + $0x8] sm:$0xff] %v170_v1  ;;  %v174_v3 = vld [vmem:[%s4263_s7 + $0x18] sm:$0xff]  ;;  %v176_v4 = vld [vmem:[%s4263_s7 + $0x20] sm:$0xff] }
  0x19   : > { %173 = vst [vmem:[%s4268_s8 + $0x10] sm:$0xff] %v172_v2  ;;  %v178_v5 = vld [vmem:[%s4263_s7 + $0x28] sm:$0xff]  ;;  %175 = vst [vmem:[%s4268_s8 + $0x18] sm:$0xff] %v174_v3  ;;  %v180_v6 = vld [vmem:[%s4263_s7 + $0x30] sm:$0xff] }
  0x1a   : > { %177 = vst [vmem:[%s4268_s8 + $0x20] sm:$0xff] %v176_v4  ;;  %179 = vst [vmem:[%s4268_s8 + $0x28] sm:$0xff] %v178_v5  ;;  %v182_v7 = vld [vmem:[%s4263_s7 + $0x38] sm:$0xff]  ;;  %v184_v8 = vld [vmem:[%s4263_s7 + $0x40] sm:$0xff] }
  0x1b   : > { %181 = vst [vmem:[%s4268_s8 + $0x30] sm:$0xff] %v180_v6  ;;  %183 = vst [vmem:[%s4268_s8 + $0x38] sm:$0xff] %v182_v7  ;;  %v186_v9 = vld [vmem:[%s4263_s7 + $0x48] sm:$0xff]  ;;  %v188_v10 = vld [vmem:[%s4263_s7 + $0x50] sm:$0xff] }
  0x1c   : > { %185 = vst [vmem:[%s4268_s8 + $0x40] sm:$0xff] %v184_v8  ;;  %v190_v11 = vld [vmem:[%s4263_s7 + $0x58] sm:$0xff]  ;;  %187 = vst [vmem:[%s4268_s8 + $0x48] sm:$0xff] %v186_v9  ;;  %v192_v12 = vld [vmem:[%s4263_s7 + $0x60] sm:$0xff] }
  0x1d   : > { %189 = vst [vmem:[%s4268_s8 + $0x50] sm:$0xff] %v188_v10  ;;  %191 = vst [vmem:[%s4268_s8 + $0x58] sm:$0xff] %v190_v11  ;;  %v194_v13 = vld [vmem:[%s4263_s7 + $0x68] sm:$0xff]  ;;  %v196_v14 = vld [vmem:[%s4263_s7 + $0x70] sm:$0xff] }
  0x1e   : > { %193 = vst [vmem:[%s4268_s8 + $0x60] sm:$0xff] %v192_v12  ;;  %195 = vst [vmem:[%s4268_s8 + $0x68] sm:$0xff] %v194_v13  ;;  %v198_v15 = vld [vmem:[%s4263_s7 + $0x78] sm:$0xff]  ;;  %v200_v16 = vld [vmem:[%s4263_s7 + $0x80] sm:$0xff] }
  0x1f   : > { %197 = vst [vmem:[%s4268_s8 + $0x70] sm:$0xff] %v196_v14  ;;  %v202_v17 = vld [vmem:[%s4263_s7 + $0x88] sm:$0xff]  ;;  %199 = vst [vmem:[%s4268_s8 + $0x78] sm:$0xff] %v198_v15  ;;  %v204_v18 = vld [vmem:[%s4263_s7 + $0x90] sm:$0xff] }
  0x20   : > { %201 = vst [vmem:[%s4268_s8 + $0x80] sm:$0xff] %v200_v16  ;;  %203 = vst [vmem:[%s4268_s8 + $0x88] sm:$0xff] %v202_v17  ;;  %v206_v19 = vld [vmem:[%s4263_s7 + $0x98] sm:$0xff]  ;;  %v208_v20 = vld [vmem:[%s4263_s7 + $0xa0] sm:$0xff] }
  0x21   : > { %205 = vst [vmem:[%s4268_s8 + $0x90] sm:$0xff] %v204_v18  ;;  %207 = vst [vmem:[%s4268_s8 + $0x98] sm:$0xff] %v206_v19  ;;  %v210_v21 = vld [vmem:[%s4263_s7 + $0xa8] sm:$0xff]  ;;  %v212_v22 = vld [vmem:[%s4263_s7 + $0xb0] sm:$0xff] }
  0x22   : > { %209 = vst [vmem:[%s4268_s8 + $0xa0] sm:$0xff] %v208_v20  ;;  %v214_v23 = vld [vmem:[%s4263_s7 + $0xb8] sm:$0xff]  ;;  %211 = vst [vmem:[%s4268_s8 + $0xa8] sm:$0xff] %v210_v21  ;;  %v216_v24 = vld [vmem:[%s4263_s7 + $0xc0] sm:$0xff] }
  0x23   : > { %213 = vst [vmem:[%s4268_s8 + $0xb0] sm:$0xff] %v212_v22  ;;  %215 = vst [vmem:[%s4268_s8 + $0xb8] sm:$0xff] %v214_v23  ;;  %v218_v25 = vld [vmem:[%s4263_s7 + $0xc8] sm:$0xff]  ;;  %v220_v26 = vld [vmem:[%s4263_s7 + $0xd0] sm:$0xff] }
  0x24   : > { %217 = vst [vmem:[%s4268_s8 + $0xc0] sm:$0xff] %v216_v24  ;;  %219 = vst [vmem:[%s4268_s8 + $0xc8] sm:$0xff] %v218_v25  ;;  %v222_v27 = vld [vmem:[%s4263_s7 + $0xd8] sm:$0xff]  ;;  %v224_v28 = vld [vmem:[%s4263_s7 + $0xe0] sm:$0xff] }
  0x25   : > { %221 = vst [vmem:[%s4268_s8 + $0xd0] sm:$0xff] %v220_v26  ;;  %v226_v29 = vld [vmem:[%s4263_s7 + $0xe8] sm:$0xff]  ;;  %223 = vst [vmem:[%s4268_s8 + $0xd8] sm:$0xff] %v222_v27  ;;  %v228_v30 = vld [vmem:[%s4263_s7 + $0xf0] sm:$0xff] }
  0x26   : > { %225 = vst [vmem:[%s4268_s8 + $0xe0] sm:$0xff] %v224_v28  ;;  %227 = vst [vmem:[%s4268_s8 + $0xe8] sm:$0xff] %v226_v29  ;;  %v230_v31 = vld [vmem:[%s4263_s7 + $0xf8] sm:$0xff]  ;;  %v232_v32 = vld [vmem:[%s4263_s7 + $0x200] sm:$0xff] }
  0x27   : > { %229 = vst [vmem:[%s4268_s8 + $0xf0] sm:$0xff] %v228_v30  ;;  %231 = vst [vmem:[%s4268_s8 + $0xf8] sm:$0xff] %v230_v31  ;;  %v234_v33 = vld [vmem:[%s4263_s7 + $0x208] sm:$0xff]  ;;  %v236_v34 = vld [vmem:[%s4263_s7 + $0x210] sm:$0xff] }
  0x28   : > { %233 = vst [vmem:[%s4268_s8 + $0x100] sm:$0xff] %v232_v32  ;;  %v238_v35 = vld [vmem:[%s4263_s7 + $0x218] sm:$0xff]  ;;  %235 = vst [vmem:[%s4268_s8 + $0x108] sm:$0xff] %v234_v33  ;;  %v240_v36 = vld [vmem:[%s4263_s7 + $0x220] sm:$0xff] }
  0x29   : > { %237 = vst [vmem:[%s4268_s8 + $0x110] sm:$0xff] %v236_v34  ;;  %239 = vst [vmem:[%s4268_s8 + $0x118] sm:$0xff] %v238_v35  ;;  %v242_v37 = vld [vmem:[%s4263_s7 + $0x228] sm:$0xff]  ;;  %v244_v38 = vld [vmem:[%s4263_s7 + $0x230] sm:$0xff] }
  0x2a   : > { %241 = vst [vmem:[%s4268_s8 + $0x120] sm:$0xff] %v240_v36  ;;  %243 = vst [vmem:[%s4268_s8 + $0x128] sm:$0xff] %v242_v37  ;;  %v246_v39 = vld [vmem:[%s4263_s7 + $0x238] sm:$0xff]  ;;  %v248_v40 = vld [vmem:[%s4263_s7 + $0x240] sm:$0xff] }
  0x2b   : > { %245 = vst [vmem:[%s4268_s8 + $0x130] sm:$0xff] %v244_v38  ;;  %v250_v41 = vld [vmem:[%s4263_s7 + $0x248] sm:$0xff]  ;;  %247 = vst [vmem:[%s4268_s8 + $0x138] sm:$0xff] %v246_v39  ;;  %v252_v42 = vld [vmem:[%s4263_s7 + $0x250] sm:$0xff] }
  0x2c   : > { %249 = vst [vmem:[%s4268_s8 + $0x140] sm:$0xff] %v248_v40  ;;  %251 = vst [vmem:[%s4268_s8 + $0x148] sm:$0xff] %v250_v41  ;;  %v254_v43 = vld [vmem:[%s4263_s7 + $0x258] sm:$0xff]  ;;  %v256_v44 = vld [vmem:[%s4263_s7 + $0x260] sm:$0xff] }
  0x2d   : > { %253 = vst [vmem:[%s4268_s8 + $0x150] sm:$0xff] %v252_v42  ;;  %255 = vst [vmem:[%s4268_s8 + $0x158] sm:$0xff] %v254_v43  ;;  %v258_v45 = vld [vmem:[%s4263_s7 + $0x268] sm:$0xff]  ;;  %v260_v46 = vld [vmem:[%s4263_s7 + $0x270] sm:$0xff] }
  0x2e   : > { %257 = vst [vmem:[%s4268_s8 + $0x160] sm:$0xff] %v256_v44  ;;  %v262_v47 = vld [vmem:[%s4263_s7 + $0x278] sm:$0xff]  ;;  %259 = vst [vmem:[%s4268_s8 + $0x168] sm:$0xff] %v258_v45  ;;  %v264_v48 = vld [vmem:[%s4263_s7 + $0x280] sm:$0xff] }
  0x2f   : > { %261 = vst [vmem:[%s4268_s8 + $0x170] sm:$0xff] %v260_v46  ;;  %263 = vst [vmem:[%s4268_s8 + $0x178] sm:$0xff] %v262_v47  ;;  %v266_v49 = vld [vmem:[%s4263_s7 + $0x288] sm:$0xff]  ;;  %v268_v50 = vld [vmem:[%s4263_s7 + $0x290] sm:$0xff] }
  0x30   : > { %265 = vst [vmem:[%s4268_s8 + $0x180] sm:$0xff] %v264_v48  ;;  %267 = vst [vmem:[%s4268_s8 + $0x188] sm:$0xff] %v266_v49  ;;  %v270_v51 = vld [vmem:[%s4263_s7 + $0x298] sm:$0xff]  ;;  %v272_v52 = vld [vmem:[%s4263_s7 + $0x2a0] sm:$0xff] }
  0x31   : > { %269 = vst [vmem:[%s4268_s8 + $0x190] sm:$0xff] %v268_v50  ;;  %v274_v53 = vld [vmem:[%s4263_s7 + $0x2a8] sm:$0xff]  ;;  %271 = vst [vmem:[%s4268_s8 + $0x198] sm:$0xff] %v270_v51  ;;  %v276_v54 = vld [vmem:[%s4263_s7 + $0x2b0] sm:$0xff] }
  0x32   : > { %273 = vst [vmem:[%s4268_s8 + $0x1a0] sm:$0xff] %v272_v52  ;;  %275 = vst [vmem:[%s4268_s8 + $0x1a8] sm:$0xff] %v274_v53  ;;  %v278_v55 = vld [vmem:[%s4263_s7 + $0x2b8] sm:$0xff]  ;;  %v280_v56 = vld [vmem:[%s4263_s7 + $0x2c0] sm:$0xff] }
  0x33   : > { %277 = vst [vmem:[%s4268_s8 + $0x1b0] sm:$0xff] %v276_v54  ;;  %279 = vst [vmem:[%s4268_s8 + $0x1b8] sm:$0xff] %v278_v55  ;;  %v282_v57 = vld [vmem:[%s4263_s7 + $0x2c8] sm:$0xff]  ;;  %v284_v58 = vld [vmem:[%s4263_s7 + $0x2d0] sm:$0xff] }
  0x34   : > { %281 = vst [vmem:[%s4268_s8 + $0x1c0] sm:$0xff] %v280_v56  ;;  %v286_v59 = vld [vmem:[%s4263_s7 + $0x2d8] sm:$0xff]  ;;  %283 = vst [vmem:[%s4268_s8 + $0x1c8] sm:$0xff] %v282_v57  ;;  %v288_v60 = vld [vmem:[%s4263_s7 + $0x2e0] sm:$0xff] }
  0x35   : > { %285 = vst [vmem:[%s4268_s8 + $0x1d0] sm:$0xff] %v284_v58  ;;  %287 = vst [vmem:[%s4268_s8 + $0x1d8] sm:$0xff] %v286_v59  ;;  %v290_v61 = vld [vmem:[%s4263_s7 + $0x2e8] sm:$0xff]  ;;  %v292_v62 = vld [vmem:[%s4263_s7 + $0x2f0] sm:$0xff] }
  0x36   : > { %289 = vst [vmem:[%s4268_s8 + $0x1e0] sm:$0xff] %v288_v60  ;;  %291 = vst [vmem:[%s4268_s8 + $0x1e8] sm:$0xff] %v290_v61  ;;  %v294_v63 = vld [vmem:[%s4263_s7 + $0x2f8] sm:$0xff]  ;;  %v296_v0 = vld [vmem:[%s4263_s7 + $0x400] sm:$0xff] }
  0x37   : > { %293 = vst [vmem:[%s4268_s8 + $0x1f0] sm:$0xff] %v292_v62  ;;  %v298_v1 = vld [vmem:[%s4263_s7 + $0x408] sm:$0xff]  ;;  %295 = vst [vmem:[%s4268_s8 + $0x1f8] sm:$0xff] %v294_v63  ;;  %v300_v2 = vld [vmem:[%s4263_s7 + $0x410] sm:$0xff] }
  0x38   : > { %297 = vst [vmem:[%s4268_s8 + $0x200] sm:$0xff] %v296_v0  ;;  %299 = vst [vmem:[%s4268_s8 + $0x208] sm:$0xff] %v298_v1  ;;  %v302_v3 = vld [vmem:[%s4263_s7 + $0x418] sm:$0xff]  ;;  %v304_v4 = vld [vmem:[%s4263_s7 + $0x420] sm:$0xff] }
  0x39   : > { %301 = vst [vmem:[%s4268_s8 + $0x210] sm:$0xff] %v300_v2  ;;  %303 = vst [vmem:[%s4268_s8 + $0x218] sm:$0xff] %v302_v3  ;;  %v306_v5 = vld [vmem:[%s4263_s7 + $0x428] sm:$0xff]  ;;  %v308_v6 = vld [vmem:[%s4263_s7 + $0x430] sm:$0xff] }
  0x3a   : > { %305 = vst [vmem:[%s4268_s8 + $0x220] sm:$0xff] %v304_v4  ;;  %v310_v7 = vld [vmem:[%s4263_s7 + $0x438] sm:$0xff]  ;;  %307 = vst [vmem:[%s4268_s8 + $0x228] sm:$0xff] %v306_v5  ;;  %v312_v8 = vld [vmem:[%s4263_s7 + $0x440] sm:$0xff] }
  0x3b   : > { %309 = vst [vmem:[%s4268_s8 + $0x230] sm:$0xff] %v308_v6  ;;  %311 = vst [vmem:[%s4268_s8 + $0x238] sm:$0xff] %v310_v7  ;;  %v314_v9 = vld [vmem:[%s4263_s7 + $0x448] sm:$0xff]  ;;  %v316_v10 = vld [vmem:[%s4263_s7 + $0x450] sm:$0xff] }
  0x3c   : > { %313 = vst [vmem:[%s4268_s8 + $0x240] sm:$0xff] %v312_v8  ;;  %315 = vst [vmem:[%s4268_s8 + $0x248] sm:$0xff] %v314_v9  ;;  %v318_v11 = vld [vmem:[%s4263_s7 + $0x458] sm:$0xff]  ;;  %v320_v12 = vld [vmem:[%s4263_s7 + $0x460] sm:$0xff] }
  0x3d   : > { %317 = vst [vmem:[%s4268_s8 + $0x250] sm:$0xff] %v316_v10  ;;  %v322_v13 = vld [vmem:[%s4263_s7 + $0x468] sm:$0xff]  ;;  %319 = vst [vmem:[%s4268_s8 + $0x258] sm:$0xff] %v318_v11  ;;  %v324_v14 = vld [vmem:[%s4263_s7 + $0x470] sm:$0xff] }
  0x3e   : > { %321 = vst [vmem:[%s4268_s8 + $0x260] sm:$0xff] %v320_v12  ;;  %323 = vst [vmem:[%s4268_s8 + $0x268] sm:$0xff] %v322_v13  ;;  %v326_v15 = vld [vmem:[%s4263_s7 + $0x478] sm:$0xff]  ;;  %v328_v16 = vld [vmem:[%s4263_s7 + $0x480] sm:$0xff] }
  0x3f   : > { %325 = vst [vmem:[%s4268_s8 + $0x270] sm:$0xff] %v324_v14  ;;  %327 = vst [vmem:[%s4268_s8 + $0x278] sm:$0xff] %v326_v15  ;;  %v330_v17 = vld [vmem:[%s4263_s7 + $0x488] sm:$0xff]  ;;  %v332_v18 = vld [vmem:[%s4263_s7 + $0x490] sm:$0xff] }
  0x40   : > { %329 = vst [vmem:[%s4268_s8 + $0x280] sm:$0xff] %v328_v16  ;;  %v334_v19 = vld [vmem:[%s4263_s7 + $0x498] sm:$0xff]  ;;  %331 = vst [vmem:[%s4268_s8 + $0x288] sm:$0xff] %v330_v17  ;;  %v336_v20 = vld [vmem:[%s4263_s7 + $0x4a0] sm:$0xff] }
  0x41   : > { %333 = vst [vmem:[%s4268_s8 + $0x290] sm:$0xff] %v332_v18  ;;  %335 = vst [vmem:[%s4268_s8 + $0x298] sm:$0xff] %v334_v19  ;;  %v338_v21 = vld [vmem:[%s4263_s7 + $0x4a8] sm:$0xff]  ;;  %v340_v22 = vld [vmem:[%s4263_s7 + $0x4b0] sm:$0xff] }
  0x42   : > { %337 = vst [vmem:[%s4268_s8 + $0x2a0] sm:$0xff] %v336_v20  ;;  %339 = vst [vmem:[%s4268_s8 + $0x2a8] sm:$0xff] %v338_v21  ;;  %v342_v23 = vld [vmem:[%s4263_s7 + $0x4b8] sm:$0xff]  ;;  %v344_v24 = vld [vmem:[%s4263_s7 + $0x4c0] sm:$0xff] }
  0x43   : > { %341 = vst [vmem:[%s4268_s8 + $0x2b0] sm:$0xff] %v340_v22  ;;  %v346_v25 = vld [vmem:[%s4263_s7 + $0x4c8] sm:$0xff]  ;;  %343 = vst [vmem:[%s4268_s8 + $0x2b8] sm:$0xff] %v342_v23  ;;  %v348_v26 = vld [vmem:[%s4263_s7 + $0x4d0] sm:$0xff] }
  0x44   : > { %345 = vst [vmem:[%s4268_s8 + $0x2c0] sm:$0xff] %v344_v24  ;;  %347 = vst [vmem:[%s4268_s8 + $0x2c8] sm:$0xff] %v346_v25  ;;  %v350_v27 = vld [vmem:[%s4263_s7 + $0x4d8] sm:$0xff]  ;;  %v352_v28 = vld [vmem:[%s4263_s7 + $0x4e0] sm:$0xff] }
  0x45   : > { %349 = vst [vmem:[%s4268_s8 + $0x2d0] sm:$0xff] %v348_v26  ;;  %351 = vst [vmem:[%s4268_s8 + $0x2d8] sm:$0xff] %v350_v27  ;;  %v354_v29 = vld [vmem:[%s4263_s7 + $0x4e8] sm:$0xff]  ;;  %v356_v30 = vld [vmem:[%s4263_s7 + $0x4f0] sm:$0xff] }
  0x46   : > { %353 = vst [vmem:[%s4268_s8 + $0x2e0] sm:$0xff] %v352_v28  ;;  %v358_v31 = vld [vmem:[%s4263_s7 + $0x4f8] sm:$0xff]  ;;  %355 = vst [vmem:[%s4268_s8 + $0x2e8] sm:$0xff] %v354_v29  ;;  %v360_v32 = vld [vmem:[%s4263_s7 + $0x600] sm:$0xff] }
  0x47   : > { %357 = vst [vmem:[%s4268_s8 + $0x2f0] sm:$0xff] %v356_v30  ;;  %359 = vst [vmem:[%s4268_s8 + $0x2f8] sm:$0xff] %v358_v31  ;;  %v362_v33 = vld [vmem:[%s4263_s7 + $0x608] sm:$0xff]  ;;  %v364_v34 = vld [vmem:[%s4263_s7 + $0x610] sm:$0xff] }
  0x48   : > { %361 = vst [vmem:[%s4268_s8 + $0x300] sm:$0xff] %v360_v32  ;;  %363 = vst [vmem:[%s4268_s8 + $0x308] sm:$0xff] %v362_v33  ;;  %v366_v35 = vld [vmem:[%s4263_s7 + $0x618] sm:$0xff]  ;;  %v368_v36 = vld [vmem:[%s4263_s7 + $0x620] sm:$0xff] }
  0x49   : > { %365 = vst [vmem:[%s4268_s8 + $0x310] sm:$0xff] %v364_v34  ;;  %v370_v37 = vld [vmem:[%s4263_s7 + $0x628] sm:$0xff]  ;;  %367 = vst [vmem:[%s4268_s8 + $0x318] sm:$0xff] %v366_v35  ;;  %v372_v38 = vld [vmem:[%s4263_s7 + $0x630] sm:$0xff] }
  0x4a   : > { %369 = vst [vmem:[%s4268_s8 + $0x320] sm:$0xff] %v368_v36  ;;  %371 = vst [vmem:[%s4268_s8 + $0x328] sm:$0xff] %v370_v37  ;;  %v374_v39 = vld [vmem:[%s4263_s7 + $0x638] sm:$0xff]  ;;  %v376_v40 = vld [vmem:[%s4263_s7 + $0x640] sm:$0xff] }
  0x4b   : > { %373 = vst [vmem:[%s4268_s8 + $0x330] sm:$0xff] %v372_v38  ;;  %375 = vst [vmem:[%s4268_s8 + $0x338] sm:$0xff] %v374_v39  ;;  %v378_v41 = vld [vmem:[%s4263_s7 + $0x648] sm:$0xff]  ;;  %v380_v42 = vld [vmem:[%s4263_s7 + $0x650] sm:$0xff] }
  0x4c   : > { %377 = vst [vmem:[%s4268_s8 + $0x340] sm:$0xff] %v376_v40  ;;  %v382_v43 = vld [vmem:[%s4263_s7 + $0x658] sm:$0xff]  ;;  %379 = vst [vmem:[%s4268_s8 + $0x348] sm:$0xff] %v378_v41  ;;  %v384_v44 = vld [vmem:[%s4263_s7 + $0x660] sm:$0xff] }
  0x4d   : > { %381 = vst [vmem:[%s4268_s8 + $0x350] sm:$0xff] %v380_v42  ;;  %383 = vst [vmem:[%s4268_s8 + $0x358] sm:$0xff] %v382_v43  ;;  %v386_v45 = vld [vmem:[%s4263_s7 + $0x668] sm:$0xff]  ;;  %v388_v46 = vld [vmem:[%s4263_s7 + $0x670] sm:$0xff] }
  0x4e   : > { %385 = vst [vmem:[%s4268_s8 + $0x360] sm:$0xff] %v384_v44  ;;  %387 = vst [vmem:[%s4268_s8 + $0x368] sm:$0xff] %v386_v45  ;;  %v390_v47 = vld [vmem:[%s4263_s7 + $0x678] sm:$0xff]  ;;  %v392_v48 = vld [vmem:[%s4263_s7 + $0x680] sm:$0xff] }
  0x4f   : > { %389 = vst [vmem:[%s4268_s8 + $0x370] sm:$0xff] %v388_v46  ;;  %v394_v49 = vld [vmem:[%s4263_s7 + $0x688] sm:$0xff]  ;;  %391 = vst [vmem:[%s4268_s8 + $0x378] sm:$0xff] %v390_v47  ;;  %v396_v50 = vld [vmem:[%s4263_s7 + $0x690] sm:$0xff] }
  0x50   : > { %393 = vst [vmem:[%s4268_s8 + $0x380] sm:$0xff] %v392_v48  ;;  %395 = vst [vmem:[%s4268_s8 + $0x388] sm:$0xff] %v394_v49  ;;  %v398_v51 = vld [vmem:[%s4263_s7 + $0x698] sm:$0xff]  ;;  %v400_v52 = vld [vmem:[%s4263_s7 + $0x6a0] sm:$0xff] }
  0x51   : > { %397 = vst [vmem:[%s4268_s8 + $0x390] sm:$0xff] %v396_v50  ;;  %399 = vst [vmem:[%s4268_s8 + $0x398] sm:$0xff] %v398_v51  ;;  %v402_v53 = vld [vmem:[%s4263_s7 + $0x6a8] sm:$0xff]  ;;  %v404_v54 = vld [vmem:[%s4263_s7 + $0x6b0] sm:$0xff] }
  0x52   : > { %401 = vst [vmem:[%s4268_s8 + $0x3a0] sm:$0xff] %v400_v52  ;;  %v406_v55 = vld [vmem:[%s4263_s7 + $0x6b8] sm:$0xff]  ;;  %403 = vst [vmem:[%s4268_s8 + $0x3a8] sm:$0xff] %v402_v53  ;;  %v408_v56 = vld [vmem:[%s4263_s7 + $0x6c0] sm:$0xff] }
  0x53   : > { %405 = vst [vmem:[%s4268_s8 + $0x3b0] sm:$0xff] %v404_v54  ;;  %407 = vst [vmem:[%s4268_s8 + $0x3b8] sm:$0xff] %v406_v55  ;;  %v410_v57 = vld [vmem:[%s4263_s7 + $0x6c8] sm:$0xff]  ;;  %v412_v58 = vld [vmem:[%s4263_s7 + $0x6d0] sm:$0xff] }
  0x54   : > { %409 = vst [vmem:[%s4268_s8 + $0x3c0] sm:$0xff] %v408_v56  ;;  %411 = vst [vmem:[%s4268_s8 + $0x3c8] sm:$0xff] %v410_v57  ;;  %v414_v59 = vld [vmem:[%s4263_s7 + $0x6d8] sm:$0xff]  ;;  %v416_v60 = vld [vmem:[%s4263_s7 + $0x6e0] sm:$0xff] }
  0x55   : > { %413 = vst [vmem:[%s4268_s8 + $0x3d0] sm:$0xff] %v412_v58  ;;  %v418_v61 = vld [vmem:[%s4263_s7 + $0x6e8] sm:$0xff]  ;;  %415 = vst [vmem:[%s4268_s8 + $0x3d8] sm:$0xff] %v414_v59  ;;  %v420_v62 = vld [vmem:[%s4263_s7 + $0x6f0] sm:$0xff] }
  0x56   : > { %417 = vst [vmem:[%s4268_s8 + $0x3e0] sm:$0xff] %v416_v60  ;;  %419 = vst [vmem:[%s4268_s8 + $0x3e8] sm:$0xff] %v418_v61  ;;  %v422_v63 = vld [vmem:[%s4263_s7 + $0x6f8] sm:$0xff]  ;;  %v424_v0 = vld [vmem:[%s4263_s7 + $0x800] sm:$0xff] }
  0x57   : > { %421 = vst [vmem:[%s4268_s8 + $0x3f0] sm:$0xff] %v420_v62  ;;  %423 = vst [vmem:[%s4268_s8 + $0x3f8] sm:$0xff] %v422_v63  ;;  %v426_v1 = vld [vmem:[%s4263_s7 + $0x808] sm:$0xff]  ;;  %v428_v2 = vld [vmem:[%s4263_s7 + $0x810] sm:$0xff] }
  0x58   : > { %425 = vst [vmem:[%s4268_s8 + $0x400] sm:$0xff] %v424_v0  ;;  %v430_v3 = vld [vmem:[%s4263_s7 + $0x818] sm:$0xff]  ;;  %427 = vst [vmem:[%s4268_s8 + $0x408] sm:$0xff] %v426_v1  ;;  %v432_v4 = vld [vmem:[%s4263_s7 + $0x820] sm:$0xff] }
  0x59   : > { %429 = vst [vmem:[%s4268_s8 + $0x410] sm:$0xff] %v428_v2  ;;  %431 = vst [vmem:[%s4268_s8 + $0x418] sm:$0xff] %v430_v3  ;;  %v434_v5 = vld [vmem:[%s4263_s7 + $0x828] sm:$0xff]  ;;  %v436_v6 = vld [vmem:[%s4263_s7 + $0x830] sm:$0xff] }
  0x5a   : > { %433 = vst [vmem:[%s4268_s8 + $0x420] sm:$0xff] %v432_v4  ;;  %435 = vst [vmem:[%s4268_s8 + $0x428] sm:$0xff] %v434_v5  ;;  %v438_v7 = vld [vmem:[%s4263_s7 + $0x838] sm:$0xff]  ;;  %v440_v8 = vld [vmem:[%s4263_s7 + $0x840] sm:$0xff] }
  0x5b   : > { %437 = vst [vmem:[%s4268_s8 + $0x430] sm:$0xff] %v436_v6  ;;  %v442_v9 = vld [vmem:[%s4263_s7 + $0x848] sm:$0xff]  ;;  %439 = vst [vmem:[%s4268_s8 + $0x438] sm:$0xff] %v438_v7  ;;  %v444_v10 = vld [vmem:[%s4263_s7 + $0x850] sm:$0xff] }
  0x5c   : > { %441 = vst [vmem:[%s4268_s8 + $0x440] sm:$0xff] %v440_v8  ;;  %443 = vst [vmem:[%s4268_s8 + $0x448] sm:$0xff] %v442_v9  ;;  %v446_v11 = vld [vmem:[%s4263_s7 + $0x858] sm:$0xff]  ;;  %v448_v12 = vld [vmem:[%s4263_s7 + $0x860] sm:$0xff] }
  0x5d   : > { %445 = vst [vmem:[%s4268_s8 + $0x450] sm:$0xff] %v444_v10  ;;  %447 = vst [vmem:[%s4268_s8 + $0x458] sm:$0xff] %v446_v11  ;;  %v450_v13 = vld [vmem:[%s4263_s7 + $0x868] sm:$0xff]  ;;  %v452_v14 = vld [vmem:[%s4263_s7 + $0x870] sm:$0xff] }
  0x5e   : > { %449 = vst [vmem:[%s4268_s8 + $0x460] sm:$0xff] %v448_v12  ;;  %v454_v15 = vld [vmem:[%s4263_s7 + $0x878] sm:$0xff]  ;;  %451 = vst [vmem:[%s4268_s8 + $0x468] sm:$0xff] %v450_v13  ;;  %v456_v16 = vld [vmem:[%s4263_s7 + $0x880] sm:$0xff] }
  0x5f   : > { %453 = vst [vmem:[%s4268_s8 + $0x470] sm:$0xff] %v452_v14  ;;  %455 = vst [vmem:[%s4268_s8 + $0x478] sm:$0xff] %v454_v15  ;;  %v458_v17 = vld [vmem:[%s4263_s7 + $0x888] sm:$0xff]  ;;  %v460_v18 = vld [vmem:[%s4263_s7 + $0x890] sm:$0xff] }
  0x60   : > { %457 = vst [vmem:[%s4268_s8 + $0x480] sm:$0xff] %v456_v16  ;;  %459 = vst [vmem:[%s4268_s8 + $0x488] sm:$0xff] %v458_v17  ;;  %v462_v19 = vld [vmem:[%s4263_s7 + $0x898] sm:$0xff]  ;;  %v464_v20 = vld [vmem:[%s4263_s7 + $0x8a0] sm:$0xff] }
  0x61   : > { %461 = vst [vmem:[%s4268_s8 + $0x490] sm:$0xff] %v460_v18  ;;  %v466_v21 = vld [vmem:[%s4263_s7 + $0x8a8] sm:$0xff]  ;;  %463 = vst [vmem:[%s4268_s8 + $0x498] sm:$0xff] %v462_v19  ;;  %v468_v22 = vld [vmem:[%s4263_s7 + $0x8b0] sm:$0xff] }
  0x62   : > { %465 = vst [vmem:[%s4268_s8 + $0x4a0] sm:$0xff] %v464_v20  ;;  %467 = vst [vmem:[%s4268_s8 + $0x4a8] sm:$0xff] %v466_v21  ;;  %v470_v23 = vld [vmem:[%s4263_s7 + $0x8b8] sm:$0xff]  ;;  %v472_v24 = vld [vmem:[%s4263_s7 + $0x8c0] sm:$0xff] }
  0x63   : > { %469 = vst [vmem:[%s4268_s8 + $0x4b0] sm:$0xff] %v468_v22  ;;  %471 = vst [vmem:[%s4268_s8 + $0x4b8] sm:$0xff] %v470_v23  ;;  %v474_v25 = vld [vmem:[%s4263_s7 + $0x8c8] sm:$0xff]  ;;  %v476_v26 = vld [vmem:[%s4263_s7 + $0x8d0] sm:$0xff] }
  0x64   : > { %473 = vst [vmem:[%s4268_s8 + $0x4c0] sm:$0xff] %v472_v24  ;;  %v478_v27 = vld [vmem:[%s4263_s7 + $0x8d8] sm:$0xff]  ;;  %475 = vst [vmem:[%s4268_s8 + $0x4c8] sm:$0xff] %v474_v25  ;;  %v480_v28 = vld [vmem:[%s4263_s7 + $0x8e0] sm:$0xff] }
  0x65   : > { %477 = vst [vmem:[%s4268_s8 + $0x4d0] sm:$0xff] %v476_v26  ;;  %479 = vst [vmem:[%s4268_s8 + $0x4d8] sm:$0xff] %v478_v27  ;;  %v482_v29 = vld [vmem:[%s4263_s7 + $0x8e8] sm:$0xff]  ;;  %v484_v30 = vld [vmem:[%s4263_s7 + $0x8f0] sm:$0xff] }
  0x66   : > { %481 = vst [vmem:[%s4268_s8 + $0x4e0] sm:$0xff] %v480_v28  ;;  %483 = vst [vmem:[%s4268_s8 + $0x4e8] sm:$0xff] %v482_v29  ;;  %v486_v31 = vld [vmem:[%s4263_s7 + $0x8f8] sm:$0xff]  ;;  %v488_v32 = vld [vmem:[%s4263_s7 + $0xa00] sm:$0xff] }
  0x67   : > { %485 = vst [vmem:[%s4268_s8 + $0x4f0] sm:$0xff] %v484_v30  ;;  %v490_v33 = vld [vmem:[%s4263_s7 + $0xa08] sm:$0xff]  ;;  %487 = vst [vmem:[%s4268_s8 + $0x4f8] sm:$0xff] %v486_v31  ;;  %v492_v34 = vld [vmem:[%s4263_s7 + $0xa10] sm:$0xff] }
  0x68   : > { %489 = vst [vmem:[%s4268_s8 + $0x500] sm:$0xff] %v488_v32  ;;  %491 = vst [vmem:[%s4268_s8 + $0x508] sm:$0xff] %v490_v33  ;;  %v494_v35 = vld [vmem:[%s4263_s7 + $0xa18] sm:$0xff]  ;;  %v496_v36 = vld [vmem:[%s4263_s7 + $0xa20] sm:$0xff] }
  0x69   : > { %493 = vst [vmem:[%s4268_s8 + $0x510] sm:$0xff] %v492_v34  ;;  %495 = vst [vmem:[%s4268_s8 + $0x518] sm:$0xff] %v494_v35  ;;  %v498_v37 = vld [vmem:[%s4263_s7 + $0xa28] sm:$0xff]  ;;  %v500_v38 = vld [vmem:[%s4263_s7 + $0xa30] sm:$0xff] }
  0x6a   : > { %497 = vst [vmem:[%s4268_s8 + $0x520] sm:$0xff] %v496_v36  ;;  %v502_v39 = vld [vmem:[%s4263_s7 + $0xa38] sm:$0xff]  ;;  %499 = vst [vmem:[%s4268_s8 + $0x528] sm:$0xff] %v498_v37  ;;  %v504_v40 = vld [vmem:[%s4263_s7 + $0xa40] sm:$0xff] }
  0x6b   : > { %501 = vst [vmem:[%s4268_s8 + $0x530] sm:$0xff] %v500_v38  ;;  %503 = vst [vmem:[%s4268_s8 + $0x538] sm:$0xff] %v502_v39  ;;  %v506_v41 = vld [vmem:[%s4263_s7 + $0xa48] sm:$0xff]  ;;  %v508_v42 = vld [vmem:[%s4263_s7 + $0xa50] sm:$0xff] }
  0x6c   : > { %505 = vst [vmem:[%s4268_s8 + $0x540] sm:$0xff] %v504_v40  ;;  %507 = vst [vmem:[%s4268_s8 + $0x548] sm:$0xff] %v506_v41  ;;  %v510_v43 = vld [vmem:[%s4263_s7 + $0xa58] sm:$0xff]  ;;  %v512_v44 = vld [vmem:[%s4263_s7 + $0xa60] sm:$0xff] }
  0x6d   : > { %509 = vst [vmem:[%s4268_s8 + $0x550] sm:$0xff] %v508_v42  ;;  %v514_v45 = vld [vmem:[%s4263_s7 + $0xa68] sm:$0xff]  ;;  %511 = vst [vmem:[%s4268_s8 + $0x558] sm:$0xff] %v510_v43  ;;  %v516_v46 = vld [vmem:[%s4263_s7 + $0xa70] sm:$0xff] }
  0x6e   : > { %513 = vst [vmem:[%s4268_s8 + $0x560] sm:$0xff] %v512_v44  ;;  %515 = vst [vmem:[%s4268_s8 + $0x568] sm:$0xff] %v514_v45  ;;  %v518_v47 = vld [vmem:[%s4263_s7 + $0xa78] sm:$0xff]  ;;  %v520_v48 = vld [vmem:[%s4263_s7 + $0xa80] sm:$0xff] }
  0x6f   : > { %517 = vst [vmem:[%s4268_s8 + $0x570] sm:$0xff] %v516_v46  ;;  %519 = vst [vmem:[%s4268_s8 + $0x578] sm:$0xff] %v518_v47  ;;  %v522_v49 = vld [vmem:[%s4263_s7 + $0xa88] sm:$0xff]  ;;  %v524_v50 = vld [vmem:[%s4263_s7 + $0xa90] sm:$0xff] }
  0x70   : > { %521 = vst [vmem:[%s4268_s8 + $0x580] sm:$0xff] %v520_v48  ;;  %v526_v51 = vld [vmem:[%s4263_s7 + $0xa98] sm:$0xff]  ;;  %523 = vst [vmem:[%s4268_s8 + $0x588] sm:$0xff] %v522_v49  ;;  %v528_v52 = vld [vmem:[%s4263_s7 + $0xaa0] sm:$0xff] }
  0x71   : > { %525 = vst [vmem:[%s4268_s8 + $0x590] sm:$0xff] %v524_v50  ;;  %527 = vst [vmem:[%s4268_s8 + $0x598] sm:$0xff] %v526_v51  ;;  %v530_v53 = vld [vmem:[%s4263_s7 + $0xaa8] sm:$0xff]  ;;  %v532_v54 = vld [vmem:[%s4263_s7 + $0xab0] sm:$0xff] }
  0x72   : > { %529 = vst [vmem:[%s4268_s8 + $0x5a0] sm:$0xff] %v528_v52  ;;  %531 = vst [vmem:[%s4268_s8 + $0x5a8] sm:$0xff] %v530_v53  ;;  %v534_v55 = vld [vmem:[%s4263_s7 + $0xab8] sm:$0xff]  ;;  %v536_v56 = vld [vmem:[%s4263_s7 + $0xac0] sm:$0xff] }
  0x73   : > { %533 = vst [vmem:[%s4268_s8 + $0x5b0] sm:$0xff] %v532_v54  ;;  %v538_v57 = vld [vmem:[%s4263_s7 + $0xac8] sm:$0xff]  ;;  %535 = vst [vmem:[%s4268_s8 + $0x5b8] sm:$0xff] %v534_v55  ;;  %v540_v58 = vld [vmem:[%s4263_s7 + $0xad0] sm:$0xff] }
  0x74   : > { %537 = vst [vmem:[%s4268_s8 + $0x5c0] sm:$0xff] %v536_v56  ;;  %539 = vst [vmem:[%s4268_s8 + $0x5c8] sm:$0xff] %v538_v57  ;;  %v542_v59 = vld [vmem:[%s4263_s7 + $0xad8] sm:$0xff]  ;;  %v544_v60 = vld [vmem:[%s4263_s7 + $0xae0] sm:$0xff] }
  0x75   : > { %541 = vst [vmem:[%s4268_s8 + $0x5d0] sm:$0xff] %v540_v58  ;;  %543 = vst [vmem:[%s4268_s8 + $0x5d8] sm:$0xff] %v542_v59  ;;  %v546_v61 = vld [vmem:[%s4263_s7 + $0xae8] sm:$0xff]  ;;  %v548_v62 = vld [vmem:[%s4263_s7 + $0xaf0] sm:$0xff] }
  0x76   : > { %545 = vst [vmem:[%s4268_s8 + $0x5e0] sm:$0xff] %v544_v60  ;;  %v550_v63 = vld [vmem:[%s4263_s7 + $0xaf8] sm:$0xff]  ;;  %547 = vst [vmem:[%s4268_s8 + $0x5e8] sm:$0xff] %v546_v61 }
  0x77   : > { %549 = vst [vmem:[%s4268_s8 + $0x5f0] sm:$0xff] %v548_v62  ;;  %551 = vst [vmem:[%s4268_s8 + $0x5f8] sm:$0xff] %v550_v63 }
  0x78 PF: > { %p3800_p7 = scmp.ge.s32.totalorder %s4179_s18, 1  ;;  %p556_p8 = scmp.lt.s32.totalorder %s4179_s18, 5 }
  0x7a   : > { %p557_p9 = pnand %p3800_p7, %p556_p8 }
  0x7b   : > { %s563_s9 = sand.u32 (!%p557_p9), 1, %s4155_s12   ;;  %s3801_s27 = sshll.u32 (!%p557_p9), %s4163_s14, 6 }
  0x7c   : > { %560 = sbr.rel (%p557_p9) target bundleno = 533 (0x215), region = 51  ;;  %p592_p10 = scmp.lt.s32.totalorder (!%p557_p9), %s4167_s15, 1 }
  0x7d   : > { %s4064_s10 = smul.u32 (!%p557_p9), 1536, %s563_s9  ;;  %p594_p11 = scmp.lt.s32.totalorder (!%p557_p9), %s3801_s27, 127 }
  0x7f   : > { %s4660_s22 = scalar_lea.vmem (!%p557_p9), [#allocation2], %s4064_s10 }
  0x81   : > { %v4181_v0 = vmov 0   ;;  %v795_v1 = vld [vmem:[%s5105_s2] sm:$0xf]  ;;  %v732_v4 = vld [vmem:[%s4660_s22 + $0x408] sm:$0xff]  ;;  %v733_v24 = vld [vmem:[%s4660_s22 + $0x410] sm:$0xff]  ;;  %vm1761_vm0 = vcmask 392192  }
  0x82   : > { %1797 = vmatprep.mubr.bf16.mxu0 %v4181_v0  ;;  %1838 = vmatprep.mubr.bf16.mxu1 %v4181_v0  ;;  %v731_v2 = vld [vmem:[%s4660_s22 + $0x400] sm:$0xff]  ;;  %v764_v6 = vld [vmem:[%s4660_s22 + $0x508] sm:$0xff]  ;;  %v765_v25 = vld [vmem:[%s4660_s22 + $0x510] sm:$0xff]  ;;  %s5120_s15 = smov (!%p592_p10, %s4167_s15), 1  ;;  %s5122_s27 = smov (!%p594_p11, %s3801_s27), 127 }
  0x83   : > { %4123 = vset.pattern.permute.xlu0 %v4181_v0  ;;  %v763_v3 = vld [vmem:[%s4660_s22 + $0x500] sm:$0xff]  ;;  %v3935_v10 = vcombine.high %v732_v4, %v764_v6  ;;  %v3934_v11 = vcombine.low %v732_v4, %v764_v6  ;;  %v668_v13 = vld [vmem:[%s4660_s22 + $0x208] sm:$0xff]  ;;  %v734_v26 = vld [vmem:[%s4660_s22 + $0x418] sm:$0xff]  ;;  %v3937_v30 = vcombine.high %v733_v24, %v765_v25  ;;  %v3936_v37 = vcombine.low %v733_v24, %v765_v25  ;;  %s3802_s14 = sshll.u32 %s5120_s15, 7 }
  0x84   : > { %798 = vperm.xlu0 %4123, %v795_v1   ;;  %v3933_v5 = vcombine.high %v731_v2, %v763_v3  ;;  %v3932_v7 = vcombine.low %v731_v2, %v763_v3  ;;  %v667_v8 = vld [vmem:[%s4660_s22 + $0x200] sm:$0xff]  ;;  %v700_v14 = vld [vmem:[%s4660_s22 + $0x308] sm:$0xff]  ;;  %v766_v27 = vld [vmem:[%s4660_s22 + $0x518] sm:$0xff]  ;;  %s597_s28 = sadd.s32 %s3802_s14, %s5122_s27 }
  0x85   : > { %v699_v9 = vld [vmem:[%s4660_s22 + $0x300] sm:$0xff]  ;;  %v3871_v16 = vcombine.high %v668_v13, %v700_v14  ;;  %v604_v18 = vld [vmem:[%s4660_s22 + $0x8] sm:$0xff]  ;;  %1816 = vmatprep.subr.bf16.mxu1 %v3935_v10  ;;  %v3870_v21 = vcombine.low %v668_v13, %v700_v14  ;;  %v3939_v31 = vcombine.high %v734_v26, %v766_v27  ;;  %v669_v32 = vld [vmem:[%s4660_s22 + $0x210] sm:$0xff]  ;;  %v3938_v38 = vcombine.low %v734_v26, %v766_v27  ;;  %s3803_s15 = sshll.u32 %s597_s28, 1 }
  0x86   : > { %v3869_v12 = vcombine.high %v667_v8, %v699_v9  ;;  %v603_v15 = vld [vmem:[%s4660_s22] sm:$0xff]  ;;  %1775 = vmatprep.subr.bf16.mxu0 %v3933_v5  ;;  %v636_v19 = vld [vmem:[%s4660_s22 + $0x108] sm:$0xff]  ;;  %v3868_v20 = vcombine.low %v667_v8, %v699_v9  ;;  %1817 = vmatpush1.bf16.msra.mxu1 %v3934_v11  ;;  %v701_v33 = vld [vmem:[%s4660_s22 + $0x310] sm:$0xff]  ;;  %s4974_s4 = scalar_lea.vmem %s5106_s3, %s3803_s15 }
  0x87   : > { %v635_v17 = vld [vmem:[%s4660_s22 + $0x100] sm:$0xff]  ;;  %1776 = vmatpush1.bf16.msra.mxu0 %v3932_v7  ;;  %1818 = vmatprep.subr.bf16.mxu1 %v3871_v16  ;;  %v3807_v23 = vcombine.high %v604_v18, %v636_v19  ;;  %v3806_v29 = vcombine.low %v604_v18, %v636_v19  ;;  %v670_v34 = vld [vmem:[%s4660_s22 + $0x218] sm:$0xff]  ;;  %v3873_v39 = vcombine.high %v669_v32, %v701_v33  ;;  %v605_v41 = vld [vmem:[%s4660_s22 + $0x10] sm:$0xff] }
  0x88   : > { %1777 = vmatprep.subr.bf16.mxu0 %v3869_v12  ;;  %v3805_v22 = vcombine.high %v603_v15, %v635_v17  ;;  %v3804_v28 = vcombine.low %v603_v15, %v635_v17  ;;  %v702_v35 = vld [vmem:[%s4660_s22 + $0x318] sm:$0xff]  ;;  %v4685_v36 = vld [vmem:[%s5104_s1] sm:$0x3]  ;;  %v637_v42 = vld [vmem:[%s4660_s22 + $0x110] sm:$0xff]  ;;  %v3872_v45 = vcombine.low %v669_v32, %v701_v33 }
  0x89   : > { %v3875_v40 = vcombine.high %v670_v34, %v702_v35  ;;  %v606_v43 = vld [vmem:[%s4660_s22 + $0x18] sm:$0xff]  ;;  %v3874_v46 = vcombine.low %v670_v34, %v702_v35  ;;  %v3809_v47 = vcombine.high %v605_v41, %v637_v42  ;;  %v735_v49 = vld [vmem:[%s4660_s22 + $0x420] sm:$0xff]  ;;  %v736_v51 = vld [vmem:[%s4660_s22 + $0x428] sm:$0xff]  ;;  %v3808_v53 = vcombine.low %v605_v41, %v637_v42 }
  0x8a   : > { %1819 = vmatpush1.bf16.msra.mxu1 %v3870_v21  ;;  %v638_v44 = vld [vmem:[%s4660_s22 + $0x118] sm:$0xff]  ;;  %v767_v50 = vld [vmem:[%s4660_s22 + $0x520] sm:$0xff]  ;;  %v768_v52 = vld [vmem:[%s4660_s22 + $0x528] sm:$0xff] }
  0x8b   : > { %1778 = vmatpush1.bf16.msra.mxu0 %v3868_v20  ;;  %1820 = vmatprep.subr.bf16.mxu1 %v3807_v23  ;;  %v3811_v48 = vcombine.high %v606_v43, %v638_v44  ;;  %v3810_v54 = vcombine.low %v606_v43, %v638_v44  ;;  %v3941_v55 = vcombine.high %v735_v49, %v767_v50  ;;  %v671_v57 = vld [vmem:[%s4660_s22 + $0x220] sm:$0xff]  ;;  %v672_v59 = vld [vmem:[%s4660_s22 + $0x228] sm:$0xff]  ;;  %v737_v10 = vld [vmem:[%s4660_s22 + $0x430] sm:$0xff] }
  0x8c   : > { %1779 = vmatprep.subr.bf16.mxu0 %v3805_v22  ;;  %v3943_v56 = vcombine.high %v736_v51, %v768_v52  ;;  %v703_v58 = vld [vmem:[%s4660_s22 + $0x320] sm:$0xff]  ;;  %v704_v60 = vld [vmem:[%s4660_s22 + $0x328] sm:$0xff]  ;;  %v3940_v61 = vcombine.low %v735_v49, %v767_v50  ;;  %v3942_v62 = vcombine.low %v736_v51, %v768_v52  ;;  %v769_v11 = vld [vmem:[%s4660_s22 + $0x530] sm:$0xff] }
  0x8d   : > { %v3877_v63 = vcombine.high %v671_v57, %v703_v58  ;;  %v3879_v1 = vcombine.high %v672_v59, %v704_v60  ;;  %v607_v2 = vld [vmem:[%s4660_s22 + $0x20] sm:$0xff]  ;;  %v608_v4 = vld [vmem:[%s4660_s22 + $0x28] sm:$0xff]  ;;  %v3876_v6 = vcombine.low %v671_v57, %v703_v58  ;;  %v3878_v7 = vcombine.low %v672_v59, %v704_v60  ;;  %v738_v12 = vld [vmem:[%s4660_s22 + $0x438] sm:$0xff] }
  0x8e   : > { %1821 = vmatpush1.bf16.msra.mxu1 %v3806_v29  ;;  %v639_v3 = vld [vmem:[%s4660_s22 + $0x120] sm:$0xff]  ;;  %v640_v5 = vld [vmem:[%s4660_s22 + $0x128] sm:$0xff]  ;;  %v770_v13 = vld [vmem:[%s4660_s22 + $0x538] sm:$0xff]  ;;  %v3945_v16 = vcombine.high %v737_v10, %v769_v11  ;;  %v3944_v22 = vcombine.low %v737_v10, %v769_v11 }
  0x8f   : > { %1780 = vmatpush1.bf16.msra.mxu0 %v3804_v28  ;;  %1898 = vmatprep.subr.bf16.mxu1 %v3939_v31  ;;  %v3813_v8 = vcombine.high %v607_v2, %v639_v3  ;;  %v3815_v9 = vcombine.high %v608_v4, %v640_v5  ;;  %v3812_v14 = vcombine.low %v607_v2, %v639_v3  ;;  %v673_v18 = vld [vmem:[%s4660_s22 + $0x230] sm:$0xff]  ;;  %v674_v20 = vld [vmem:[%s4660_s22 + $0x238] sm:$0xff]  ;;  %v739_v34 = vld [vmem:[%s4660_s22 + $0x440] sm:$0xff] }
  0x90   : > { %1857 = vmatprep.subr.bf16.mxu0 %v3937_v30  ;;  %v3814_v15 = vcombine.low %v608_v4, %v640_v5  ;;  %v3947_v17 = vcombine.high %v738_v12, %v770_v13  ;;  %v705_v19 = vld [vmem:[%s4660_s22 + $0x330] sm:$0xff]  ;;  %v706_v21 = vld [vmem:[%s4660_s22 + $0x338] sm:$0xff]  ;;  %v3946_v23 = vcombine.low %v738_v12, %v770_v13  ;;  %v771_v35 = vld [vmem:[%s4660_s22 + $0x540] sm:$0xff] }
  0x91   : > { %3997 = vmatmul.mubr.msk.bf16.vlgmr.msra.gmra.mxu1 %vm1761_vm0, %v4685_v36  ;;  %v3881_v24 = vcombine.high %v673_v18, %v705_v19  ;;  %v3883_v25 = vcombine.high %v674_v20, %v706_v21  ;;  %v609_v26 = vld [vmem:[%s4660_s22 + $0x30] sm:$0xff]  ;;  %v610_v28 = vld [vmem:[%s4660_s22 + $0x38] sm:$0xff]  ;;  %v3880_v30 = vcombine.low %v673_v18, %v705_v19  ;;  %v3882_v31 = vcombine.low %v674_v20, %v706_v21  ;;  %v675_v43 = vld [vmem:[%s4660_s22 + $0x240] sm:$0xff] }
  0x92   : > { %3996 = vmatmul.mubr.msk.bf16.vlgmr.msra.gmra.mxu0 %vm1761_vm0, %v4685_v36  ;;  %1899 = vmatpush1.bf16.msra.mxu1 %v3938_v38  ;;  %v641_v27 = vld [vmem:[%s4660_s22 + $0x130] sm:$0xff]  ;;  %v642_v29 = vld [vmem:[%s4660_s22 + $0x138] sm:$0xff]  ;;  %v772_v38 = vld [vmem:[%s4660_s22 + $0x548] sm:$0xff]  ;;  %v3949_v41 = vcombine.high %v739_v34, %v771_v35 }
  0x93   : > { %1858 = vmatpush1.bf16.msra.mxu0 %v3936_v37  ;;  %1900 = vmatprep.subr.bf16.mxu1 %v3875_v40  ;;  %v3817_v32 = vcombine.high %v609_v26, %v641_v27  ;;  %v3819_v33 = vcombine.high %v610_v28, %v642_v29  ;;  %v740_v37 = vld [vmem:[%s4660_s22 + $0x448] sm:$0xff]  ;;  %v3818_v40 = vcombine.low %v610_v28, %v642_v29  ;;  %v707_v44 = vld [vmem:[%s4660_s22 + $0x340] sm:$0xff]  ;;  %v741_v59 = vld [vmem:[%s4660_s22 + $0x450] sm:$0xff] }
  0x94   : > { %1859 = vmatprep.subr.bf16.mxu0 %v3873_v39  ;;  %1879 = vmatprep.mubr.bf16.mxu0 %v4181_v0  ;;  %v3816_v39 = vcombine.low %v609_v26, %v641_v27  ;;  %v3951_v42 = vcombine.high %v740_v37, %v772_v38  ;;  %v3885_v49 = vcombine.high %v675_v43, %v707_v44  ;;  %v611_v51 = vld [vmem:[%s4660_s22 + $0x40] sm:$0xff]  ;;  %v773_v60 = vld [vmem:[%s4660_s22 + $0x550] sm:$0xff] }
  0x95   : > { %1920 = vmatprep.mubr.bf16.mxu1 %v4181_v0  ;;  %v643_v52 = vld [vmem:[%s4660_s22 + $0x140] sm:$0xff]  ;;  %v3953_v2 = vcombine.high %v741_v59, %v773_v60  ;;  %v677_v4 = vld [vmem:[%s4660_s22 + $0x250] sm:$0xff] }
  0x96   : > { %1901 = vmatpush1.bf16.msra.mxu1 %v3874_v46  ;;  %v708_v46 = vld [vmem:[%s4660_s22 + $0x348] sm:$0xff]  ;;  %v3821_v57 = vcombine.high %v611_v51, %v643_v52  ;;  %v709_v5 = vld [vmem:[%s4660_s22 + $0x350] sm:$0xff]  ;;  %v743_v20 = vld [vmem:[%s4660_s22 + $0x460] sm:$0xff] }
  0x97   : > { %1860 = vmatpush1.bf16.msra.mxu0 %v3872_v45  ;;  %1902 = vmatprep.subr.bf16.mxu1 %v3811_v48  ;;  %v676_v45 = vld [vmem:[%s4660_s22 + $0x248] sm:$0xff]  ;;  %v3950_v48 = vcombine.low %v740_v37, %v772_v38  ;;  %v3889_v10 = vcombine.high %v677_v4, %v709_v5  ;;  %v613_v12 = vld [vmem:[%s4660_s22 + $0x50] sm:$0xff]  ;;  %v775_v21 = vld [vmem:[%s4660_s22 + $0x560] sm:$0xff] }
  0x98   : > { %1861 = vmatprep.subr.bf16.mxu0 %v3809_v47  ;;  %v3948_v47 = vcombine.low %v739_v34, %v771_v35  ;;  %v3887_v50 = vcombine.high %v676_v45, %v708_v46  ;;  %v645_v13 = vld [vmem:[%s4660_s22 + $0x150] sm:$0xff]  ;;  %v3957_v26 = vcombine.high %v743_v20, %v775_v21  ;;  %v679_v28 = vld [vmem:[%s4660_s22 + $0x260] sm:$0xff] }
  0x99   : > { %v3825_v18 = vcombine.high %v613_v12, %v645_v13  ;;  %v711_v29 = vld [vmem:[%s4660_s22 + $0x360] sm:$0xff] }
  0x9a   : > { %1903 = vmatpush1.bf16.msra.mxu1 %v3810_v54  ;;  %v644_v54 = vld [vmem:[%s4660_s22 + $0x148] sm:$0xff]  ;;  %v3893_v34 = vcombine.high %v679_v28, %v711_v29  ;;  %v615_v37 = vld [vmem:[%s4660_s22 + $0x60] sm:$0xff] }
  0x9b   : > { %1862 = vmatpush1.bf16.msra.mxu0 %v3808_v53  ;;  %1980 = vmatprep.subr.bf16.mxu1 %v3943_v56  ;;  %v612_v53 = vld [vmem:[%s4660_s22 + $0x48] sm:$0xff]  ;;  %v3886_v56 = vcombine.low %v676_v45, %v708_v46  ;;  %v647_v38 = vld [vmem:[%s4660_s22 + $0x160] sm:$0xff]  ;;  %v745_v45 = vld [vmem:[%s4660_s22 + $0x470] sm:$0xff] }
  0x9c   : > { %1939 = vmatprep.subr.bf16.mxu0 %v3941_v55  ;;  %v3884_v55 = vcombine.low %v675_v43, %v707_v44  ;;  %v3823_v58 = vcombine.high %v612_v53, %v644_v54  ;;  %v3829_v43 = vcombine.high %v615_v37, %v647_v38  ;;  %v777_v46 = vld [vmem:[%s4660_s22 + $0x570] sm:$0xff] }
  0x9d   : > { %3999 = vmatmul.mubr.msk.bf16.vlgmr.msra.gmra.mxu1 %vm1761_vm0, %v4685_v36 }
  0x9e   : > { %3998 = vmatmul.mubr.msk.bf16.vlgmr.msra.gmra.mxu0 %vm1761_vm0, %v4685_v36  ;;  %1981 = vmatpush1.bf16.msra.mxu1 %v3942_v62  ;;  %v774_v62 = vld [vmem:[%s4660_s22 + $0x558] sm:$0xff] }
  0x9f   : > { %1940 = vmatpush1.bf16.msra.mxu0 %v3940_v61  ;;  %1982 = vmatprep.subr.bf16.mxu1 %v3879_v1  ;;  %v742_v61 = vld [vmem:[%s4660_s22 + $0x458] sm:$0xff]  ;;  %v3822_v1 = vcombine.low %v612_v53, %v644_v54  ;;  %v681_v53 = vld [vmem:[%s4660_s22 + $0x270] sm:$0xff] }
  0xa0   : > { %1941 = vmatprep.subr.bf16.mxu0 %v3877_v63  ;;  %1961 = vmatprep.mubr.bf16.mxu0 %v4181_v0  ;;  %v3820_v63 = vcombine.low %v611_v51, %v643_v52  ;;  %v3955_v3 = vcombine.high %v742_v61, %v774_v62  ;;  %v3961_v51 = vcombine.high %v745_v45, %v777_v46  ;;  %v713_v54 = vld [vmem:[%s4660_s22 + $0x370] sm:$0xff] }
  0xa1   : > { %2002 = vmatprep.mubr.bf16.mxu1 %v4181_v0 }
  0xa2   : > { %1983 = vmatpush1.bf16.msra.mxu1 %v3878_v7  ;;  %v710_v7 = vld [vmem:[%s4660_s22 + $0x358] sm:$0xff] }
  0xa3   : > { %1942 = vmatpush1.bf16.msra.mxu0 %v3876_v6  ;;  %1984 = vmatprep.subr.bf16.mxu1 %v3815_v9  ;;  %v678_v6 = vld [vmem:[%s4660_s22 + $0x258] sm:$0xff]  ;;  %v3954_v9 = vcombine.low %v742_v61, %v774_v62  ;;  %v617_v61 = vld [vmem:[%s4660_s22 + $0x70] sm:$0xff] }
  0xa4   : > { %1943 = vmatprep.subr.bf16.mxu0 %v3813_v8  ;;  %v3952_v8 = vcombine.low %v741_v59, %v773_v60  ;;  %v3891_v11 = vcombine.high %v678_v6, %v710_v7  ;;  %v3897_v59 = vcombine.high %v681_v53, %v713_v54  ;;  %v649_v62 = vld [vmem:[%s4660_s22 + $0x170] sm:$0xff] }
  0xa6   : > { %1985 = vmatpush1.bf16.msra.mxu1 %v3814_v15  ;;  %v646_v15 = vld [vmem:[%s4660_s22 + $0x158] sm:$0xff] }
  0xa7   : > { %1944 = vmatpush1.bf16.msra.mxu0 %v3812_v14  ;;  %2062 = vmatprep.subr.bf16.mxu1 %v3947_v17  ;;  %v614_v14 = vld [vmem:[%s4660_s22 + $0x58] sm:$0xff]  ;;  %v3890_v17 = vcombine.low %v678_v6, %v710_v7  ;;  %v747_v6 = vld [vmem:[%s4660_s22 + $0x480] sm:$0xff] }
  0xa8   : > { %2021 = vmatprep.subr.bf16.mxu0 %v3945_v16  ;;  %v3888_v16 = vcombine.low %v677_v4, %v709_v5  ;;  %v3827_v19 = vcombine.high %v614_v14, %v646_v15  ;;  %v3833_v4 = vcombine.high %v617_v61, %v649_v62  ;;  %v779_v7 = vld [vmem:[%s4660_s22 + $0x580] sm:$0xff] }
  0xa9   : > { %4001 = vmatmul.mubr.msk.bf16.vlgmr.msra.gmra.mxu1 %vm1761_vm0, %v4685_v36 }
  0xaa   : > { %4000 = vmatmul.mubr.msk.bf16.vlgmr.msra.gmra.mxu0 %vm1761_vm0, %v4685_v36  ;;  %2063 = vmatpush1.bf16.msra.mxu1 %v3946_v23  ;;  %v776_v23 = vld [vmem:[%s4660_s22 + $0x568] sm:$0xff] }
  0xab   : > { %2022 = vmatpush1.bf16.msra.mxu0 %v3944_v22  ;;  %2064 = vmatprep.subr.bf16.mxu1 %v3883_v25  ;;  %v744_v22 = vld [vmem:[%s4660_s22 + $0x468] sm:$0xff]  ;;  %v3826_v25 = vcombine.low %v614_v14, %v646_v15  ;;  %v683_v14 = vld [vmem:[%s4660_s22 + $0x280] sm:$0xff] }
  0xac   : > { %2023 = vmatprep.subr.bf16.mxu0 %v3881_v24  ;;  %2043 = vmatprep.mubr.bf16.mxu0 %v4181_v0  ;;  %v3824_v24 = vcombine.low %v613_v12, %v645_v13  ;;  %v3959_v27 = vcombine.high %v744_v22, %v776_v23  ;;  %v3965_v12 = vcombine.high %v747_v6, %v779_v7  ;;  %v715_v15 = vld [vmem:[%s4660_s22 + $0x380] sm:$0xff] }
  0xad   : > { %2084 = vmatprep.mubr.bf16.mxu1 %v4181_v0 }
  0xae   : > { %2065 = vmatpush1.bf16.msra.mxu1 %v3882_v31  ;;  %v712_v31 = vld [vmem:[%s4660_s22 + $0x368] sm:$0xff] }
  0xaf   : > { %2024 = vmatpush1.bf16.msra.mxu0 %v3880_v30  ;;  %2066 = vmatprep.subr.bf16.mxu1 %v3819_v33  ;;  %v680_v30 = vld [vmem:[%s4660_s22 + $0x268] sm:$0xff]  ;;  %v3958_v33 = vcombine.low %v744_v22, %v776_v23  ;;  %v619_v22 = vld [vmem:[%s4660_s22 + $0x80] sm:$0xff] }
  0xb0   : > { %2025 = vmatprep.subr.bf16.mxu0 %v3817_v32  ;;  %v3956_v32 = vcombine.low %v743_v20, %v775_v21  ;;  %v3895_v35 = vcombine.high %v680_v30, %v712_v31  ;;  %v3901_v20 = vcombine.high %v683_v14, %v715_v15  ;;  %v651_v23 = vld [vmem:[%s4660_s22 + $0x180] sm:$0xff] }
  0xb2   : > { %2067 = vmatpush1.bf16.msra.mxu1 %v3818_v40  ;;  %v648_v40 = vld [vmem:[%s4660_s22 + $0x168] sm:$0xff] }
  0xb3   : > { %2026 = vmatpush1.bf16.msra.mxu0 %v3816_v39  ;;  %2144 = vmatprep.subr.bf16.mxu1 %v3951_v42  ;;  %v616_v39 = vld [vmem:[%s4660_s22 + $0x68] sm:$0xff]  ;;  %v3894_v42 = vcombine.low %v680_v30, %v712_v31  ;;  %v749_v30 = vld [vmem:[%s4660_s22 + $0x490] sm:$0xff] }
  0xb4   : > { %2103 = vmatprep.subr.bf16.mxu0 %v3949_v41  ;;  %v3892_v41 = vcombine.low %v679_v28, %v711_v29  ;;  %v3831_v44 = vcombine.high %v616_v39, %v648_v40  ;;  %v3837_v28 = vcombine.high %v619_v22, %v651_v23  ;;  %v781_v31 = vld [vmem:[%s4660_s22 + $0x590] sm:$0xff] }
  0xb5   : > { %4003 = vmatmul.mubr.msk.bf16.vlgmr.msra.gmra.mxu1 %vm1761_vm0, %v4685_v36 }
  0xb6   : > { %4002 = vmatmul.mubr.msk.bf16.vlgmr.msra.gmra.mxu0 %vm1761_vm0, %v4685_v36  ;;  %2145 = vmatpush1.bf16.msra.mxu1 %v3950_v48  ;;  %v778_v48 = vld [vmem:[%s4660_s22 + $0x578] sm:$0xff] }
  0xb7   : > { %2104 = vmatpush1.bf16.msra.mxu0 %v3948_v47  ;;  %2146 = vmatprep.subr.bf16.mxu1 %v3887_v50  ;;  %v746_v47 = vld [vmem:[%s4660_s22 + $0x478] sm:$0xff]  ;;  %v3830_v50 = vcombine.low %v616_v39, %v648_v40  ;;  %v685_v39 = vld [vmem:[%s4660_s22 + $0x290] sm:$0xff] }
  0xb8   : > { %2105 = vmatprep.subr.bf16.mxu0 %v3885_v49  ;;  %2125 = vmatprep.mubr.bf16.mxu0 %v4181_v0  ;;  %v3828_v49 = vcombine.low %v615_v37, %v647_v38  ;;  %v3963_v52 = vcombine.high %v746_v47, %v778_v48  ;;  %v3969_v37 = vcombine.high %v749_v30, %v781_v31  ;;  %v717_v40 = vld [vmem:[%s4660_s22 + $0x390] sm:$0xff] }
  0xb9   : > { %2166 = vmatprep.mubr.bf16.mxu1 %v4181_v0 }
  0xba   : > { %2147 = vmatpush1.bf16.msra.mxu1 %v3886_v56  ;;  %v714_v56 = vld [vmem:[%s4660_s22 + $0x378] sm:$0xff] }
  0xbb   : > { %2106 = vmatpush1.bf16.msra.mxu0 %v3884_v55  ;;  %2148 = vmatprep.subr.bf16.mxu1 %v3823_v58  ;;  %v682_v55 = vld [vmem:[%s4660_s22 + $0x278] sm:$0xff]  ;;  %v3962_v58 = vcombine.low %v746_v47, %v778_v48  ;;  %v621_v47 = vld [vmem:[%s4660_s22 + $0x90] sm:$0xff] }
  0xbc   : > { %2107 = vmatprep.subr.bf16.mxu0 %v3821_v57  ;;  %v3960_v57 = vcombine.low %v745_v45, %v777_v46  ;;  %v3899_v60 = vcombine.high %v682_v55, %v714_v56  ;;  %v3905_v45 = vcombine.high %v685_v39, %v717_v40  ;;  %v653_v48 = vld [vmem:[%s4660_s22 + $0x190] sm:$0xff] }
  0xbe   : > { %2149 = vmatpush1.bf16.msra.mxu1 %v3822_v1  ;;  %v650_v1 = vld [vmem:[%s4660_s22 + $0x178] sm:$0xff] }
  0xbf   : > { %2108 = vmatpush1.bf16.msra.mxu0 %v3820_v63  ;;  %2226 = vmatprep.subr.bf16.mxu1 %v3955_v3  ;;  %v618_v63 = vld [vmem:[%s4660_s22 + $0x78] sm:$0xff]  ;;  %v3898_v3 = vcombine.low %v682_v55, %v714_v56  ;;  %v751_v55 = vld [vmem:[%s4660_s22 + $0x4a0] sm:$0xff] }
  0xc0   : > { %2185 = vmatprep.subr.bf16.mxu0 %v3953_v2  ;;  %v3896_v2 = vcombine.low %v681_v53, %v713_v54  ;;  %v3835_v5 = vcombine.high %v618_v63, %v650_v1  ;;  %v3841_v53 = vcombine.high %v621_v47, %v653_v48  ;;  %v783_v56 = vld [vmem:[%s4660_s22 + $0x5a0] sm:$0xff] }
  0xc1   : > { %4005 = vmatmul.mubr.msk.bf16.vlgmr.msra.gmra.mxu1 %vm1761_vm0, %v4685_v36 }
  0xc2   : > { %4004 = vmatmul.mubr.msk.bf16.vlgmr.msra.gmra.mxu0 %vm1761_vm0, %v4685_v36  ;;  %2227 = vmatpush1.bf16.msra.mxu1 %v3954_v9  ;;  %v780_v9 = vld [vmem:[%s4660_s22 + $0x588] sm:$0xff] }
  0xc3   : > { %2186 = vmatpush1.bf16.msra.mxu0 %v3952_v8  ;;  %2228 = vmatprep.subr.bf16.mxu1 %v3891_v11  ;;  %v748_v8 = vld [vmem:[%s4660_s22 + $0x488] sm:$0xff]  ;;  %v3834_v11 = vcombine.low %v618_v63, %v650_v1  ;;  %v687_v63 = vld [vmem:[%s4660_s22 + $0x2a0] sm:$0xff] }
  0xc4   : > { %2187 = vmatprep.subr.bf16.mxu0 %v3889_v10  ;;  %2207 = vmatprep.mubr.bf16.mxu0 %v4181_v0  ;;  %v3832_v10 = vcombine.low %v617_v61, %v649_v62  ;;  %v3967_v13 = vcombine.high %v748_v8, %v780_v9  ;;  %v3973_v61 = vcombine.high %v751_v55, %v783_v56  ;;  %v719_v1 = vld [vmem:[%s4660_s22 + $0x3a0] sm:$0xff] }
  0xc5   : > { %2248 = vmatprep.mubr.bf16.mxu1 %v4181_v0 }
  0xc6   : > { %2229 = vmatpush1.bf16.msra.mxu1 %v3890_v17  ;;  %v716_v17 = vld [vmem:[%s4660_s22 + $0x388] sm:$0xff] }
  0xc7   : > { %2188 = vmatpush1.bf16.msra.mxu0 %v3888_v16  ;;  %2230 = vmatprep.subr.bf16.mxu1 %v3827_v19  ;;  %v684_v16 = vld [vmem:[%s4660_s22 + $0x288] sm:$0xff]  ;;  %v3966_v19 = vcombine.low %v748_v8, %v780_v9  ;;  %v623_v8 = vld [vmem:[%s4660_s22 + $0xa0] sm:$0xff] }
  0xc8   : > { %2189 = vmatprep.subr.bf16.mxu0 %v3825_v18  ;;  %v3964_v18 = vcombine.low %v747_v6, %v779_v7  ;;  %v3903_v21 = vcombine.high %v684_v16, %v716_v17  ;;  %v3909_v6 = vcombine.high %v687_v63, %v719_v1  ;;  %v655_v9 = vld [vmem:[%s4660_s22 + $0x1a0] sm:$0xff] }
  0xca   : > { %2231 = vmatpush1.bf16.msra.mxu1 %v3826_v25  ;;  %v652_v25 = vld [vmem:[%s4660_s22 + $0x188] sm:$0xff] }
  0xcb   : > { %2190 = vmatpush1.bf16.msra.mxu0 %v3824_v24  ;;  %2308 = vmatprep.subr.bf16.mxu1 %v3959_v27  ;;  %v620_v24 = vld [vmem:[%s4660_s22 + $0x88] sm:$0xff]  ;;  %v3902_v27 = vcombine.low %v684_v16, %v716_v17  ;;  %v753_v16 = vld [vmem:[%s4660_s22 + $0x4b0] sm:$0xff] }
  0xcc   : > { %2267 = vmatprep.subr.bf16.mxu0 %v3957_v26  ;;  %v3900_v26 = vcombine.low %v683_v14, %v715_v15  ;;  %v3839_v29 = vcombine.high %v620_v24, %v652_v25  ;;  %v3845_v14 = vcombine.high %v623_v8, %v655_v9  ;;  %v785_v17 = vld [vmem:[%s4660_s22 + $0x5b0] sm:$0xff] }
  0xcd   : > { %4007 = vmatmul.mubr.msk.bf16.vlgmr.msra.gmra.mxu1 %vm1761_vm0, %v4685_v36 }
  0xce   : > { %4006 = vmatmul.mubr.msk.bf16.vlgmr.msra.gmra.mxu0 %vm1761_vm0, %v4685_v36  ;;  %2309 = vmatpush1.bf16.msra.mxu1 %v3958_v33  ;;  %v782_v33 = vld [vmem:[%s4660_s22 + $0x598] sm:$0xff] }
  0xcf   : > { %2268 = vmatpush1.bf16.msra.mxu0 %v3956_v32  ;;  %2310 = vmatprep.subr.bf16.mxu1 %v3895_v35  ;;  %v750_v32 = vld [vmem:[%s4660_s22 + $0x498] sm:$0xff]  ;;  %v3838_v35 = vcombine.low %v620_v24, %v652_v25  ;;  %v689_v24 = vld [vmem:[%s4660_s22 + $0x2b0] sm:$0xff] }
  0xd0   : > { %2269 = vmatprep.subr.bf16.mxu0 %v3893_v34  ;;  %2289 = vmatprep.mubr.bf16.mxu0 %v4181_v0  ;;  %v3836_v34 = vcombine.low %v619_v22, %v651_v23  ;;  %v3971_v38 = vcombine.high %v750_v32, %v782_v33  ;;  %v3977_v22 = vcombine.high %v753_v16, %v785_v17  ;;  %v721_v25 = vld [vmem:[%s4660_s22 + $0x3b0] sm:$0xff] }
  0xd1   : > { %2330 = vmatprep.mubr.bf16.mxu1 %v4181_v0 }
  0xd2   : > { %2311 = vmatpush1.bf16.msra.mxu1 %v3894_v42  ;;  %v718_v42 = vld [vmem:[%s4660_s22 + $0x398] sm:$0xff] }
  0xd3   : > { %2270 = vmatpush1.bf16.msra.mxu0 %v3892_v41  ;;  %2312 = vmatprep.subr.bf16.mxu1 %v3831_v44  ;;  %v686_v41 = vld [vmem:[%s4660_s22 + $0x298] sm:$0xff]  ;;  %v3970_v44 = vcombine.low %v750_v32, %v782_v33  ;;  %v625_v32 = vld [vmem:[%s4660_s22 + $0xb0] sm:$0xff] }
  0xd4   : > { %2271 = vmatprep.subr.bf16.mxu0 %v3829_v43  ;;  %v3968_v43 = vcombine.low %v749_v30, %v781_v31  ;;  %v3907_v46 = vcombine.high %v686_v41, %v718_v42  ;;  %v3913_v30 = vcombine.high %v689_v24, %v721_v25  ;;  %v657_v33 = vld [vmem:[%s4660_s22 + $0x1b0] sm:$0xff] }
  0xd6   : > { %2313 = vmatpush1.bf16.msra.mxu1 %v3830_v50  ;;  %v654_v50 = vld [vmem:[%s4660_s22 + $0x198] sm:$0xff] }
  0xd7   : > { %2272 = vmatpush1.bf16.msra.mxu0 %v3828_v49  ;;  %2390 = vmatprep.subr.bf16.mxu1 %v3963_v52  ;;  %v622_v49 = vld [vmem:[%s4660_s22 + $0x98] sm:$0xff]  ;;  %v3906_v52 = vcombine.low %v686_v41, %v718_v42  ;;  %v755_v41 = vld [vmem:[%s4660_s22 + $0x4c0] sm:$0xff] }
  0xd8   : > { %2349 = vmatprep.subr.bf16.mxu0 %v3961_v51  ;;  %v3904_v51 = vcombine.low %v685_v39, %v717_v40  ;;  %v3843_v54 = vcombine.high %v622_v49, %v654_v50  ;;  %v3849_v39 = vcombine.high %v625_v32, %v657_v33  ;;  %v787_v42 = vld [vmem:[%s4660_s22 + $0x5c0] sm:$0xff] }
  0xd9   : > { %4009 = vmatmul.mubr.msk.bf16.vlgmr.msra.gmra.mxu1 %vm1761_vm0, %v4685_v36 }
  0xda   : > { %4008 = vmatmul.mubr.msk.bf16.vlgmr.msra.gmra.mxu0 %vm1761_vm0, %v4685_v36  ;;  %2391 = vmatpush1.bf16.msra.mxu1 %v3962_v58  ;;  %v784_v58 = vld [vmem:[%s4660_s22 + $0x5a8] sm:$0xff] }
  0xdb   : > { %2350 = vmatpush1.bf16.msra.mxu0 %v3960_v57  ;;  %2392 = vmatprep.subr.bf16.mxu1 %v3899_v60  ;;  %v752_v57 = vld [vmem:[%s4660_s22 + $0x4a8] sm:$0xff]  ;;  %v3842_v60 = vcombine.low %v622_v49, %v654_v50  ;;  %v691_v49 = vld [vmem:[%s4660_s22 + $0x2c0] sm:$0xff] }
  0xdc   : > { %2351 = vmatprep.subr.bf16.mxu0 %v3897_v59  ;;  %2371 = vmatprep.mubr.bf16.mxu0 %v4181_v0  ;;  %v3840_v59 = vcombine.low %v621_v47, %v653_v48  ;;  %v3975_v62 = vcombine.high %v752_v57, %v784_v58  ;;  %v3981_v47 = vcombine.high %v755_v41, %v787_v42  ;;  %v723_v50 = vld [vmem:[%s4660_s22 + $0x3c0] sm:$0xff] }
  0xdd   : > { %2412 = vmatprep.mubr.bf16.mxu1 %v4181_v0 }
  0xde   : > { %2393 = vmatpush1.bf16.msra.mxu1 %v3898_v3  ;;  %v720_v3 = vld [vmem:[%s4660_s22 + $0x3a8] sm:$0xff] }
  0xdf   : > { %2352 = vmatpush1.bf16.msra.mxu0 %v3896_v2  ;;  %2394 = vmatprep.subr.bf16.mxu1 %v3835_v5  ;;  %v688_v2 = vld [vmem:[%s4660_s22 + $0x2a8] sm:$0xff]  ;;  %v3974_v5 = vcombine.low %v752_v57, %v784_v58  ;;  %v627_v57 = vld [vmem:[%s4660_s22 + $0xc0] sm:$0xff] }
  0xe0   : > { %2353 = vmatprep.subr.bf16.mxu0 %v3833_v4  ;;  %v3972_v4 = vcombine.low %v751_v55, %v783_v56  ;;  %v3911_v7 = vcombine.high %v688_v2, %v720_v3  ;;  %v3917_v55 = vcombine.high %v691_v49, %v723_v50  ;;  %v659_v58 = vld [vmem:[%s4660_s22 + $0x1c0] sm:$0xff] }
  0xe2   : > { %2395 = vmatpush1.bf16.msra.mxu1 %v3834_v11  ;;  %v656_v11 = vld [vmem:[%s4660_s22 + $0x1a8] sm:$0xff] }
  0xe3   : > { %2354 = vmatpush1.bf16.msra.mxu0 %v3832_v10  ;;  %2472 = vmatprep.subr.bf16.mxu1 %v3967_v13  ;;  %v624_v10 = vld [vmem:[%s4660_s22 + $0xa8] sm:$0xff]  ;;  %v3910_v13 = vcombine.low %v688_v2, %v720_v3  ;;  %v757_v2 = vld [vmem:[%s4660_s22 + $0x4d0] sm:$0xff] }
  0xe4   : > { %2431 = vmatprep.subr.bf16.mxu0 %v3965_v12  ;;  %v3908_v12 = vcombine.low %v687_v63, %v719_v1  ;;  %v3847_v15 = vcombine.high %v624_v10, %v656_v11  ;;  %v3853_v63 = vcombine.high %v627_v57, %v659_v58  ;;  %v789_v3 = vld [vmem:[%s4660_s22 + $0x5d0] sm:$0xff] }
  0xe5   : > { %4011 = vmatmul.mubr.msk.bf16.vlgmr.msra.gmra.mxu1 %vm1761_vm0, %v4685_v36 }
  0xe6   : > { %4010 = vmatmul.mubr.msk.bf16.vlgmr.msra.gmra.mxu0 %vm1761_vm0, %v4685_v36  ;;  %2473 = vmatpush1.bf16.msra.mxu1 %v3966_v19  ;;  %v786_v19 = vld [vmem:[%s4660_s22 + $0x5b8] sm:$0xff] }
  0xe7   : > { %2432 = vmatpush1.bf16.msra.mxu0 %v3964_v18  ;;  %2474 = vmatprep.subr.bf16.mxu1 %v3903_v21  ;;  %v754_v18 = vld [vmem:[%s4660_s22 + $0x4b8] sm:$0xff]  ;;  %v3846_v21 = vcombine.low %v624_v10, %v656_v11  ;;  %v693_v10 = vld [vmem:[%s4660_s22 + $0x2d0] sm:$0xff] }
  0xe8   : > { %2433 = vmatprep.subr.bf16.mxu0 %v3901_v20  ;;  %2453 = vmatprep.mubr.bf16.mxu0 %v4181_v0  ;;  %v3844_v20 = vcombine.low %v623_v8, %v655_v9  ;;  %v3979_v23 = vcombine.high %v754_v18, %v786_v19  ;;  %v3985_v8 = vcombine.high %v757_v2, %v789_v3  ;;  %v725_v11 = vld [vmem:[%s4660_s22 + $0x3d0] sm:$0xff] }
  0xe9   : > { %2494 = vmatprep.mubr.bf16.mxu1 %v4181_v0 }
  0xea   : > { %2475 = vmatpush1.bf16.msra.mxu1 %v3902_v27  ;;  %v722_v27 = vld [vmem:[%s4660_s22 + $0x3b8] sm:$0xff] }
  0xeb   : > { %2434 = vmatpush1.bf16.msra.mxu0 %v3900_v26  ;;  %2476 = vmatprep.subr.bf16.mxu1 %v3839_v29  ;;  %v690_v26 = vld [vmem:[%s4660_s22 + $0x2b8] sm:$0xff]  ;;  %v3978_v29 = vcombine.low %v754_v18, %v786_v19  ;;  %v629_v18 = vld [vmem:[%s4660_s22 + $0xd0] sm:$0xff] }
  0xec   : > { %2435 = vmatprep.subr.bf16.mxu0 %v3837_v28  ;;  %v3976_v28 = vcombine.low %v753_v16, %v785_v17  ;;  %v3915_v31 = vcombine.high %v690_v26, %v722_v27  ;;  %v3921_v16 = vcombine.high %v693_v10, %v725_v11  ;;  %v661_v19 = vld [vmem:[%s4660_s22 + $0x1d0] sm:$0xff] }
  0xee   : > { %2477 = vmatpush1.bf16.msra.mxu1 %v3838_v35  ;;  %v658_v35 = vld [vmem:[%s4660_s22 + $0x1b8] sm:$0xff] }
  0xef   : > { %2436 = vmatpush1.bf16.msra.mxu0 %v3836_v34  ;;  %2554 = vmatprep.subr.bf16.mxu1 %v3971_v38  ;;  %v626_v34 = vld [vmem:[%s4660_s22 + $0xb8] sm:$0xff]  ;;  %v3914_v38 = vcombine.low %v690_v26, %v722_v27  ;;  %v759_v26 = vld [vmem:[%s4660_s22 + $0x4e0] sm:$0xff] }
  0xf0   : > { %2513 = vmatprep.subr.bf16.mxu0 %v3969_v37  ;;  %v3912_v37 = vcombine.low %v689_v24, %v721_v25  ;;  %v3851_v40 = vcombine.high %v626_v34, %v658_v35  ;;  %v3857_v24 = vcombine.high %v629_v18, %v661_v19  ;;  %v791_v27 = vld [vmem:[%s4660_s22 + $0x5e0] sm:$0xff] }
  0xf1   : > { %4013 = vmatmul.mubr.msk.bf16.vlgmr.msra.gmra.mxu1 %vm1761_vm0, %v4685_v36 }
  0xf2   : > { %4012 = vmatmul.mubr.msk.bf16.vlgmr.msra.gmra.mxu0 %vm1761_vm0, %v4685_v36  ;;  %2555 = vmatpush1.bf16.msra.mxu1 %v3970_v44  ;;  %v788_v44 = vld [vmem:[%s4660_s22 + $0x5c8] sm:$0xff] }
  0xf3   : > { %2514 = vmatpush1.bf16.msra.mxu0 %v3968_v43  ;;  %2556 = vmatprep.subr.bf16.mxu1 %v3907_v46  ;;  %v756_v43 = vld [vmem:[%s4660_s22 + $0x4c8] sm:$0xff]  ;;  %v3850_v46 = vcombine.low %v626_v34, %v658_v35  ;;  %v727_v34 = vld [vmem:[%s4660_s22 + $0x3e0] sm:$0xff] }
  0xf4   : > { %2515 = vmatprep.subr.bf16.mxu0 %v3905_v45  ;;  %2535 = vmatprep.mubr.bf16.mxu0 %v4181_v0  ;;  %v3848_v45 = vcombine.low %v625_v32, %v657_v33  ;;  %v3983_v48 = vcombine.high %v756_v43, %v788_v44  ;;  %v695_v33 = vld [vmem:[%s4660_s22 + $0x2e0] sm:$0xff]  ;;  %v696_v35 = vld [vmem:[%s4660_s22 + $0x2e8] sm:$0xff] }
  0xf5   : > { %2576 = vmatprep.mubr.bf16.mxu1 %v4181_v0 }
  0xf6   : > { %2557 = vmatpush1.bf16.msra.mxu1 %v3906_v52  ;;  %v724_v52 = vld [vmem:[%s4660_s22 + $0x3c8] sm:$0xff] }
  0xf7   : > { %2516 = vmatpush1.bf16.msra.mxu0 %v3904_v51  ;;  %2558 = vmatprep.subr.bf16.mxu1 %v3843_v54  ;;  %v692_v51 = vld [vmem:[%s4660_s22 + $0x2c8] sm:$0xff]  ;;  %v3982_v54 = vcombine.low %v756_v43, %v788_v44  ;;  %v663_v43 = vld [vmem:[%s4660_s22 + $0x1e0] sm:$0xff] }
  0xf8   : > { %2517 = vmatprep.subr.bf16.mxu0 %v3841_v53  ;;  %v3980_v53 = vcombine.low %v755_v41, %v787_v42  ;;  %v3919_v56 = vcombine.high %v692_v51, %v724_v52  ;;  %v631_v42 = vld [vmem:[%s4660_s22 + $0xe0] sm:$0xff] }
  0xf9   : > { %v4926_v44 = vld [vmem:[%s5104_s1] sm:$0x3] }
  0xfa   : > { %2559 = vmatpush1.bf16.msra.mxu1 %v3842_v60  ;;  %v660_v60 = vld [vmem:[%s4660_s22 + $0x1c8] sm:$0xff] }
  0xfb   : > { %2518 = vmatpush1.bf16.msra.mxu0 %v3840_v59  ;;  %2636 = vmatprep.subr.bf16.mxu1 %v3975_v62  ;;  %v628_v59 = vld [vmem:[%s4660_s22 + $0xc8] sm:$0xff]  ;;  %v3918_v62 = vcombine.low %v692_v51, %v724_v52  ;;  %v761_v51 = vld [vmem:[%s4660_s22 + $0x4f0] sm:$0xff] }
  0xfc   : > { %2595 = vmatprep.subr.bf16.mxu0 %v3973_v61  ;;  %v3916_v61 = vcombine.low %v691_v49, %v723_v50  ;;  %v3855_v1 = vcombine.high %v628_v59, %v660_v60  ;;  %v3861_v49 = vcombine.high %v631_v42, %v663_v43  ;;  %v793_v52 = vld [vmem:[%s4660_s22 + $0x5f0] sm:$0xff] }
  0xfd   : > { %4015 = vmatmul.mubr.msk.bf16.vlgmr.msra.gmra.mxu1 %vm1761_vm0, %v4685_v36 }
  0xfe   : > { %4014 = vmatmul.mubr.msk.bf16.vlgmr.msra.gmra.mxu0 %vm1761_vm0, %v4685_v36  ;;  %2637 = vmatpush1.bf16.msra.mxu1 %v3974_v5  ;;  %v790_v5 = vld [vmem:[%s4660_s22 + $0x5d8] sm:$0xff] }
  0xff   : > { %2596 = vmatpush1.bf16.msra.mxu0 %v3972_v4  ;;  %2638 = vmatprep.subr.bf16.mxu1 %v3911_v7  ;;  %v758_v4 = vld [vmem:[%s4660_s22 + $0x4d8] sm:$0xff]  ;;  %v3854_v7 = vcombine.low %v628_v59, %v660_v60  ;;  %v697_v59 = vld [vmem:[%s4660_s22 + $0x2f0] sm:$0xff] }
 0x100   : > { %2597 = vmatprep.subr.bf16.mxu0 %v3909_v6  ;;  %2617 = vmatprep.mubr.bf16.mxu0 %v4181_v0  ;;  %v3852_v6 = vcombine.low %v627_v57, %v659_v58  ;;  %v3987_v9 = vcombine.high %v758_v4, %v790_v5  ;;  %v3993_v57 = vcombine.high %v761_v51, %v793_v52  ;;  %v729_v60 = vld [vmem:[%s4660_s22 + $0x3f0] sm:$0xff] }
 0x101   : > { %2658 = vmatprep.mubr.bf16.mxu1 %v4181_v0 }
 0x102   : > { %2639 = vmatpush1.bf16.msra.mxu1 %v3910_v13  ;;  %v726_v13 = vld [vmem:[%s4660_s22 + $0x3d8] sm:$0xff] }
 0x103   : > { %2598 = vmatpush1.bf16.msra.mxu0 %v3908_v12  ;;  %2640 = vmatprep.subr.bf16.mxu1 %v3847_v15  ;;  %v694_v12 = vld [vmem:[%s4660_s22 + $0x2d8] sm:$0xff]  ;;  %v3986_v15 = vcombine.low %v758_v4, %v790_v5  ;;  %v633_v4 = vld [vmem:[%s4660_s22 + $0xf0] sm:$0xff] }
 0x104   : > { %2599 = vmatprep.subr.bf16.mxu0 %v3845_v14  ;;  %v3984_v14 = vcombine.low %v757_v2, %v789_v3  ;;  %v3923_v17 = vcombine.high %v694_v12, %v726_v13  ;;  %v3929_v2 = vcombine.high %v697_v59, %v729_v60  ;;  %v665_v5 = vld [vmem:[%s4660_s22 + $0x1f0] sm:$0xff] }
 0x106   : > { %2641 = vmatpush1.bf16.msra.mxu1 %v3846_v21  ;;  %v662_v21 = vld [vmem:[%s4660_s22 + $0x1d8] sm:$0xff] }
 0x107   : > { %2600 = vmatpush1.bf16.msra.mxu0 %v3844_v20  ;;  %2718 = vmatprep.subr.bf16.mxu1 %v3979_v23  ;;  %v630_v20 = vld [vmem:[%s4660_s22 + $0xd8] sm:$0xff]  ;;  %v3922_v23 = vcombine.low %v694_v12, %v726_v13  ;;  %v3864_v12 = vcombine.low %v633_v4, %v665_v5 }
 0x108   : > { %2677 = vmatprep.subr.bf16.mxu0 %v3977_v22  ;;  %v3920_v22 = vcombine.low %v693_v10, %v725_v11  ;;  %v3859_v25 = vcombine.high %v630_v20, %v662_v21  ;;  %v3865_v10 = vcombine.high %v633_v4, %v665_v5 }
 0x109   : > { %4017 = vmatmul.mubr.msk.bf16.vlgmr.msra.gmra.mxu1 %vm1761_vm0, %v4685_v36 }
 0x10a   : > { %4016 = vmatmul.mubr.msk.bf16.vlgmr.msra.gmra.mxu0 %vm1761_vm0, %v4685_v36  ;;  %2719 = vmatpush1.bf16.msra.mxu1 %v3978_v29  ;;  %v3856_v29 = vcombine.low %v629_v18, %v661_v19 }
 0x10b   : > { %2678 = vmatpush1.bf16.msra.mxu0 %v3976_v28  ;;  %2720 = vmatprep.subr.bf16.mxu1 %v3915_v31  ;;  %v760_v28 = vld [vmem:[%s4660_s22 + $0x4e8] sm:$0xff]  ;;  %v3989_v31 = vcombine.high %v759_v26, %v791_v27 }
 0x10c   : > { %2679 = vmatprep.subr.bf16.mxu0 %v3913_v30  ;;  %2699 = vmatprep.mubr.bf16.mxu0 %v4181_v0  ;;  %v3858_v30 = vcombine.low %v630_v20, %v662_v21 }
 0x10d   : > { %2740 = vmatprep.mubr.bf16.mxu1 %v4181_v0 }
 0x10e   : > { %2721 = vmatpush1.bf16.msra.mxu1 %v3914_v38  ;;  %v3988_v38 = vcombine.low %v759_v26, %v791_v27 }
 0x10f   : > { %2680 = vmatpush1.bf16.msra.mxu0 %v3912_v37  ;;  %2722 = vmatprep.subr.bf16.mxu1 %v3851_v40  ;;  %v728_v37 = vld [vmem:[%s4660_s22 + $0x3e8] sm:$0xff]  ;;  %v3925_v40 = vcombine.high %v695_v33, %v727_v34 }
 0x110   : > { %2681 = vmatprep.subr.bf16.mxu0 %v3849_v39  ;;  %v3927_v41 = vcombine.high %v696_v35, %v728_v37 }
 0x112   : > { %2723 = vmatpush1.bf16.msra.mxu1 %v3850_v46  ;;  %v664_v46 = vld [vmem:[%s4660_s22 + $0x1e8] sm:$0xff] }
 0x113   : > { %2682 = vmatpush1.bf16.msra.mxu0 %v3848_v45  ;;  %2800 = vmatprep.subr.bf16.mxu1 %v3983_v48  ;;  %v632_v45 = vld [vmem:[%s4660_s22 + $0xe8] sm:$0xff]  ;;  %v3926_v48 = vcombine.low %v696_v35, %v728_v37 }
 0x114   : > { %2759 = vmatprep.subr.bf16.mxu0 %v3981_v47  ;;  %v3924_v47 = vcombine.low %v695_v33, %v727_v34  ;;  %v3863_v50 = vcombine.high %v632_v45, %v664_v46 }
 0x115   : > { %4019 = vmatmul.mubr.msk.bf16.vlgmr.msra.gmra.mxu1 %vm1761_vm0, %v4685_v36 }
 0x116   : > { %4018 = vmatmul.mubr.msk.bf16.vlgmr.msra.gmra.mxu0 %vm1761_vm0, %v4685_v36  ;;  %2801 = vmatpush1.bf16.msra.mxu1 %v3982_v54  ;;  %v794_v54 = vld [vmem:[%s4660_s22 + $0x5f8] sm:$0xff] }
 0x117   : > { %2760 = vmatpush1.bf16.msra.mxu0 %v3980_v53  ;;  %2802 = vmatprep.subr.bf16.mxu1 %v3919_v56  ;;  %v762_v53 = vld [vmem:[%s4660_s22 + $0x4f8] sm:$0xff]  ;;  %v3862_v56 = vcombine.low %v632_v45, %v664_v46 }
 0x118   : > { %2761 = vmatprep.subr.bf16.mxu0 %v3917_v55  ;;  %2781 = vmatprep.mubr.bf16.mxu0 %v4181_v0  ;;  %v3860_v55 = vcombine.low %v631_v42, %v663_v43  ;;  %v3995_v58 = vcombine.high %v762_v53, %v794_v54 }
 0x119   : > { %2822 = vmatprep.mubr.bf16.mxu1 %v4181_v0 }
 0x11a   : > { %2803 = vmatpush1.bf16.msra.mxu1 %v3918_v62  ;;  %v730_v62 = vld [vmem:[%s4660_s22 + $0x3f8] sm:$0xff] }
 0x11b   : > { %2762 = vmatpush1.bf16.msra.mxu0 %v3916_v61  ;;  %2804 = vmatprep.subr.bf16.mxu1 %v3855_v1  ;;  %v698_v61 = vld [vmem:[%s4660_s22 + $0x2f8] sm:$0xff]  ;;  %v3994_v1 = vcombine.low %v762_v53, %v794_v54 }
 0x11c   : > { %2763 = vmatprep.subr.bf16.mxu0 %v3853_v63  ;;  %v3992_v63 = vcombine.low %v761_v51, %v793_v52  ;;  %v3931_v3 = vcombine.high %v698_v61, %v730_v62 }
 0x11e   : > { %2805 = vmatpush1.bf16.msra.mxu1 %v3854_v7  ;;  %v666_v7 = vld [vmem:[%s4660_s22 + $0x1f8] sm:$0xff] }
 0x11f   : > { %2764 = vmatpush1.bf16.msra.mxu0 %v3852_v6  ;;  %2882 = vmatprep.subr.bf16.mxu1 %v3987_v9  ;;  %v634_v6 = vld [vmem:[%s4660_s22 + $0xf8] sm:$0xff]  ;;  %v3930_v9 = vcombine.low %v698_v61, %v730_v62 }
 0x120   : > { %2841 = vmatprep.subr.bf16.mxu0 %v3985_v8  ;;  %v3928_v8 = vcombine.low %v697_v59, %v729_v60  ;;  %v3867_v11 = vcombine.high %v634_v6, %v666_v7  ;;  %v3866_v13 = vcombine.low %v634_v6, %v666_v7 }
 0x121   : > { %4021 = vmatmul.mubr.msk.bf16.vlgmr.msra.gmra.mxu1 %vm1761_vm0, %v4685_v36 }
 0x122   : > { %4020 = vmatmul.mubr.msk.bf16.vlgmr.msra.gmra.mxu0 %vm1761_vm0, %v4685_v36  ;;  %2883 = vmatpush1.bf16.msra.mxu1 %v3986_v15  ;;  %v792_v36 = vld [vmem:[%s4660_s22 + $0x5e8] sm:$0xff] }
 0x123   : > { %2842 = vmatpush1.bf16.msra.mxu0 %v3984_v14  ;;  %2884 = vmatprep.subr.bf16.mxu1 %v3923_v17  ;;  %v3991_v32 = vcombine.high %v760_v28, %v792_v36  ;;  %v3990_v39 = vcombine.low %v760_v28, %v792_v36  ;;  %v4960_v14 = vpop.permute.xlu0 %798 }
 0x124   : > { %2843 = vmatprep.subr.bf16.mxu0 %v3921_v16  ;;  %2863 = vmatprep.mubr.bf16.mxu0 %v4181_v0  ;;  %v3402_v16 = vlaneseq }
 0x125   : > { %2904 = vmatprep.mubr.bf16.mxu1 %v4181_v0 }
 0x126   : > { %2885 = vmatpush1.bf16.msra.mxu1 %v3922_v23  ;;  %v3403_v23 = vshrl.u32 %v3402_v16, 7 }
 0x127   : > { %2844 = vmatpush1.bf16.msra.mxu0 %v3920_v22  ;;  %2886 = vmatprep.subr.bf16.mxu1 %v3859_v25 }
 0x128   : > { %2845 = vmatprep.subr.bf16.mxu0 %v3857_v24 }
 0x12a   : > { %2887 = vmatpush1.bf16.msra.mxu1 %v3858_v30 }
 0x12b   : > { %2846 = vmatpush1.bf16.msra.mxu0 %v3856_v29  ;;  %2964 = vmatprep.subr.bf16.mxu1 %v3991_v32 }
 0x12c   : > { %2923 = vmatprep.subr.bf16.mxu0 %v3989_v31 }
 0x12d   : > { %4023 = vmatmul.mubr.msk.bf16.vlgmr.msra.gmra.mxu1 %vm1761_vm0, %v4926_v44 }
 0x12e   : > { %4022 = vmatmul.mubr.msk.bf16.vlgmr.msra.gmra.mxu0 %vm1761_vm0, %v4926_v44  ;;  %2965 = vmatpush1.bf16.msra.mxu1 %v3990_v39 }
 0x12f   : > { %2924 = vmatpush1.bf16.msra.mxu0 %v3988_v38  ;;  %2966 = vmatprep.subr.bf16.mxu1 %v3927_v41 }
 0x130   : > { %2925 = vmatprep.subr.bf16.mxu0 %v3925_v40  ;;  %2945 = vmatprep.mubr.bf16.mxu0 %v4181_v0 }
 0x131   : > { %2986 = vmatprep.mubr.bf16.mxu1 %v4181_v0 }
 0x132   : > { %2967 = vmatpush1.bf16.msra.mxu1 %v3926_v48 }
 0x133   : > { %2926 = vmatpush1.bf16.msra.mxu0 %v3924_v47  ;;  %2968 = vmatprep.subr.bf16.mxu1 %v3863_v50 }
 0x134   : > { %2927 = vmatprep.subr.bf16.mxu0 %v3861_v49 }
 0x136   : > { %2969 = vmatpush1.bf16.msra.mxu1 %v3862_v56 }
 0x137   : > { %2928 = vmatpush1.bf16.msra.mxu0 %v3860_v55  ;;  %3046 = vmatprep.subr.bf16.mxu1 %v3995_v58 }
 0x138   : > { %3005 = vmatprep.subr.bf16.mxu0 %v3993_v57 }
 0x139   : > { %4025 = vmatmul.mubr.msk.bf16.vlgmr.msra.gmra.mxu1 %vm1761_vm0, %v4926_v44 }
 0x13a   : > { %4024 = vmatmul.mubr.msk.bf16.vlgmr.msra.gmra.mxu0 %vm1761_vm0, %v4926_v44  ;;  %3047 = vmatpush1.bf16.msra.mxu1 %v3994_v1 }
 0x13b   : > { %3006 = vmatpush1.bf16.msra.mxu0 %v3992_v63  ;;  %3048 = vmatprep.subr.bf16.mxu1 %v3931_v3 }
 0x13c   : > { %3007 = vmatprep.subr.bf16.mxu0 %v3929_v2  ;;  %3027 = vmatprep.mubr.bf16.mxu0 %v4181_v0 }
 0x13d   : > { %3068 = vmatprep.mubr.bf16.mxu1 %v4181_v0  ;;  %v4182_v0 = vmov 1983009808  }
 0x13e   : > { %3049 = vmatpush1.bf16.msra.mxu1 %v3930_v9  ;;  %v3400_v15 = vunpack.c.l.s4 %v4182_v0 }
 0x13f   : > { %3008 = vmatpush1.bf16.msra.mxu0 %v3928_v8  ;;  %3050 = vmatprep.subr.bf16.mxu1 %v3867_v11 }
 0x140   : > { %3009 = vmatprep.subr.bf16.mxu0 %v3865_v10  ;;  %v3401_v22 = vunpack.c.0.s8 %v3400_v15 }
 0x142   : > { %3051 = vmatpush1.bf16.msra.mxu1 %v3866_v13  ;;  %v4967_v31 = vsub.s32 %v3401_v22, %v3403_v23 }
 0x143   : > { %3010 = vmatpush1.bf16.msra.mxu0 %v3864_v12 }
 0x145   : > { %4027 = vmatmul.mubr.msk.bf16.vlgmr.msra.gmra.mxu1 %vm1761_vm0, %v4926_v44 }
 0x146   : > { %4026 = vmatmul.mubr.msk.bf16.vlgmr.msra.gmra.mxu0 %vm1761_vm0, %v4926_v44 }
 0x151   : > { %v1840_v19 = vpop.f32.mrf.mxu1 }
 0x152   : > { %v1799_v17 = vpop.f32.mrf.mxu0  ;;  %v1841_v20 = vadd.f32 %v1840_v19, %v4960_v14 }
 0x153   : > { %v1800_v18 = vadd.f32 %v1799_v17, %v4960_v14  ;;  %v1842_v26 = vpop.f32.mrf.mxu1 }
 0x154   : > { %v1801_v21 = vpop.f32.mrf.mxu0  ;;  %v3143_v27 = vmul.f32 0.2, %v1841_v20  ;;  %v1843_v28 = vadd.f32 %v1842_v26, %v4960_v14  ;;  %vm3079_vm2 = vcmp.gt.f32.partialorder %v1841_v20, 0.0 }
 0x155   : > { %v3141_v24 = vmul.f32 0.2, %v1800_v18  ;;  %v1802_v25 = vadd.f32 %v1801_v21, %v4960_v14  ;;  %vm3077_vm1 = vcmp.gt.f32.partialorder %v1800_v18, 0.0  ;;  %v1844_v30 = vpop.f32.mrf.mxu1 }
 0x156   : > { %v1803_v36 = vpop.f32.mrf.mxu0  ;;  %vm3080_vm4 = vcmp.gt.f32.partialorder %v1843_v28, 0.0  ;;  %v3144_v32 = vmul.f32 0.2, %v1843_v28  ;;  %v3207_v38 = vsel %vm3079_vm2, %v1841_v20, %v3143_v27 }
 0x157   : > { %vm3078_vm3 = vcmp.gt.f32.partialorder %v1802_v25, 0.0  ;;  %v3142_v29 = vmul.f32 0.2, %v1802_v25  ;;  %v3205_v34 = vsel %vm3077_vm1, %v1800_v18, %v3141_v24  ;;  %v1845_v37 = vpop.f32.mrf.mxu1 }
 0x158   : > { %v1804_v33 = vpop.f32.mrf.mxu0  ;;  %v3208_v40 = vsel %vm3080_vm4, %v1843_v28, %v3144_v32 }
 0x159   : > { %v3206_v35 = vsel %vm3078_vm3, %v1802_v25, %v3142_v29  ;;  %v4029_v41 = vpack.c.bf16 %v3208_v40, %v3207_v38 }
 0x15a   : > { %v4028_v39 = vpack.c.bf16 %v3206_v35, %v3205_v34 }
 0x15b   : > { %v3412_v43 = vrot.slane %v4029_v41, %v4967_v31 }
 0x15c   : > { %v3405_v42 = vrot.slane %v4028_v39, %v4967_v31 }
 0x15d   : > { %v1922_v47 = vpop.f32.mrf.mxu1 }
 0x15e   : > { %v1881_v44 = vpop.f32.mrf.mxu0  ;;  %v3413_v45 = vcombine.low %v3405_v42, %v3412_v43  ;;  %v1923_v48 = vadd.f32 %v1922_v47, %v4960_v14 }
 0x15f   : > { %v1882_v46 = vadd.f32 %v1881_v44, %v4960_v14  ;;  %v1924_v52 = vpop.f32.mrf.mxu1 }
 0x160   : > { %v1883_v49 = vpop.f32.mrf.mxu0  ;;  %3685 = vst [vmem:[%s4974_s4] sm:$0xff] %v3413_v45  ;;  %v3147_v53 = vmul.f32 0.2, %v1923_v48  ;;  %v1925_v54 = vadd.f32 %v1924_v52, %v4960_v14  ;;  %vm3083_vm6 = vcmp.gt.f32.partialorder %v1923_v48, 0.0 }
 0x161   : > { %v3145_v50 = vmul.f32 0.2, %v1882_v46  ;;  %v1884_v51 = vadd.f32 %v1883_v49, %v4960_v14  ;;  %vm3081_vm5 = vcmp.gt.f32.partialorder %v1882_v46, 0.0  ;;  %v1926_v57 = vpop.f32.mrf.mxu1 }
 0x162   : > { %v1885_v55 = vpop.f32.mrf.mxu0  ;;  %vm3084_vm8 = vcmp.gt.f32.partialorder %v1925_v54, 0.0  ;;  %v3148_v58 = vmul.f32 0.2, %v1925_v54  ;;  %v3211_v63 = vsel %vm3083_vm6, %v1923_v48, %v3147_v53 }
 0x163   : > { %vm3082_vm7 = vcmp.gt.f32.partialorder %v1884_v51, 0.0  ;;  %v3146_v56 = vmul.f32 0.2, %v1884_v51  ;;  %v3209_v60 = vsel %vm3081_vm5, %v1882_v46, %v3145_v50  ;;  %v1927_v62 = vpop.f32.mrf.mxu1 }
 0x164   : > { %v1886_v59 = vpop.f32.mrf.mxu0  ;;  %v3212_v2 = vsel %vm3084_vm8, %v1925_v54, %v3148_v58 }
 0x165   : > { %v3210_v61 = vsel %vm3082_vm7, %v1884_v51, %v3146_v56  ;;  %v4031_v3 = vpack.c.bf16 %v3212_v2, %v3211_v63 }
 0x166   : > { %v4030_v1 = vpack.c.bf16 %v3210_v61, %v3209_v60 }
 0x167   : > { %v3429_v5 = vrot.slane %v4031_v3, %v4967_v31 }
 0x168   : > { %v3422_v4 = vrot.slane %v4030_v1, %v4967_v31 }
 0x169   : > { %v2004_v9 = vpop.f32.mrf.mxu1 }
 0x16a   : > { %v1963_v6 = vpop.f32.mrf.mxu0  ;;  %v3430_v7 = vcombine.low %v3422_v4, %v3429_v5  ;;  %v2005_v10 = vadd.f32 %v2004_v9, %v4960_v14 }
 0x16b   : > { %v1964_v8 = vadd.f32 %v1963_v6, %v4960_v14  ;;  %v2006_v0 = vpop.f32.mrf.mxu1 }
 0x16c   : > { %v1965_v11 = vpop.f32.mrf.mxu0  ;;  %3686 = vst [vmem:[%s4974_s4 + $0x8] sm:$0xff] %v3430_v7  ;;  %v3151_v15 = vmul.f32 0.2, %v2005_v10  ;;  %v2007_v16 = vadd.f32 %v2006_v0, %v4960_v14  ;;  %vm3087_vm10 = vcmp.gt.f32.partialorder %v2005_v10, 0.0 }
 0x16d   : > { %v3149_v12 = vmul.f32 0.2, %v1964_v8  ;;  %v1966_v13 = vadd.f32 %v1965_v11, %v4960_v14  ;;  %vm3085_vm9 = vcmp.gt.f32.partialorder %v1964_v8, 0.0  ;;  %v2008_v19 = vpop.f32.mrf.mxu1 }
 0x16e   : > { %v1967_v17 = vpop.f32.mrf.mxu0  ;;  %vm3088_vm12 = vcmp.gt.f32.partialorder %v2007_v16, 0.0  ;;  %v3152_v20 = vmul.f32 0.2, %v2007_v16  ;;  %v3215_v25 = vsel %vm3087_vm10, %v2005_v10, %v3151_v15 }
 0x16f   : > { %vm3086_vm11 = vcmp.gt.f32.partialorder %v1966_v13, 0.0  ;;  %v3150_v18 = vmul.f32 0.2, %v1966_v13  ;;  %v3213_v22 = vsel %vm3085_vm9, %v1964_v8, %v3149_v12  ;;  %v2009_v24 = vpop.f32.mrf.mxu1 }
 0x170   : > { %v1968_v21 = vpop.f32.mrf.mxu0  ;;  %v3216_v27 = vsel %vm3088_vm12, %v2007_v16, %v3152_v20 }
 0x171   : > { %v3214_v23 = vsel %vm3086_vm11, %v1966_v13, %v3150_v18  ;;  %v4033_v28 = vpack.c.bf16 %v3216_v27, %v3215_v25 }
 0x172   : > { %v4032_v26 = vpack.c.bf16 %v3214_v23, %v3213_v22 }
 0x173   : > { %v3446_v29 = vrot.slane %v4033_v28, %v4967_v31 }
 0x174   : > { %v3439_v36 = vrot.slane %v4032_v26, %v4967_v31 }
 0x175   : > { %v2086_v34 = vpop.f32.mrf.mxu1 }
 0x176   : > { %v2045_v30 = vpop.f32.mrf.mxu0  ;;  %v3447_v32 = vcombine.low %v3439_v36, %v3446_v29  ;;  %v2087_v35 = vadd.f32 %v2086_v34, %v4960_v14 }
 0x177   : > { %v2046_v33 = vadd.f32 %v2045_v30, %v4960_v14  ;;  %v2088_v40 = vpop.f32.mrf.mxu1 }
 0x178   : > { %v2047_v37 = vpop.f32.mrf.mxu0  ;;  %3687 = vst [vmem:[%s4974_s4 + $0x10] sm:$0xff] %v3447_v32  ;;  %v3155_v41 = vmul.f32 0.2, %v2087_v35  ;;  %v2089_v42 = vadd.f32 %v2088_v40, %v4960_v14  ;;  %vm3091_vm14 = vcmp.gt.f32.partialorder %v2087_v35, 0.0 }
 0x179   : > { %v3153_v38 = vmul.f32 0.2, %v2046_v33  ;;  %v2048_v39 = vadd.f32 %v2047_v37, %v4960_v14  ;;  %vm3089_vm13 = vcmp.gt.f32.partialorder %v2046_v33, 0.0  ;;  %v2090_v45 = vpop.f32.mrf.mxu1 }
 0x17a   : > { %v2049_v43 = vpop.f32.mrf.mxu0  ;;  %vm3092_vm0 = vcmp.gt.f32.partialorder %v2089_v42, 0.0  ;;  %v3156_v46 = vmul.f32 0.2, %v2089_v42  ;;  %v3219_v51 = vsel %vm3091_vm14, %v2087_v35, %v3155_v41 }
 0x17b   : > { %vm3090_vm15 = vcmp.gt.f32.partialorder %v2048_v39, 0.0  ;;  %v3154_v44 = vmul.f32 0.2, %v2048_v39  ;;  %v3217_v48 = vsel %vm3089_vm13, %v2046_v33, %v3153_v38  ;;  %v2091_v50 = vpop.f32.mrf.mxu1 }
 0x17c   : > { %v2050_v47 = vpop.f32.mrf.mxu0  ;;  %v3220_v53 = vsel %vm3092_vm0, %v2089_v42, %v3156_v46 }
 0x17d   : > { %v3218_v49 = vsel %vm3090_vm15, %v2048_v39, %v3154_v44  ;;  %v4035_v54 = vpack.c.bf16 %v3220_v53, %v3219_v51 }
 0x17e   : > { %v4034_v52 = vpack.c.bf16 %v3218_v49, %v3217_v48 }
 0x17f   : > { %v3463_v56 = vrot.slane %v4035_v54, %v4967_v31 }
 0x180   : > { %v3456_v55 = vrot.slane %v4034_v52, %v4967_v31 }
 0x181   : > { %v2168_v60 = vpop.f32.mrf.mxu1 }
 0x182   : > { %v2127_v57 = vpop.f32.mrf.mxu0  ;;  %v3464_v58 = vcombine.low %v3456_v55, %v3463_v56  ;;  %v2169_v61 = vadd.f32 %v2168_v60, %v4960_v14 }
 0x183   : > { %v2128_v59 = vadd.f32 %v2127_v57, %v4960_v14  ;;  %v2170_v2 = vpop.f32.mrf.mxu1 }
 0x184   : > { %v2129_v62 = vpop.f32.mrf.mxu0  ;;  %3688 = vst [vmem:[%s4974_s4 + $0x18] sm:$0xff] %v3464_v58  ;;  %v3159_v3 = vmul.f32 0.2, %v2169_v61  ;;  %v2171_v4 = vadd.f32 %v2170_v2, %v4960_v14  ;;  %vm3095_vm2 = vcmp.gt.f32.partialorder %v2169_v61, 0.0 }
 0x185   : > { %v3157_v63 = vmul.f32 0.2, %v2128_v59  ;;  %v2130_v1 = vadd.f32 %v2129_v62, %v4960_v14  ;;  %vm3093_vm1 = vcmp.gt.f32.partialorder %v2128_v59, 0.0  ;;  %v2172_v7 = vpop.f32.mrf.mxu1 }
 0x186   : > { %v2131_v5 = vpop.f32.mrf.mxu0  ;;  %vm3096_vm4 = vcmp.gt.f32.partialorder %v2171_v4, 0.0  ;;  %v3160_v8 = vmul.f32 0.2, %v2171_v4  ;;  %v3223_v13 = vsel %vm3095_vm2, %v2169_v61, %v3159_v3 }
 0x187   : > { %vm3094_vm3 = vcmp.gt.f32.partialorder %v2130_v1, 0.0  ;;  %v3158_v6 = vmul.f32 0.2, %v2130_v1  ;;  %v3221_v10 = vsel %vm3093_vm1, %v2128_v59, %v3157_v63  ;;  %v2173_v12 = vpop.f32.mrf.mxu1 }
 0x188   : > { %v2132_v9 = vpop.f32.mrf.mxu0  ;;  %v3224_v15 = vsel %vm3096_vm4, %v2171_v4, %v3160_v8 }
 0x189   : > { %v3222_v11 = vsel %vm3094_vm3, %v2130_v1, %v3158_v6  ;;  %v4037_v16 = vpack.c.bf16 %v3224_v15, %v3223_v13 }
 0x18a   : > { %v4036_v0 = vpack.c.bf16 %v3222_v11, %v3221_v10 }
 0x18b   : > { %v3480_v18 = vrot.slane %v4037_v16, %v4967_v31 }
 0x18c   : > { %v3473_v17 = vrot.slane %v4036_v0, %v4967_v31 }
 0x18d   : > { %v2250_v22 = vpop.f32.mrf.mxu1 }
 0x18e   : > { %v2209_v19 = vpop.f32.mrf.mxu0  ;;  %v3481_v20 = vcombine.low %v3473_v17, %v3480_v18  ;;  %v2251_v23 = vadd.f32 %v2250_v22, %v4960_v14 }
 0x18f   : > { %v2210_v21 = vadd.f32 %v2209_v19, %v4960_v14  ;;  %v2252_v27 = vpop.f32.mrf.mxu1 }
 0x190   : > { %v2211_v24 = vpop.f32.mrf.mxu0  ;;  %3689 = vst [vmem:[%s4974_s4 + $0x20] sm:$0xff] %v3481_v20  ;;  %v3163_v28 = vmul.f32 0.2, %v2251_v23  ;;  %v2253_v36 = vadd.f32 %v2252_v27, %v4960_v14  ;;  %vm3099_vm6 = vcmp.gt.f32.partialorder %v2251_v23, 0.0 }
 0x191   : > { %v3161_v25 = vmul.f32 0.2, %v2210_v21  ;;  %v2212_v26 = vadd.f32 %v2211_v24, %v4960_v14  ;;  %vm3097_vm5 = vcmp.gt.f32.partialorder %v2210_v21, 0.0  ;;  %v2254_v32 = vpop.f32.mrf.mxu1 }
 0x192   : > { %v2213_v29 = vpop.f32.mrf.mxu0  ;;  %vm3100_vm8 = vcmp.gt.f32.partialorder %v2253_v36, 0.0  ;;  %v3164_v33 = vmul.f32 0.2, %v2253_v36  ;;  %v3227_v39 = vsel %vm3099_vm6, %v2251_v23, %v3163_v28 }
 0x193   : > { %vm3098_vm7 = vcmp.gt.f32.partialorder %v2212_v26, 0.0  ;;  %v3162_v30 = vmul.f32 0.2, %v2212_v26  ;;  %v3225_v35 = vsel %vm3097_vm5, %v2210_v21, %v3161_v25  ;;  %v2255_v38 = vpop.f32.mrf.mxu1 }
 0x194   : > { %v2214_v34 = vpop.f32.mrf.mxu0  ;;  %v3228_v41 = vsel %vm3100_vm8, %v2253_v36, %v3164_v33 }
 0x195   : > { %v3226_v37 = vsel %vm3098_vm7, %v2212_v26, %v3162_v30  ;;  %v4039_v42 = vpack.c.bf16 %v3228_v41, %v3227_v39 }
 0x196   : > { %v4038_v40 = vpack.c.bf16 %v3226_v37, %v3225_v35 }
 0x197   : > { %v3497_v44 = vrot.slane %v4039_v42, %v4967_v31 }
 0x198   : > { %v3490_v43 = vrot.slane %v4038_v40, %v4967_v31 }
 0x199   : > { %v2332_v48 = vpop.f32.mrf.mxu1 }
 0x19a   : > { %v2291_v45 = vpop.f32.mrf.mxu0  ;;  %v3498_v46 = vcombine.low %v3490_v43, %v3497_v44  ;;  %v2333_v49 = vadd.f32 %v2332_v48, %v4960_v14 }
 0x19b   : > { %v2292_v47 = vadd.f32 %v2291_v45, %v4960_v14  ;;  %v2334_v53 = vpop.f32.mrf.mxu1 }
 0x19c   : > { %v2293_v50 = vpop.f32.mrf.mxu0  ;;  %3690 = vst [vmem:[%s4974_s4 + $0x28] sm:$0xff] %v3498_v46  ;;  %v3167_v54 = vmul.f32 0.2, %v2333_v49  ;;  %v2335_v55 = vadd.f32 %v2334_v53, %v4960_v14  ;;  %vm3103_vm10 = vcmp.gt.f32.partialorder %v2333_v49, 0.0 }
 0x19d   : > { %v3165_v51 = vmul.f32 0.2, %v2292_v47  ;;  %v2294_v52 = vadd.f32 %v2293_v50, %v4960_v14  ;;  %vm3101_vm9 = vcmp.gt.f32.partialorder %v2292_v47, 0.0  ;;  %v2336_v58 = vpop.f32.mrf.mxu1 }
 0x19e   : > { %v2295_v56 = vpop.f32.mrf.mxu0  ;;  %vm3104_vm12 = vcmp.gt.f32.partialorder %v2335_v55, 0.0  ;;  %v3168_v59 = vmul.f32 0.2, %v2335_v55  ;;  %v3231_v1 = vsel %vm3103_vm10, %v2333_v49, %v3167_v54 }
 0x19f   : > { %vm3102_vm11 = vcmp.gt.f32.partialorder %v2294_v52, 0.0  ;;  %v3166_v57 = vmul.f32 0.2, %v2294_v52  ;;  %v3229_v61 = vsel %vm3101_vm9, %v2292_v47, %v3165_v51  ;;  %v2337_v63 = vpop.f32.mrf.mxu1 }
 0x1a0   : > { %v2296_v60 = vpop.f32.mrf.mxu0  ;;  %v3232_v3 = vsel %vm3104_vm12, %v2335_v55, %v3168_v59 }
 0x1a1   : > { %v3230_v62 = vsel %vm3102_vm11, %v2294_v52, %v3166_v57  ;;  %v4041_v4 = vpack.c.bf16 %v3232_v3, %v3231_v1 }
 0x1a2   : > { %v4040_v2 = vpack.c.bf16 %v3230_v62, %v3229_v61 }
 0x1a3   : > { %v3514_v6 = vrot.slane %v4041_v4, %v4967_v31 }
 0x1a4   : > { %v3507_v5 = vrot.slane %v4040_v2, %v4967_v31 }
 0x1a5   : > { %v2414_v10 = vpop.f32.mrf.mxu1 }
 0x1a6   : > { %v2373_v7 = vpop.f32.mrf.mxu0  ;;  %v3515_v8 = vcombine.low %v3507_v5, %v3514_v6  ;;  %v2415_v11 = vadd.f32 %v2414_v10, %v4960_v14 }
 0x1a7   : > { %v2374_v9 = vadd.f32 %v2373_v7, %v4960_v14  ;;  %v2416_v15 = vpop.f32.mrf.mxu1 }
 0x1a8   : > { %v2375_v12 = vpop.f32.mrf.mxu0  ;;  %3691 = vst [vmem:[%s4974_s4 + $0x30] sm:$0xff] %v3515_v8  ;;  %v3171_v16 = vmul.f32 0.2, %v2415_v11  ;;  %v2417_v17 = vadd.f32 %v2416_v15, %v4960_v14  ;;  %vm3107_vm14 = vcmp.gt.f32.partialorder %v2415_v11, 0.0 }
 0x1a9   : > { %v3169_v13 = vmul.f32 0.2, %v2374_v9  ;;  %v2376_v0 = vadd.f32 %v2375_v12, %v4960_v14  ;;  %vm3105_vm13 = vcmp.gt.f32.partialorder %v2374_v9, 0.0  ;;  %v2418_v20 = vpop.f32.mrf.mxu1 }
 0x1aa   : > { %v2377_v18 = vpop.f32.mrf.mxu0  ;;  %vm3108_vm0 = vcmp.gt.f32.partialorder %v2417_v17, 0.0  ;;  %v3172_v21 = vmul.f32 0.2, %v2417_v17  ;;  %v3235_v26 = vsel %vm3107_vm14, %v2415_v11, %v3171_v16 }
 0x1ab   : > { %vm3106_vm15 = vcmp.gt.f32.partialorder %v2376_v0, 0.0  ;;  %v3170_v19 = vmul.f32 0.2, %v2376_v0  ;;  %v3233_v23 = vsel %vm3105_vm13, %v2374_v9, %v3169_v13  ;;  %v2419_v25 = vpop.f32.mrf.mxu1 }
 0x1ac   : > { %v2378_v22 = vpop.f32.mrf.mxu0  ;;  %v3236_v28 = vsel %vm3108_vm0, %v2417_v17, %v3172_v21 }
 0x1ad   : > { %v3234_v24 = vsel %vm3106_vm15, %v2376_v0, %v3170_v19  ;;  %v4043_v36 = vpack.c.bf16 %v3236_v28, %v3235_v26 }
 0x1ae   : > { %v4042_v27 = vpack.c.bf16 %v3234_v24, %v3233_v23 }
 0x1af   : > { %v3531_v30 = vrot.slane %v4043_v36, %v4967_v31 }
 0x1b0   : > { %v3524_v29 = vrot.slane %v4042_v27, %v4967_v31 }
 0x1b1   : > { %v2496_v35 = vpop.f32.mrf.mxu1 }
 0x1b2   : > { %v2455_v32 = vpop.f32.mrf.mxu0  ;;  %v3532_v33 = vcombine.low %v3524_v29, %v3531_v30  ;;  %v2497_v37 = vadd.f32 %v2496_v35, %v4960_v14 }
 0x1b3   : > { %v2456_v34 = vadd.f32 %v2455_v32, %v4960_v14  ;;  %v2498_v41 = vpop.f32.mrf.mxu1 }
 0x1b4   : > { %v2457_v38 = vpop.f32.mrf.mxu0  ;;  %3692 = vst [vmem:[%s4974_s4 + $0x38] sm:$0xff] %v3532_v33  ;;  %v3175_v42 = vmul.f32 0.2, %v2497_v37  ;;  %v2499_v43 = vadd.f32 %v2498_v41, %v4960_v14  ;;  %vm3111_vm2 = vcmp.gt.f32.partialorder %v2497_v37, 0.0 }
 0x1b5   : > { %v3173_v39 = vmul.f32 0.2, %v2456_v34  ;;  %v2458_v40 = vadd.f32 %v2457_v38, %v4960_v14  ;;  %vm3109_vm1 = vcmp.gt.f32.partialorder %v2456_v34, 0.0  ;;  %v2500_v46 = vpop.f32.mrf.mxu1 }
 0x1b6   : > { %v2459_v44 = vpop.f32.mrf.mxu0  ;;  %vm3112_vm4 = vcmp.gt.f32.partialorder %v2499_v43, 0.0  ;;  %v3176_v47 = vmul.f32 0.2, %v2499_v43  ;;  %v3239_v52 = vsel %vm3111_vm2, %v2497_v37, %v3175_v42 }
 0x1b7   : > { %vm3110_vm3 = vcmp.gt.f32.partialorder %v2458_v40, 0.0  ;;  %v3174_v45 = vmul.f32 0.2, %v2458_v40  ;;  %v3237_v49 = vsel %vm3109_vm1, %v2456_v34, %v3173_v39  ;;  %v2501_v51 = vpop.f32.mrf.mxu1 }
 0x1b8   : > { %v2460_v48 = vpop.f32.mrf.mxu0  ;;  %v3240_v54 = vsel %vm3112_vm4, %v2499_v43, %v3176_v47 }
 0x1b9   : > { %v3238_v50 = vsel %vm3110_vm3, %v2458_v40, %v3174_v45  ;;  %v4045_v55 = vpack.c.bf16 %v3240_v54, %v3239_v52 }
 0x1ba   : > { %v4044_v53 = vpack.c.bf16 %v3238_v50, %v3237_v49 }
 0x1bb   : > { %v3548_v57 = vrot.slane %v4045_v55, %v4967_v31 }
 0x1bc   : > { %v3541_v56 = vrot.slane %v4044_v53, %v4967_v31 }
 0x1bd   : > { %v2578_v61 = vpop.f32.mrf.mxu1 }
 0x1be   : > { %v2537_v58 = vpop.f32.mrf.mxu0  ;;  %v3549_v59 = vcombine.low %v3541_v56, %v3548_v57  ;;  %v2579_v62 = vadd.f32 %v2578_v61, %v4960_v14 }
 0x1bf   : > { %v2538_v60 = vadd.f32 %v2537_v58, %v4960_v14  ;;  %v2580_v3 = vpop.f32.mrf.mxu1 }
 0x1c0   : > { %v2539_v63 = vpop.f32.mrf.mxu0  ;;  %3693 = vst [vmem:[%s4974_s4 + $0x40] sm:$0xff] %v3549_v59  ;;  %v3179_v4 = vmul.f32 0.2, %v2579_v62  ;;  %v2581_v5 = vadd.f32 %v2580_v3, %v4960_v14  ;;  %vm3115_vm6 = vcmp.gt.f32.partialorder %v2579_v62, 0.0 }
 0x1c1   : > { %v3177_v1 = vmul.f32 0.2, %v2538_v60  ;;  %v2540_v2 = vadd.f32 %v2539_v63, %v4960_v14  ;;  %vm3113_vm5 = vcmp.gt.f32.partialorder %v2538_v60, 0.0  ;;  %v2582_v8 = vpop.f32.mrf.mxu1 }
 0x1c2   : > { %v2541_v6 = vpop.f32.mrf.mxu0  ;;  %vm3116_vm8 = vcmp.gt.f32.partialorder %v2581_v5, 0.0  ;;  %v3180_v9 = vmul.f32 0.2, %v2581_v5  ;;  %v3243_v0 = vsel %vm3115_vm6, %v2579_v62, %v3179_v4 }
 0x1c3   : > { %vm3114_vm7 = vcmp.gt.f32.partialorder %v2540_v2, 0.0  ;;  %v3178_v7 = vmul.f32 0.2, %v2540_v2  ;;  %v3241_v11 = vsel %vm3113_vm5, %v2538_v60, %v3177_v1  ;;  %v2583_v13 = vpop.f32.mrf.mxu1 }
 0x1c4   : > { %v2542_v10 = vpop.f32.mrf.mxu0  ;;  %v3244_v16 = vsel %vm3116_vm8, %v2581_v5, %v3180_v9 }
 0x1c5   : > { %v3242_v12 = vsel %vm3114_vm7, %v2540_v2, %v3178_v7  ;;  %v4047_v17 = vpack.c.bf16 %v3244_v16, %v3243_v0 }
 0x1c6   : > { %v4046_v15 = vpack.c.bf16 %v3242_v12, %v3241_v11 }
 0x1c7   : > { %v3565_v19 = vrot.slane %v4047_v17, %v4967_v31 }
 0x1c8   : > { %v3558_v18 = vrot.slane %v4046_v15, %v4967_v31 }
 0x1c9   : > { %v2660_v23 = vpop.f32.mrf.mxu1 }
 0x1ca   : > { %v2619_v20 = vpop.f32.mrf.mxu0  ;;  %v3566_v21 = vcombine.low %v3558_v18, %v3565_v19  ;;  %v2661_v24 = vadd.f32 %v2660_v23, %v4960_v14 }
 0x1cb   : > { %v2620_v22 = vadd.f32 %v2619_v20, %v4960_v14  ;;  %v2662_v28 = vpop.f32.mrf.mxu1 }
 0x1cc   : > { %v2621_v25 = vpop.f32.mrf.mxu0  ;;  %3694 = vst [vmem:[%s4974_s4 + $0x48] sm:$0xff] %v3566_v21  ;;  %v3183_v36 = vmul.f32 0.2, %v2661_v24  ;;  %v2663_v29 = vadd.f32 %v2662_v28, %v4960_v14  ;;  %vm3119_vm10 = vcmp.gt.f32.partialorder %v2661_v24, 0.0 }
 0x1cd   : > { %v3181_v26 = vmul.f32 0.2, %v2620_v22  ;;  %v2622_v27 = vadd.f32 %v2621_v25, %v4960_v14  ;;  %vm3117_vm9 = vcmp.gt.f32.partialorder %v2620_v22, 0.0  ;;  %v2664_v33 = vpop.f32.mrf.mxu1 }
 0x1ce   : > { %v2623_v30 = vpop.f32.mrf.mxu0  ;;  %vm3120_vm12 = vcmp.gt.f32.partialorder %v2663_v29, 0.0  ;;  %v3184_v34 = vmul.f32 0.2, %v2663_v29  ;;  %v3247_v40 = vsel %vm3119_vm10, %v2661_v24, %v3183_v36 }
 0x1cf   : > { %vm3118_vm11 = vcmp.gt.f32.partialorder %v2622_v27, 0.0  ;;  %v3182_v32 = vmul.f32 0.2, %v2622_v27  ;;  %v3245_v37 = vsel %vm3117_vm9, %v2620_v22, %v3181_v26  ;;  %v2665_v39 = vpop.f32.mrf.mxu1 }
 0x1d0   : > { %v2624_v35 = vpop.f32.mrf.mxu0  ;;  %v3248_v42 = vsel %vm3120_vm12, %v2663_v29, %v3184_v34 }
 0x1d1   : > { %v3246_v38 = vsel %vm3118_vm11, %v2622_v27, %v3182_v32  ;;  %v4049_v43 = vpack.c.bf16 %v3248_v42, %v3247_v40 }
 0x1d2   : > { %v4048_v41 = vpack.c.bf16 %v3246_v38, %v3245_v37 }
 0x1d3   : > { %v3582_v45 = vrot.slane %v4049_v43, %v4967_v31 }
 0x1d4   : > { %v3575_v44 = vrot.slane %v4048_v41, %v4967_v31 }
 0x1d5   : > { %v2742_v49 = vpop.f32.mrf.mxu1 }
 0x1d6   : > { %v2701_v46 = vpop.f32.mrf.mxu0  ;;  %v3583_v47 = vcombine.low %v3575_v44, %v3582_v45  ;;  %v2743_v50 = vadd.f32 %v2742_v49, %v4960_v14 }
 0x1d7   : > { %v2702_v48 = vadd.f32 %v2701_v46, %v4960_v14  ;;  %v2744_v54 = vpop.f32.mrf.mxu1 }
 0x1d8   : > { %v2703_v51 = vpop.f32.mrf.mxu0  ;;  %3695 = vst [vmem:[%s4974_s4 + $0x50] sm:$0xff] %v3583_v47  ;;  %v3187_v55 = vmul.f32 0.2, %v2743_v50  ;;  %v2745_v56 = vadd.f32 %v2744_v54, %v4960_v14  ;;  %vm3123_vm14 = vcmp.gt.f32.partialorder %v2743_v50, 0.0 }
 0x1d9   : > { %v3185_v52 = vmul.f32 0.2, %v2702_v48  ;;  %v2704_v53 = vadd.f32 %v2703_v51, %v4960_v14  ;;  %vm3121_vm13 = vcmp.gt.f32.partialorder %v2702_v48, 0.0  ;;  %v2746_v59 = vpop.f32.mrf.mxu1 }
 0x1da   : > { %v2705_v57 = vpop.f32.mrf.mxu0  ;;  %vm3124_vm0 = vcmp.gt.f32.partialorder %v2745_v56, 0.0  ;;  %v3188_v60 = vmul.f32 0.2, %v2745_v56  ;;  %v3251_v2 = vsel %vm3123_vm14, %v2743_v50, %v3187_v55 }
 0x1db   : > { %vm3122_vm15 = vcmp.gt.f32.partialorder %v2704_v53, 0.0  ;;  %v3186_v58 = vmul.f32 0.2, %v2704_v53  ;;  %v3249_v62 = vsel %vm3121_vm13, %v2702_v48, %v3185_v52  ;;  %v2747_v1 = vpop.f32.mrf.mxu1 }
 0x1dc   : > { %v2706_v61 = vpop.f32.mrf.mxu0  ;;  %v3252_v4 = vsel %vm3124_vm0, %v2745_v56, %v3188_v60 }
 0x1dd   : > { %v3250_v63 = vsel %vm3122_vm15, %v2704_v53, %v3186_v58  ;;  %v4051_v5 = vpack.c.bf16 %v3252_v4, %v3251_v2 }
 0x1de   : > { %v4050_v3 = vpack.c.bf16 %v3250_v63, %v3249_v62 }
 0x1df   : > { %v3599_v7 = vrot.slane %v4051_v5, %v4967_v31 }
 0x1e0   : > { %v3592_v6 = vrot.slane %v4050_v3, %v4967_v31 }
 0x1e1   : > { %v2824_v11 = vpop.f32.mrf.mxu1 }
 0x1e2   : > { %v2783_v8 = vpop.f32.mrf.mxu0  ;;  %v3600_v9 = vcombine.low %v3592_v6, %v3599_v7  ;;  %v2825_v12 = vadd.f32 %v2824_v11, %v4960_v14 }
 0x1e3   : > { %v2784_v10 = vadd.f32 %v2783_v8, %v4960_v14  ;;  %v2826_v16 = vpop.f32.mrf.mxu1 }
 0x1e4   : > { %v2785_v13 = vpop.f32.mrf.mxu0  ;;  %3696 = vst [vmem:[%s4974_s4 + $0x58] sm:$0xff] %v3600_v9  ;;  %v3191_v17 = vmul.f32 0.2, %v2825_v12  ;;  %v2827_v18 = vadd.f32 %v2826_v16, %v4960_v14  ;;  %vm3127_vm2 = vcmp.gt.f32.partialorder %v2825_v12, 0.0 }
 0x1e5   : > { %v3189_v0 = vmul.f32 0.2, %v2784_v10  ;;  %v2786_v15 = vadd.f32 %v2785_v13, %v4960_v14  ;;  %vm3125_vm1 = vcmp.gt.f32.partialorder %v2784_v10, 0.0  ;;  %v2828_v21 = vpop.f32.mrf.mxu1 }
 0x1e6   : > { %v2787_v19 = vpop.f32.mrf.mxu0  ;;  %vm3128_vm4 = vcmp.gt.f32.partialorder %v2827_v18, 0.0  ;;  %v3192_v22 = vmul.f32 0.2, %v2827_v18  ;;  %v3255_v27 = vsel %vm3127_vm2, %v2825_v12, %v3191_v17 }
 0x1e7   : > { %vm3126_vm3 = vcmp.gt.f32.partialorder %v2786_v15, 0.0  ;;  %v3190_v20 = vmul.f32 0.2, %v2786_v15  ;;  %v3253_v24 = vsel %vm3125_vm1, %v2784_v10, %v3189_v0  ;;  %v2829_v26 = vpop.f32.mrf.mxu1 }
 0x1e8   : > { %v2788_v23 = vpop.f32.mrf.mxu0  ;;  %v3256_v36 = vsel %vm3128_vm4, %v2827_v18, %v3192_v22 }
 0x1e9   : > { %v3254_v25 = vsel %vm3126_vm3, %v2786_v15, %v3190_v20  ;;  %v4053_v29 = vpack.c.bf16 %v3256_v36, %v3255_v27 }
 0x1ea   : > { %v4052_v28 = vpack.c.bf16 %v3254_v25, %v3253_v24 }
 0x1eb   : > { %v3616_v32 = vrot.slane %v4053_v29, %v4967_v31 }
 0x1ec   : > { %v3609_v30 = vrot.slane %v4052_v28, %v4967_v31 }
 0x1ed   : > { %v2906_v37 = vpop.f32.mrf.mxu1 }
 0x1ee   : > { %v2865_v33 = vpop.f32.mrf.mxu0  ;;  %v3617_v34 = vcombine.low %v3609_v30, %v3616_v32  ;;  %v2907_v38 = vadd.f32 %v2906_v37, %v4960_v14 }
 0x1ef   : > { %v2866_v35 = vadd.f32 %v2865_v33, %v4960_v14  ;;  %v2908_v42 = vpop.f32.mrf.mxu1 }
 0x1f0   : > { %v2867_v39 = vpop.f32.mrf.mxu0  ;;  %3697 = vst [vmem:[%s4974_s4 + $0x60] sm:$0xff] %v3617_v34  ;;  %v3195_v43 = vmul.f32 0.2, %v2907_v38  ;;  %v2909_v44 = vadd.f32 %v2908_v42, %v4960_v14  ;;  %vm3131_vm6 = vcmp.gt.f32.partialorder %v2907_v38, 0.0 }
 0x1f1   : > { %v3193_v40 = vmul.f32 0.2, %v2866_v35  ;;  %v2868_v41 = vadd.f32 %v2867_v39, %v4960_v14  ;;  %vm3129_vm5 = vcmp.gt.f32.partialorder %v2866_v35, 0.0  ;;  %v2910_v47 = vpop.f32.mrf.mxu1 }
 0x1f2   : > { %v2869_v45 = vpop.f32.mrf.mxu0  ;;  %vm3132_vm8 = vcmp.gt.f32.partialorder %v2909_v44, 0.0  ;;  %v3196_v48 = vmul.f32 0.2, %v2909_v44  ;;  %v3259_v53 = vsel %vm3131_vm6, %v2907_v38, %v3195_v43 }
 0x1f3   : > { %vm3130_vm7 = vcmp.gt.f32.partialorder %v2868_v41, 0.0  ;;  %v3194_v46 = vmul.f32 0.2, %v2868_v41  ;;  %v3257_v50 = vsel %vm3129_vm5, %v2866_v35, %v3193_v40  ;;  %v2911_v52 = vpop.f32.mrf.mxu1 }
 0x1f4   : > { %v2870_v49 = vpop.f32.mrf.mxu0  ;;  %v3260_v55 = vsel %vm3132_vm8, %v2909_v44, %v3196_v48 }
 0x1f5   : > { %v3258_v51 = vsel %vm3130_vm7, %v2868_v41, %v3194_v46  ;;  %v4055_v56 = vpack.c.bf16 %v3260_v55, %v3259_v53 }
 0x1f6   : > { %v4054_v54 = vpack.c.bf16 %v3258_v51, %v3257_v50 }
 0x1f7   : > { %v3633_v58 = vrot.slane %v4055_v56, %v4967_v31 }
 0x1f8   : > { %v3626_v57 = vrot.slane %v4054_v54, %v4967_v31 }
 0x1f9   : > { %v2988_v62 = vpop.f32.mrf.mxu1 }
 0x1fa   : > { %v2947_v59 = vpop.f32.mrf.mxu0  ;;  %v3634_v60 = vcombine.low %v3626_v57, %v3633_v58  ;;  %v2989_v63 = vadd.f32 %v2988_v62, %v4960_v14 }
 0x1fb   : > { %v2948_v61 = vadd.f32 %v2947_v59, %v4960_v14  ;;  %v2990_v4 = vpop.f32.mrf.mxu1 }
 0x1fc   : > { %v2949_v1 = vpop.f32.mrf.mxu0  ;;  %3698 = vst [vmem:[%s4974_s4 + $0x68] sm:$0xff] %v3634_v60  ;;  %v3199_v5 = vmul.f32 0.2, %v2989_v63  ;;  %v2991_v6 = vadd.f32 %v2990_v4, %v4960_v14  ;;  %vm3135_vm10 = vcmp.gt.f32.partialorder %v2989_v63, 0.0 }
 0x1fd   : > { %v3197_v2 = vmul.f32 0.2, %v2948_v61  ;;  %v2950_v3 = vadd.f32 %v2949_v1, %v4960_v14  ;;  %vm3133_vm9 = vcmp.gt.f32.partialorder %v2948_v61, 0.0  ;;  %v2992_v9 = vpop.f32.mrf.mxu1 }
 0x1fe   : > { %v2951_v7 = vpop.f32.mrf.mxu0  ;;  %vm3136_vm12 = vcmp.gt.f32.partialorder %v2991_v6, 0.0  ;;  %v3200_v10 = vmul.f32 0.2, %v2991_v6  ;;  %v3263_v15 = vsel %vm3135_vm10, %v2989_v63, %v3199_v5 }
 0x1ff   : > { %vm3134_vm11 = vcmp.gt.f32.partialorder %v2950_v3, 0.0  ;;  %v3198_v8 = vmul.f32 0.2, %v2950_v3  ;;  %v3261_v12 = vsel %vm3133_vm9, %v2948_v61, %v3197_v2  ;;  %v2993_v0 = vpop.f32.mrf.mxu1 }
 0x200   : > { %v2952_v11 = vpop.f32.mrf.mxu0  ;;  %v3264_v17 = vsel %vm3136_vm12, %v2991_v6, %v3200_v10 }
 0x201   : > { %v3262_v13 = vsel %vm3134_vm11, %v2950_v3, %v3198_v8  ;;  %v4057_v18 = vpack.c.bf16 %v3264_v17, %v3263_v15 }
 0x202   : > { %v4056_v16 = vpack.c.bf16 %v3262_v13, %v3261_v12 }
 0x203   : > { %v3650_v20 = vrot.slane %v4057_v18, %v4967_v31 }
 0x204   : > { %v3643_v19 = vrot.slane %v4056_v16, %v4967_v31 }
 0x205   : > { %v3070_v24 = vpop.f32.mrf.mxu1 }
 0x206   : > { %v3029_v21 = vpop.f32.mrf.mxu0  ;;  %v3651_v22 = vcombine.low %v3643_v19, %v3650_v20  ;;  %v3071_v25 = vadd.f32 %v3070_v24, %v4960_v14 }
 0x207   : > { %v3030_v23 = vadd.f32 %v3029_v21, %v4960_v14  ;;  %v3072_v36 = vpop.f32.mrf.mxu1 }
 0x208   : > { %v3031_v26 = vpop.f32.mrf.mxu0  ;;  %3699 = vst [vmem:[%s4974_s4 + $0x70] sm:$0xff] %v3651_v22  ;;  %v3203_v29 = vmul.f32 0.2, %v3071_v25  ;;  %v3073_v30 = vadd.f32 %v3072_v36, %v4960_v14  ;;  %vm3139_vm14 = vcmp.gt.f32.partialorder %v3071_v25, 0.0 }
 0x209   : > { %v3201_v27 = vmul.f32 0.2, %v3030_v23  ;;  %v3032_v28 = vadd.f32 %v3031_v26, %v4960_v14  ;;  %vm3137_vm13 = vcmp.gt.f32.partialorder %v3030_v23, 0.0  ;;  %v3074_v34 = vpop.f32.mrf.mxu1 }
 0x20a   : > { %v3033_v32 = vpop.f32.mrf.mxu0  ;;  %vm3140_vm0 = vcmp.gt.f32.partialorder %v3073_v30, 0.0  ;;  %v3204_v35 = vmul.f32 0.2, %v3073_v30  ;;  %v3267_v41 = vsel %vm3139_vm14, %v3071_v25, %v3203_v29 }
 0x20b   : > { %vm3138_vm15 = vcmp.gt.f32.partialorder %v3032_v28, 0.0  ;;  %v3202_v33 = vmul.f32 0.2, %v3032_v28  ;;  %v3265_v38 = vsel %vm3137_vm13, %v3030_v23, %v3201_v27  ;;  %v3075_v40 = vpop.f32.mrf.mxu1 }
 0x20c   : > { %v3034_v37 = vpop.f32.mrf.mxu0  ;;  %v3268_v43 = vsel %vm3140_vm0, %v3073_v30, %v3204_v35 }
 0x20d   : > { %v3266_v39 = vsel %vm3138_vm15, %v3032_v28, %v3202_v33  ;;  %v4059_v44 = vpack.c.bf16 %v3268_v43, %v3267_v41 }
 0x20e   : > { %v4058_v42 = vpack.c.bf16 %v3266_v39, %v3265_v38 }
 0x20f   : > { %v3667_v14 = vrot.slane %v4059_v44, %v4967_v31 }
 0x210   : > { %v3660_v45 = vrot.slane %v4058_v42, %v4967_v31 }
 0x212   : > { %v3668_v46 = vcombine.low %v3660_v45, %v3667_v14 }
 0x214   : > { %3700 = vst [vmem:[%s4974_s4 + $0x78] sm:$0xff] %v3668_v46 }
 0x215 PF: > { %s13_s18 = sadd.s32 1, %s4179_s18   ;;  %s5107_s12 = smov %s4159_s13 }
 0x216   : > { %p10_p12 = scmp.ge.s32.totalorder %s13_s18, 6   ;;  %s5108_s13 = smov %s4254_s25 }
 0x217   : > { %s5109_s14 = smov %s4171_s16  ;;  %s5110_s15 = smov %s4175_s17 }
 0x218   : > { %s5111_s16 = smov %s5114_s19  ;;  %s5112_s17 = smov %s5118_s20 }
 0x219   :  { %12 = sbr.rel (!%p10_p12) target bundleno = 4 (0x4), region = 90 }

// kernel: discriminator_forward.6
= control target key start
LH: loop header
LB: loop body
LE: loop exit
PB: predicated region body
PF: predicated region fallthrough
CT: control target
= control target key end

     0   :  { %s2402_s12 = smov 0   ;;  %s2404_s13 = smov 0   ;;  %s3185_s0 = inlined_call_operand.vmem [shape: bf16[2,64,4096], index: 0, kind: input, shape index: {}]   ;;  %s3186_s1 = inlined_call_operand.vmem [shape: bf16[8,64], index: 1, kind: input, shape index: {}]   ;;  %s3187_s2 = inlined_call_operand.vmem [shape: f32[8,1], index: 2, kind: input, shape index: {}]   ;;  %s3188_s3 = inlined_call_operand.vmem [shape: bf16[2,8,4096], index: 3, kind: output, shape index: {}]  }
   0x1   :  { %s2406_s14 = smov 0  }
   0x2 LB: > { %s25_s15 = sadd.s32 1, %s2375_s13  ;;  %p2144_p0 = scmp.ge.s32.totalorder %s2379_s14, 1  ;;  %s2379_s14 = sphi %s2406_s14, %s13_s14   ;;  %s2375_s13 = sphi %s2404_s13, %s3204_s13   ;;  %s2371_s12 = sphi %s2402_s12, %s3203_s12  }
   0x3   : > { %p27_p1 = scmp.ge.s32.totalorder %s25_s15, 2  ;;  %p158_p2 = scmp.lt.s32.totalorder %s2379_s14, 3 }
   0x5   : > { %s3206_s15 = smov (%p27_p1, %s25_s15), 0  ;;  %p159_p3 = pnand %p2144_p0, %p158_p2 }
   0x6   : > { %p191_p4 = scmp.lt.s32.totalorder (!%p159_p3), %s2371_s12, 1 }
   0x7   : > { %162 = sbr.rel (%p159_p3) target bundleno = 754 (0x2f2), region = 32 }
   0xc   : > { %v340_v0 = vld [vmem:[%s3187_s2] sm:$0xff]  ;;  %v2381_v1 = vmov 0   ;;  %s3208_s12 = smov (!%p191_p4, %s2371_s12), 1  ;;  %vm986_vm0 = vcmask 523264  }
   0xd   : > { %1022 = vmatprep.mubr.bf16.mxu0 %v2381_v1  ;;  %1063 = vmatprep.mubr.bf16.mxu1 %v2381_v1  ;;  %s2311_s18 = sshll.u32 %s3208_s12, 10  ;;  %v2461_v44 = vld [vmem:[%s3186_s1] sm:$0xf]  ;;  %s2312_s24 = sshll.u32 %s3208_s12, 7 }
   0xe   : > { %2354 = vset.pattern.permute.xlu0 %v2381_v1  ;;  %s2432_s21 = scalar_lea.vmem %s3185_s0, %s2311_s18  ;;  %s3138_s27 = scalar_lea.vmem %s3188_s3, %s2312_s24 }
   0xf   : > { %343 = vperm.xlu0 %2354, %v340_v0   ;;  %v308_v2 = vld [vmem:[%s2432_s21 + $0x300] sm:$0xff]  ;;  %v309_v4 = vld [vmem:[%s2432_s21 + $0x308] sm:$0xff]  ;;  %v310_v32 = vld [vmem:[%s2432_s21 + $0x310] sm:$0xff] }
  0x10   : > { %v324_v3 = vld [vmem:[%s2432_s21 + $0x380] sm:$0xff]  ;;  %v325_v6 = vld [vmem:[%s2432_s21 + $0x388] sm:$0xff]  ;;  %v326_v33 = vld [vmem:[%s2432_s21 + $0x390] sm:$0xff] }
  0x11   : > { %v2246_v5 = vcombine.high %v308_v2, %v324_v3  ;;  %v2245_v7 = vcombine.low %v308_v2, %v324_v3  ;;  %v276_v8 = vld [vmem:[%s2432_s21 + $0x200] sm:$0xff]  ;;  %v2248_v10 = vcombine.high %v309_v4, %v325_v6  ;;  %v2247_v11 = vcombine.low %v309_v4, %v325_v6  ;;  %v277_v13 = vld [vmem:[%s2432_s21 + $0x208] sm:$0xff]  ;;  %v311_v34 = vld [vmem:[%s2432_s21 + $0x318] sm:$0xff] }
  0x12   : > { %v292_v9 = vld [vmem:[%s2432_s21 + $0x280] sm:$0xff]  ;;  %v293_v14 = vld [vmem:[%s2432_s21 + $0x288] sm:$0xff]  ;;  %v327_v35 = vld [vmem:[%s2432_s21 + $0x398] sm:$0xff]  ;;  %v2250_v38 = vcombine.high %v310_v32, %v326_v33  ;;  %v2249_v45 = vcombine.low %v310_v32, %v326_v33 }
  0x13   : > { %v2214_v12 = vcombine.high %v276_v8, %v292_v9  ;;  %v244_v15 = vld [vmem:[%s2432_s21 + $0x100] sm:$0xff]  ;;  %998 = vmatprep.subr.bf16.mxu0 %v2246_v5  ;;  %v2216_v16 = vcombine.high %v277_v13, %v293_v14  ;;  %v245_v18 = vld [vmem:[%s2432_s21 + $0x108] sm:$0xff]  ;;  %1039 = vmatprep.subr.bf16.mxu1 %v2248_v10  ;;  %v2213_v20 = vcombine.low %v276_v8, %v292_v9  ;;  %v278_v40 = vld [vmem:[%s2432_s21 + $0x210] sm:$0xff] }
  0x14   : > { %v260_v17 = vld [vmem:[%s2432_s21 + $0x180] sm:$0xff]  ;;  %v261_v19 = vld [vmem:[%s2432_s21 + $0x188] sm:$0xff]  ;;  %999 = vmatpush1.bf16.msra.mxu0 %v2245_v7  ;;  %1040 = vmatpush1.bf16.msra.mxu1 %v2247_v11  ;;  %v2215_v21 = vcombine.low %v277_v13, %v293_v14  ;;  %v2252_v39 = vcombine.high %v311_v34, %v327_v35  ;;  %v294_v41 = vld [vmem:[%s2432_s21 + $0x290] sm:$0xff]  ;;  %v2251_v46 = vcombine.low %v311_v34, %v327_v35 }
  0x15   : > { %1000 = vmatprep.subr.bf16.mxu0 %v2214_v12  ;;  %v2182_v22 = vcombine.high %v244_v15, %v260_v17  ;;  %1041 = vmatprep.subr.bf16.mxu1 %v2216_v16  ;;  %v2184_v23 = vcombine.high %v245_v18, %v261_v19  ;;  %v212_v24 = vld [vmem:[%s2432_s21] sm:$0xff]  ;;  %v213_v26 = vld [vmem:[%s2432_s21 + $0x8] sm:$0xff]  ;;  %v2181_v28 = vcombine.low %v244_v15, %v260_v17  ;;  %v279_v42 = vld [vmem:[%s2432_s21 + $0x218] sm:$0xff] }
  0x16   : > { %v228_v25 = vld [vmem:[%s2432_s21 + $0x80] sm:$0xff]  ;;  %v229_v27 = vld [vmem:[%s2432_s21 + $0x88] sm:$0xff]  ;;  %v2183_v29 = vcombine.low %v245_v18, %v261_v19  ;;  %v295_v43 = vld [vmem:[%s2432_s21 + $0x298] sm:$0xff]  ;;  %v2218_v47 = vcombine.high %v278_v40, %v294_v41  ;;  %v2217_v53 = vcombine.low %v278_v40, %v294_v41 }
  0x17   : > { %v2150_v30 = vcombine.high %v212_v24, %v228_v25  ;;  %v2152_v31 = vcombine.high %v213_v26, %v229_v27  ;;  %v2149_v36 = vcombine.low %v212_v24, %v228_v25  ;;  %v2151_v37 = vcombine.low %v213_v26, %v229_v27  ;;  %v246_v49 = vld [vmem:[%s2432_s21 + $0x110] sm:$0xff]  ;;  %v247_v51 = vld [vmem:[%s2432_s21 + $0x118] sm:$0xff]  ;;  %v312_v2 = vld [vmem:[%s2432_s21 + $0x320] sm:$0xff] }
  0x18   : > { %1001 = vmatpush1.bf16.msra.mxu0 %v2213_v20  ;;  %1042 = vmatpush1.bf16.msra.mxu1 %v2215_v21  ;;  %v2220_v48 = vcombine.high %v279_v42, %v295_v43  ;;  %v262_v50 = vld [vmem:[%s2432_s21 + $0x190] sm:$0xff]  ;;  %v263_v52 = vld [vmem:[%s2432_s21 + $0x198] sm:$0xff]  ;;  %v2219_v54 = vcombine.low %v279_v42, %v295_v43  ;;  %v328_v3 = vld [vmem:[%s2432_s21 + $0x3a0] sm:$0xff] }
  0x19   : > { %1002 = vmatprep.subr.bf16.mxu0 %v2182_v22  ;;  %1043 = vmatprep.subr.bf16.mxu1 %v2184_v23  ;;  %v2186_v55 = vcombine.high %v246_v49, %v262_v50  ;;  %v2188_v56 = vcombine.high %v247_v51, %v263_v52  ;;  %v214_v57 = vld [vmem:[%s2432_s21 + $0x10] sm:$0xff]  ;;  %v215_v59 = vld [vmem:[%s2432_s21 + $0x18] sm:$0xff]  ;;  %v2185_v61 = vcombine.low %v246_v49, %v262_v50  ;;  %v313_v4 = vld [vmem:[%s2432_s21 + $0x328] sm:$0xff] }
  0x1a   : > { %v230_v58 = vld [vmem:[%s2432_s21 + $0x90] sm:$0xff]  ;;  %v231_v60 = vld [vmem:[%s2432_s21 + $0x98] sm:$0xff]  ;;  %v2187_v62 = vcombine.low %v247_v51, %v263_v52  ;;  %v329_v5 = vld [vmem:[%s2432_s21 + $0x3a8] sm:$0xff]  ;;  %v2254_v8 = vcombine.high %v312_v2, %v328_v3  ;;  %v2253_v14 = vcombine.low %v312_v2, %v328_v3 }
  0x1b   : > { %v2154_v63 = vcombine.high %v214_v57, %v230_v58  ;;  %v2156_v0 = vcombine.high %v215_v59, %v231_v60  ;;  %v2153_v6 = vcombine.low %v214_v57, %v230_v58  ;;  %v2155_v7 = vcombine.low %v215_v59, %v231_v60  ;;  %v280_v10 = vld [vmem:[%s2432_s21 + $0x220] sm:$0xff]  ;;  %v281_v12 = vld [vmem:[%s2432_s21 + $0x228] sm:$0xff]  ;;  %v314_v34 = vld [vmem:[%s2432_s21 + $0x330] sm:$0xff] }
  0x1c   : > { %1003 = vmatpush1.bf16.msra.mxu0 %v2181_v28  ;;  %1044 = vmatpush1.bf16.msra.mxu1 %v2183_v29  ;;  %v2256_v9 = vcombine.high %v313_v4, %v329_v5  ;;  %v296_v11 = vld [vmem:[%s2432_s21 + $0x2a0] sm:$0xff]  ;;  %v297_v13 = vld [vmem:[%s2432_s21 + $0x2a8] sm:$0xff]  ;;  %v2255_v15 = vcombine.low %v313_v4, %v329_v5  ;;  %v330_v35 = vld [vmem:[%s2432_s21 + $0x3b0] sm:$0xff] }
  0x1d   : > { %1004 = vmatprep.subr.bf16.mxu0 %v2150_v30  ;;  %1045 = vmatprep.subr.bf16.mxu1 %v2152_v31  ;;  %v2222_v16 = vcombine.high %v280_v10, %v296_v11  ;;  %v2224_v17 = vcombine.high %v281_v12, %v297_v13  ;;  %v248_v18 = vld [vmem:[%s2432_s21 + $0x120] sm:$0xff]  ;;  %v249_v20 = vld [vmem:[%s2432_s21 + $0x128] sm:$0xff]  ;;  %v2221_v22 = vcombine.low %v280_v10, %v296_v11  ;;  %v282_v42 = vld [vmem:[%s2432_s21 + $0x230] sm:$0xff] }
  0x1e   : > { %v264_v19 = vld [vmem:[%s2432_s21 + $0x1a0] sm:$0xff]  ;;  %v265_v21 = vld [vmem:[%s2432_s21 + $0x1a8] sm:$0xff]  ;;  %v2223_v23 = vcombine.low %v281_v12, %v297_v13  ;;  %v2258_v40 = vcombine.high %v314_v34, %v330_v35  ;;  %v298_v43 = vld [vmem:[%s2432_s21 + $0x2b0] sm:$0xff] }
  0x1f   : > { %v2190_v24 = vcombine.high %v248_v18, %v264_v19  ;;  %v2192_v25 = vcombine.high %v249_v20, %v265_v21  ;;  %v216_v26 = vld [vmem:[%s2432_s21 + $0x20] sm:$0xff]  ;;  %v217_v28 = vld [vmem:[%s2432_s21 + $0x28] sm:$0xff]  ;;  %v2189_v30 = vcombine.low %v248_v18, %v264_v19  ;;  %v2191_v31 = vcombine.low %v249_v20, %v265_v21  ;;  %v250_v51 = vld [vmem:[%s2432_s21 + $0x130] sm:$0xff] }
  0x20   : > { %1005 = vmatpush1.bf16.msra.mxu0 %v2149_v36  ;;  %1046 = vmatpush1.bf16.msra.mxu1 %v2151_v37  ;;  %v232_v27 = vld [vmem:[%s2432_s21 + $0xa0] sm:$0xff]  ;;  %v233_v29 = vld [vmem:[%s2432_s21 + $0xa8] sm:$0xff]  ;;  %v315_v36 = vld [vmem:[%s2432_s21 + $0x338] sm:$0xff]  ;;  %v2226_v49 = vcombine.high %v282_v42, %v298_v43 }
  0x21   : > { %1080 = vmatprep.subr.bf16.mxu0 %v2250_v38  ;;  %1121 = vmatprep.subr.bf16.mxu1 %v2252_v39  ;;  %v2158_v32 = vcombine.high %v216_v26, %v232_v27  ;;  %v2160_v33 = vcombine.high %v217_v28, %v233_v29  ;;  %v331_v37 = vld [vmem:[%s2432_s21 + $0x3b8] sm:$0xff]  ;;  %v2157_v38 = vcombine.low %v216_v26, %v232_v27  ;;  %v266_v52 = vld [vmem:[%s2432_s21 + $0x1b0] sm:$0xff]  ;;  %v316_v4 = vld [vmem:[%s2432_s21 + $0x340] sm:$0xff] }
  0x22   : > { %v2159_v39 = vcombine.low %v217_v28, %v233_v29  ;;  %v2260_v41 = vcombine.high %v315_v36, %v331_v37  ;;  %v2194_v57 = vcombine.high %v250_v51, %v266_v52  ;;  %v218_v59 = vld [vmem:[%s2432_s21 + $0x30] sm:$0xff]  ;;  %v332_v5 = vld [vmem:[%s2432_s21 + $0x3c0] sm:$0xff] }
  0x23   : > { %2277 = vmatmul.mubr.msk.bf16.vlgmr.msra.gmra.mxu0 %vm986_vm0, %v2461_v44  ;;  %2278 = vmatmul.mubr.msk.bf16.vlgmr.msra.gmra.mxu1 %vm986_vm0, %v2461_v44  ;;  %v234_v60 = vld [vmem:[%s2432_s21 + $0xb0] sm:$0xff]  ;;  %v2262_v10 = vcombine.high %v316_v4, %v332_v5  ;;  %v284_v12 = vld [vmem:[%s2432_s21 + $0x240] sm:$0xff] }
  0x24   : > { %1081 = vmatpush1.bf16.msra.mxu0 %v2249_v45  ;;  %1122 = vmatpush1.bf16.msra.mxu1 %v2251_v46  ;;  %v283_v45 = vld [vmem:[%s2432_s21 + $0x238] sm:$0xff]  ;;  %v2162_v2 = vcombine.high %v218_v59, %v234_v60  ;;  %v300_v13 = vld [vmem:[%s2432_s21 + $0x2c0] sm:$0xff] }
  0x25   : > { %1082 = vmatprep.subr.bf16.mxu0 %v2218_v47  ;;  %1123 = vmatprep.subr.bf16.mxu1 %v2220_v48  ;;  %v299_v46 = vld [vmem:[%s2432_s21 + $0x2b8] sm:$0xff]  ;;  %v2257_v47 = vcombine.low %v314_v34, %v330_v35  ;;  %v2259_v48 = vcombine.low %v315_v36, %v331_v37  ;;  %v2230_v18 = vcombine.high %v284_v12, %v300_v13  ;;  %v252_v20 = vld [vmem:[%s2432_s21 + $0x140] sm:$0xff]  ;;  %v318_v36 = vld [vmem:[%s2432_s21 + $0x350] sm:$0xff] }
  0x26   : > { %1104 = vmatprep.mubr.bf16.mxu0 %v2381_v1  ;;  %1145 = vmatprep.mubr.bf16.mxu1 %v2381_v1  ;;  %v2228_v50 = vcombine.high %v283_v45, %v299_v46  ;;  %v268_v21 = vld [vmem:[%s2432_s21 + $0x1c0] sm:$0xff]  ;;  %v334_v37 = vld [vmem:[%s2432_s21 + $0x3d0] sm:$0xff] }
  0x27   : > { %v2198_v26 = vcombine.high %v252_v20, %v268_v21  ;;  %v220_v28 = vld [vmem:[%s2432_s21 + $0x40] sm:$0xff] }
  0x28   : > { %1083 = vmatpush1.bf16.msra.mxu0 %v2217_v53  ;;  %1124 = vmatpush1.bf16.msra.mxu1 %v2219_v54  ;;  %v251_v53 = vld [vmem:[%s2432_s21 + $0x138] sm:$0xff]  ;;  %v236_v29 = vld [vmem:[%s2432_s21 + $0xc0] sm:$0xff] }
  0x29   : > { %1084 = vmatprep.subr.bf16.mxu0 %v2186_v55  ;;  %1125 = vmatprep.subr.bf16.mxu1 %v2188_v56  ;;  %v267_v54 = vld [vmem:[%s2432_s21 + $0x1b8] sm:$0xff]  ;;  %v2225_v55 = vcombine.low %v282_v42, %v298_v43  ;;  %v2227_v56 = vcombine.low %v283_v45, %v299_v46  ;;  %v2166_v34 = vcombine.high %v220_v28, %v236_v29  ;;  %v286_v45 = vld [vmem:[%s2432_s21 + $0x250] sm:$0xff] }
  0x2a   : > { %v2196_v58 = vcombine.high %v251_v53, %v267_v54  ;;  %v2266_v42 = vcombine.high %v318_v36, %v334_v37  ;;  %v302_v46 = vld [vmem:[%s2432_s21 + $0x2d0] sm:$0xff] }
  0x2c   : > { %1085 = vmatpush1.bf16.msra.mxu0 %v2185_v61  ;;  %1126 = vmatpush1.bf16.msra.mxu1 %v2187_v62  ;;  %v219_v61 = vld [vmem:[%s2432_s21 + $0x38] sm:$0xff] }
  0x2d   : > { %1086 = vmatprep.subr.bf16.mxu0 %v2154_v63  ;;  %1127 = vmatprep.subr.bf16.mxu1 %v2156_v0  ;;  %v235_v62 = vld [vmem:[%s2432_s21 + $0xb8] sm:$0xff]  ;;  %v2193_v63 = vcombine.low %v250_v51, %v266_v52  ;;  %v2195_v0 = vcombine.low %v251_v53, %v267_v54  ;;  %v2234_v51 = vcombine.high %v286_v45, %v302_v46  ;;  %v254_v53 = vld [vmem:[%s2432_s21 + $0x150] sm:$0xff] }
  0x2e   : > { %v2164_v3 = vcombine.high %v219_v61, %v235_v62  ;;  %v270_v54 = vld [vmem:[%s2432_s21 + $0x1d0] sm:$0xff] }
  0x30   : > { %1087 = vmatpush1.bf16.msra.mxu0 %v2153_v6  ;;  %1128 = vmatpush1.bf16.msra.mxu1 %v2155_v7  ;;  %v317_v6 = vld [vmem:[%s2432_s21 + $0x348] sm:$0xff] }
  0x31   : > { %1162 = vmatprep.subr.bf16.mxu0 %v2254_v8  ;;  %1203 = vmatprep.subr.bf16.mxu1 %v2256_v9  ;;  %v333_v7 = vld [vmem:[%s2432_s21 + $0x3c8] sm:$0xff]  ;;  %v2161_v8 = vcombine.low %v218_v59, %v234_v60  ;;  %v2163_v9 = vcombine.low %v219_v61, %v235_v62  ;;  %v2202_v59 = vcombine.high %v254_v53, %v270_v54  ;;  %v222_v61 = vld [vmem:[%s2432_s21 + $0x50] sm:$0xff] }
  0x32   : > { %v2264_v11 = vcombine.high %v317_v6, %v333_v7  ;;  %v238_v62 = vld [vmem:[%s2432_s21 + $0xd0] sm:$0xff] }
  0x33   : > { %2279 = vmatmul.mubr.msk.bf16.vlgmr.msra.gmra.mxu0 %vm986_vm0, %v2461_v44  ;;  %2280 = vmatmul.mubr.msk.bf16.vlgmr.msra.gmra.mxu1 %vm986_vm0, %v2461_v44 }
  0x34   : > { %1163 = vmatpush1.bf16.msra.mxu0 %v2253_v14  ;;  %1204 = vmatpush1.bf16.msra.mxu1 %v2255_v15  ;;  %v285_v14 = vld [vmem:[%s2432_s21 + $0x248] sm:$0xff] }
  0x35   : > { %1164 = vmatprep.subr.bf16.mxu0 %v2222_v16  ;;  %1205 = vmatprep.subr.bf16.mxu1 %v2224_v17  ;;  %v301_v15 = vld [vmem:[%s2432_s21 + $0x2c8] sm:$0xff]  ;;  %v2261_v16 = vcombine.low %v316_v4, %v332_v5  ;;  %v2263_v17 = vcombine.low %v317_v6, %v333_v7  ;;  %v2170_v4 = vcombine.high %v222_v61, %v238_v62  ;;  %v320_v6 = vld [vmem:[%s2432_s21 + $0x360] sm:$0xff] }
  0x36   : > { %1186 = vmatprep.mubr.bf16.mxu0 %v2381_v1  ;;  %1227 = vmatprep.mubr.bf16.mxu1 %v2381_v1  ;;  %v2232_v19 = vcombine.high %v285_v14, %v301_v15  ;;  %v336_v7 = vld [vmem:[%s2432_s21 + $0x3e0] sm:$0xff] }
  0x38   : > { %1165 = vmatpush1.bf16.msra.mxu0 %v2221_v22  ;;  %1206 = vmatpush1.bf16.msra.mxu1 %v2223_v23  ;;  %v253_v22 = vld [vmem:[%s2432_s21 + $0x148] sm:$0xff] }
  0x39   : > { %1166 = vmatprep.subr.bf16.mxu0 %v2190_v24  ;;  %1207 = vmatprep.subr.bf16.mxu1 %v2192_v25  ;;  %v269_v23 = vld [vmem:[%s2432_s21 + $0x1c8] sm:$0xff]  ;;  %v2229_v24 = vcombine.low %v284_v12, %v300_v13  ;;  %v2231_v25 = vcombine.low %v285_v14, %v301_v15  ;;  %v2270_v12 = vcombine.high %v320_v6, %v336_v7  ;;  %v288_v14 = vld [vmem:[%s2432_s21 + $0x260] sm:$0xff] }
  0x3a   : > { %v2200_v27 = vcombine.high %v253_v22, %v269_v23  ;;  %v304_v15 = vld [vmem:[%s2432_s21 + $0x2e0] sm:$0xff] }
  0x3c   : > { %1167 = vmatpush1.bf16.msra.mxu0 %v2189_v30  ;;  %1208 = vmatpush1.bf16.msra.mxu1 %v2191_v31  ;;  %v221_v30 = vld [vmem:[%s2432_s21 + $0x48] sm:$0xff] }
  0x3d   : > { %1168 = vmatprep.subr.bf16.mxu0 %v2158_v32  ;;  %1209 = vmatprep.subr.bf16.mxu1 %v2160_v33  ;;  %v237_v31 = vld [vmem:[%s2432_s21 + $0xc8] sm:$0xff]  ;;  %v2197_v32 = vcombine.low %v252_v20, %v268_v21  ;;  %v2199_v33 = vcombine.low %v253_v22, %v269_v23  ;;  %v2238_v20 = vcombine.high %v288_v14, %v304_v15  ;;  %v256_v22 = vld [vmem:[%s2432_s21 + $0x160] sm:$0xff] }
  0x3e   : > { %v2168_v35 = vcombine.high %v221_v30, %v237_v31  ;;  %v272_v23 = vld [vmem:[%s2432_s21 + $0x1e0] sm:$0xff] }
  0x40   : > { %1169 = vmatpush1.bf16.msra.mxu0 %v2157_v38  ;;  %1210 = vmatpush1.bf16.msra.mxu1 %v2159_v39  ;;  %v319_v38 = vld [vmem:[%s2432_s21 + $0x358] sm:$0xff] }
  0x41   : > { %1244 = vmatprep.subr.bf16.mxu0 %v2258_v40  ;;  %1285 = vmatprep.subr.bf16.mxu1 %v2260_v41  ;;  %v335_v39 = vld [vmem:[%s2432_s21 + $0x3d8] sm:$0xff]  ;;  %v2165_v40 = vcombine.low %v220_v28, %v236_v29  ;;  %v2167_v41 = vcombine.low %v221_v30, %v237_v31  ;;  %v2206_v28 = vcombine.high %v256_v22, %v272_v23  ;;  %v224_v30 = vld [vmem:[%s2432_s21 + $0x60] sm:$0xff] }
  0x42   : > { %v2268_v43 = vcombine.high %v319_v38, %v335_v39  ;;  %v240_v31 = vld [vmem:[%s2432_s21 + $0xe0] sm:$0xff] }
  0x43   : > { %2281 = vmatmul.mubr.msk.bf16.vlgmr.msra.gmra.mxu0 %vm986_vm0, %v2461_v44  ;;  %2282 = vmatmul.mubr.msk.bf16.vlgmr.msra.gmra.mxu1 %vm986_vm0, %v2461_v44 }
  0x44   : > { %1245 = vmatpush1.bf16.msra.mxu0 %v2257_v47  ;;  %1286 = vmatpush1.bf16.msra.mxu1 %v2259_v48  ;;  %v287_v47 = vld [vmem:[%s2432_s21 + $0x258] sm:$0xff] }
  0x45   : > { %1246 = vmatprep.subr.bf16.mxu0 %v2226_v49  ;;  %1287 = vmatprep.subr.bf16.mxu1 %v2228_v50  ;;  %v303_v48 = vld [vmem:[%s2432_s21 + $0x2d8] sm:$0xff]  ;;  %v2265_v49 = vcombine.low %v318_v36, %v334_v37  ;;  %v2267_v50 = vcombine.low %v319_v38, %v335_v39  ;;  %v2174_v36 = vcombine.high %v224_v30, %v240_v31  ;;  %v322_v38 = vld [vmem:[%s2432_s21 + $0x370] sm:$0xff] }
  0x46   : > { %1268 = vmatprep.mubr.bf16.mxu0 %v2381_v1  ;;  %1309 = vmatprep.mubr.bf16.mxu1 %v2381_v1  ;;  %v2236_v52 = vcombine.high %v287_v47, %v303_v48  ;;  %v338_v39 = vld [vmem:[%s2432_s21 + $0x3f0] sm:$0xff] }
  0x48   : > { %1247 = vmatpush1.bf16.msra.mxu0 %v2225_v55  ;;  %1288 = vmatpush1.bf16.msra.mxu1 %v2227_v56  ;;  %v255_v55 = vld [vmem:[%s2432_s21 + $0x158] sm:$0xff] }
  0x49   : > { %1248 = vmatprep.subr.bf16.mxu0 %v2194_v57  ;;  %1289 = vmatprep.subr.bf16.mxu1 %v2196_v58  ;;  %v271_v56 = vld [vmem:[%s2432_s21 + $0x1d8] sm:$0xff]  ;;  %v2233_v57 = vcombine.low %v286_v45, %v302_v46  ;;  %v2235_v58 = vcombine.low %v287_v47, %v303_v48  ;;  %v2274_v45 = vcombine.high %v322_v38, %v338_v39  ;;  %v290_v47 = vld [vmem:[%s2432_s21 + $0x270] sm:$0xff] }
  0x4a   : > { %v2204_v60 = vcombine.high %v255_v55, %v271_v56  ;;  %v306_v48 = vld [vmem:[%s2432_s21 + $0x2f0] sm:$0xff] }
  0x4c   : > { %1249 = vmatpush1.bf16.msra.mxu0 %v2193_v63  ;;  %1290 = vmatpush1.bf16.msra.mxu1 %v2195_v0  ;;  %v223_v63 = vld [vmem:[%s2432_s21 + $0x58] sm:$0xff] }
  0x4d   : > { %1250 = vmatprep.subr.bf16.mxu0 %v2162_v2  ;;  %1291 = vmatprep.subr.bf16.mxu1 %v2164_v3  ;;  %v239_v0 = vld [vmem:[%s2432_s21 + $0xd8] sm:$0xff]  ;;  %v2201_v2 = vcombine.low %v254_v53, %v270_v54  ;;  %v2203_v3 = vcombine.low %v255_v55, %v271_v56  ;;  %v2242_v53 = vcombine.high %v290_v47, %v306_v48  ;;  %v258_v55 = vld [vmem:[%s2432_s21 + $0x170] sm:$0xff] }
  0x4e   : > { %v2172_v5 = vcombine.high %v223_v63, %v239_v0  ;;  %v274_v56 = vld [vmem:[%s2432_s21 + $0x1f0] sm:$0xff] }
  0x50   : > { %1251 = vmatpush1.bf16.msra.mxu0 %v2161_v8  ;;  %1292 = vmatpush1.bf16.msra.mxu1 %v2163_v9  ;;  %v321_v8 = vld [vmem:[%s2432_s21 + $0x368] sm:$0xff] }
  0x51   : > { %1326 = vmatprep.subr.bf16.mxu0 %v2262_v10  ;;  %1367 = vmatprep.subr.bf16.mxu1 %v2264_v11  ;;  %v337_v9 = vld [vmem:[%s2432_s21 + $0x3e8] sm:$0xff]  ;;  %v2169_v10 = vcombine.low %v222_v61, %v238_v62  ;;  %v2171_v11 = vcombine.low %v223_v63, %v239_v0  ;;  %v2210_v61 = vcombine.high %v258_v55, %v274_v56  ;;  %v226_v63 = vld [vmem:[%s2432_s21 + $0x70] sm:$0xff] }
  0x52   : > { %v2272_v13 = vcombine.high %v321_v8, %v337_v9  ;;  %v242_v0 = vld [vmem:[%s2432_s21 + $0xf0] sm:$0xff] }
  0x53   : > { %2283 = vmatmul.mubr.msk.bf16.vlgmr.msra.gmra.mxu0 %vm986_vm0, %v2461_v44  ;;  %2284 = vmatmul.mubr.msk.bf16.vlgmr.msra.gmra.mxu1 %vm986_vm0, %v2461_v44 }
  0x54   : > { %1327 = vmatpush1.bf16.msra.mxu0 %v2261_v16  ;;  %1368 = vmatpush1.bf16.msra.mxu1 %v2263_v17  ;;  %v289_v16 = vld [vmem:[%s2432_s21 + $0x268] sm:$0xff] }
  0x55   : > { %1328 = vmatprep.subr.bf16.mxu0 %v2230_v18  ;;  %1369 = vmatprep.subr.bf16.mxu1 %v2232_v19  ;;  %v305_v17 = vld [vmem:[%s2432_s21 + $0x2e8] sm:$0xff]  ;;  %v2269_v18 = vcombine.low %v320_v6, %v336_v7  ;;  %v2271_v19 = vcombine.low %v321_v8, %v337_v9  ;;  %v2178_v6 = vcombine.high %v226_v63, %v242_v0 }
  0x56   : > { %1350 = vmatprep.mubr.bf16.mxu0 %v2381_v1  ;;  %1391 = vmatprep.mubr.bf16.mxu1 %v2381_v1  ;;  %v2240_v21 = vcombine.high %v289_v16, %v305_v17  ;;  %v2177_v8 = vcombine.low %v226_v63, %v242_v0 }
  0x58   : > { %1329 = vmatpush1.bf16.msra.mxu0 %v2229_v24  ;;  %1370 = vmatpush1.bf16.msra.mxu1 %v2231_v25  ;;  %v257_v24 = vld [vmem:[%s2432_s21 + $0x168] sm:$0xff] }
  0x59   : > { %1330 = vmatprep.subr.bf16.mxu0 %v2198_v26  ;;  %1371 = vmatprep.subr.bf16.mxu1 %v2200_v27  ;;  %v273_v25 = vld [vmem:[%s2432_s21 + $0x1e8] sm:$0xff]  ;;  %v2237_v26 = vcombine.low %v288_v14, %v304_v15  ;;  %v2239_v27 = vcombine.low %v289_v16, %v305_v17 }
  0x5a   : > { %v2208_v29 = vcombine.high %v257_v24, %v273_v25 }
  0x5c   : > { %1331 = vmatpush1.bf16.msra.mxu0 %v2197_v32  ;;  %1372 = vmatpush1.bf16.msra.mxu1 %v2199_v33  ;;  %v225_v32 = vld [vmem:[%s2432_s21 + $0x68] sm:$0xff] }
  0x5d   : > { %1332 = vmatprep.subr.bf16.mxu0 %v2166_v34  ;;  %1373 = vmatprep.subr.bf16.mxu1 %v2168_v35  ;;  %v241_v33 = vld [vmem:[%s2432_s21 + $0xe8] sm:$0xff]  ;;  %v2205_v34 = vcombine.low %v256_v22, %v272_v23  ;;  %v2207_v35 = vcombine.low %v257_v24, %v273_v25 }
  0x5e   : > { %v2176_v37 = vcombine.high %v225_v32, %v241_v33 }
  0x60   : > { %1333 = vmatpush1.bf16.msra.mxu0 %v2165_v40  ;;  %1374 = vmatpush1.bf16.msra.mxu1 %v2167_v41  ;;  %v323_v40 = vld [vmem:[%s2432_s21 + $0x378] sm:$0xff] }
  0x61   : > { %1408 = vmatprep.subr.bf16.mxu0 %v2266_v42  ;;  %1449 = vmatprep.subr.bf16.mxu1 %v2268_v43  ;;  %v339_v41 = vld [vmem:[%s2432_s21 + $0x3f8] sm:$0xff]  ;;  %v2173_v42 = vcombine.low %v224_v30, %v240_v31  ;;  %v2175_v43 = vcombine.low %v225_v32, %v241_v33 }
  0x62   : > { %v2276_v46 = vcombine.high %v323_v40, %v339_v41 }
  0x63   : > { %2285 = vmatmul.mubr.msk.bf16.vlgmr.msra.gmra.mxu0 %vm986_vm0, %v2461_v44  ;;  %2286 = vmatmul.mubr.msk.bf16.vlgmr.msra.gmra.mxu1 %vm986_vm0, %v2461_v44 }
  0x64   : > { %1409 = vmatpush1.bf16.msra.mxu0 %v2265_v49  ;;  %1450 = vmatpush1.bf16.msra.mxu1 %v2267_v50  ;;  %v291_v49 = vld [vmem:[%s2432_s21 + $0x278] sm:$0xff] }
  0x65   : > { %1410 = vmatprep.subr.bf16.mxu0 %v2234_v51  ;;  %1451 = vmatprep.subr.bf16.mxu1 %v2236_v52  ;;  %v307_v50 = vld [vmem:[%s2432_s21 + $0x2f8] sm:$0xff]  ;;  %v2273_v51 = vcombine.low %v322_v38, %v338_v39  ;;  %v2275_v52 = vcombine.low %v323_v40, %v339_v41 }
  0x66   : > { %1432 = vmatprep.mubr.bf16.mxu0 %v2381_v1  ;;  %1473 = vmatprep.mubr.bf16.mxu1 %v2381_v1  ;;  %v2244_v54 = vcombine.high %v291_v49, %v307_v50 }
  0x68   : > { %1411 = vmatpush1.bf16.msra.mxu0 %v2233_v57  ;;  %1452 = vmatpush1.bf16.msra.mxu1 %v2235_v58  ;;  %v259_v57 = vld [vmem:[%s2432_s21 + $0x178] sm:$0xff] }
  0x69   : > { %1412 = vmatprep.subr.bf16.mxu0 %v2202_v59  ;;  %1453 = vmatprep.subr.bf16.mxu1 %v2204_v60  ;;  %v275_v58 = vld [vmem:[%s2432_s21 + $0x1f8] sm:$0xff]  ;;  %v2241_v59 = vcombine.low %v290_v47, %v306_v48  ;;  %v2243_v60 = vcombine.low %v291_v49, %v307_v50 }
  0x6a   : > { %v2212_v62 = vcombine.high %v259_v57, %v275_v58 }
  0x6c   : > { %1413 = vmatpush1.bf16.msra.mxu0 %v2201_v2  ;;  %1454 = vmatpush1.bf16.msra.mxu1 %v2203_v3  ;;  %v227_v2 = vld [vmem:[%s2432_s21 + $0x78] sm:$0xff] }
  0x6d   : > { %1414 = vmatprep.subr.bf16.mxu0 %v2170_v4  ;;  %1455 = vmatprep.subr.bf16.mxu1 %v2172_v5  ;;  %v243_v3 = vld [vmem:[%s2432_s21 + $0xf8] sm:$0xff]  ;;  %v2209_v4 = vcombine.low %v258_v55, %v274_v56  ;;  %v2211_v5 = vcombine.low %v259_v57, %v275_v58 }
  0x6e   : > { %v2180_v7 = vcombine.high %v227_v2, %v243_v3  ;;  %v2179_v9 = vcombine.low %v227_v2, %v243_v3 }
  0x70   : > { %1415 = vmatpush1.bf16.msra.mxu0 %v2169_v10  ;;  %1456 = vmatpush1.bf16.msra.mxu1 %v2171_v11 }
  0x71   : > { %1490 = vmatprep.subr.bf16.mxu0 %v2270_v12  ;;  %1531 = vmatprep.subr.bf16.mxu1 %v2272_v13 }
  0x73   : > { %2287 = vmatmul.mubr.msk.bf16.vlgmr.msra.gmra.mxu0 %vm986_vm0, %v2461_v44  ;;  %2288 = vmatmul.mubr.msk.bf16.vlgmr.msra.gmra.mxu1 %vm986_vm0, %v2461_v44 }
  0x74   : > { %1491 = vmatpush1.bf16.msra.mxu0 %v2269_v18  ;;  %1532 = vmatpush1.bf16.msra.mxu1 %v2271_v19 }
  0x75   : > { %1492 = vmatprep.subr.bf16.mxu0 %v2238_v20  ;;  %1533 = vmatprep.subr.bf16.mxu1 %v2240_v21 }
  0x76   : > { %1514 = vmatprep.mubr.bf16.mxu0 %v2381_v1  ;;  %1555 = vmatprep.mubr.bf16.mxu1 %v2381_v1 }
  0x78   : > { %1493 = vmatpush1.bf16.msra.mxu0 %v2237_v26  ;;  %1534 = vmatpush1.bf16.msra.mxu1 %v2239_v27 }
  0x79   : > { %1494 = vmatprep.subr.bf16.mxu0 %v2206_v28  ;;  %1535 = vmatprep.subr.bf16.mxu1 %v2208_v29 }
  0x7c   : > { %1495 = vmatpush1.bf16.msra.mxu0 %v2205_v34  ;;  %1536 = vmatpush1.bf16.msra.mxu1 %v2207_v35 }
  0x7d   : > { %1496 = vmatprep.subr.bf16.mxu0 %v2174_v36  ;;  %1537 = vmatprep.subr.bf16.mxu1 %v2176_v37 }
  0x80   : > { %1497 = vmatpush1.bf16.msra.mxu0 %v2173_v42  ;;  %1538 = vmatpush1.bf16.msra.mxu1 %v2175_v43 }
  0x81   : > { %1572 = vmatprep.subr.bf16.mxu0 %v2274_v45  ;;  %1613 = vmatprep.subr.bf16.mxu1 %v2276_v46 }
  0x83   : > { %2289 = vmatmul.mubr.msk.bf16.vlgmr.msra.gmra.mxu0 %vm986_vm0, %v2461_v44  ;;  %2290 = vmatmul.mubr.msk.bf16.vlgmr.msra.gmra.mxu1 %vm986_vm0, %v2461_v44 }
  0x84   : > { %1573 = vmatpush1.bf16.msra.mxu0 %v2273_v51  ;;  %1614 = vmatpush1.bf16.msra.mxu1 %v2275_v52 }
  0x85   : > { %1574 = vmatprep.subr.bf16.mxu0 %v2242_v53  ;;  %1615 = vmatprep.subr.bf16.mxu1 %v2244_v54 }
  0x86   : > { %1596 = vmatprep.mubr.bf16.mxu0 %v2381_v1  ;;  %1637 = vmatprep.mubr.bf16.mxu1 %v2381_v1 }
  0x88   : > { %1575 = vmatpush1.bf16.msra.mxu0 %v2241_v59  ;;  %1616 = vmatpush1.bf16.msra.mxu1 %v2243_v60 }
  0x89   : > { %1576 = vmatprep.subr.bf16.mxu0 %v2210_v61  ;;  %1617 = vmatprep.subr.bf16.mxu1 %v2212_v62 }
  0x8a   : > { %v2613_v17 = vpop.permute.xlu0 %343 }
  0x8c   : > { %1577 = vmatpush1.bf16.msra.mxu0 %v2209_v4  ;;  %1618 = vmatpush1.bf16.msra.mxu1 %v2211_v5 }
  0x8d   : > { %1578 = vmatprep.subr.bf16.mxu0 %v2178_v6  ;;  %1619 = vmatprep.subr.bf16.mxu1 %v2180_v7 }
  0x90   : > { %1579 = vmatpush1.bf16.msra.mxu0 %v2177_v8  ;;  %1620 = vmatpush1.bf16.msra.mxu1 %v2179_v9 }
  0x93   : > { %2291 = vmatmul.mubr.msk.bf16.vlgmr.msra.gmra.mxu0 %vm986_vm0, %v2461_v44  ;;  %2292 = vmatmul.mubr.msk.bf16.vlgmr.msra.gmra.mxu1 %vm986_vm0, %v2461_v44 }
  0xe3   : > { %v1024_v1 = vpop.f32.mrf.mxu0  ;;  %v1065_v10 = vpop.f32.mrf.mxu1 }
  0xe4   : > { %v2616_v19 = vadd.f32 %v1024_v1, %v2613_v17  ;;  %v2624_v25 = vadd.f32 %v1065_v10, %v2613_v17 }
  0xe5   : > { %v1026_v11 = vpop.f32.mrf.mxu0  ;;  %v1067_v12 = vpop.f32.mrf.mxu1 }
  0xe6   : > { %v2619_v20 = vadd.f32 %v1026_v11, %v2613_v17  ;;  %v2627_v29 = vadd.f32 %v1067_v12, %v2613_v17 }
  0xe7   : > { %v1028_v13 = vpop.f32.mrf.mxu0  ;;  %v1069_v14 = vpop.f32.mrf.mxu1 }
  0xe8   : > { %v1646_v24 = vadd.f32 %v2619_v20, %v2616_v19 }
  0xe9   : > { %v1029_v15 = vpop.f32.mrf.mxu0  ;;  %v1070_v16 = vpop.f32.mrf.mxu1 }
  0xea   : > { %v1647_v30 = vadd.f32 %v1646_v24, %v2624_v25 }
  0xec   : > { %v1648_v32 = vadd.f32 %v1647_v30, %v2627_v29 }
  0xf3   : > { %v1106_v18 = vpop.f32.mrf.mxu0  ;;  %v1147_v21 = vpop.f32.mrf.mxu1 }
  0xf4   : > { %v2631_v31 = vadd.f32 %v1106_v18, %v2613_v17  ;;  %v2639_v38 = vadd.f32 %v1147_v21, %v2613_v17 }
  0xf5   : > { %v1108_v22 = vpop.f32.mrf.mxu0  ;;  %v1149_v44 = vpop.f32.mrf.mxu1 }
  0xf6   : > { %v1649_v33 = vadd.f32 %v1648_v32, %v2631_v31  ;;  %v2636_v34 = vadd.f32 %v1108_v22, %v2613_v17  ;;  %v2643_v45 = vadd.f32 %v1149_v44, %v2613_v17 }
  0xf7   : > { %v1110_v23 = vpop.f32.mrf.mxu0  ;;  %v1151_v26 = vpop.f32.mrf.mxu1 }
  0xf8   : > { %v1650_v39 = vadd.f32 %v1649_v33, %v2636_v34 }
  0xf9   : > { %v1111_v27 = vpop.f32.mrf.mxu0  ;;  %v1152_v28 = vpop.f32.mrf.mxu1 }
  0xfa   : > { %v1651_v46 = vadd.f32 %v1650_v39, %v2639_v38 }
  0xfc   : > { %v1652_v49 = vadd.f32 %v1651_v46, %v2643_v45 }
 0x103   : > { %v1188_v35 = vpop.f32.mrf.mxu0  ;;  %v1229_v36 = vpop.f32.mrf.mxu1 }
 0x104   : > { %v2647_v48 = vadd.f32 %v1188_v35, %v2613_v17  ;;  %v2655_v53 = vadd.f32 %v1229_v36, %v2613_v17 }
 0x105   : > { %v1190_v37 = vpop.f32.mrf.mxu0  ;;  %v1231_v40 = vpop.f32.mrf.mxu1 }
 0x106   : > { %v1653_v50 = vadd.f32 %v1652_v49, %v2647_v48  ;;  %v2652_v51 = vadd.f32 %v1190_v37, %v2613_v17  ;;  %v2659_v59 = vadd.f32 %v1231_v40, %v2613_v17 }
 0x107   : > { %v1192_v41 = vpop.f32.mrf.mxu0  ;;  %v1233_v42 = vpop.f32.mrf.mxu1 }
 0x108   : > { %v1654_v54 = vadd.f32 %v1653_v50, %v2652_v51 }
 0x109   : > { %v1193_v43 = vpop.f32.mrf.mxu0  ;;  %v1234_v47 = vpop.f32.mrf.mxu1 }
 0x10a   : > { %v1655_v60 = vadd.f32 %v1654_v54, %v2655_v53 }
 0x10c   : > { %v1656_v2 = vadd.f32 %v1655_v60, %v2659_v59 }
 0x113   : > { %v1270_v52 = vpop.f32.mrf.mxu0  ;;  %v1311_v55 = vpop.f32.mrf.mxu1 }
 0x114   : > { %v2663_v63 = vadd.f32 %v1270_v52, %v2613_v17  ;;  %v2671_v5 = vadd.f32 %v1311_v55, %v2613_v17 }
 0x115   : > { %v1272_v56 = vpop.f32.mrf.mxu0  ;;  %v1313_v57 = vpop.f32.mrf.mxu1 }
 0x116   : > { %v1657_v3 = vadd.f32 %v1656_v2, %v2663_v63  ;;  %v2668_v4 = vadd.f32 %v1272_v56, %v2613_v17  ;;  %v2675_v1 = vadd.f32 %v1313_v57, %v2613_v17 }
 0x117   : > { %v1274_v58 = vpop.f32.mrf.mxu0  ;;  %v1315_v61 = vpop.f32.mrf.mxu1 }
 0x118   : > { %v1658_v6 = vadd.f32 %v1657_v3, %v2668_v4 }
 0x119   : > { %v1275_v62 = vpop.f32.mrf.mxu0  ;;  %v1316_v0 = vpop.f32.mrf.mxu1 }
 0x11a   : > { %v1659_v10 = vadd.f32 %v1658_v6, %v2671_v5 }
 0x11c   : > { %v1660_v16 = vadd.f32 %v1659_v10, %v2675_v1 }
 0x123   : > { %v1352_v7 = vpop.f32.mrf.mxu0  ;;  %v1393_v8 = vpop.f32.mrf.mxu1 }
 0x124   : > { %v2679_v13 = vadd.f32 %v1352_v7, %v2613_v17  ;;  %v2688_v23 = vadd.f32 %v1393_v8, %v2613_v17 }
 0x125   : > { %v1354_v9 = vpop.f32.mrf.mxu0  ;;  %v1395_v11 = vpop.f32.mrf.mxu1 }
 0x126   : > { %v1661_v21 = vadd.f32 %v1660_v16, %v2679_v13  ;;  %v2684_v22 = vadd.f32 %v1354_v9, %v2613_v17  ;;  %v2692_v30 = vadd.f32 %v1395_v11, %v2613_v17 }
 0x127   : > { %v1356_v12 = vpop.f32.mrf.mxu0  ;;  %v1397_v14 = vpop.f32.mrf.mxu1 }
 0x128   : > { %v1662_v44 = vadd.f32 %v1661_v21, %v2684_v22 }
 0x129   : > { %v1357_v15 = vpop.f32.mrf.mxu0  ;;  %v1398_v18 = vpop.f32.mrf.mxu1 }
 0x12a   : > { %v1663_v26 = vadd.f32 %v1662_v44, %v2688_v23 }
 0x12c   : > { %v1664_v36 = vadd.f32 %v1663_v26, %v2692_v30 }
 0x133   : > { %v1434_v24 = vpop.f32.mrf.mxu0  ;;  %v1475_v27 = vpop.f32.mrf.mxu1 }
 0x134   : > { %v2695_v32 = vadd.f32 %v1434_v24, %v2613_v17  ;;  %v2704_v46 = vadd.f32 %v1475_v27, %v2613_v17 }
 0x135   : > { %v1436_v28 = vpop.f32.mrf.mxu0  ;;  %v1477_v33 = vpop.f32.mrf.mxu1 }
 0x136   : > { %v1665_v40 = vadd.f32 %v1664_v36, %v2695_v32  ;;  %v2700_v41 = vadd.f32 %v1436_v28, %v2613_v17  ;;  %v2708_v50 = vadd.f32 %v1477_v33, %v2613_v17 }
 0x137   : > { %v1438_v35 = vpop.f32.mrf.mxu0  ;;  %v1479_v37 = vpop.f32.mrf.mxu1 }
 0x138   : > { %v1666_v43 = vadd.f32 %v1665_v40, %v2700_v41 }
 0x139   : > { %v1439_v39 = vpop.f32.mrf.mxu0  ;;  %v1480_v42 = vpop.f32.mrf.mxu1 }
 0x13a   : > { %v1667_v47 = vadd.f32 %v1666_v43, %v2704_v46 }
 0x13c   : > { %v1668_v56 = vadd.f32 %v1667_v47, %v2708_v50 }
 0x143   : > { %v1516_v49 = vpop.f32.mrf.mxu0  ;;  %v1557_v54 = vpop.f32.mrf.mxu1 }
 0x144   : > { %v2711_v52 = vadd.f32 %v1516_v49, %v2613_v17  ;;  %v2720_v6 = vadd.f32 %v1557_v54, %v2613_v17 }
 0x145   : > { %v1518_v55 = vpop.f32.mrf.mxu0  ;;  %v1559_v57 = vpop.f32.mrf.mxu1 }
 0x146   : > { %v1669_v60 = vadd.f32 %v1668_v56, %v2711_v52  ;;  %v2716_v61 = vadd.f32 %v1518_v55, %v2613_v17  ;;  %v2724_v8 = vadd.f32 %v1559_v57, %v2613_v17 }
 0x147   : > { %v1520_v58 = vpop.f32.mrf.mxu0  ;;  %v1561_v62 = vpop.f32.mrf.mxu1 }
 0x148   : > { %v1670_v3 = vadd.f32 %v1669_v60, %v2716_v61 }
 0x149   : > { %v1521_v0 = vpop.f32.mrf.mxu0  ;;  %v1562_v2 = vpop.f32.mrf.mxu1 }
 0x14a   : > { %v1671_v7 = vadd.f32 %v1670_v3, %v2720_v6 }
 0x14c   : > { %v1672_v10 = vadd.f32 %v1671_v7, %v2724_v8 }
 0x153   : > { %v1598_v9 = vpop.f32.mrf.mxu0  ;;  %v1639_v12 = vpop.f32.mrf.mxu1 }
 0x154   : > { %v2728_v11 = vadd.f32 %v1598_v9, %v2613_v17  ;;  %v2735_v44 = vadd.f32 %v1639_v12, %v2613_v17 }
 0x155   : > { %v1600_v14 = vpop.f32.mrf.mxu0  ;;  %v1641_v18 = vpop.f32.mrf.mxu1 }
 0x156   : > { %v1673_v15 = vadd.f32 %v1672_v10, %v2728_v11  ;;  %v2732_v16 = vadd.f32 %v1600_v14, %v2613_v17  ;;  %v2739_v28 = vadd.f32 %v1641_v18, %v2613_v17 }
 0x157   : > { %v1602_v21 = vpop.f32.mrf.mxu0  ;;  %v1643_v26 = vpop.f32.mrf.mxu1 }
 0x158   : > { %v1674_v24 = vadd.f32 %v1673_v15, %v2732_v16 }
 0x159   : > { %v1603_v27 = vpop.f32.mrf.mxu0  ;;  %v1644_v33 = vpop.f32.mrf.mxu1 }
 0x15a   : > { %v1675_v35 = vadd.f32 %v1674_v24, %v2735_v44 }
 0x15c   : > { %v1676_v36 = vadd.f32 %v1675_v35, %v2739_v28 }
 0x15e   : > { %1677 = vadd.xlane.f32.xlu0 %v1676_v36 }
 0x1e7   : > { %v1678_v37 = vpop.xlane.xlu0 %1677 }
 0x1e8   : > { %v2743_v39 = vmul.f32 0.00024414063, %v1678_v37 }
 0x1ea   : > { %v2747_v40 = vsub.f32 %v2616_v19, %v2743_v39  ;;  %v2751_v42 = vsub.f32 %v2619_v20, %v2743_v39  ;;  %v2755_v17 = vsub.f32 %v2624_v25, %v2743_v39  ;;  %v2763_v49 = vsub.f32 %v2627_v29, %v2743_v39 }
 0x1eb   : > { %v2767_v19 = vsub.f32 %v2631_v31, %v2743_v39  ;;  %v2773_v25 = vsub.f32 %v2636_v34, %v2743_v39  ;;  %v2779_v29 = vsub.f32 %v2639_v38, %v2743_v39  ;;  %v2785_v58 = vsub.f32 %v2643_v45, %v2743_v39 }
 0x1ec   : > { %v1713_v43 = vmul.f32 %v2747_v40, %v2747_v40  ;;  %v1714_v47 = vmul.f32 %v2751_v42, %v2751_v42  ;;  %v1715_v20 = vmul.f32 %v2755_v17, %v2755_v17  ;;  %v1716_v55 = vmul.f32 %v2763_v49, %v2763_v49 }
 0x1ed   : > { %v1717_v31 = vmul.f32 %v2767_v19, %v2767_v19  ;;  %v1718_v34 = vmul.f32 %v2773_v25, %v2773_v25  ;;  %v2791_v62 = vsub.f32 %v2647_v48, %v2743_v39  ;;  %v1719_v38 = vmul.f32 %v2779_v29, %v2779_v29 }
 0x1ee   : > { %v1745_v54 = vadd.f32 %v1714_v47, %v1713_v43  ;;  %v2797_v2 = vsub.f32 %v2652_v51, %v2743_v39  ;;  %v1720_v45 = vmul.f32 %v2785_v58, %v2785_v58  ;;  %v2803_v7 = vsub.f32 %v2655_v53, %v2743_v39 }
 0x1ef   : > { %v1721_v48 = vmul.f32 %v2791_v62, %v2791_v62  ;;  %v2809_v10 = vsub.f32 %v2659_v59, %v2743_v39  ;;  %v2815_v14 = vsub.f32 %v2663_v63, %v2743_v39  ;;  %v2821_v18 = vsub.f32 %v2668_v4, %v2743_v39 }
 0x1f0   : > { %v1746_v56 = vadd.f32 %v1745_v54, %v1715_v20  ;;  %v1722_v51 = vmul.f32 %v2797_v2, %v2797_v2  ;;  %v1723_v53 = vmul.f32 %v2803_v7, %v2803_v7  ;;  %v2827_v24 = vsub.f32 %v2671_v5, %v2743_v39 }
 0x1f1   : > { %v1724_v59 = vmul.f32 %v2809_v10, %v2809_v10  ;;  %v1725_v63 = vmul.f32 %v2815_v14, %v2815_v14  ;;  %v2833_v27 = vsub.f32 %v2675_v1, %v2743_v39  ;;  %v1726_v4 = vmul.f32 %v2821_v18, %v2821_v18 }
 0x1f2   : > { %v1747_v57 = vadd.f32 %v1746_v56, %v1716_v55  ;;  %v2839_v35 = vsub.f32 %v2679_v13, %v2743_v39  ;;  %v1727_v5 = vmul.f32 %v2827_v24, %v2827_v24  ;;  %v2845_v37 = vsub.f32 %v2684_v22, %v2743_v39 }
 0x1f3   : > { %v1728_v1 = vmul.f32 %v2833_v27, %v2833_v27  ;;  %v2851_v47 = vsub.f32 %v2688_v23, %v2743_v39  ;;  %v2857_v54 = vsub.f32 %v2692_v30, %v2743_v39  ;;  %v2863_v56 = vsub.f32 %v2695_v32, %v2743_v39 }
 0x1f4   : > { %v1748_v60 = vadd.f32 %v1747_v57, %v1717_v31  ;;  %v1729_v13 = vmul.f32 %v2839_v35, %v2839_v35  ;;  %v1730_v22 = vmul.f32 %v2845_v37, %v2845_v37  ;;  %v2869_v57 = vsub.f32 %v2700_v41, %v2743_v39 }
 0x1f5   : > { %v1731_v23 = vmul.f32 %v2851_v47, %v2851_v47  ;;  %v1732_v30 = vmul.f32 %v2857_v54, %v2857_v54  ;;  %v1733_v32 = vmul.f32 %v2863_v56, %v2863_v56 }
 0x1f6   : > { %v1749_v0 = vadd.f32 %v1748_v60, %v1718_v34  ;;  %v2875_v60 = vsub.f32 %v2704_v46, %v2743_v39  ;;  %v1706_v46 = vsub.f32 %v2716_v61, %v2743_v39  ;;  %v1710_v61 = vsub.f32 %v2732_v16, %v2743_v39 }
 0x1f8   : > { %v1750_v3 = vadd.f32 %v1749_v0, %v1719_v38  ;;  %v1704_v0 = vsub.f32 %v2708_v50, %v2743_v39 }
 0x1fa   : > { %v1751_v9 = vadd.f32 %v1750_v3, %v1720_v45  ;;  %v1734_v45 = vmul.f32 %v2869_v57, %v2869_v57  ;;  %v1705_v3 = vsub.f32 %v2711_v52, %v2743_v39  ;;  %v1709_v52 = vsub.f32 %v2728_v11, %v2743_v39 }
 0x1fc   : > { %v1752_v12 = vadd.f32 %v1751_v9, %v1721_v48  ;;  %v1735_v48 = vmul.f32 %v2875_v60, %v2875_v60  ;;  %v1737_v50 = vmul.f32 %v1705_v3, %v1705_v3 }
 0x1fe   : > { %v1753_v15 = vadd.f32 %v1752_v12, %v1722_v51  ;;  %v1736_v51 = vmul.f32 %v1704_v0, %v1704_v0 }
 0x200   : > { %v1754_v21 = vadd.f32 %v1753_v15, %v1723_v53  ;;  %v1707_v53 = vsub.f32 %v2720_v6, %v2743_v39  ;;  %v1711_v6 = vsub.f32 %v2735_v44, %v2743_v39 }
 0x202   : > { %v1755_v26 = vadd.f32 %v1754_v21, %v1724_v59  ;;  %v1708_v59 = vsub.f32 %v2724_v8, %v2743_v39  ;;  %v1738_v21 = vmul.f32 %v1706_v46, %v1706_v46  ;;  %v1712_v8 = vsub.f32 %v2739_v28, %v2743_v39 }
 0x204   : > { %v1756_v33 = vadd.f32 %v1755_v26, %v1725_v63  ;;  %v1739_v26 = vmul.f32 %v1707_v53, %v1707_v53  ;;  %v1744_v11 = vmul.f32 %v1712_v8, %v1712_v8 }
 0x206   : > { %v1757_v36 = vadd.f32 %v1756_v33, %v1726_v4  ;;  %v1740_v33 = vmul.f32 %v1708_v59, %v1708_v59 }
 0x208   : > { %v1758_v43 = vadd.f32 %v1757_v36, %v1727_v5  ;;  %v1741_v36 = vmul.f32 %v1709_v52, %v1709_v52 }
 0x20a   : > { %v1759_v20 = vadd.f32 %v1758_v43, %v1728_v1  ;;  %v1742_v43 = vmul.f32 %v1710_v61, %v1710_v61 }
 0x20c   : > { %v1760_v55 = vadd.f32 %v1759_v20, %v1729_v13  ;;  %v1743_v20 = vmul.f32 %v1711_v6, %v1711_v6 }
 0x20e   : > { %v1761_v31 = vadd.f32 %v1760_v55, %v1730_v22 }
 0x210   : > { %v1762_v34 = vadd.f32 %v1761_v31, %v1731_v23 }
 0x212   : > { %v1763_v38 = vadd.f32 %v1762_v34, %v1732_v30 }
 0x214   : > { %v1764_v41 = vadd.f32 %v1763_v38, %v1733_v32 }
 0x216   : > { %v1765_v9 = vadd.f32 %v1764_v41, %v1734_v45 }
 0x218   : > { %v1766_v12 = vadd.f32 %v1765_v9, %v1735_v48 }
 0x21a   : > { %v1767_v15 = vadd.f32 %v1766_v12, %v1736_v51 }
 0x21c   : > { %v1768_v63 = vadd.f32 %v1767_v15, %v1737_v50 }
 0x21e   : > { %v1769_v4 = vadd.f32 %v1768_v63, %v1738_v21 }
 0x220   : > { %v1770_v5 = vadd.f32 %v1769_v4, %v1739_v26 }
 0x222   : > { %v1771_v1 = vadd.f32 %v1770_v5, %v1740_v33 }
 0x224   : > { %v1772_v13 = vadd.f32 %v1771_v1, %v1741_v36 }
 0x226   : > { %v1773_v22 = vadd.f32 %v1772_v13, %v1742_v43 }
 0x228   : > { %v1774_v55 = vadd.f32 %v1773_v22, %v1743_v20 }
 0x22a   : > { %v1775_v23 = vadd.f32 %v1774_v55, %v1744_v11 }
 0x22c   : > { %1776 = vadd.xlane.f32.xlu1 %v1775_v23 }
 0x2b5   : > { %v1777_v31 = vpop.xlane.xlu1 %1776 }
 0x2b6   : > { %v1778_v16 = vmul.f32 0.00024414063, %v1777_v31 }
 0x2b8   : > { %v1779_v30 = vadd.f32 1e-05, %v1778_v16 }
 0x2ba   : > { %2355 = vrsqrt.f32 %v1779_v30 }
 0x2c7   : > { %v2356_v34 = vpop.eup %2355 }
 0x2c8   : > { %v2902_v44 = vmul.f32 %v2356_v34, %v2747_v40  ;;  %v2905_v32 = vmul.f32 %v2356_v34, %v2751_v42  ;;  %v2908_v28 = vmul.f32 %v2356_v34, %v2755_v17  ;;  %v2911_v39 = vmul.f32 %v2356_v34, %v2763_v49 }
 0x2c9   : > { %v2914_v38 = vmul.f32 %v2356_v34, %v2767_v19  ;;  %v2917_v45 = vmul.f32 %v2356_v34, %v2773_v25  ;;  %v2920_v41 = vmul.f32 %v2356_v34, %v2779_v29  ;;  %v2923_v40 = vmul.f32 %v2356_v34, %v2785_v58 }
 0x2ca   : > { %v2926_v42 = vmul.f32 %v2356_v34, %v2791_v62  ;;  %v2929_v17 = vmul.f32 %v2356_v34, %v2797_v2  ;;  %v2932_v49 = vmul.f32 %v2356_v34, %v2803_v7  ;;  %v2935_v19 = vmul.f32 %v2356_v34, %v2809_v10 }
 0x2cb   : > { %v2938_v25 = vmul.f32 %v2356_v34, %v2815_v14  ;;  %v2941_v29 = vmul.f32 %v2356_v34, %v2821_v18  ;;  %v2944_v58 = vmul.f32 %v2356_v34, %v2827_v24  ;;  %v2947_v62 = vmul.f32 %v2356_v34, %v2833_v27 }
 0x2cc   : > { %v2950_v2 = vmul.f32 %v2356_v34, %v2839_v35  ;;  %v2953_v7 = vmul.f32 %v2356_v34, %v2845_v37  ;;  %v2956_v10 = vmul.f32 %v2356_v34, %v2851_v47  ;;  %v2959_v14 = vmul.f32 %v2356_v34, %v2857_v54 }
 0x2cd   : > { %v2962_v18 = vmul.f32 %v2356_v34, %v2863_v56  ;;  %v2965_v24 = vmul.f32 %v2356_v34, %v2869_v57  ;;  %v2968_v27 = vmul.f32 %v2356_v34, %v2875_v60  ;;  %v2970_v35 = vmul.f32 %v2356_v34, %v1704_v0 }
 0x2ce   : > { %v2972_v48 = vmul.f32 %v2356_v34, %v1705_v3  ;;  %v2974_v37 = vmul.f32 %v2356_v34, %v1706_v46  ;;  %v2976_v47 = vmul.f32 %v2356_v34, %v1707_v53  ;;  %v2978_v9 = vmul.f32 %v2356_v34, %v1708_v59 }
 0x2cf   : > { %v2980_v54 = vmul.f32 %v2356_v34, %v1709_v52  ;;  %v2982_v56 = vmul.f32 %v2356_v34, %v1710_v61  ;;  %vm1813_vm1 = vcmp.gt.f32.partialorder %v2902_v44, 0.0  ;;  %vm1814_vm2 = vcmp.gt.f32.partialorder %v2905_v32, 0.0 }
 0x2d0   : > { %vm1815_vm3 = vcmp.gt.f32.partialorder %v2908_v28, 0.0  ;;  %vm1816_vm4 = vcmp.gt.f32.partialorder %v2911_v39, 0.0  ;;  %vm1817_vm5 = vcmp.gt.f32.partialorder %v2914_v38, 0.0  ;;  %vm1818_vm6 = vcmp.gt.f32.partialorder %v2917_v45, 0.0 }
 0x2d1   : > { %vm1819_vm7 = vcmp.gt.f32.partialorder %v2920_v41, 0.0  ;;  %vm1820_vm8 = vcmp.gt.f32.partialorder %v2923_v40, 0.0  ;;  %vm1821_vm9 = vcmp.gt.f32.partialorder %v2926_v42, 0.0  ;;  %v2994_v57 = vmul.f32 %v2356_v34, %v1711_v6 }
 0x2d2   : > { %v1845_v60 = vmul.f32 0.2, %v2902_v44  ;;  %v1846_v0 = vmul.f32 0.2, %v2905_v32  ;;  %v1847_v3 = vmul.f32 0.2, %v2908_v28  ;;  %v3003_v46 = vmul.f32 %v2356_v34, %v1712_v8 }
 0x2d3   : > { %vm1828_vm0 = vcmp.gt.f32.partialorder %v2947_v62, 0.0  ;;  %vm1829_vm11 = vcmp.gt.f32.partialorder %v2950_v2, 0.0  ;;  %v1848_v51 = vmul.f32 0.2, %v2911_v39  ;;  %v1849_v12 = vmul.f32 0.2, %v2914_v38 }
 0x2d4   : > { %v1850_v53 = vmul.f32 0.2, %v2917_v45  ;;  %vm1834_vm15 = vcmp.gt.f32.partialorder %v2965_v24, 0.0  ;;  %v1851_v50 = vmul.f32 0.2, %v2920_v41  ;;  %v3022_v21 = vsel %vm1813_vm1, %v2902_v44, %v1845_v60 }
 0x2d5   : > { %v1852_v15 = vmul.f32 0.2, %v2923_v40  ;;  %v1853_v59 = vmul.f32 0.2, %v2926_v42  ;;  %vm1838_vm10 = vcmp.gt.f32.partialorder %v2974_v37, 0.0  ;;  %v3034_v4 = vsel %vm1814_vm2, %v2905_v32, %v1846_v0 }
 0x2d6   : > { %v1854_v63 = vmul.f32 0.2, %v2929_v17  ;;  %v1855_v52 = vmul.f32 0.2, %v2932_v49  ;;  %v1856_v26 = vmul.f32 0.2, %v2935_v19  ;;  %v1879_v6 = vsel %vm1815_vm3, %v2908_v28, %v1847_v3 }
 0x2d7   : > { %vm1840_vm12 = vcmp.gt.f32.partialorder %v2978_v9, 0.0  ;;  %vm1841_vm14 = vcmp.gt.f32.partialorder %v2980_v54, 0.0  ;;  %vm1842_vm13 = vcmp.gt.f32.partialorder %v2982_v56, 0.0  ;;  %v1857_v61 = vmul.f32 0.2, %v2938_v25 }
 0x2d8   : > { %v1858_v33 = vmul.f32 0.2, %v2941_v29  ;;  %v1859_v5 = vmul.f32 0.2, %v2944_v58  ;;  %vm1843_vm2 = vcmp.gt.f32.partialorder %v2994_v57, 0.0  ;;  %vm1844_vm1 = vcmp.gt.f32.partialorder %v3003_v46, 0.0 }
 0x2d9   : > { %v1860_v36 = vmul.f32 0.2, %v2947_v62  ;;  %v1861_v1 = vmul.f32 0.2, %v2950_v2  ;;  %v1862_v8 = vmul.f32 0.2, %v2953_v7  ;;  %v1880_v43 = vsel %vm1816_vm4, %v2911_v39, %v1848_v51 }
 0x2da   : > { %v1863_v13 = vmul.f32 0.2, %v2956_v10  ;;  %v1864_v20 = vmul.f32 0.2, %v2959_v14  ;;  %v1865_v22 = vmul.f32 0.2, %v2962_v18  ;;  %v1881_v11 = vsel %vm1817_vm5, %v2914_v38, %v1849_v12 }
 0x2db   : > { %v1866_v55 = vmul.f32 0.2, %v2965_v24  ;;  %v1867_v23 = vmul.f32 0.2, %v2968_v27  ;;  %v1868_v31 = vmul.f32 0.2, %v2970_v35  ;;  %v1882_v16 = vsel %vm1818_vm6, %v2917_v45, %v1850_v53 }
 0x2dc   : > { %v1869_v30 = vmul.f32 0.2, %v2972_v48  ;;  %v1870_v34 = vmul.f32 0.2, %v2974_v37  ;;  %v1871_v44 = vmul.f32 0.2, %v2976_v47  ;;  %v1883_v32 = vsel %vm1819_vm7, %v2920_v41, %v1851_v50 }
 0x2dd   : > { %v1872_v28 = vmul.f32 0.2, %v2978_v9  ;;  %v1873_v39 = vmul.f32 0.2, %v2980_v54  ;;  %v1874_v38 = vmul.f32 0.2, %v2982_v56  ;;  %v1884_v45 = vsel %vm1820_vm8, %v2923_v40, %v1852_v15 }
 0x2de   : > { %v1875_v60 = vmul.f32 0.2, %v2994_v57  ;;  %v1876_v0 = vmul.f32 0.2, %v3003_v46  ;;  %v1885_v3 = vsel %vm1821_vm9, %v2926_v42, %v1853_v59  ;;  %vm3189_vm3 = vcmp.gt.f32.partialorder %v2929_v17, 0.0 }
 0x2df   : > { %v1886_v41 = vsel %vm3189_vm3, %v2929_v17, %v1854_v63  ;;  %vm3190_vm4 = vcmp.gt.f32.partialorder %v2932_v49, 0.0  ;;  %vm3191_vm5 = vcmp.gt.f32.partialorder %v2935_v19, 0.0  ;;  %vm3192_vm6 = vcmp.gt.f32.partialorder %v2938_v25, 0.0 }
 0x2e0   : > { %v1887_v51 = vsel %vm3190_vm4, %v2932_v49, %v1855_v52  ;;  %v1888_v40 = vsel %vm3191_vm5, %v2935_v19, %v1856_v26  ;;  %v1889_v12 = vsel %vm3192_vm6, %v2938_v25, %v1857_v61  ;;  %vm3193_vm7 = vcmp.gt.f32.partialorder %v2941_v29, 0.0 }
 0x2e1   : > { %v1890_v42 = vsel %vm3193_vm7, %v2941_v29, %v1858_v33  ;;  %vm3194_vm8 = vcmp.gt.f32.partialorder %v2944_v58, 0.0  ;;  %v1892_v49 = vsel %vm1828_vm0, %v2947_v62, %v1860_v36  ;;  %v1893_v19 = vsel %vm1829_vm11, %v2950_v2, %v1861_v1 }
 0x2e2   : > { %v1891_v17 = vsel %vm3194_vm8, %v2944_v58, %v1859_v5  ;;  %vm3195_vm9 = vcmp.gt.f32.partialorder %v2953_v7, 0.0  ;;  %vm3196_vm3 = vcmp.gt.f32.partialorder %v2956_v10, 0.0  ;;  %vm3197_vm4 = vcmp.gt.f32.partialorder %v2959_v14, 0.0 }
 0x2e3   : > { %v1894_v25 = vsel %vm3195_vm9, %v2953_v7, %v1862_v8  ;;  %v1895_v29 = vsel %vm3196_vm3, %v2956_v10, %v1863_v13  ;;  %v1896_v58 = vsel %vm3197_vm4, %v2959_v14, %v1864_v20  ;;  %vm3198_vm5 = vcmp.gt.f32.partialorder %v2962_v18, 0.0 }
 0x2e4   : > { %v1897_v62 = vsel %vm3198_vm5, %v2962_v18, %v1865_v22  ;;  %v1898_v2 = vsel %vm1834_vm15, %v2965_v24, %v1866_v55  ;;  %vm3199_vm11 = vcmp.gt.f32.partialorder %v2968_v27, 0.0  ;;  %vm3200_vm0 = vcmp.gt.f32.partialorder %v2970_v35, 0.0 }
 0x2e5   : > { %v1899_v7 = vsel %vm3199_vm11, %v2968_v27, %v1867_v23  ;;  %v1900_v10 = vsel %vm3200_vm0, %v2970_v35, %v1868_v31  ;;  %vm3201_vm6 = vcmp.gt.f32.partialorder %v2972_v48, 0.0  ;;  %v1902_v18 = vsel %vm1838_vm10, %v2974_v37, %v1870_v34 }
 0x2e6   : > { %v1901_v14 = vsel %vm3201_vm6, %v2972_v48, %v1869_v30  ;;  %vm3202_vm15 = vcmp.gt.f32.partialorder %v2976_v47, 0.0  ;;  %v1904_v27 = vsel %vm1840_vm12, %v2978_v9, %v1872_v28  ;;  %v1905_v35 = vsel %vm1841_vm14, %v2980_v54, %v1873_v39 }
 0x2e7   : > { %v1903_v24 = vsel %vm3202_vm15, %v2976_v47, %v1871_v44  ;;  %v1906_v48 = vsel %vm1842_vm13, %v2982_v56, %v1874_v38  ;;  %v1907_v37 = vsel %vm1843_vm2, %v2994_v57, %v1875_v60  ;;  %v1908_v47 = vsel %vm1844_vm1, %v3003_v46, %v1876_v0 }
 0x2e8   : > { %v2313_v9 = vpack.c.bf16 %v3034_v4, %v3022_v21  ;;  %v2314_v53 = vpack.c.bf16 %v1880_v43, %v1879_v6  ;;  %v2315_v50 = vpack.c.bf16 %v1882_v16, %v1881_v11  ;;  %v2316_v54 = vpack.c.bf16 %v1884_v45, %v1883_v32 }
 0x2e9   : > { %v2317_v15 = vpack.c.bf16 %v1886_v41, %v1885_v3  ;;  %v2318_v56 = vpack.c.bf16 %v1888_v40, %v1887_v51  ;;  %v2319_v59 = vpack.c.bf16 %v1890_v42, %v1889_v12  ;;  %v2320_v63 = vpack.c.bf16 %v1892_v49, %v1891_v17 }
 0x2ea   : > { %v2321_v57 = vpack.c.bf16 %v1894_v25, %v1893_v19  ;;  %v2322_v52 = vpack.c.bf16 %v1896_v58, %v1895_v29  ;;  %2037 = vst [vmem:[%s3138_s27] sm:$0xff] %v2313_v9  ;;  %2038 = vst [vmem:[%s3138_s27 + $0x8] sm:$0xff] %v2314_v53  ;;  %v2323_v46 = vpack.c.bf16 %v1898_v2, %v1897_v62 }
 0x2eb   : > { %v2324_v21 = vpack.c.bf16 %v1900_v10, %v1899_v7  ;;  %v2325_v26 = vpack.c.bf16 %v1902_v18, %v1901_v14  ;;  %v2326_v4 = vpack.c.bf16 %v1904_v27, %v1903_v24  ;;  %2039 = vst [vmem:[%s3138_s27 + $0x10] sm:$0xff] %v2315_v50  ;;  %2040 = vst [vmem:[%s3138_s27 + $0x18] sm:$0xff] %v2316_v54 }
 0x2ec   : > { %2041 = vst [vmem:[%s3138_s27 + $0x20] sm:$0xff] %v2317_v15  ;;  %2042 = vst [vmem:[%s3138_s27 + $0x28] sm:$0xff] %v2318_v56  ;;  %v2327_v61 = vpack.c.bf16 %v1906_v48, %v1905_v35  ;;  %v2328_v33 = vpack.c.bf16 %v1908_v47, %v1907_v37 }
 0x2ed   : > { %2043 = vst [vmem:[%s3138_s27 + $0x30] sm:$0xff] %v2319_v59  ;;  %2044 = vst [vmem:[%s3138_s27 + $0x38] sm:$0xff] %v2320_v63 }
 0x2ee   : > { %2045 = vst [vmem:[%s3138_s27 + $0x40] sm:$0xff] %v2321_v57  ;;  %2046 = vst [vmem:[%s3138_s27 + $0x48] sm:$0xff] %v2322_v52 }
 0x2ef   : > { %2047 = vst [vmem:[%s3138_s27 + $0x50] sm:$0xff] %v2323_v46  ;;  %2048 = vst [vmem:[%s3138_s27 + $0x58] sm:$0xff] %v2324_v21 }
 0x2f0   : > { %2049 = vst [vmem:[%s3138_s27 + $0x60] sm:$0xff] %v2325_v26  ;;  %2050 = vst [vmem:[%s3138_s27 + $0x68] sm:$0xff] %v2326_v4 }
 0x2f1   : > { %2051 = vst [vmem:[%s3138_s27 + $0x70] sm:$0xff] %v2327_v61  ;;  %2052 = vst [vmem:[%s3138_s27 + $0x78] sm:$0xff] %v2328_v33 }
 0x2f2 PF: > { %s13_s14 = sadd.s32 1, %s2379_s14   ;;  %s3203_s12 = smov %s2375_s13 }
 0x2f3   : > { %p10_p5 = scmp.ge.s32.totalorder %s13_s14, 4   ;;  %s3204_s13 = smov %s3206_s15 }
 0x2f5   :  { %12 = sbr.rel (!%p10_p5) target bundleno = 2 (0x2), region = 62 }

// kernel: discriminator_forward.7
= control target key start
LH: loop header
LB: loop body
LE: loop exit
PB: predicated region body
PF: predicated region fallthrough
CT: control target
= control target key end

     0   :  { %s1241_s12 = smov 0   ;;  %s1243_s13 = smov 0   ;;  %s1430_s0 = inlined_call_operand.vmem [shape: bf16[2,128,1024], index: 0, kind: input, shape index: {}]   ;;  %s1431_s1 = inlined_call_operand.vmem [shape: bf16[16,128], index: 1, kind: input, shape index: {}]   ;;  %s1432_s2 = inlined_call_operand.vmem [shape: f32[16,1], index: 2, kind: input, shape index: {}]   ;;  %s1433_s3 = inlined_call_operand.vmem [shape: bf16[2,16,1024], index: 3, kind: output, shape index: {}]  }
   0x1   :  { %s1245_s14 = smov 0  }
   0x2 LB: > { %s25_s15 = sadd.s32 1, %s1214_s13  ;;  %p1075_p0 = scmp.ge.s32.totalorder %s1218_s14, 1  ;;  %s1218_s14 = sphi %s1245_s14, %s13_s14   ;;  %s1214_s13 = sphi %s1243_s13, %s1435_s13   ;;  %s1210_s12 = sphi %s1241_s12, %s1434_s12  }
   0x3   : > { %p27_p1 = scmp.ge.s32.totalorder %s25_s15, 2  ;;  %p158_p2 = scmp.lt.s32.totalorder %s1218_s14, 3 }
   0x5   : > { %s1437_s15 = smov (%p27_p1, %s25_s15), 0  ;;  %p159_p3 = pnand %p1075_p0, %p158_p2 }
   0x6   : > { %p191_p4 = scmp.lt.s32.totalorder (!%p159_p3), %s1210_s12, 1 }
   0x7   : > { %162 = sbr.rel (%p159_p3) target bundleno = 621 (0x26d), region = 32 }
   0xc   : > { %v1220_v0 = vmov 0   ;;  %v277_v1 = vld [vmem:[%s1432_s2] sm:$0xff]  ;;  %s1439_s12 = smov (!%p191_p4, %s1210_s12), 1  ;;  %v278_v2 = vld [vmem:[%s1432_s2 + $0x8] sm:$0xff] }
   0xd   : > { %647 = vmatprep.mubr.bf16.mxu0 %v1220_v0  ;;  %690 = vmatprep.mubr.bf16.mxu1 %v1220_v0  ;;  %s1155_s18 = sshll.u32 %s1439_s12, 9  ;;  %s1156_s26 = sshll.u32 %s1439_s12, 6 }
   0xe   : > { %1190 = vset.pattern.permute.xlu0 %v1220_v0  ;;  %s1274_s23 = scalar_lea.vmem %s1430_s0, %s1155_s18  ;;  %s1390_s29 = scalar_lea.vmem %s1433_s3, %s1156_s26 }
   0xf   : > { %281 = vperm.xlu0 %1190, %v277_v1   ;;  %v269_v3 = vld [vmem:[%s1274_s23 + $0x1c0] sm:$0xff]  ;;  %v270_v5 = vld [vmem:[%s1274_s23 + $0x1c8] sm:$0xff] }
  0x10   : > { %v273_v4 = vld [vmem:[%s1274_s23 + $0x1e0] sm:$0xff]  ;;  %v274_v7 = vld [vmem:[%s1274_s23 + $0x1e8] sm:$0xff] }
  0x11   : > { %v1138_v6 = vcombine.high %v269_v3, %v273_v4  ;;  %v1137_v8 = vcombine.low %v269_v3, %v273_v4  ;;  %v261_v9 = vld [vmem:[%s1274_s23 + $0x180] sm:$0xff]  ;;  %v1140_v11 = vcombine.high %v270_v5, %v274_v7  ;;  %v1139_v12 = vcombine.low %v270_v5, %v274_v7  ;;  %v262_v14 = vld [vmem:[%s1274_s23 + $0x188] sm:$0xff]  ;;  %v275_v3 = vld [vmem:[%s1274_s23 + $0x1f0] sm:$0xff] }
  0x12   : > { %v265_v10 = vld [vmem:[%s1274_s23 + $0x1a0] sm:$0xff]  ;;  %v266_v15 = vld [vmem:[%s1274_s23 + $0x1a8] sm:$0xff]  ;;  %v272_v4 = vld [vmem:[%s1274_s23 + $0x1d8] sm:$0xff] }
  0x13   : > { %286 = vperm.xlu0 %1190, %v278_v2   ;;  %v1130_v13 = vcombine.high %v261_v9, %v265_v10  ;;  %v253_v16 = vld [vmem:[%s1274_s23 + $0x140] sm:$0xff]  ;;  %615 = vmatprep.subr.bf16.mxu0 %v1138_v6  ;;  %v1132_v17 = vcombine.high %v262_v14, %v266_v15  ;;  %v254_v19 = vld [vmem:[%s1274_s23 + $0x148] sm:$0xff]  ;;  %v1129_v21 = vcombine.low %v261_v9, %v265_v10  ;;  %v271_v2 = vld [vmem:[%s1274_s23 + $0x1d0] sm:$0xff] }
  0x14   : > { %v257_v18 = vld [vmem:[%s1274_s23 + $0x160] sm:$0xff]  ;;  %v258_v20 = vld [vmem:[%s1274_s23 + $0x168] sm:$0xff]  ;;  %658 = vmatprep.subr.bf16.mxu1 %v1140_v11  ;;  %616 = vmatpush1.bf16.msra.mxu0 %v1137_v8  ;;  %v1131_v22 = vcombine.low %v262_v14, %v266_v15  ;;  %v276_v5 = vld [vmem:[%s1274_s23 + $0x1f8] sm:$0xff]  ;;  %v1142_v8 = vcombine.high %v271_v2, %v275_v3  ;;  %v1141_v15 = vcombine.low %v271_v2, %v275_v3 }
  0x15   : > { %659 = vmatpush1.bf16.msra.mxu1 %v1139_v12  ;;  %617 = vmatprep.subr.bf16.mxu0 %v1130_v13  ;;  %v1122_v23 = vcombine.high %v253_v16, %v257_v18  ;;  %v1124_v24 = vcombine.high %v254_v19, %v258_v20  ;;  %v245_v25 = vld [vmem:[%s1274_s23 + $0x100] sm:$0xff]  ;;  %v246_v27 = vld [vmem:[%s1274_s23 + $0x108] sm:$0xff]  ;;  %v1121_v29 = vcombine.low %v253_v16, %v257_v18  ;;  %v263_v10 = vld [vmem:[%s1274_s23 + $0x190] sm:$0xff] }
  0x16   : > { %660 = vmatprep.subr.bf16.mxu1 %v1132_v17  ;;  %v249_v26 = vld [vmem:[%s1274_s23 + $0x120] sm:$0xff]  ;;  %v250_v28 = vld [vmem:[%s1274_s23 + $0x128] sm:$0xff]  ;;  %v1123_v30 = vcombine.low %v254_v19, %v258_v20  ;;  %v1144_v9 = vcombine.high %v272_v4, %v276_v5  ;;  %v267_v11 = vld [vmem:[%s1274_s23 + $0x1b0] sm:$0xff]  ;;  %v1143_v16 = vcombine.low %v272_v4, %v276_v5 }
  0x17   : > { %v1114_v31 = vcombine.high %v245_v25, %v249_v26  ;;  %v1116_v32 = vcombine.high %v246_v27, %v250_v28  ;;  %v237_v33 = vld [vmem:[%s1274_s23 + $0xc0] sm:$0xff]  ;;  %v238_v35 = vld [vmem:[%s1274_s23 + $0xc8] sm:$0xff]  ;;  %v1113_v37 = vcombine.low %v245_v25, %v249_v26  ;;  %v1115_v38 = vcombine.low %v246_v27, %v250_v28  ;;  %v264_v13 = vld [vmem:[%s1274_s23 + $0x198] sm:$0xff] }
  0x18   : > { %618 = vmatpush1.bf16.msra.mxu0 %v1129_v21  ;;  %v241_v34 = vld [vmem:[%s1274_s23 + $0xe0] sm:$0xff]  ;;  %v242_v36 = vld [vmem:[%s1274_s23 + $0xe8] sm:$0xff]  ;;  %v268_v14 = vld [vmem:[%s1274_s23 + $0x1b8] sm:$0xff]  ;;  %v1134_v17 = vcombine.high %v263_v10, %v267_v11 }
  0x19   : > { %661 = vmatpush1.bf16.msra.mxu1 %v1131_v22  ;;  %619 = vmatprep.subr.bf16.mxu0 %v1122_v23  ;;  %v1106_v39 = vcombine.high %v237_v33, %v241_v34  ;;  %v1108_v40 = vcombine.high %v238_v35, %v242_v36  ;;  %v229_v41 = vld [vmem:[%s1274_s23 + $0x80] sm:$0xff]  ;;  %v230_v43 = vld [vmem:[%s1274_s23 + $0x88] sm:$0xff]  ;;  %v1105_v45 = vcombine.low %v237_v33, %v241_v34  ;;  %v255_v19 = vld [vmem:[%s1274_s23 + $0x150] sm:$0xff] }
  0x1a   : > { %662 = vmatprep.subr.bf16.mxu1 %v1124_v24  ;;  %v233_v42 = vld [vmem:[%s1274_s23 + $0xa0] sm:$0xff]  ;;  %v234_v44 = vld [vmem:[%s1274_s23 + $0xa8] sm:$0xff]  ;;  %v1107_v46 = vcombine.low %v238_v35, %v242_v36  ;;  %v1136_v18 = vcombine.high %v264_v13, %v268_v14  ;;  %v259_v20 = vld [vmem:[%s1274_s23 + $0x170] sm:$0xff]  ;;  %v1133_v23 = vcombine.low %v263_v10, %v267_v11  ;;  %v1135_v24 = vcombine.low %v264_v13, %v268_v14 }
  0x1b   : > { %v1098_v47 = vcombine.high %v229_v41, %v233_v42  ;;  %v1100_v48 = vcombine.high %v230_v43, %v234_v44  ;;  %v221_v49 = vld [vmem:[%s1274_s23 + $0x40] sm:$0xff]  ;;  %v222_v51 = vld [vmem:[%s1274_s23 + $0x48] sm:$0xff]  ;;  %v1097_v53 = vcombine.low %v229_v41, %v233_v42  ;;  %v1099_v54 = vcombine.low %v230_v43, %v234_v44  ;;  %v256_v21 = vld [vmem:[%s1274_s23 + $0x158] sm:$0xff] }
  0x1c   : > { %620 = vmatpush1.bf16.msra.mxu0 %v1121_v29  ;;  %v225_v50 = vld [vmem:[%s1274_s23 + $0x60] sm:$0xff]  ;;  %v226_v52 = vld [vmem:[%s1274_s23 + $0x68] sm:$0xff]  ;;  %v260_v22 = vld [vmem:[%s1274_s23 + $0x178] sm:$0xff]  ;;  %v1126_v25 = vcombine.high %v255_v19, %v259_v20 }
  0x1d   : > { %663 = vmatpush1.bf16.msra.mxu1 %v1123_v30  ;;  %621 = vmatprep.subr.bf16.mxu0 %v1114_v31  ;;  %v1090_v55 = vcombine.high %v221_v49, %v225_v50  ;;  %v1092_v56 = vcombine.high %v222_v51, %v226_v52  ;;  %v213_v57 = vld [vmem:[%s1274_s23] sm:$0xff]  ;;  %v214_v59 = vld [vmem:[%s1274_s23 + $0x8] sm:$0xff]  ;;  %v1089_v61 = vcombine.low %v221_v49, %v225_v50  ;;  %v247_v27 = vld [vmem:[%s1274_s23 + $0x110] sm:$0xff] }
  0x1e   : > { %664 = vmatprep.subr.bf16.mxu1 %v1116_v32  ;;  %v217_v58 = vld [vmem:[%s1274_s23 + $0x20] sm:$0xff]  ;;  %v218_v60 = vld [vmem:[%s1274_s23 + $0x28] sm:$0xff]  ;;  %v1091_v62 = vcombine.low %v222_v51, %v226_v52  ;;  %v1128_v26 = vcombine.high %v256_v21, %v260_v22  ;;  %v251_v28 = vld [vmem:[%s1274_s23 + $0x130] sm:$0xff]  ;;  %v1125_v31 = vcombine.low %v255_v19, %v259_v20  ;;  %v1127_v32 = vcombine.low %v256_v21, %v260_v22 }
  0x1f   : > { %v1082_v63 = vcombine.high %v213_v57, %v217_v58  ;;  %v1084_v1 = vcombine.high %v214_v59, %v218_v60  ;;  %v1081_v6 = vcombine.low %v213_v57, %v217_v58  ;;  %v1083_v7 = vcombine.low %v214_v59, %v218_v60  ;;  %v1317_v12 = vld [vmem:[%s1431_s1] sm:$0xff]   ;;  %v248_v29 = vld [vmem:[%s1274_s23 + $0x118] sm:$0xff]  ;;  %v239_v35 = vld [vmem:[%s1274_s23 + $0xd0] sm:$0xff] }
  0x20   : > { %622 = vmatpush1.bf16.msra.mxu0 %v1113_v37  ;;  %v252_v30 = vld [vmem:[%s1274_s23 + $0x138] sm:$0xff]  ;;  %v1118_v33 = vcombine.high %v247_v27, %v251_v28  ;;  %v243_v36 = vld [vmem:[%s1274_s23 + $0xf0] sm:$0xff] }
  0x21   : > { %665 = vmatpush1.bf16.msra.mxu1 %v1115_v38  ;;  %623 = vmatprep.subr.bf16.mxu0 %v1106_v39  ;;  %v1120_v34 = vcombine.high %v248_v29, %v252_v30  ;;  %v240_v37 = vld [vmem:[%s1274_s23 + $0xd8] sm:$0xff]  ;;  %v1117_v39 = vcombine.low %v247_v27, %v251_v28  ;;  %v231_v42 = vld [vmem:[%s1274_s23 + $0x90] sm:$0xff] }
  0x22   : > { %666 = vmatprep.subr.bf16.mxu1 %v1108_v40  ;;  %v244_v38 = vld [vmem:[%s1274_s23 + $0xf8] sm:$0xff]  ;;  %v1110_v40 = vcombine.high %v239_v35, %v243_v36  ;;  %v235_v43 = vld [vmem:[%s1274_s23 + $0xb0] sm:$0xff] }
  0x23   : > { %v1112_v41 = vcombine.high %v240_v37, %v244_v38  ;;  %v232_v44 = vld [vmem:[%s1274_s23 + $0x98] sm:$0xff]  ;;  %v223_v50 = vld [vmem:[%s1274_s23 + $0x50] sm:$0xff] }
  0x24   : > { %624 = vmatpush1.bf16.msra.mxu0 %v1105_v45  ;;  %v236_v45 = vld [vmem:[%s1274_s23 + $0xb8] sm:$0xff]  ;;  %v227_v51 = vld [vmem:[%s1274_s23 + $0x70] sm:$0xff] }
  0x25   : > { %667 = vmatpush1.bf16.msra.mxu1 %v1107_v46  ;;  %625 = vmatprep.subr.bf16.mxu0 %v1098_v47  ;;  %v1109_v46 = vcombine.low %v239_v35, %v243_v36  ;;  %v1111_v47 = vcombine.low %v240_v37, %v244_v38  ;;  %v1104_v49 = vcombine.high %v232_v44, %v236_v45  ;;  %v224_v52 = vld [vmem:[%s1274_s23 + $0x58] sm:$0xff]  ;;  %v215_v58 = vld [vmem:[%s1274_s23 + $0x10] sm:$0xff] }
  0x26   : > { %668 = vmatprep.subr.bf16.mxu1 %v1100_v48  ;;  %v1102_v48 = vcombine.high %v231_v42, %v235_v43  ;;  %v219_v59 = vld [vmem:[%s1274_s23 + $0x30] sm:$0xff]  ;;  %v216_v60 = vld [vmem:[%s1274_s23 + $0x18] sm:$0xff] }
  0x27   : > { %v1085_v3 = vcombine.low %v215_v58, %v219_v59 }
  0x28   : > { %626 = vmatpush1.bf16.msra.mxu0 %v1097_v53  ;;  %v228_v53 = vld [vmem:[%s1274_s23 + $0x78] sm:$0xff] }
  0x29   : > { %669 = vmatpush1.bf16.msra.mxu1 %v1099_v54  ;;  %627 = vmatprep.subr.bf16.mxu0 %v1090_v55  ;;  %v1101_v54 = vcombine.low %v231_v42, %v235_v43  ;;  %v1103_v55 = vcombine.low %v232_v44, %v236_v45  ;;  %v1096_v57 = vcombine.high %v224_v52, %v228_v53 }
  0x2a   : > { %670 = vmatprep.subr.bf16.mxu1 %v1092_v56  ;;  %v1094_v56 = vcombine.high %v223_v50, %v227_v51 }
  0x2c   : > { %628 = vmatpush1.bf16.msra.mxu0 %v1089_v61  ;;  %v220_v61 = vld [vmem:[%s1274_s23 + $0x38] sm:$0xff] }
  0x2d   : > { %671 = vmatpush1.bf16.msra.mxu1 %v1091_v62  ;;  %629 = vmatprep.subr.bf16.mxu0 %v1082_v63  ;;  %v1093_v62 = vcombine.low %v223_v50, %v227_v51  ;;  %v1095_v63 = vcombine.low %v224_v52, %v228_v53  ;;  %v1088_v2 = vcombine.high %v216_v60, %v220_v61 }
  0x2e   : > { %672 = vmatprep.subr.bf16.mxu1 %v1084_v1  ;;  %v1086_v1 = vcombine.high %v215_v58, %v219_v59  ;;  %v1087_v4 = vcombine.low %v216_v60, %v220_v61 }
  0x30   : > { %630 = vmatpush1.bf16.msra.mxu0 %v1081_v6 }
  0x31   : > { %673 = vmatpush1.bf16.msra.mxu1 %v1083_v7  ;;  %701 = vmatprep.subr.bf16.mxu0 %v1142_v8 }
  0x32   : > { %744 = vmatprep.subr.bf16.mxu1 %v1144_v9 }
  0x33   : > { %648 = vmatmul.mubr.bf16.vlgmr.msra.gmra.mxu0 %v1317_v12 }
  0x34   : > { %691 = vmatmul.mubr.bf16.vlgmr.msra.gmra.mxu1 %v1317_v12  ;;  %702 = vmatpush1.bf16.msra.mxu0 %v1141_v15 }
  0x35   : > { %745 = vmatpush1.bf16.msra.mxu1 %v1143_v16  ;;  %703 = vmatprep.subr.bf16.mxu0 %v1134_v17 }
  0x36   : > { %746 = vmatprep.subr.bf16.mxu1 %v1136_v18  ;;  %733 = vmatprep.mubr.bf16.mxu0 %v1220_v0 }
  0x37   : > { %776 = vmatprep.mubr.bf16.mxu1 %v1220_v0  ;;  %v1119_v0 = vcombine.low %v248_v29, %v252_v30 }
  0x38   : > { %704 = vmatpush1.bf16.msra.mxu0 %v1133_v23 }
  0x39   : > { %747 = vmatpush1.bf16.msra.mxu1 %v1135_v24  ;;  %705 = vmatprep.subr.bf16.mxu0 %v1126_v25 }
  0x3a   : > { %748 = vmatprep.subr.bf16.mxu1 %v1128_v26 }
  0x3c   : > { %706 = vmatpush1.bf16.msra.mxu0 %v1125_v31 }
  0x3d   : > { %749 = vmatpush1.bf16.msra.mxu1 %v1127_v32  ;;  %707 = vmatprep.subr.bf16.mxu0 %v1118_v33 }
  0x3e   : > { %750 = vmatprep.subr.bf16.mxu1 %v1120_v34 }
  0x40   : > { %708 = vmatpush1.bf16.msra.mxu0 %v1117_v39 }
  0x41   : > { %751 = vmatpush1.bf16.msra.mxu1 %v1119_v0  ;;  %709 = vmatprep.subr.bf16.mxu0 %v1110_v40 }
  0x42   : > { %752 = vmatprep.subr.bf16.mxu1 %v1112_v41 }
  0x44   : > { %710 = vmatpush1.bf16.msra.mxu0 %v1109_v46 }
  0x45   : > { %753 = vmatpush1.bf16.msra.mxu1 %v1111_v47  ;;  %711 = vmatprep.subr.bf16.mxu0 %v1102_v48 }
  0x46   : > { %754 = vmatprep.subr.bf16.mxu1 %v1104_v49 }
  0x48   : > { %712 = vmatpush1.bf16.msra.mxu0 %v1101_v54 }
  0x49   : > { %755 = vmatpush1.bf16.msra.mxu1 %v1103_v55  ;;  %713 = vmatprep.subr.bf16.mxu0 %v1094_v56 }
  0x4a   : > { %756 = vmatprep.subr.bf16.mxu1 %v1096_v57 }
  0x4c   : > { %714 = vmatpush1.bf16.msra.mxu0 %v1093_v62 }
  0x4d   : > { %757 = vmatpush1.bf16.msra.mxu1 %v1095_v63  ;;  %715 = vmatprep.subr.bf16.mxu0 %v1086_v1 }
  0x4e   : > { %758 = vmatprep.subr.bf16.mxu1 %v1088_v2 }
  0x50   : > { %716 = vmatpush1.bf16.msra.mxu0 %v1085_v3 }
  0x51   : > { %759 = vmatpush1.bf16.msra.mxu1 %v1087_v4 }
  0x53   : > { %734 = vmatmul.mubr.bf16.vlgmr.msra.gmra.mxu0 %v1317_v12 }
  0x54   : > { %777 = vmatmul.mubr.bf16.vlgmr.msra.gmra.mxu1 %v1317_v12 }
  0x8a   : > { %v282_v7 = vpop.permute.xlu0 %281 }
  0x8e   : > { %v287_v15 = vpop.permute.xlu0 %286 }
  0xf3   : > { %v649_v5 = vpop.f32.mrf.mxu0 }
  0xf4   : > { %v692_v9 = vpop.f32.mrf.mxu1  ;;  %v650_v10 = vadd.f32 %v649_v5, %v282_v7 }
  0xf5   : > { %v651_v6 = vpop.f32.mrf.mxu0  ;;  %v693_v16 = vadd.f32 %v692_v9, %v282_v7 }
  0xf6   : > { %v652_v11 = vadd.f32 %v651_v6, %v282_v7  ;;  %v694_v14 = vpop.f32.mrf.mxu1 }
  0xf7   : > { %v653_v8 = vpop.f32.mrf.mxu0  ;;  %v695_v21 = vadd.f32 %v694_v14, %v282_v7 }
  0xf8   : > { %v787_v17 = vadd.f32 %v652_v11, %v650_v10  ;;  %v654_v19 = vadd.f32 %v653_v8, %v287_v15  ;;  %v696_v20 = vpop.f32.mrf.mxu1 }
  0xf9   : > { %v655_v13 = vpop.f32.mrf.mxu0  ;;  %v697_v24 = vadd.f32 %v696_v20, %v287_v15 }
  0xfa   : > { %v656_v18 = vadd.f32 %v655_v13, %v287_v15  ;;  %v788_v22 = vadd.f32 %v787_v17, %v693_v16  ;;  %v698_v12 = vpop.f32.mrf.mxu1 }
  0xfb   : > { %v699_v31 = vadd.f32 %v698_v12, %v287_v15 }
  0xfc   : > { %v796_v23 = vadd.f32 %v656_v18, %v654_v19  ;;  %v789_v26 = vadd.f32 %v788_v22, %v695_v21 }
  0xfe   : > { %v797_v27 = vadd.f32 %v796_v23, %v697_v24 }
 0x100   : > { %v798_v36 = vadd.f32 %v797_v27, %v699_v31 }
 0x113   : > { %v735_v25 = vpop.f32.mrf.mxu0 }
 0x114   : > { %v736_v28 = vadd.f32 %v735_v25, %v282_v7  ;;  %v778_v29 = vpop.f32.mrf.mxu1 }
 0x115   : > { %v737_v30 = vpop.f32.mrf.mxu0  ;;  %v779_v37 = vadd.f32 %v778_v29, %v282_v7 }
 0x116   : > { %v790_v32 = vadd.f32 %v789_v26, %v736_v28  ;;  %v738_v33 = vadd.f32 %v737_v30, %v282_v7  ;;  %v780_v34 = vpop.f32.mrf.mxu1 }
 0x117   : > { %v739_v35 = vpop.f32.mrf.mxu0  ;;  %v781_v41 = vadd.f32 %v780_v34, %v282_v7 }
 0x118   : > { %v791_v38 = vadd.f32 %v790_v32, %v738_v33  ;;  %v740_v39 = vadd.f32 %v739_v35, %v287_v15  ;;  %v782_v0 = vpop.f32.mrf.mxu1 }
 0x119   : > { %v741_v40 = vpop.f32.mrf.mxu0  ;;  %v783_v46 = vadd.f32 %v782_v0, %v287_v15 }
 0x11a   : > { %v799_v42 = vadd.f32 %v798_v36, %v740_v39  ;;  %v742_v43 = vadd.f32 %v741_v40, %v287_v15  ;;  %v792_v44 = vadd.f32 %v791_v38, %v779_v37  ;;  %v784_v45 = vpop.f32.mrf.mxu1 }
 0x11b   : > { %v785_v49 = vadd.f32 %v784_v45, %v287_v15 }
 0x11c   : > { %v800_v47 = vadd.f32 %v799_v42, %v742_v43  ;;  %v793_v48 = vadd.f32 %v792_v44, %v781_v41 }
 0x11e   : > { %794 = vadd.xlane.f32.xlu1 %v793_v48  ;;  %v801_v50 = vadd.f32 %v800_v47, %v783_v46 }
 0x120   : > { %v802_v51 = vadd.f32 %v801_v50, %v785_v49 }
 0x122   : > { %803 = vadd.xlane.f32.xlu1 %v802_v51 }
 0x1a7   : > { %v795_v52 = vpop.xlane.xlu1 %794 }
 0x1a8   : > { %v806_v53 = vmul.f32 0.0009765625, %v795_v52 }
 0x1aa   : > { %v808_v54 = vsub.f32 %v650_v10, %v806_v53  ;;  %v809_v55 = vsub.f32 %v652_v11, %v806_v53  ;;  %v810_v56 = vsub.f32 %v693_v16, %v806_v53  ;;  %v811_v59 = vsub.f32 %v695_v21, %v806_v53 }
 0x1ab   : > { %v804_v57 = vpop.xlane.xlu1 %803  ;;  %v812_v62 = vsub.f32 %v736_v28, %v806_v53  ;;  %v813_v5 = vsub.f32 %v738_v33, %v806_v53  ;;  %v814_v11 = vsub.f32 %v779_v37, %v806_v53 }
 0x1ac   : > { %v807_v58 = vmul.f32 0.0009765625, %v804_v57  ;;  %v824_v60 = vmul.f32 %v808_v54, %v808_v54  ;;  %v825_v61 = vmul.f32 %v809_v55, %v809_v55  ;;  %v826_v63 = vmul.f32 %v810_v56, %v810_v56 }
 0x1ad   : > { %v827_v6 = vmul.f32 %v811_v59, %v811_v59  ;;  %v828_v13 = vmul.f32 %v812_v62, %v812_v62 }
 0x1ae   : > { %v840_v1 = vadd.f32 %v825_v61, %v824_v60  ;;  %v1351_v2 = vsub.f32 %v654_v19, %v807_v58  ;;  %v1353_v3 = vsub.f32 %v656_v18, %v807_v58  ;;  %v1355_v4 = vsub.f32 %v697_v24, %v807_v58 }
 0x1af   : > { %v1359_v9 = vsub.f32 %v699_v31, %v807_v58  ;;  %v1363_v15 = vsub.f32 %v740_v39, %v807_v58  ;;  %v815_v18 = vsub.f32 %v781_v41, %v806_v53  ;;  %v829_v19 = vmul.f32 %v813_v5, %v813_v5 }
 0x1b0   : > { %v841_v7 = vadd.f32 %v840_v1, %v826_v63  ;;  %v832_v8 = vmul.f32 %v1351_v2, %v1351_v2  ;;  %v833_v10 = vmul.f32 %v1353_v3, %v1353_v3  ;;  %v834_v16 = vmul.f32 %v1355_v4, %v1355_v4 }
 0x1b1   : > { %v1367_v21 = vsub.f32 %v742_v43, %v807_v58  ;;  %v835_v22 = vmul.f32 %v1359_v9, %v1359_v9  ;;  %v830_v24 = vmul.f32 %v814_v11, %v814_v11  ;;  %v1371_v25 = vsub.f32 %v783_v46, %v807_v58 }
 0x1b2   : > { %v842_v14 = vadd.f32 %v841_v7, %v827_v6  ;;  %v849_v17 = vadd.f32 %v833_v10, %v832_v8  ;;  %v836_v26 = vmul.f32 %v1363_v15, %v1363_v15  ;;  %v831_v28 = vmul.f32 %v815_v18, %v815_v18 }
 0x1b3   : > { %v1375_v30 = vsub.f32 %v785_v49, %v807_v58  ;;  %v837_v31 = vmul.f32 %v1367_v21, %v1367_v21  ;;  %v838_v34 = vmul.f32 %v1371_v25, %v1371_v25 }
 0x1b4   : > { %v843_v20 = vadd.f32 %v842_v14, %v828_v13  ;;  %v850_v23 = vadd.f32 %v849_v17, %v834_v16 }
 0x1b5   : > { %v839_v36 = vmul.f32 %v1375_v30, %v1375_v30 }
 0x1b6   : > { %v844_v12 = vadd.f32 %v843_v20, %v829_v19  ;;  %v851_v27 = vadd.f32 %v850_v23, %v835_v22 }
 0x1b8   : > { %v845_v29 = vadd.f32 %v844_v12, %v830_v24  ;;  %v852_v32 = vadd.f32 %v851_v27, %v836_v26 }
 0x1ba   : > { %v846_v33 = vadd.f32 %v845_v29, %v831_v28  ;;  %v853_v35 = vadd.f32 %v852_v32, %v837_v31 }
 0x1bc   : > { %847 = vadd.xlane.f32.xlu0 %v846_v33  ;;  %v854_v37 = vadd.f32 %v853_v35, %v838_v34 }
 0x1be   : > { %v855_v38 = vadd.f32 %v854_v37, %v839_v36 }
 0x1c0   : > { %856 = vadd.xlane.f32.xlu1 %v855_v38 }
 0x245   : > { %v848_v39 = vpop.xlane.xlu0 %847 }
 0x246   : > { %v858_v0 = vmul.f32 0.0009765625, %v848_v39 }
 0x248   : > { %v860_v40 = vadd.f32 1e-05, %v858_v0 }
 0x249   : > { %v857_v41 = vpop.xlane.xlu1 %856 }
 0x24a   : > { %1192 = vrsqrt.f32 %v860_v40  ;;  %v859_v42 = vmul.f32 0.0009765625, %v857_v41 }
 0x24c   : > { %v861_v43 = vadd.f32 1e-05, %v859_v42 }
 0x24e   : > { %1194 = vrsqrt.f32 %v861_v43 }
 0x257   : > { %v1193_v44 = vpop.eup %1192 }
 0x258   : > { %v864_v45 = vmul.f32 %v1193_v44, %v808_v54  ;;  %v865_v46 = vmul.f32 %v1193_v44, %v809_v55  ;;  %v866_v47 = vmul.f32 %v1193_v44, %v810_v56  ;;  %v867_v48 = vmul.f32 %v1193_v44, %v811_v59 }
 0x259   : > { %v868_v49 = vmul.f32 %v1193_v44, %v812_v62  ;;  %v869_v50 = vmul.f32 %v1193_v44, %v813_v5  ;;  %v870_v51 = vmul.f32 %v1193_v44, %v814_v11  ;;  %v871_v52 = vmul.f32 %v1193_v44, %v815_v18 }
 0x25a   : > { %vm880_vm0 = vcmp.gt.f32.partialorder %v864_v45, 0.0  ;;  %vm881_vm1 = vcmp.gt.f32.partialorder %v865_v46, 0.0  ;;  %vm882_vm2 = vcmp.gt.f32.partialorder %v866_v47, 0.0  ;;  %vm883_vm3 = vcmp.gt.f32.partialorder %v867_v48, 0.0 }
 0x25b   : > { %vm884_vm4 = vcmp.gt.f32.partialorder %v868_v49, 0.0  ;;  %vm885_vm5 = vcmp.gt.f32.partialorder %v869_v50, 0.0  ;;  %vm886_vm6 = vcmp.gt.f32.partialorder %v870_v51, 0.0  ;;  %vm887_vm7 = vcmp.gt.f32.partialorder %v871_v52, 0.0  ;;  %v1195_v53 = vpop.eup %1194 }
 0x25c   : > { %v896_v57 = vmul.f32 0.2, %v864_v45  ;;  %v897_v58 = vmul.f32 0.2, %v865_v46  ;;  %v898_v54 = vmul.f32 0.2, %v866_v47  ;;  %v872_v60 = vmul.f32 %v1195_v53, %v1351_v2 }
 0x25d   : > { %v899_v55 = vmul.f32 0.2, %v867_v48  ;;  %v900_v56 = vmul.f32 0.2, %v868_v49  ;;  %v901_v59 = vmul.f32 0.2, %v869_v50  ;;  %v873_v17 = vmul.f32 %v1195_v53, %v1353_v3 }
 0x25e   : > { %v902_v61 = vmul.f32 0.2, %v870_v51  ;;  %v903_v62 = vmul.f32 0.2, %v871_v52  ;;  %v912_v63 = vsel %vm880_vm0, %v864_v45, %v896_v57  ;;  %v913_v1 = vsel %vm881_vm1, %v865_v46, %v897_v58 }
 0x25f   : > { %v914_v5 = vsel %vm882_vm2, %v866_v47, %v898_v54  ;;  %v915_v6 = vsel %vm883_vm3, %v867_v48, %v899_v55  ;;  %v916_v7 = vsel %vm884_vm4, %v868_v49, %v900_v56  ;;  %v917_v2 = vsel %vm885_vm5, %v869_v50, %v901_v59 }
 0x260   : > { %v918_v8 = vsel %vm886_vm6, %v870_v51, %v902_v61  ;;  %v919_v10 = vsel %vm887_vm7, %v871_v52, %v903_v62  ;;  %v1157_v11 = vpack.c.bf16 %v913_v1, %v912_v63  ;;  %v1158_v13 = vpack.c.bf16 %v915_v6, %v914_v5 }
 0x261   : > { %v1159_v14 = vpack.c.bf16 %v917_v2, %v916_v7  ;;  %v1160_v16 = vpack.c.bf16 %v919_v10, %v918_v8  ;;  %v874_v18 = vmul.f32 %v1195_v53, %v1355_v4  ;;  %v875_v19 = vmul.f32 %v1195_v53, %v1359_v9 }
 0x262   : > { %976 = vst [vmem:[%s1390_s29] sm:$0xff] %v1157_v11  ;;  %977 = vst [vmem:[%s1390_s29 + $0x8] sm:$0xff] %v1158_v13  ;;  %v876_v20 = vmul.f32 %v1195_v53, %v1363_v15  ;;  %v877_v22 = vmul.f32 %v1195_v53, %v1367_v21  ;;  %v878_v23 = vmul.f32 %v1195_v53, %v1371_v25  ;;  %vm888_vm8 = vcmp.gt.f32.partialorder %v872_v60, 0.0 }
 0x263   : > { %978 = vst [vmem:[%s1390_s29 + $0x10] sm:$0xff] %v1159_v14  ;;  %979 = vst [vmem:[%s1390_s29 + $0x18] sm:$0xff] %v1160_v16  ;;  %v879_v24 = vmul.f32 %v1195_v53, %v1375_v30  ;;  %vm889_vm9 = vcmp.gt.f32.partialorder %v873_v17, 0.0  ;;  %vm890_vm10 = vcmp.gt.f32.partialorder %v874_v18, 0.0  ;;  %vm891_vm11 = vcmp.gt.f32.partialorder %v875_v19, 0.0 }
 0x264   : > { %vm892_vm12 = vcmp.gt.f32.partialorder %v876_v20, 0.0  ;;  %vm893_vm13 = vcmp.gt.f32.partialorder %v877_v22, 0.0  ;;  %vm894_vm14 = vcmp.gt.f32.partialorder %v878_v23, 0.0  ;;  %v904_v3 = vmul.f32 0.2, %v872_v60 }
 0x265   : > { %vm895_vm15 = vcmp.gt.f32.partialorder %v879_v24, 0.0  ;;  %v905_v4 = vmul.f32 0.2, %v873_v17  ;;  %v906_v9 = vmul.f32 0.2, %v874_v18 }
 0x266   : > { %v907_v15 = vmul.f32 0.2, %v875_v19  ;;  %v908_v12 = vmul.f32 0.2, %v876_v20  ;;  %v909_v21 = vmul.f32 0.2, %v877_v22  ;;  %v920_v27 = vsel %vm888_vm8, %v872_v60, %v904_v3 }
 0x267   : > { %v910_v25 = vmul.f32 0.2, %v878_v23  ;;  %v911_v26 = vmul.f32 0.2, %v879_v24  ;;  %v921_v28 = vsel %vm889_vm9, %v873_v17, %v905_v4  ;;  %v922_v29 = vsel %vm890_vm10, %v874_v18, %v906_v9 }
 0x268   : > { %v923_v30 = vsel %vm891_vm11, %v875_v19, %v907_v15  ;;  %v924_v31 = vsel %vm892_vm12, %v876_v20, %v908_v12  ;;  %v925_v32 = vsel %vm893_vm13, %v877_v22, %v909_v21  ;;  %v1161_v35 = vpack.c.bf16 %v921_v28, %v920_v27 }
 0x269   : > { %v926_v33 = vsel %vm894_vm14, %v878_v23, %v910_v25  ;;  %v927_v34 = vsel %vm895_vm15, %v879_v24, %v911_v26  ;;  %v1162_v36 = vpack.c.bf16 %v923_v30, %v922_v29  ;;  %v1163_v37 = vpack.c.bf16 %v925_v32, %v924_v31 }
 0x26a   : > { %v1164_v38 = vpack.c.bf16 %v927_v34, %v926_v33  ;;  %980 = vst [vmem:[%s1390_s29 + $0x20] sm:$0xff] %v1161_v35 }
 0x26b   : > { %981 = vst [vmem:[%s1390_s29 + $0x28] sm:$0xff] %v1162_v36  ;;  %982 = vst [vmem:[%s1390_s29 + $0x30] sm:$0xff] %v1163_v37 }
 0x26c   : > { %983 = vst [vmem:[%s1390_s29 + $0x38] sm:$0xff] %v1164_v38 }
 0x26d PF: > { %s13_s14 = sadd.s32 1, %s1218_s14   ;;  %s1434_s12 = smov %s1214_s13 }
 0x26e   : > { %p10_p5 = scmp.ge.s32.totalorder %s13_s14, 4   ;;  %s1435_s13 = smov %s1437_s15 }
 0x270   :  { %12 = sbr.rel (!%p10_p5) target bundleno = 2 (0x2), region = 62 }

// kernel: discriminator_forward.8
= control target key start
LH: loop header
LB: loop body
LE: loop exit
PB: predicated region body
PF: predicated region fallthrough
CT: control target
= control target key end

     0   :  { %s1993_s12 = smov 0   ;;  %s1995_s13 = smov 0   ;;  %s2588_s0 = inlined_call_operand.vmem [shape: bf16[2,256,961], index: 0, kind: input, shape index: {}]   ;;  %s2589_s1 = inlined_call_operand.vmem [shape: bf16[32,256], index: 1, kind: input, shape index: {}]   ;;  %s2590_s2 = inlined_call_operand.vmem [shape: f32[32,1], index: 2, kind: input, shape index: {}]   ;;  %s2591_s3 = inlined_call_operand.vmem [shape: bf16[2,32,961], index: 3, kind: output, shape index: {}]  }
   0x1   :  { %s1997_s14 = smov 0  }
   0x2 LB: > { %s25_s15 = sadd.s32 1, %s1966_s13  ;;  %p1734_p0 = scmp.ge.s32.totalorder %s1970_s14, 1  ;;  %s1970_s14 = sphi %s1997_s14, %s13_s14   ;;  %s1966_s13 = sphi %s1995_s13, %s2595_s13   ;;  %s1962_s12 = sphi %s1993_s12, %s2594_s12  }
   0x3   : > { %p27_p1 = scmp.ge.s32.totalorder %s25_s15, 2  ;;  %p158_p2 = scmp.lt.s32.totalorder %s1970_s14, 3 }
   0x5   : > { %s2597_s15 = smov (%p27_p1, %s25_s15), 0  ;;  %p159_p3 = pnand %p1734_p0, %p158_p2 }
   0x6   : > { %p191_p4 = scmp.lt.s32.totalorder (!%p159_p3), %s1962_s12, 1 }
   0x7   : > { %162 = sbr.rel (%p159_p3) target bundleno = 721 (0x2d1), region = 32 }
   0xc   : > { %v2014_v0 = vld [vmem:[%s2589_s1 + $0x4] ss:$8 sps:$4 sm:$0xff]   ;;  %s2599_s12 = smov (!%p191_p4, %s1962_s12), 1  ;;  %v1972_v27 = vmov 0   ;;  %vm1244_vm0 = vcmask 531456   ;;  %vm1627_vm1 = vcmask 1043456  }
   0xd   : > { %1058 = vmatprep.mubr.bf16.mxu0 %v2014_v0  ;;  %1111 = vmatprep.mubr.bf16.mxu1 %v2014_v0  ;;  %s1889_s18 = sshll.u32 %s2599_s12, 10  ;;  %vm1628_vm2 = vcmask 531460   ;;  %s1890_s9 = sshll.u32 %s2599_s12, 7 }
   0xe   : > { %s2024_s21 = scalar_lea.vmem %s2588_s0, %s1889_s18  ;;  %1932 = vset.pattern.permute.xlu0 %v1972_v27  ;;  %1933 = vset.pattern.permute.xlu1 %v1972_v27  ;;  %s2494_s12 = scalar_lea.vmem %s2591_s3, %s1890_s9  ;;  %vm2502_vm11 = vmor %vm1628_vm2, %vm1627_vm1 }
   0xf   : > { %v270_v1 = vld [vmem:[%s2024_s21 + $0x1c0] sm:$0xff]  ;;  %v271_v3 = vld [vmem:[%s2024_s21 + $0x1c8] sm:$0xff] }
  0x10   : > { %v274_v2 = vld [vmem:[%s2024_s21 + $0x1e0] sm:$0xff]  ;;  %v275_v5 = vld [vmem:[%s2024_s21 + $0x1e8] sm:$0xff] }
  0x11   : > { %v1800_v4 = vcombine.high %v270_v1, %v274_v2  ;;  %v1799_v6 = vcombine.low %v270_v1, %v274_v2  ;;  %v262_v7 = vld [vmem:[%s2024_s21 + $0x180] sm:$0xff]  ;;  %v1802_v9 = vcombine.high %v271_v3, %v275_v5  ;;  %v1801_v10 = vcombine.low %v271_v3, %v275_v5  ;;  %v263_v12 = vld [vmem:[%s2024_s21 + $0x188] sm:$0xff] }
  0x12   : > { %v266_v8 = vld [vmem:[%s2024_s21 + $0x1a0] sm:$0xff]  ;;  %v267_v13 = vld [vmem:[%s2024_s21 + $0x1a8] sm:$0xff] }
  0x13   : > { %v1792_v11 = vcombine.high %v262_v7, %v266_v8  ;;  %v254_v14 = vld [vmem:[%s2024_s21 + $0x140] sm:$0xff]  ;;  %1026 = vmatprep.subr.bf16.mxu0 %v1800_v4  ;;  %v1794_v15 = vcombine.high %v263_v12, %v267_v13  ;;  %v255_v17 = vld [vmem:[%s2024_s21 + $0x148] sm:$0xff]  ;;  %1079 = vmatprep.subr.bf16.mxu1 %v1802_v9  ;;  %v1791_v19 = vcombine.low %v262_v7, %v266_v8 }
  0x14   : > { %v258_v16 = vld [vmem:[%s2024_s21 + $0x160] sm:$0xff]  ;;  %v259_v18 = vld [vmem:[%s2024_s21 + $0x168] sm:$0xff]  ;;  %1027 = vmatpush1.bf16.msra.mxu0 %v1799_v6  ;;  %1080 = vmatpush1.bf16.msra.mxu1 %v1801_v10  ;;  %v1793_v20 = vcombine.low %v263_v12, %v267_v13 }
  0x15   : > { %1028 = vmatprep.subr.bf16.mxu0 %v1792_v11  ;;  %v1784_v21 = vcombine.high %v254_v14, %v258_v16  ;;  %1081 = vmatprep.subr.bf16.mxu1 %v1794_v15  ;;  %v1786_v22 = vcombine.high %v255_v17, %v259_v18  ;;  %v246_v23 = vld [vmem:[%s2024_s21 + $0x100] sm:$0xff]  ;;  %v247_v25 = vld [vmem:[%s2024_s21 + $0x108] sm:$0xff]  ;;  %v1783_v28 = vcombine.low %v254_v14, %v258_v16 }
  0x16   : > { %v250_v24 = vld [vmem:[%s2024_s21 + $0x120] sm:$0xff]  ;;  %v251_v26 = vld [vmem:[%s2024_s21 + $0x128] sm:$0xff]  ;;  %v1785_v29 = vcombine.low %v255_v17, %v259_v18 }
  0x17   : > { %v1776_v30 = vcombine.high %v246_v23, %v250_v24  ;;  %v1778_v31 = vcombine.high %v247_v25, %v251_v26  ;;  %v238_v32 = vld [vmem:[%s2024_s21 + $0xc0] sm:$0xff]  ;;  %v239_v34 = vld [vmem:[%s2024_s21 + $0xc8] sm:$0xff]  ;;  %v1775_v36 = vcombine.low %v246_v23, %v250_v24  ;;  %v1777_v37 = vcombine.low %v247_v25, %v251_v26 }
  0x18   : > { %1029 = vmatpush1.bf16.msra.mxu0 %v1791_v19  ;;  %1082 = vmatpush1.bf16.msra.mxu1 %v1793_v20  ;;  %v242_v33 = vld [vmem:[%s2024_s21 + $0xe0] sm:$0xff]  ;;  %v243_v35 = vld [vmem:[%s2024_s21 + $0xe8] sm:$0xff] }
  0x19   : > { %1030 = vmatprep.subr.bf16.mxu0 %v1784_v21  ;;  %1083 = vmatprep.subr.bf16.mxu1 %v1786_v22  ;;  %v1768_v38 = vcombine.high %v238_v32, %v242_v33  ;;  %v1770_v39 = vcombine.high %v239_v34, %v243_v35  ;;  %v230_v40 = vld [vmem:[%s2024_s21 + $0x80] sm:$0xff]  ;;  %v231_v42 = vld [vmem:[%s2024_s21 + $0x88] sm:$0xff]  ;;  %v1767_v44 = vcombine.low %v238_v32, %v242_v33 }
  0x1a   : > { %v234_v41 = vld [vmem:[%s2024_s21 + $0xa0] sm:$0xff]  ;;  %v235_v43 = vld [vmem:[%s2024_s21 + $0xa8] sm:$0xff]  ;;  %v1769_v45 = vcombine.low %v239_v34, %v243_v35 }
  0x1b   : > { %v1760_v46 = vcombine.high %v230_v40, %v234_v41  ;;  %v1762_v47 = vcombine.high %v231_v42, %v235_v43  ;;  %v222_v48 = vld [vmem:[%s2024_s21 + $0x40] sm:$0xff]  ;;  %v223_v50 = vld [vmem:[%s2024_s21 + $0x48] sm:$0xff]  ;;  %v1759_v52 = vcombine.low %v230_v40, %v234_v41  ;;  %v1761_v53 = vcombine.low %v231_v42, %v235_v43  ;;  %v345_v43 = vld [vmem:[%s2590_s2 + $0x18] sm:$0xff] }
  0x1c   : > { %1031 = vmatpush1.bf16.msra.mxu0 %v1783_v28  ;;  %1084 = vmatpush1.bf16.msra.mxu1 %v1785_v29  ;;  %v226_v49 = vld [vmem:[%s2024_s21 + $0x60] sm:$0xff]  ;;  %v227_v51 = vld [vmem:[%s2024_s21 + $0x68] sm:$0xff] }
  0x1d   : > { %1032 = vmatprep.subr.bf16.mxu0 %v1776_v30  ;;  %1085 = vmatprep.subr.bf16.mxu1 %v1778_v31  ;;  %v1752_v54 = vcombine.high %v222_v48, %v226_v49  ;;  %v1754_v55 = vcombine.high %v223_v50, %v227_v51  ;;  %v214_v56 = vld [vmem:[%s2024_s21] sm:$0xff]  ;;  %v215_v58 = vld [vmem:[%s2024_s21 + $0x8] sm:$0xff]  ;;  %v1751_v60 = vcombine.low %v222_v48, %v226_v49 }
  0x1e   : > { %v218_v57 = vld [vmem:[%s2024_s21 + $0x20] sm:$0xff]  ;;  %v219_v59 = vld [vmem:[%s2024_s21 + $0x28] sm:$0xff]  ;;  %v1753_v61 = vcombine.low %v223_v50, %v227_v51 }
  0x1f   : > { %v1744_v62 = vcombine.high %v214_v56, %v218_v57  ;;  %v1746_v63 = vcombine.high %v215_v58, %v219_v59  ;;  %v334_v1 = vld [vmem:[%s2024_s21 + $0x3c0] sm:$0xff]  ;;  %v335_v3 = vld [vmem:[%s2024_s21 + $0x3c8] sm:$0xff]  ;;  %v1743_v5 = vcombine.low %v214_v56, %v218_v57  ;;  %v1745_v6 = vcombine.low %v215_v58, %v219_v59 }
  0x20   : > { %1033 = vmatpush1.bf16.msra.mxu0 %v1775_v36  ;;  %1086 = vmatpush1.bf16.msra.mxu1 %v1777_v37  ;;  %v338_v2 = vld [vmem:[%s2024_s21 + $0x3e0] sm:$0xff]  ;;  %v339_v4 = vld [vmem:[%s2024_s21 + $0x3e8] sm:$0xff] }
  0x21   : > { %1034 = vmatprep.subr.bf16.mxu0 %v1768_v38  ;;  %1087 = vmatprep.subr.bf16.mxu1 %v1770_v39  ;;  %v1864_v7 = vcombine.high %v334_v1, %v338_v2  ;;  %v1866_v8 = vcombine.high %v335_v3, %v339_v4  ;;  %v326_v9 = vld [vmem:[%s2024_s21 + $0x380] sm:$0xff]  ;;  %v327_v11 = vld [vmem:[%s2024_s21 + $0x388] sm:$0xff]  ;;  %v1863_v13 = vcombine.low %v334_v1, %v338_v2  ;;  %v344_v38 = vld [vmem:[%s2590_s2 + $0x10] sm:$0xff] }
  0x22   : > { %v330_v10 = vld [vmem:[%s2024_s21 + $0x3a0] sm:$0xff]  ;;  %v331_v12 = vld [vmem:[%s2024_s21 + $0x3a8] sm:$0xff]  ;;  %v1865_v14 = vcombine.low %v335_v3, %v339_v4  ;;  %358 = vperm.xlu1 %1933, %v344_v38  }
  0x23   : > { %v1856_v15 = vcombine.high %v326_v9, %v330_v10  ;;  %v1858_v16 = vcombine.high %v327_v11, %v331_v12  ;;  %v318_v17 = vld [vmem:[%s2024_s21 + $0x340] sm:$0xff]  ;;  %v319_v19 = vld [vmem:[%s2024_s21 + $0x348] sm:$0xff]  ;;  %v1855_v21 = vcombine.low %v326_v9, %v330_v10  ;;  %v1857_v22 = vcombine.low %v327_v11, %v331_v12  ;;  %v277_v9 = vld [vmem:[%s2024_s21 + $0x1f8] sm:$0xff] }
  0x24   : > { %1035 = vmatpush1.bf16.msra.mxu0 %v1767_v44  ;;  %1088 = vmatpush1.bf16.msra.mxu1 %v1769_v45  ;;  %v322_v18 = vld [vmem:[%s2024_s21 + $0x360] sm:$0xff]  ;;  %v323_v20 = vld [vmem:[%s2024_s21 + $0x368] sm:$0xff] }
  0x25   : > { %1036 = vmatprep.subr.bf16.mxu0 %v1760_v46  ;;  %1089 = vmatprep.subr.bf16.mxu1 %v1762_v47  ;;  %v1848_v23 = vcombine.high %v318_v17, %v322_v18  ;;  %v1850_v24 = vcombine.high %v319_v19, %v323_v20  ;;  %v310_v25 = vld [vmem:[%s2024_s21 + $0x300] sm:$0xff]  ;;  %v311_v27 = vld [vmem:[%s2024_s21 + $0x308] sm:$0xff]  ;;  %v1847_v29 = vcombine.low %v318_v17, %v322_v18  ;;  %v265_v17 = vld [vmem:[%s2024_s21 + $0x198] sm:$0xff] }
  0x26   : > { %v314_v26 = vld [vmem:[%s2024_s21 + $0x320] sm:$0xff]  ;;  %v315_v28 = vld [vmem:[%s2024_s21 + $0x328] sm:$0xff]  ;;  %v1849_v30 = vcombine.low %v319_v19, %v323_v20  ;;  %363 = vperm.xlu1 %1933, %v345_v43   ;;  %v269_v18 = vld [vmem:[%s2024_s21 + $0x1b8] sm:$0xff] }
  0x27   : > { %v1840_v31 = vcombine.high %v310_v25, %v314_v26  ;;  %v1842_v32 = vcombine.high %v311_v27, %v315_v28  ;;  %v302_v33 = vld [vmem:[%s2024_s21 + $0x2c0] sm:$0xff]  ;;  %v303_v36 = vld [vmem:[%s2024_s21 + $0x2c8] sm:$0xff]  ;;  %v1839_v39 = vcombine.low %v310_v25, %v314_v26  ;;  %v1841_v41 = vcombine.low %v311_v27, %v315_v28  ;;  %v2120_v25 = vld [vmem:[%s2589_s1 + $0x14] ss:$8 sps:$4 sm:$0xff]  }
  0x28   : > { %1037 = vmatpush1.bf16.msra.mxu0 %v1759_v52  ;;  %1090 = vmatpush1.bf16.msra.mxu1 %v1761_v53  ;;  %v306_v34 = vld [vmem:[%s2024_s21 + $0x2e0] sm:$0xff]  ;;  %v307_v37 = vld [vmem:[%s2024_s21 + $0x2e8] sm:$0xff]  ;;  %v257_v26 = vld [vmem:[%s2024_s21 + $0x158] sm:$0xff] }
  0x29   : > { %1038 = vmatprep.subr.bf16.mxu0 %v1752_v54  ;;  %1091 = vmatprep.subr.bf16.mxu1 %v1754_v55  ;;  %v342_v35 = vld [vmem:[%s2590_s2] sm:$0xff]  ;;  %v343_v40 = vld [vmem:[%s2590_s2 + $0x8] sm:$0xff]  ;;  %v1832_v42 = vcombine.high %v302_v33, %v306_v34  ;;  %v1834_v44 = vcombine.high %v303_v36, %v307_v37  ;;  %v1831_v49 = vcombine.low %v302_v33, %v306_v34  ;;  %v261_v27 = vld [vmem:[%s2024_s21 + $0x178] sm:$0xff] }
  0x2a   : > { %348 = vperm.xlu0 %1932, %v342_v35   ;;  %v294_v45 = vld [vmem:[%s2024_s21 + $0x280] sm:$0xff]  ;;  %v295_v47 = vld [vmem:[%s2024_s21 + $0x288] sm:$0xff]  ;;  %v1833_v50 = vcombine.low %v303_v36, %v307_v37  ;;  %v252_v33 = vld [vmem:[%s2024_s21 + $0x130] sm:$0xff]  ;;  %v1789_v38 = vcombine.low %v257_v26, %v261_v27 }
  0x2b   : > { %v298_v46 = vld [vmem:[%s2024_s21 + $0x2a0] sm:$0xff]  ;;  %v299_v48 = vld [vmem:[%s2024_s21 + $0x2a8] sm:$0xff]  ;;  %v249_v34 = vld [vmem:[%s2024_s21 + $0x118] sm:$0xff] }
  0x2c   : > { %1039 = vmatpush1.bf16.msra.mxu0 %v1751_v60  ;;  %1092 = vmatpush1.bf16.msra.mxu1 %v1753_v61  ;;  %v1824_v51 = vcombine.high %v294_v45, %v298_v46  ;;  %v1826_v52 = vcombine.high %v295_v47, %v299_v48  ;;  %v286_v53 = vld [vmem:[%s2024_s21 + $0x240] sm:$0xff]  ;;  %v287_v55 = vld [vmem:[%s2024_s21 + $0x248] sm:$0xff]  ;;  %v1823_v57 = vcombine.low %v294_v45, %v298_v46  ;;  %v253_v35 = vld [vmem:[%s2024_s21 + $0x138] sm:$0xff] }
  0x2d   : > { %1040 = vmatprep.subr.bf16.mxu0 %v1744_v62  ;;  %1093 = vmatprep.subr.bf16.mxu1 %v1746_v63  ;;  %v290_v54 = vld [vmem:[%s2024_s21 + $0x260] sm:$0xff]  ;;  %v291_v56 = vld [vmem:[%s2024_s21 + $0x268] sm:$0xff]  ;;  %v1825_v58 = vcombine.low %v295_v47, %v299_v48  ;;  %v2134_v36 = vld [vmem:[%s2589_s1 + $0x10] ss:$8 sps:$4 sm:$0xff]   ;;  %v1781_v46 = vcombine.low %v249_v34, %v253_v35 }
  0x2e   : > { %353 = vperm.xlu0 %1932, %v343_v40   ;;  %v1816_v59 = vcombine.high %v286_v53, %v290_v54  ;;  %v1818_v60 = vcombine.high %v287_v55, %v291_v56  ;;  %v278_v61 = vld [vmem:[%s2024_s21 + $0x200] sm:$0xff]  ;;  %v279_v63 = vld [vmem:[%s2024_s21 + $0x208] sm:$0xff]  ;;  %v1815_v2 = vcombine.low %v286_v53, %v290_v54  ;;  %v1817_v3 = vcombine.low %v287_v55, %v291_v56  ;;  %v241_v43 = vld [vmem:[%s2024_s21 + $0xd8] sm:$0xff] }
  0x2f   : > { %v282_v62 = vld [vmem:[%s2024_s21 + $0x220] sm:$0xff]  ;;  %v283_v1 = vld [vmem:[%s2024_s21 + $0x228] sm:$0xff]  ;;  %v1782_v40 = vcombine.high %v249_v34, %v253_v35  ;;  %v312_v35 = vld [vmem:[%s2024_s21 + $0x310] sm:$0xff] }
  0x30   : > { %1041 = vmatpush1.bf16.msra.mxu0 %v1743_v5  ;;  %1094 = vmatpush1.bf16.msra.mxu1 %v1745_v6  ;;  %v1808_v4 = vcombine.high %v278_v61, %v282_v62  ;;  %v1810_v5 = vcombine.high %v279_v63, %v283_v1  ;;  %v272_v6 = vld [vmem:[%s2024_s21 + $0x1d0] sm:$0xff]  ;;  %v1807_v10 = vcombine.low %v278_v61, %v282_v62 }
  0x31   : > { %1042 = vmatprep.subr.bf16.mxu0 %v1864_v7  ;;  %1095 = vmatprep.subr.bf16.mxu1 %v1866_v8  ;;  %v276_v7 = vld [vmem:[%s2024_s21 + $0x1f0] sm:$0xff]  ;;  %v273_v8 = vld [vmem:[%s2024_s21 + $0x1d8] sm:$0xff]  ;;  %v1809_v11 = vcombine.low %v279_v63, %v283_v1 }
  0x32   : > { %v1804_v12 = vcombine.high %v272_v6, %v276_v7  ;;  %v1803_v19 = vcombine.low %v272_v6, %v276_v7  ;;  %v1805_v20 = vcombine.low %v273_v8, %v277_v9  ;;  %v216_v1 = vld [vmem:[%s2024_s21 + $0x10] sm:$0xff] }
  0x34   : > { %1043 = vmatpush2.bf16.msra.mxu0 %v1863_v13  ;;  %1096 = vmatpush2.bf16.msra.mxu1 %v1865_v14  ;;  %v1806_v13 = vcombine.high %v273_v8, %v277_v9  ;;  %v264_v14 = vld [vmem:[%s2024_s21 + $0x190] sm:$0xff] }
  0x35   : > { %1044 = vmatprep.subr.bf16.mxu0 %v1856_v15  ;;  %1097 = vmatprep.subr.bf16.mxu1 %v1858_v16  ;;  %v268_v15 = vld [vmem:[%s2024_s21 + $0x1b0] sm:$0xff]  ;;  %v2111_v16 = vld [vmem:[%s2589_s1] ss:$8 sps:$4 sm:$0xff]  }
  0x36   : > { %v1795_v28 = vcombine.low %v264_v14, %v268_v15  ;;  %v336_v9 = vld [vmem:[%s2024_s21 + $0x3d0] sm:$0xff] }
  0x38   : > { %1045 = vmatpush2.bf16.msra.mxu0 %v1855_v21  ;;  %1098 = vmatpush2.bf16.msra.mxu1 %v1857_v22  ;;  %v1796_v21 = vcombine.high %v264_v14, %v268_v15  ;;  %v1798_v22 = vcombine.high %v265_v17, %v269_v18 }
  0x39   : > { %1046 = vmatprep.subr.bf16.mxu0 %v1848_v23  ;;  %1099 = vmatprep.subr.bf16.mxu1 %v1850_v24  ;;  %v256_v23 = vld [vmem:[%s2024_s21 + $0x150] sm:$0xff] }
  0x3a   : > { %v260_v24 = vld [vmem:[%s2024_s21 + $0x170] sm:$0xff] }
  0x3b   : > { %v1787_v37 = vcombine.low %v256_v23, %v260_v24 }
  0x3c   : > { %1047 = vmatpush2.bf16.msra.mxu0 %v1847_v29  ;;  %1100 = vmatpush2.bf16.msra.mxu1 %v1849_v30  ;;  %v1797_v29 = vcombine.low %v265_v17, %v269_v18  ;;  %v1788_v30 = vcombine.high %v256_v23, %v260_v24  ;;  %v328_v18 = vld [vmem:[%s2024_s21 + $0x390] sm:$0xff] }
  0x3d   : > { %1048 = vmatprep.subr.bf16.mxu0 %v1840_v31  ;;  %1101 = vmatprep.subr.bf16.mxu1 %v1842_v32  ;;  %v1790_v31 = vcombine.high %v257_v26, %v261_v27  ;;  %v248_v32 = vld [vmem:[%s2024_s21 + $0x110] sm:$0xff] }
  0x3e   : > { %v1779_v45 = vcombine.low %v248_v32, %v252_v33  ;;  %v320_v27 = vld [vmem:[%s2024_s21 + $0x350] sm:$0xff] }
  0x40   : > { %1049 = vmatpush2.bf16.msra.mxu0 %v1839_v39  ;;  %1102 = vmatpush2.bf16.msra.mxu1 %v1841_v41  ;;  %v1780_v39 = vcombine.high %v248_v32, %v252_v33  ;;  %v240_v41 = vld [vmem:[%s2024_s21 + $0xd0] sm:$0xff] }
  0x41   : > { %1050 = vmatprep.subr.bf16.mxu0 %v1832_v42  ;;  %1103 = vmatprep.subr.bf16.mxu1 %v1834_v44  ;;  %v244_v42 = vld [vmem:[%s2024_s21 + $0xf0] sm:$0xff]  ;;  %v245_v44 = vld [vmem:[%s2024_s21 + $0xf8] sm:$0xff] }
  0x42   : > { %v1772_v47 = vcombine.high %v240_v41, %v244_v42  ;;  %v1774_v48 = vcombine.high %v241_v43, %v245_v44  ;;  %v1771_v53 = vcombine.low %v240_v41, %v244_v42  ;;  %v1773_v54 = vcombine.low %v241_v43, %v245_v44  ;;  %v304_v44 = vld [vmem:[%s2024_s21 + $0x2d0] sm:$0xff] }
  0x44   : > { %1051 = vmatpush2.bf16.msra.mxu0 %v1831_v49  ;;  %1104 = vmatpush2.bf16.msra.mxu1 %v1833_v50  ;;  %v232_v49 = vld [vmem:[%s2024_s21 + $0x90] sm:$0xff] }
  0x45   : > { %1052 = vmatprep.subr.bf16.mxu0 %v1824_v51  ;;  %1105 = vmatprep.subr.bf16.mxu1 %v1826_v52  ;;  %v236_v50 = vld [vmem:[%s2024_s21 + $0xb0] sm:$0xff]  ;;  %v233_v51 = vld [vmem:[%s2024_s21 + $0x98] sm:$0xff] }
  0x46   : > { %v237_v52 = vld [vmem:[%s2024_s21 + $0xb8] sm:$0xff]  ;;  %v1764_v55 = vcombine.high %v232_v49, %v236_v50  ;;  %v1763_v61 = vcombine.low %v232_v49, %v236_v50 }
  0x47   : > { %v1766_v56 = vcombine.high %v233_v51, %v237_v52 }
  0x48   : > { %1053 = vmatpush2.bf16.msra.mxu0 %v1823_v57  ;;  %1106 = vmatpush2.bf16.msra.mxu1 %v1825_v58  ;;  %v224_v57 = vld [vmem:[%s2024_s21 + $0x50] sm:$0xff] }
  0x49   : > { %1054 = vmatprep.subr.bf16.mxu0 %v1816_v59  ;;  %1107 = vmatprep.subr.bf16.mxu1 %v1818_v60  ;;  %v228_v58 = vld [vmem:[%s2024_s21 + $0x70] sm:$0xff]  ;;  %v225_v59 = vld [vmem:[%s2024_s21 + $0x58] sm:$0xff] }
  0x4a   : > { %v229_v60 = vld [vmem:[%s2024_s21 + $0x78] sm:$0xff]  ;;  %v1756_v62 = vcombine.high %v224_v57, %v228_v58 }
  0x4b   : > { %v1758_v63 = vcombine.high %v225_v59, %v229_v60  ;;  %v1757_v6 = vcombine.low %v225_v59, %v229_v60  ;;  %v288_v60 = vld [vmem:[%s2024_s21 + $0x250] sm:$0xff] }
  0x4c   : > { %1055 = vmatpush2.bf16.msra.mxu0 %v1815_v2  ;;  %1108 = vmatpush2.bf16.msra.mxu1 %v1817_v3  ;;  %v220_v2 = vld [vmem:[%s2024_s21 + $0x30] sm:$0xff]  ;;  %v217_v3 = vld [vmem:[%s2024_s21 + $0x18] sm:$0xff] }
  0x4d   : > { %1056 = vmatprep.subr.bf16.mxu0 %v1808_v4  ;;  %1109 = vmatprep.subr.bf16.mxu1 %v1810_v5  ;;  %v221_v4 = vld [vmem:[%s2024_s21 + $0x38] sm:$0xff]  ;;  %v1755_v5 = vcombine.low %v224_v57, %v228_v58  ;;  %v1748_v7 = vcombine.high %v216_v1, %v220_v2 }
  0x4e   : > { %v1750_v8 = vcombine.high %v217_v3, %v221_v4  ;;  %v1749_v14 = vcombine.low %v217_v3, %v221_v4  ;;  %v280_v4 = vld [vmem:[%s2024_s21 + $0x210] sm:$0xff] }
  0x50   : > { %1057 = vmatpush2.bf16.msra.mxu0 %v1807_v10  ;;  %1110 = vmatpush2.bf16.msra.mxu1 %v1809_v11  ;;  %v340_v10 = vld [vmem:[%s2024_s21 + $0x3f0] sm:$0xff]  ;;  %v337_v11 = vld [vmem:[%s2024_s21 + $0x3d8] sm:$0xff] }
  0x51   : > { %1132 = vmatprep.subr.bf16.mxu0 %v1804_v12  ;;  %1185 = vmatprep.subr.bf16.mxu1 %v1806_v13  ;;  %v341_v12 = vld [vmem:[%s2024_s21 + $0x3f8] sm:$0xff]  ;;  %v1747_v13 = vcombine.low %v216_v1, %v220_v2  ;;  %v1868_v15 = vcombine.high %v336_v9, %v340_v10 }
  0x52   : > { %v1870_v17 = vcombine.high %v337_v11, %v341_v12  ;;  %v1869_v23 = vcombine.low %v337_v11, %v341_v12 }
  0x53   : > { %1059 = vmatmul.mubr.bf16.vlgmr.msra.gmra.mxu0 %v2111_v16  ;;  %1112 = vmatmul.mubr.bf16.vlgmr.msra.gmra.mxu1 %v2111_v16 }
  0x54   : > { %1133 = vmatpush1.bf16.msra.mxu0 %v1803_v19  ;;  %1186 = vmatpush1.bf16.msra.mxu1 %v1805_v20  ;;  %v332_v19 = vld [vmem:[%s2024_s21 + $0x3b0] sm:$0xff]  ;;  %v329_v20 = vld [vmem:[%s2024_s21 + $0x398] sm:$0xff] }
  0x55   : > { %1134 = vmatprep.subr.bf16.mxu0 %v1796_v21  ;;  %1187 = vmatprep.subr.bf16.mxu1 %v1798_v22  ;;  %v333_v21 = vld [vmem:[%s2024_s21 + $0x3b8] sm:$0xff]  ;;  %v1867_v22 = vcombine.low %v336_v9, %v340_v10  ;;  %v1860_v24 = vcombine.high %v328_v18, %v332_v19 }
  0x56   : > { %1068 = vmatprep.mubr.bf16.mxu0 %v2120_v25  ;;  %1121 = vmatprep.mubr.bf16.mxu1 %v2120_v25  ;;  %v1862_v26 = vcombine.high %v329_v20, %v333_v21  ;;  %v1861_v32 = vcombine.low %v329_v20, %v333_v21 }
  0x58   : > { %1135 = vmatpush1.bf16.msra.mxu0 %v1795_v28  ;;  %1188 = vmatpush1.bf16.msra.mxu1 %v1797_v29  ;;  %v324_v28 = vld [vmem:[%s2024_s21 + $0x370] sm:$0xff]  ;;  %v321_v29 = vld [vmem:[%s2024_s21 + $0x358] sm:$0xff] }
  0x59   : > { %1136 = vmatprep.subr.bf16.mxu0 %v1788_v30  ;;  %1189 = vmatprep.subr.bf16.mxu1 %v1790_v31  ;;  %v325_v30 = vld [vmem:[%s2024_s21 + $0x378] sm:$0xff]  ;;  %v1859_v31 = vcombine.low %v328_v18, %v332_v19  ;;  %v1852_v33 = vcombine.high %v320_v27, %v324_v28 }
  0x5a   : > { %v1854_v34 = vcombine.high %v321_v29, %v325_v30  ;;  %v1853_v41 = vcombine.low %v321_v29, %v325_v30 }
  0x5b   : > { %1069 = vmatmul.mubr.bf16.gmra.mxu0 %v2134_v36  ;;  %1122 = vmatmul.mubr.bf16.gmra.mxu1 %v2134_v36 }
  0x5c   : > { %1137 = vmatpush1.bf16.msra.mxu0 %v1787_v37  ;;  %1190 = vmatpush1.bf16.msra.mxu1 %v1789_v38  ;;  %v316_v37 = vld [vmem:[%s2024_s21 + $0x330] sm:$0xff]  ;;  %v313_v38 = vld [vmem:[%s2024_s21 + $0x318] sm:$0xff] }
  0x5d   : > { %1138 = vmatprep.subr.bf16.mxu0 %v1780_v39  ;;  %1191 = vmatprep.subr.bf16.mxu1 %v1782_v40  ;;  %v317_v39 = vld [vmem:[%s2024_s21 + $0x338] sm:$0xff]  ;;  %v1851_v40 = vcombine.low %v320_v27, %v324_v28  ;;  %v1844_v42 = vcombine.high %v312_v35, %v316_v37 }
  0x5e   : > { %1164 = vmatprep.mubr.bf16.mxu0 %v2014_v0  ;;  %1217 = vmatprep.mubr.bf16.mxu1 %v2014_v0  ;;  %v1765_v0 = vcombine.low %v233_v51, %v237_v52  ;;  %v1846_v43 = vcombine.high %v313_v38, %v317_v39  ;;  %v1845_v49 = vcombine.low %v313_v38, %v317_v39  ;;  %v296_v52 = vld [vmem:[%s2024_s21 + $0x290] sm:$0xff] }
  0x60   : > { %1139 = vmatpush1.bf16.msra.mxu0 %v1779_v45  ;;  %1192 = vmatpush1.bf16.msra.mxu1 %v1781_v46  ;;  %v308_v45 = vld [vmem:[%s2024_s21 + $0x2f0] sm:$0xff]  ;;  %v305_v46 = vld [vmem:[%s2024_s21 + $0x2d8] sm:$0xff] }
  0x61   : > { %1140 = vmatprep.subr.bf16.mxu0 %v1772_v47  ;;  %1193 = vmatprep.subr.bf16.mxu1 %v1774_v48  ;;  %v309_v47 = vld [vmem:[%s2024_s21 + $0x2f8] sm:$0xff]  ;;  %v1843_v48 = vcombine.low %v312_v35, %v316_v37  ;;  %v1836_v50 = vcombine.high %v304_v44, %v308_v45 }
  0x62   : > { %v1838_v51 = vcombine.high %v305_v46, %v309_v47  ;;  %v1837_v57 = vcombine.low %v305_v46, %v309_v47 }
  0x64   : > { %1141 = vmatpush1.bf16.msra.mxu0 %v1771_v53  ;;  %1194 = vmatpush1.bf16.msra.mxu1 %v1773_v54  ;;  %v300_v53 = vld [vmem:[%s2024_s21 + $0x2b0] sm:$0xff]  ;;  %v297_v54 = vld [vmem:[%s2024_s21 + $0x298] sm:$0xff] }
  0x65   : > { %1142 = vmatprep.subr.bf16.mxu0 %v1764_v55  ;;  %1195 = vmatprep.subr.bf16.mxu1 %v1766_v56  ;;  %v301_v55 = vld [vmem:[%s2024_s21 + $0x2b8] sm:$0xff]  ;;  %v1835_v56 = vcombine.low %v304_v44, %v308_v45  ;;  %v1828_v58 = vcombine.high %v296_v52, %v300_v53 }
  0x66   : > { %v1830_v59 = vcombine.high %v297_v54, %v301_v55  ;;  %v1829_v1 = vcombine.low %v297_v54, %v301_v55 }
  0x68   : > { %1143 = vmatpush1.bf16.msra.mxu0 %v1763_v61  ;;  %1196 = vmatpush1.bf16.msra.mxu1 %v1765_v0  ;;  %v292_v61 = vld [vmem:[%s2024_s21 + $0x270] sm:$0xff]  ;;  %v289_v0 = vld [vmem:[%s2024_s21 + $0x258] sm:$0xff] }
  0x69   : > { %1144 = vmatprep.subr.bf16.mxu0 %v1756_v62  ;;  %1197 = vmatprep.subr.bf16.mxu1 %v1758_v63  ;;  %v293_v62 = vld [vmem:[%s2024_s21 + $0x278] sm:$0xff]  ;;  %v1827_v63 = vcombine.low %v296_v52, %v300_v53  ;;  %v1820_v2 = vcombine.high %v288_v60, %v292_v61 }
  0x6a   : > { %v1822_v3 = vcombine.high %v289_v0, %v293_v62  ;;  %v1821_v9 = vcombine.low %v289_v0, %v293_v62 }
  0x6c   : > { %1145 = vmatpush1.bf16.msra.mxu0 %v1755_v5  ;;  %1198 = vmatpush1.bf16.msra.mxu1 %v1757_v6  ;;  %v284_v5 = vld [vmem:[%s2024_s21 + $0x230] sm:$0xff]  ;;  %v281_v6 = vld [vmem:[%s2024_s21 + $0x218] sm:$0xff] }
  0x6d   : > { %1146 = vmatprep.subr.bf16.mxu0 %v1748_v7  ;;  %1199 = vmatprep.subr.bf16.mxu1 %v1750_v8  ;;  %v285_v7 = vld [vmem:[%s2024_s21 + $0x238] sm:$0xff]  ;;  %v1819_v8 = vcombine.low %v288_v60, %v292_v61  ;;  %v1812_v10 = vcombine.high %v280_v4, %v284_v5  ;;  %v1811_v12 = vcombine.low %v280_v4, %v284_v5 }
  0x6e   : > { %v1814_v11 = vcombine.high %v281_v6, %v285_v7 }
  0x70   : > { %1147 = vmatpush1.bf16.msra.mxu0 %v1747_v13  ;;  %1200 = vmatpush1.bf16.msra.mxu1 %v1749_v14  ;;  %v1813_v13 = vcombine.low %v281_v6, %v285_v7 }
  0x71   : > { %1148 = vmatprep.subr.bf16.mxu0 %v1868_v15  ;;  %1201 = vmatprep.subr.bf16.mxu1 %v1870_v17 }
  0x74   : > { %1149 = vmatpush2.bf16.msra.mxu0 %v1867_v22  ;;  %1202 = vmatpush2.bf16.msra.mxu1 %v1869_v23 }
  0x75   : > { %1150 = vmatprep.subr.bf16.mxu0 %v1860_v24  ;;  %1203 = vmatprep.subr.bf16.mxu1 %v1862_v26 }
  0x78   : > { %1151 = vmatpush2.bf16.msra.mxu0 %v1859_v31  ;;  %1204 = vmatpush2.bf16.msra.mxu1 %v1861_v32 }
  0x79   : > { %1152 = vmatprep.subr.bf16.mxu0 %v1852_v33  ;;  %1205 = vmatprep.subr.bf16.mxu1 %v1854_v34 }
  0x7c   : > { %1153 = vmatpush2.bf16.msra.mxu0 %v1851_v40  ;;  %1206 = vmatpush2.bf16.msra.mxu1 %v1853_v41 }
  0x7d   : > { %1154 = vmatprep.subr.bf16.mxu0 %v1844_v42  ;;  %1207 = vmatprep.subr.bf16.mxu1 %v1846_v43 }
  0x80   : > { %1155 = vmatpush2.bf16.msra.mxu0 %v1843_v48  ;;  %1208 = vmatpush2.bf16.msra.mxu1 %v1845_v49 }
  0x81   : > { %1156 = vmatprep.subr.bf16.mxu0 %v1836_v50  ;;  %1209 = vmatprep.subr.bf16.mxu1 %v1838_v51 }
  0x84   : > { %1157 = vmatpush2.bf16.msra.mxu0 %v1835_v56  ;;  %1210 = vmatpush2.bf16.msra.mxu1 %v1837_v57 }
  0x85   : > { %1158 = vmatprep.subr.bf16.mxu0 %v1828_v58  ;;  %1211 = vmatprep.subr.bf16.mxu1 %v1830_v59 }
  0x88   : > { %1159 = vmatpush2.bf16.msra.mxu0 %v1827_v63  ;;  %1212 = vmatpush2.bf16.msra.mxu1 %v1829_v1 }
  0x89   : > { %1160 = vmatprep.subr.bf16.mxu0 %v1820_v2  ;;  %1213 = vmatprep.subr.bf16.mxu1 %v1822_v3 }
  0x8c   : > { %1161 = vmatpush2.bf16.msra.mxu0 %v1819_v8  ;;  %1214 = vmatpush2.bf16.msra.mxu1 %v1821_v9 }
  0x8d   : > { %1162 = vmatprep.subr.bf16.mxu0 %v1812_v10  ;;  %1215 = vmatprep.subr.bf16.mxu1 %v1814_v11 }
  0x90   : > { %1163 = vmatpush2.bf16.msra.mxu0 %v1811_v12  ;;  %1216 = vmatpush2.bf16.msra.mxu1 %v1813_v13 }
  0x93   : > { %1165 = vmatmul.mubr.bf16.vlgmr.msra.gmra.mxu0 %v2111_v16  ;;  %1218 = vmatmul.mubr.bf16.vlgmr.msra.gmra.mxu1 %v2111_v16 }
  0x94   : > { %1174 = vmatprep.mubr.bf16.mxu0 %v2120_v25  ;;  %1227 = vmatprep.mubr.bf16.mxu1 %v2120_v25 }
  0x9b   : > { %1175 = vmatmul.mubr.bf16.gmra.mxu0 %v2134_v36  ;;  %1228 = vmatmul.mubr.bf16.gmra.mxu1 %v2134_v36 }
  0x9d   : > { %v2199_v28 = vpop.permute.xlu1 %358 }
  0xa1   : > { %v2218_v41 = vpop.permute.xlu1 %363 }
  0xa5   : > { %v349_v24 = vpop.permute.xlu0 %348 }
  0xa9   : > { %v354_v36 = vpop.permute.xlu0 %353 }
 0x113   : > { %v1060_v14 = vpop.f32.mrf.mxu0  ;;  %v1113_v15 = vpop.f32.mrf.mxu1 }
 0x114   : > { %v2195_v16 = vadd.f32 %v1060_v14, %v349_v24  ;;  %v2201_v30 = vadd.f32 %v1113_v15, %v349_v24 }
 0x115   : > { %v1062_v17 = vpop.f32.mrf.mxu0  ;;  %v1115_v18 = vpop.f32.mrf.mxu1 }
 0x116   : > { %v2197_v27 = vadd.f32 %v1062_v17, %v349_v24  ;;  %v2220_v43 = vadd.f32 %v1115_v18, %v349_v24 }
 0x117   : > { %v1064_v19 = vpop.f32.mrf.mxu0  ;;  %v1117_v20 = vpop.f32.mrf.mxu1 }
 0x118   : > { %v1238_v31 = vadd.f32 %v2197_v27, %v2195_v16  ;;  %v2207_v34 = vadd.f32 %v1064_v19, %v354_v36  ;;  %v2222_v44 = vadd.f32 %v1117_v20, %v354_v36 }
 0x119   : > { %v1066_v21 = vpop.f32.mrf.mxu0  ;;  %v1119_v22 = vpop.f32.mrf.mxu1 }
 0x11a   : > { %v2205_v32 = vadd.f32 %v1066_v21, %v354_v36  ;;  %v1239_v39 = vadd.f32 %v1238_v31, %v2201_v30  ;;  %v2239_v56 = vadd.f32 %v1119_v22, %v354_v36 }
 0x11b   : > { %v1070_v23 = vpop.f32.mrf.mxu0  ;;  %v1123_v26 = vpop.f32.mrf.mxu1 }
 0x11c   : > { %v2210_v37 = vadd.f32 %v1070_v23, %v2199_v28  ;;  %v1249_v40 = vadd.f32 %v2205_v32, %v2207_v34  ;;  %v2227_v47 = vadd.f32 %v1123_v26, %v2199_v28  ;;  %v1240_v51 = vadd.f32 %v1239_v39, %v2220_v43 }
 0x11d   : > { %v1072_v25 = vpop.f32.mrf.mxu0  ;;  %v1125_v29 = vpop.f32.mrf.mxu1 }
 0x11e   : > { %v2213_v38 = vadd.f32 %v1072_v25, %v2199_v28  ;;  %v1250_v52 = vadd.f32 %v1249_v40, %v2222_v44  ;;  %v2242_v57 = vadd.f32 %v1125_v29, %v2199_v28 }
 0x11f   : > { %v1074_v33 = vpop.f32.mrf.mxu0  ;;  %v1127_v35 = vpop.f32.mrf.mxu1 }
 0x120   : > { %v1259_v46 = vadd.f32 %v2213_v38, %v2210_v37  ;;  %v2230_v48 = vadd.f32 %v1074_v33, %v2218_v41  ;;  %v2251_v62 = vadd.f32 %v1127_v35, %v2218_v41  ;;  %v1251_v2 = vadd.f32 %v1250_v52, %v2239_v56 }
 0x121   : > { %v1076_v42 = vpop.f32.mrf.mxu0  ;;  %v1129_v45 = vpop.f32.mrf.mxu1 }
 0x122   : > { %v2233_v49 = vadd.f32 %v1076_v42, %v2218_v41  ;;  %v1260_v61 = vadd.f32 %v1259_v46, %v2227_v47  ;;  %v2262_v8 = vadd.f32 %v1129_v45, %v2218_v41 }
 0x124   : > { %v1269_v0 = vadd.f32 %v2233_v49, %v2230_v48  ;;  %v1261_v13 = vadd.f32 %v1260_v61, %v2242_v57 }
 0x126   : > { %v1270_v14 = vadd.f32 %v1269_v0, %v2251_v62 }
 0x153   : > { %v1166_v50 = vpop.f32.mrf.mxu0  ;;  %v1219_v54 = vpop.f32.mrf.mxu1 }
 0x154   : > { %v2237_v53 = vadd.f32 %v1166_v50, %v349_v24  ;;  %v2256_v3 = vadd.f32 %v1219_v54, %v349_v24 }
 0x155   : > { %v1168_v55 = vpop.f32.mrf.mxu0  ;;  %v1221_v60 = vpop.f32.mrf.mxu1 }
 0x156   : > { %v1241_v58 = vadd.f32 %v1240_v51, %v2237_v53  ;;  %v2245_v59 = vadd.f32 %v1168_v55, %v349_v24  ;;  %v2253_v63 = vadd.f32 %v1221_v60, %v349_v24 }
 0x157   : > { %v1170_v1 = vpop.f32.mrf.mxu0  ;;  %v1223_v6 = vpop.f32.mrf.mxu1 }
 0x158   : > { %v1242_v4 = vadd.f32 %v1241_v58, %v2245_v59  ;;  %v2259_v5 = vadd.f32 %v1170_v1, %v354_v36  ;;  %v1245_v18 = vsel %vm1244_vm0, %v2253_v63, 0.0  ;;  %v2274_v19 = vadd.f32 %v1223_v6, %v354_v36 }
 0x159   : > { %v1172_v7 = vpop.f32.mrf.mxu0  ;;  %v1225_v11 = vpop.f32.mrf.mxu1 }
 0x15a   : > { %v1252_v9 = vadd.f32 %v1251_v2, %v2259_v5  ;;  %v2265_v10 = vadd.f32 %v1172_v7, %v354_v36  ;;  %v1243_v12 = vadd.f32 %v1242_v4, %v2256_v3  ;;  %v2270_v15 = vadd.f32 %v1225_v11, %v354_v36 }
 0x15b   : > { %v1176_v17 = vpop.f32.mrf.mxu0  ;;  %v1229_v22 = vpop.f32.mrf.mxu1  ;;  %v1271_v36 = vadd.f32 %v1270_v14, %v2262_v8 }
 0x15c   : > { %v1253_v20 = vadd.f32 %v1252_v9, %v2265_v10  ;;  %v2278_v21 = vadd.f32 %v1176_v17, %v2199_v28  ;;  %v1246_v23 = vadd.f32 %v1245_v18, %v1243_v12  ;;  %v1255_v39 = vsel %vm1244_vm0, %v2270_v15, 0.0 }
 0x15d   : > { %v1178_v24 = vpop.f32.mrf.mxu0  ;;  %v1231_v29 = vpop.f32.mrf.mxu1  ;;  %v2292_v40 = vadd.f32 %v1229_v22, %v2199_v28 }
 0x15e   : > { %v1262_v26 = vadd.f32 %v1261_v13, %v2278_v21  ;;  %v2282_v25 = vadd.f32 %v1178_v24, %v2199_v28  ;;  %1247 = vadd.xlane.f32.xlu0 %v1246_v23  ;;  %v1254_v31 = vadd.f32 %v1253_v20, %v2274_v19  ;;  %v2287_v33 = vadd.f32 %v1231_v29, %v2199_v28 }
 0x15f   : > { %v1180_v35 = vpop.f32.mrf.mxu0  ;;  %v1233_v46 = vpop.f32.mrf.mxu1 }
 0x160   : > { %v1263_v42 = vadd.f32 %v1262_v26, %v2282_v25  ;;  %v2296_v45 = vadd.f32 %v1180_v35, %v2218_v41  ;;  %v1256_v50 = vadd.f32 %v1255_v39, %v1254_v31  ;;  %v1265_v60 = vsel %vm1244_vm0, %v2287_v33, 0.0 }
 0x161   : > { %v1182_v51 = vpop.f32.mrf.mxu0  ;;  %v1235_v55 = vpop.f32.mrf.mxu1  ;;  %v2309_v61 = vadd.f32 %v1233_v46, %v2218_v41 }
 0x162   : > { %v1272_v52 = vadd.f32 %v1271_v36, %v2296_v45  ;;  %v2300_v54 = vadd.f32 %v1182_v51, %v2218_v41  ;;  %1257 = vadd.xlane.f32.xlu1 %v1256_v50  ;;  %v1264_v58 = vadd.f32 %v1263_v42, %v2292_v40  ;;  %v2304_v28 = vadd.f32 %v1235_v55, %v2218_v41 }
 0x164   : > { %v1273_v0 = vadd.f32 %v1272_v52, %v2300_v54  ;;  %v1266_v1 = vadd.f32 %v1265_v60, %v1264_v58  ;;  %v1275_v4 = vsel %vm1244_vm0, %v2304_v28, 0.0 }
 0x166   : > { %1267 = vadd.xlane.f32.xlu0 %v1266_v1  ;;  %v1274_v2 = vadd.f32 %v1273_v0, %v2309_v61 }
 0x168   : > { %v1276_v6 = vadd.f32 %v1275_v4, %v1274_v2 }
 0x16a   : > { %1277 = vadd.xlane.f32.xlu0 %v1276_v6 }
 0x1e7   : > { %v1248_v7 = vpop.xlane.xlu0 %1247 }
 0x1e8   : > { %v1280_v9 = vmul.f32 0.0010405828, %v1248_v7 }
 0x1ea   : > { %v2316_v11 = vsub.f32 %v2195_v16, %v1280_v9  ;;  %v2319_v12 = vsub.f32 %v2197_v27, %v1280_v9  ;;  %v2322_v41 = vsub.f32 %v2201_v30, %v1280_v9  ;;  %v2325_v17 = vsub.f32 %v2220_v43, %v1280_v9 }
 0x1eb   : > { %v1258_v13 = vpop.xlane.xlu1 %1257  ;;  %v2332_v16 = vsub.f32 %v2237_v53, %v1280_v9  ;;  %v2335_v27 = vsub.f32 %v2245_v59, %v1280_v9  ;;  %v2346_v26 = vsub.f32 %v2256_v3, %v1280_v9  ;;  %v2352_v59 = vsub.f32 %v2253_v63, %v1280_v9 }
 0x1ec   : > { %v1281_v14 = vmul.f32 0.0010405828, %v1258_v13  ;;  %v1316_v18 = vmul.f32 %v2316_v11, %v2316_v11  ;;  %v1317_v20 = vmul.f32 %v2319_v12, %v2319_v12  ;;  %v1318_v30 = vmul.f32 %v2322_v41, %v2322_v41 }
 0x1ed   : > { %v1319_v31 = vmul.f32 %v2325_v17, %v2325_v17  ;;  %v1321_v63 = vmul.f32 %v2335_v27, %v2335_v27  ;;  %v1323_v52 = vmul.f32 %v2352_v59, %v2352_v59 }
 0x1ee   : > { %v1348_v22 = vadd.f32 %v1317_v20, %v1316_v18  ;;  %v2340_v23 = vsub.f32 %v2207_v34, %v1281_v14  ;;  %v2343_v43 = vsub.f32 %v2205_v32, %v1281_v14  ;;  %v2349_v53 = vsub.f32 %v2222_v44, %v1281_v14 }
 0x1ef   : > { %v1268_v24 = vpop.xlane.xlu0 %1267  ;;  %v2357_v34 = vsub.f32 %v2239_v56, %v1281_v14  ;;  %v1320_v44 = vmul.f32 %v2332_v16, %v2332_v16  ;;  %v2368_v39 = vsub.f32 %v2259_v5, %v1281_v14  ;;  %v1322_v56 = vmul.f32 %v2346_v26, %v2346_v26 }
 0x1f0   : > { %v1282_v29 = vmul.f32 0.0010405828, %v1268_v24  ;;  %v1349_v36 = vadd.f32 %v1348_v22, %v1318_v30  ;;  %v1324_v32 = vmul.f32 %v2340_v23, %v2340_v23  ;;  %v1325_v3 = vmul.f32 %v2343_v43, %v2343_v43 }
 0x1f1   : > { %v1326_v46 = vmul.f32 %v2349_v53, %v2349_v53  ;;  %v2380_v58 = vsub.f32 %v2265_v10, %v1281_v14  ;;  %v2386_v60 = vsub.f32 %v2274_v19, %v1281_v14  ;;  %v1327_v0 = vmul.f32 %v2357_v34, %v2357_v34 }
 0x1f2   : > { %v1350_v35 = vadd.f32 %v1349_v36, %v1319_v31  ;;  %v1358_v50 = vadd.f32 %v1325_v3, %v1324_v32  ;;  %v2375_v51 = vsub.f32 %v2210_v37, %v1282_v29  ;;  %v2383_v5 = vsub.f32 %v2213_v38, %v1282_v29 }
 0x1f3   : > { %v1278_v42 = vpop.xlane.xlu0 %1277  ;;  %v2391_v37 = vsub.f32 %v2227_v47, %v1282_v29  ;;  %v2394_v6 = vsub.f32 %v2270_v15, %v1281_v14  ;;  %v1328_v10 = vmul.f32 %v2368_v39, %v2368_v39  ;;  %v2399_v7 = vsub.f32 %v2242_v57, %v1282_v29 }
 0x1f4   : > { %v1351_v55 = vadd.f32 %v1350_v35, %v1320_v44  ;;  %v1359_v1 = vadd.f32 %v1358_v50, %v1326_v46  ;;  %v1283_v2 = vmul.f32 0.0010405828, %v1278_v42  ;;  %v1332_v19 = vmul.f32 %v2375_v51, %v2375_v51 }
 0x1f5   : > { %v1333_v9 = vmul.f32 %v2383_v5, %v2383_v5  ;;  %v1354_v13 = vsel %vm1244_vm0, %v1323_v52, 0.0  ;;  %v1329_v15 = vmul.f32 %v2380_v58, %v2380_v58  ;;  %v2409_v14 = vsub.f32 %v2278_v21, %v1282_v29 }
 0x1f6   : > { %v1352_v4 = vadd.f32 %v1351_v55, %v1321_v63  ;;  %v1360_v38 = vadd.f32 %v1359_v1, %v1327_v0  ;;  %v1330_v18 = vmul.f32 %v2386_v60, %v2386_v60  ;;  %v1334_v20 = vmul.f32 %v2391_v37, %v2391_v37 }
 0x1f7   : > { %v1368_v30 = vadd.f32 %v1333_v9, %v1332_v19  ;;  %v1331_v24 = vmul.f32 %v2394_v6, %v2394_v6  ;;  %v2418_v31 = vsub.f32 %v2230_v48, %v1283_v2  ;;  %v2421_v36 = vsub.f32 %v2233_v49, %v1283_v2 }
 0x1f8   : > { %v1353_v47 = vadd.f32 %v1352_v4, %v1322_v56  ;;  %v1361_v57 = vadd.f32 %v1360_v38, %v1328_v10  ;;  %v2424_v32 = vsub.f32 %v2282_v25, %v1282_v29  ;;  %v1335_v3 = vmul.f32 %v2399_v7, %v2399_v7 }
 0x1f9   : > { %v1369_v44 = vadd.f32 %v1368_v30, %v1334_v20  ;;  %v2429_v63 = vsub.f32 %v2292_v40, %v1282_v29  ;;  %v2432_v35 = vsub.f32 %v2287_v33, %v1282_v29  ;;  %v1336_v48 = vmul.f32 %v2409_v14, %v2409_v14 }
 0x1fa   : > { %v1355_v22 = vadd.f32 %v1354_v13, %v1353_v47  ;;  %v1362_v21 = vadd.f32 %v1361_v57, %v1329_v15  ;;  %v2437_v49 = vsub.f32 %v2251_v62, %v1283_v2  ;;  %v1340_v56 = vmul.f32 %v2418_v31, %v2418_v31 }
 0x1fb   : > { %v1370_v25 = vadd.f32 %v1369_v44, %v1335_v3  ;;  %v1341_v46 = vmul.f32 %v2421_v36, %v2421_v36  ;;  %v1364_v40 = vsel %vm1244_vm0, %v1331_v24, 0.0  ;;  %v2445_v50 = vsub.f32 %v2262_v8, %v1283_v2 }
 0x1fc   : > { %1356 = vadd.xlane.f32.xlu1 %v1355_v22  ;;  %v1363_v42 = vadd.f32 %v1362_v21, %v1330_v18  ;;  %v1337_v29 = vmul.f32 %v2424_v32, %v2424_v32  ;;  %v1339_v62 = vmul.f32 %v2432_v35, %v2432_v35  ;;  %v2452_v55 = vsub.f32 %v2296_v45, %v1283_v2 }
 0x1fd   : > { %v1371_v52 = vadd.f32 %v1370_v25, %v1336_v48  ;;  %v1342_v0 = vmul.f32 %v2437_v49, %v2437_v49  ;;  %v1378_v1 = vadd.f32 %v1341_v46, %v1340_v56  ;;  %v1338_v8 = vmul.f32 %v2429_v63, %v2429_v63 }
 0x1fe   : > { %v1365_v33 = vadd.f32 %v1364_v40, %v1363_v42  ;;  %v2459_v10 = vsub.f32 %v2300_v54, %v1283_v2  ;;  %v1343_v38 = vmul.f32 %v2445_v50, %v2445_v50  ;;  %v2464_v45 = vsub.f32 %v2304_v28, %v1283_v2 }
 0x1ff   : > { %v1372_v4 = vadd.f32 %v1371_v52, %v1337_v29  ;;  %v1379_v19 = vadd.f32 %v1378_v1, %v1342_v0  ;;  %v1374_v47 = vsel %vm1244_vm0, %v1339_v62, 0.0  ;;  %v2468_v13 = vsub.f32 %v2309_v61, %v1283_v2 }
 0x200   : > { %1366 = vadd.xlane.f32.xlu0 %v1365_v33  ;;  %v1344_v15 = vmul.f32 %v2452_v55, %v2452_v55  ;;  %v1345_v54 = vmul.f32 %v2459_v10, %v2459_v10  ;;  %v1347_v30 = vmul.f32 %v2464_v45, %v2464_v45 }
 0x201   : > { %v1373_v9 = vadd.f32 %v1372_v4, %v1338_v8  ;;  %v1380_v18 = vadd.f32 %v1379_v19, %v1343_v38  ;;  %v1346_v28 = vmul.f32 %v2468_v13, %v2468_v13 }
 0x202   : > { %v1384_v61 = vsel %vm1244_vm0, %v1347_v30, 0.0 }
 0x203   : > { %v1375_v57 = vadd.f32 %v1374_v47, %v1373_v9  ;;  %v1381_v20 = vadd.f32 %v1380_v18, %v1344_v15 }
 0x205   : > { %1376 = vadd.xlane.f32.xlu1 %v1375_v57  ;;  %v1382_v22 = vadd.f32 %v1381_v20, %v1345_v54 }
 0x207   : > { %v1383_v24 = vadd.f32 %v1382_v22, %v1346_v28 }
 0x209   : > { %v1385_v2 = vadd.f32 %v1384_v61, %v1383_v24 }
 0x20b   : > { %1386 = vadd.xlane.f32.xlu0 %v1385_v2 }
 0x285   : > { %v1357_v21 = vpop.xlane.xlu1 %1356 }
 0x286   : > { %v1388_v3 = vmul.f32 0.0010405828, %v1357_v21 }
 0x288   : > { %v1392_v44 = vadd.f32 1e-05, %v1388_v3 }
 0x289   : > { %v1367_v48 = vpop.xlane.xlu0 %1366 }
 0x28a   : > { %1940 = vrsqrt.f32 %v1392_v44  ;;  %v1389_v42 = vmul.f32 0.0010405828, %v1367_v48 }
 0x28c   : > { %v1393_v25 = vadd.f32 1e-05, %v1389_v42 }
 0x28e   : > { %1942 = vrsqrt.f32 %v1393_v25  ;;  %v1377_v56 = vpop.xlane.xlu1 %1376 }
 0x28f   : > { %v1390_v46 = vmul.f32 0.0010405828, %v1377_v56 }
 0x291   : > { %v1394_v40 = vadd.f32 1e-05, %v1390_v46 }
 0x293   : > { %1944 = vrsqrt.f32 %v1394_v40 }
 0x297   : > { %v1941_v33 = vpop.eup %1940 }
 0x298   : > { %v1400_v29 = vmul.f32 %v1941_v33, %v2316_v11  ;;  %v1401_v52 = vmul.f32 %v1941_v33, %v2319_v12  ;;  %v1402_v62 = vmul.f32 %v1941_v33, %v2322_v41  ;;  %v1403_v0 = vmul.f32 %v1941_v33, %v2325_v17 }
 0x299   : > { %v1404_v1 = vmul.f32 %v1941_v33, %v2332_v16  ;;  %v1405_v8 = vmul.f32 %v1941_v33, %v2335_v27  ;;  %v1406_v4 = vmul.f32 %v1941_v33, %v2346_v26  ;;  %v1407_v38 = vmul.f32 %v1941_v33, %v2352_v59 }
 0x29a   : > { %vm1432_vm3 = vcmp.gt.f32.partialorder %v1400_v29, 0.0  ;;  %vm1433_vm4 = vcmp.gt.f32.partialorder %v1401_v52, 0.0  ;;  %vm1434_vm5 = vcmp.gt.f32.partialorder %v1402_v62, 0.0  ;;  %vm1435_vm6 = vcmp.gt.f32.partialorder %v1403_v0, 0.0 }
 0x29b   : > { %vm1436_vm7 = vcmp.gt.f32.partialorder %v1404_v1, 0.0  ;;  %vm1437_vm8 = vcmp.gt.f32.partialorder %v1405_v8, 0.0  ;;  %vm1438_vm9 = vcmp.gt.f32.partialorder %v1406_v4, 0.0  ;;  %vm1439_vm10 = vcmp.gt.f32.partialorder %v1407_v38, 0.0  ;;  %v1943_v11 = vpop.eup %1942 }
 0x29c   : > { %v1464_v12 = vmul.f32 0.2, %v1400_v29  ;;  %v1465_v41 = vmul.f32 0.2, %v1401_v52  ;;  %v1466_v17 = vmul.f32 0.2, %v1402_v62  ;;  %v1408_v26 = vmul.f32 %v1943_v11, %v2340_v23 }
 0x29d   : > { %v1467_v16 = vmul.f32 0.2, %v1403_v0  ;;  %v1468_v19 = vmul.f32 0.2, %v1404_v1  ;;  %v1469_v27 = vmul.f32 0.2, %v1405_v8  ;;  %v1409_v21 = vmul.f32 %v1943_v11, %v2343_v43 }
 0x29e   : > { %v1470_v9 = vmul.f32 0.2, %v1406_v4  ;;  %v1471_v59 = vmul.f32 0.2, %v1407_v38  ;;  %v1496_v47 = vsel %vm1432_vm3, %v1400_v29, %v1464_v12  ;;  %v1497_v15 = vsel %vm1433_vm4, %v1401_v52, %v1465_v41 }
 0x29f   : > { %v1498_v18 = vsel %vm1434_vm5, %v1402_v62, %v1466_v17  ;;  %v1499_v57 = vsel %vm1435_vm6, %v1403_v0, %v1467_v16  ;;  %v1500_v54 = vsel %vm1436_vm7, %v1404_v1, %v1468_v19  ;;  %v1501_v23 = vsel %vm1437_vm8, %v1405_v8, %v1469_v27 }
 0x2a0   : > { %v1502_v30 = vsel %vm1438_vm9, %v1406_v4, %v1470_v9  ;;  %v1503_v28 = vsel %vm1439_vm10, %v1407_v38, %v1471_v59  ;;  %v1891_v22 = vpack.c.bf16 %v1497_v15, %v1496_v47  ;;  %v1892_v24 = vpack.c.bf16 %v1499_v57, %v1498_v18  ;;  %v1945_v44 = vpop.eup %1944  ;;  %v1387_v18 = vpop.xlane.xlu0 %1386 }
 0x2a1   : > { %v1893_v61 = vpack.c.bf16 %v1501_v23, %v1500_v54  ;;  %v1894_v2 = vpack.c.bf16 %v1503_v28, %v1502_v30  ;;  %v1410_v3 = vmul.f32 %v1943_v11, %v2349_v53  ;;  %v1411_v48 = vmul.f32 %v1943_v11, %v2357_v34 }
 0x2a2   : > { %1624 = vst [vmem:[%s2494_s12] sm:$0xff] %v1891_v22  ;;  %1625 = vst [vmem:[%s2494_s12 + $0x8] sm:$0xff] %v1892_v24  ;;  %v1412_v42 = vmul.f32 %v1943_v11, %v2368_v39  ;;  %v1413_v25 = vmul.f32 %v1943_v11, %v2380_v58  ;;  %v1414_v56 = vmul.f32 %v1943_v11, %v2386_v60  ;;  %vm1440_vm12 = vcmp.gt.f32.partialorder %v1408_v26, 0.0 }
 0x2a3   : > { %1626 = vst [vmem:[%s2494_s12 + $0x10] sm:$0xff] %v1893_v61  ;;  %1630 = vst.msk [vmem:[%s2494_s12 + $0x18] sm:$0xff] %vm2502_vm11, %v1894_v2  ;;  %v1415_v46 = vmul.f32 %v1943_v11, %v2394_v6  ;;  %vm1441_vm13 = vcmp.gt.f32.partialorder %v1409_v21, 0.0  ;;  %vm1442_vm14 = vcmp.gt.f32.partialorder %v1410_v3, 0.0  ;;  %vm1443_vm15 = vcmp.gt.f32.partialorder %v1411_v48, 0.0 }
 0x2a4   : > { %vm1444_vm0 = vcmp.gt.f32.partialorder %v1412_v42, 0.0  ;;  %vm1445_vm1 = vcmp.gt.f32.partialorder %v1413_v25, 0.0  ;;  %vm1446_vm2 = vcmp.gt.f32.partialorder %v1414_v56, 0.0  ;;  %v1472_v43 = vmul.f32 0.2, %v1408_v26 }
 0x2a5   : > { %vm1447_vm3 = vcmp.gt.f32.partialorder %v1415_v46, 0.0  ;;  %v1473_v53 = vmul.f32 0.2, %v1409_v21  ;;  %v1416_v34 = vmul.f32 %v1945_v44, %v2375_v51  ;;  %v1474_v39 = vmul.f32 0.2, %v1410_v3 }
 0x2a6   : > { %v1475_v58 = vmul.f32 0.2, %v1411_v48  ;;  %v1476_v60 = vmul.f32 0.2, %v1412_v42  ;;  %v1417_v40 = vmul.f32 %v1945_v44, %v2383_v5  ;;  %v1477_v33 = vmul.f32 0.2, %v1413_v25 }
 0x2a7   : > { %v1478_v6 = vmul.f32 0.2, %v1414_v56  ;;  %v1479_v29 = vmul.f32 0.2, %v1415_v46  ;;  %v1504_v52 = vsel %vm1440_vm12, %v1408_v26, %v1472_v43  ;;  %v1505_v62 = vsel %vm1441_vm13, %v1409_v21, %v1473_v53 }
 0x2a8   : > { %v1506_v0 = vsel %vm1442_vm14, %v1410_v3, %v1474_v39  ;;  %v1507_v1 = vsel %vm1443_vm15, %v1411_v48, %v1475_v58  ;;  %v1508_v51 = vsel %vm1444_vm0, %v1412_v42, %v1476_v60  ;;  %v1509_v8 = vsel %vm1445_vm1, %v1413_v25, %v1477_v33 }
 0x2a9   : > { %v1510_v5 = vsel %vm1446_vm2, %v1414_v56, %v1478_v6  ;;  %v1511_v4 = vsel %vm1447_vm3, %v1415_v46, %v1479_v29  ;;  %v1895_v38 = vpack.c.bf16 %v1505_v62, %v1504_v52  ;;  %v1896_v11 = vpack.c.bf16 %v1507_v1, %v1506_v0 }
 0x2aa   : > { %v1897_v12 = vpack.c.bf16 %v1509_v8, %v1508_v51  ;;  %v1898_v41 = vpack.c.bf16 %v1511_v4, %v1510_v5  ;;  %v1418_v17 = vmul.f32 %v1945_v44, %v2391_v37  ;;  %v1419_v16 = vmul.f32 %v1945_v44, %v2399_v7 }
 0x2ab   : > { %1631 = vst [vmem:[%s2494_s12 + $0x20] sm:$0xff] %v1895_v38  ;;  %v1420_v19 = vmul.f32 %v1945_v44, %v2409_v14  ;;  %v1421_v27 = vmul.f32 %v1945_v44, %v2424_v32  ;;  %v1422_v26 = vmul.f32 %v1945_v44, %v2429_v63  ;;  %1632 = vst [vmem:[%s2494_s12 + $0x28] sm:$0xff] %v1896_v11  ;;  %vm1448_vm4 = vcmp.gt.f32.partialorder %v1416_v34, 0.0 }
 0x2ac   : > { %1633 = vst [vmem:[%s2494_s12 + $0x30] sm:$0xff] %v1897_v12  ;;  %1634 = vst.msk [vmem:[%s2494_s12 + $0x38] sm:$0xff] %vm2502_vm11, %v1898_v41  ;;  %v1423_v9 = vmul.f32 %v1945_v44, %v2432_v35  ;;  %vm1449_vm5 = vcmp.gt.f32.partialorder %v1417_v40, 0.0  ;;  %vm1450_vm6 = vcmp.gt.f32.partialorder %v1418_v17, 0.0  ;;  %vm1451_vm7 = vcmp.gt.f32.partialorder %v1419_v16, 0.0 }
 0x2ad   : > { %vm1452_vm8 = vcmp.gt.f32.partialorder %v1420_v19, 0.0  ;;  %vm1453_vm9 = vcmp.gt.f32.partialorder %v1421_v27, 0.0  ;;  %vm1454_vm10 = vcmp.gt.f32.partialorder %v1422_v26, 0.0  ;;  %v1480_v37 = vmul.f32 0.2, %v1416_v34 }
 0x2ae   : > { %vm1455_vm12 = vcmp.gt.f32.partialorder %v1423_v9, 0.0  ;;  %v1481_v7 = vmul.f32 0.2, %v1417_v40  ;;  %v1482_v14 = vmul.f32 0.2, %v1418_v17 }
 0x2af   : > { %v1483_v32 = vmul.f32 0.2, %v1419_v16  ;;  %v1484_v63 = vmul.f32 0.2, %v1420_v19  ;;  %v1485_v59 = vmul.f32 0.2, %v1421_v27  ;;  %v1512_v35 = vsel %vm1448_vm4, %v1416_v34, %v1480_v37 }
 0x2b0   : > { %v1486_v47 = vmul.f32 0.2, %v1422_v26  ;;  %v1487_v15 = vmul.f32 0.2, %v1423_v9  ;;  %v1513_v57 = vsel %vm1449_vm5, %v1417_v40, %v1481_v7  ;;  %v1514_v54 = vsel %vm1450_vm6, %v1418_v17, %v1482_v14 }
 0x2b1   : > { %v1515_v23 = vsel %vm1451_vm7, %v1419_v16, %v1483_v32  ;;  %v1516_v30 = vsel %vm1452_vm8, %v1420_v19, %v1484_v63  ;;  %v1517_v28 = vsel %vm1453_vm9, %v1421_v27, %v1485_v59  ;;  %v1899_v61 = vpack.c.bf16 %v1513_v57, %v1512_v35 }
 0x2b2   : > { %v1518_v22 = vsel %vm1454_vm10, %v1422_v26, %v1486_v47  ;;  %v1519_v24 = vsel %vm1455_vm12, %v1423_v9, %v1487_v15  ;;  %v1900_v2 = vpack.c.bf16 %v1515_v23, %v1514_v54  ;;  %v1901_v21 = vpack.c.bf16 %v1517_v28, %v1516_v30 }
 0x2b3   : > { %v1902_v3 = vpack.c.bf16 %v1519_v24, %v1518_v22  ;;  %v1391_v44 = vmul.f32 0.0010405828, %v1387_v18  ;;  %1635 = vst [vmem:[%s2494_s12 + $0x40] sm:$0xff] %v1899_v61 }
 0x2b4   : > { %1636 = vst [vmem:[%s2494_s12 + $0x48] sm:$0xff] %v1900_v2  ;;  %1637 = vst [vmem:[%s2494_s12 + $0x50] sm:$0xff] %v1901_v21 }
 0x2b5   : > { %1638 = vst.msk [vmem:[%s2494_s12 + $0x58] sm:$0xff] %vm2502_vm11, %v1902_v3  ;;  %v1395_v48 = vadd.f32 1e-05, %v1391_v44 }
 0x2b7   : > { %1946 = vrsqrt.f32 %v1395_v48 }
 0x2c4   : > { %v1947_v42 = vpop.eup %1946 }
 0x2c5   : > { %v1424_v25 = vmul.f32 %v1947_v42, %v2418_v31  ;;  %v1425_v56 = vmul.f32 %v1947_v42, %v2421_v36  ;;  %v1426_v46 = vmul.f32 %v1947_v42, %v2437_v49  ;;  %v1427_v43 = vmul.f32 %v1947_v42, %v2445_v50 }
 0x2c6   : > { %v1428_v53 = vmul.f32 %v1947_v42, %v2452_v55  ;;  %v1429_v34 = vmul.f32 %v1947_v42, %v2459_v10  ;;  %v1430_v39 = vmul.f32 %v1947_v42, %v2468_v13  ;;  %v1431_v58 = vmul.f32 %v1947_v42, %v2464_v45 }
 0x2c7   : > { %vm1456_vm13 = vcmp.gt.f32.partialorder %v1424_v25, 0.0  ;;  %vm1457_vm14 = vcmp.gt.f32.partialorder %v1425_v56, 0.0  ;;  %vm1458_vm15 = vcmp.gt.f32.partialorder %v1426_v46, 0.0  ;;  %vm1459_vm0 = vcmp.gt.f32.partialorder %v1427_v43, 0.0 }
 0x2c8   : > { %vm1460_vm1 = vcmp.gt.f32.partialorder %v1428_v53, 0.0  ;;  %vm1461_vm2 = vcmp.gt.f32.partialorder %v1429_v34, 0.0  ;;  %vm1462_vm3 = vcmp.gt.f32.partialorder %v1430_v39, 0.0  ;;  %vm1463_vm4 = vcmp.gt.f32.partialorder %v1431_v58, 0.0 }
 0x2c9   : > { %v1488_v31 = vmul.f32 0.2, %v1424_v25  ;;  %v1489_v36 = vmul.f32 0.2, %v1425_v56  ;;  %v1490_v49 = vmul.f32 0.2, %v1426_v46 }
 0x2ca   : > { %v1491_v50 = vmul.f32 0.2, %v1427_v43  ;;  %v1492_v60 = vmul.f32 0.2, %v1428_v53  ;;  %v1493_v55 = vmul.f32 0.2, %v1429_v34 }
 0x2cb   : > { %v1494_v10 = vmul.f32 0.2, %v1430_v39  ;;  %v1495_v13 = vmul.f32 0.2, %v1431_v58  ;;  %v1520_v45 = vsel %vm1456_vm13, %v1424_v25, %v1488_v31  ;;  %v1521_v40 = vsel %vm1457_vm14, %v1425_v56, %v1489_v36 }
 0x2cc   : > { %v1522_v33 = vsel %vm1458_vm15, %v1426_v46, %v1490_v49  ;;  %v1523_v6 = vsel %vm1459_vm0, %v1427_v43, %v1491_v50  ;;  %v1524_v29 = vsel %vm1460_vm1, %v1428_v53, %v1492_v60  ;;  %v1525_v52 = vsel %vm1461_vm2, %v1429_v34, %v1493_v55 }
 0x2cd   : > { %v1526_v62 = vsel %vm1462_vm3, %v1430_v39, %v1494_v10  ;;  %v1527_v0 = vsel %vm1463_vm4, %v1431_v58, %v1495_v13  ;;  %v1903_v1 = vpack.c.bf16 %v1521_v40, %v1520_v45  ;;  %v1904_v51 = vpack.c.bf16 %v1523_v6, %v1522_v33 }
 0x2ce   : > { %v1905_v8 = vpack.c.bf16 %v1525_v52, %v1524_v29  ;;  %v1906_v5 = vpack.c.bf16 %v1527_v0, %v1526_v62 }
 0x2cf   : > { %1639 = vst [vmem:[%s2494_s12 + $0x60] sm:$0xff] %v1903_v1  ;;  %1640 = vst [vmem:[%s2494_s12 + $0x68] sm:$0xff] %v1904_v51 }
 0x2d0   : > { %1641 = vst [vmem:[%s2494_s12 + $0x70] sm:$0xff] %v1905_v8  ;;  %1642 = vst.msk [vmem:[%s2494_s12 + $0x78] sm:$0xff] %vm2502_vm11, %v1906_v5 }
 0x2d1 PF: > { %s13_s14 = sadd.s32 1, %s1970_s14   ;;  %s2594_s12 = smov %s1966_s13 }
 0x2d2   : > { %p10_p5 = scmp.ge.s32.totalorder %s13_s14, 4   ;;  %s2595_s13 = smov %s2597_s15 }
 0x2d4   :  { %12 = sbr.rel (!%p10_p5) target bundleno = 2 (0x2), region = 62 }

// kernel: discriminator_forward.9
= control target key start
LH: loop header
LB: loop body
LE: loop exit
PB: predicated region body
PF: predicated region fallthrough
CT: control target
= control target key end

     0   :  { %s2602_s14 = smov 0   ;;  %s2604_s15 = smov 0   ;;  %s2949_s0 = inlined_call_operand.vmem [shape: bf16[2,512,900], index: 0, kind: input, shape index: {}]   ;;  %s2950_s1 = inlined_call_operand.vmem [shape: bf16[1,512], index: 1, kind: input, shape index: {}]   ;;  %s2951_s2 = inlined_call_operand.<no memory space> [shape: f32[1,1], index: 2, kind: input, shape index: {}]   ;;  %s2952_s3 = inlined_call_operand.vmem [shape: f32[2,1,900], index: 3, kind: output, shape index: {}]  }
   0x1   :  { %v8_v0 = vstv %s2951_s2  ;;  %s2606_s16 = smov 0  }
   0x2   :  { %9 = vst [vmem:[#allocation2] sm:$0x1] %v8_v0 }
   0x3 LB: > { %s27_s2 = sadd.s32 1, %s2571_s15  ;;  %p2262_p0 = scmp.ge.s32.totalorder %s2575_s16, 1  ;;  %s2575_s16 = sphi %s2606_s16, %s15_s16   ;;  %s2571_s15 = sphi %s2604_s15, %s2954_s15   ;;  %s2567_s14 = sphi %s2602_s14, %s2953_s14  }
   0x4   : > { %p29_p1 = scmp.ge.s32.totalorder %s27_s2, 2  ;;  %p160_p2 = scmp.lt.s32.totalorder %s2575_s16, 3 }
   0x6   : > { %s2956_s2 = smov (%p29_p1, %s27_s2), 0  ;;  %p161_p3 = pnand %p2262_p0, %p160_p2 }
   0x7   : > { %p192_p4 = scmp.lt.s32.totalorder (!%p161_p3), %s2567_s14, 1 }
   0x8   : > { %164 = sbr.rel (%p161_p3) target bundleno = 487 (0x1e7), region = 32 }
   0xd   : > { %v473_v1 = vlaneseq  ;;  %s2958_s14 = smov (!%p192_p4, %s2567_s14), 1  ;;  %v2625_v2 = vld.sshfl [vmem:[%s2950_s1] sm:$0x33 pattern:$0x75316420]  ;;  %v2578_v45 = vmov 0  }
   0xe   : > { %v2577_v4 = vmov 1966171168   ;;  %s2525_s19 = sshll.u32 %s2958_s14, 11  ;;  %v485_v7 = vcombine.high %v2625_v2, %v2625_v2  ;;  %2552 = vset.pattern.permute.xlu0 %v2578_v45  ;;  %s2265_s23 = sshll.u32 %s2958_s14, 3 }
   0xf   : > { %v2628_v3 = vshrl.u32 %v473_v1, 7  ;;  %v487_v5 = vunpack.c.l.s4 %v2577_v4  ;;  %s2634_s22 = scalar_lea.vmem %s2949_s0, %s2525_s19  ;;  %s208_s26 = scalar_lea.vmem %s2952_s3, %s2265_s23  ;;  %vm2174_vm0 = vcmp.lt.s32.totalorder %v473_v1, 900 }
  0x10   : > { %v267_v8 = vld [vmem:[%s2634_s22 + $0x1c0] sm:$0xff] }
  0x11   : > { %v488_v6 = vunpack.c.0.s8 %v487_v5  ;;  %v271_v9 = vld [vmem:[%s2634_s22 + $0x1e0] sm:$0xff] }
  0x12   : > { %v395_v10 = vld [vmem:[%s2634_s22 + $0x5c0] sm:$0xff]  ;;  %v2324_v12 = vcombine.high %v267_v8, %v271_v9  ;;  %v2323_v14 = vcombine.low %v267_v8, %v271_v9 }
  0x13   : > { %v2642_v11 = vsub.s32 %v488_v6, %v2628_v3  ;;  %v399_v13 = vld [vmem:[%s2634_s22 + $0x5e0] sm:$0xff] }
  0x14   : > { %v259_v15 = vld [vmem:[%s2634_s22 + $0x180] sm:$0xff]  ;;  %v2452_v17 = vcombine.high %v395_v10, %v399_v13  ;;  %v2451_v18 = vcombine.low %v395_v10, %v399_v13  ;;  %1786 = vmatprep.subr.bf16.mxu0 %v2324_v12 }
  0x15   : > { %v263_v16 = vld [vmem:[%s2634_s22 + $0x1a0] sm:$0xff]  ;;  %v2654_v27 = vrot.slane %v485_v7, %v2642_v11  ;;  %1787 = vmatpush1.bf16.msra.mxu0 %v2323_v14 }
  0x16   : > { %v2316_v19 = vcombine.high %v259_v15, %v263_v16  ;;  %v387_v20 = vld [vmem:[%s2634_s22 + $0x580] sm:$0xff]  ;;  %1827 = vmatprep.subr.bf16.mxu1 %v2452_v17  ;;  %v2315_v28 = vcombine.low %v259_v15, %v263_v16 }
  0x17   : > { %v391_v21 = vld [vmem:[%s2634_s22 + $0x5a0] sm:$0xff]  ;;  %1828 = vmatpush1.bf16.msra.mxu1 %v2451_v18  ;;  %1818 = vmatprep.mubr.bf16.mxu0 %v2654_v27  ;;  %v2663_v36 = vcombine.high %v2654_v27, %v2654_v27 }
  0x18   : > { %v251_v22 = vld [vmem:[%s2634_s22 + $0x140] sm:$0xff]  ;;  %v2444_v23 = vcombine.high %v387_v20, %v391_v21  ;;  %1788 = vmatprep.subr.bf16.mxu0 %v2316_v19  ;;  %v2443_v29 = vcombine.low %v387_v20, %v391_v21 }
  0x19   : > { %v255_v24 = vld [vmem:[%s2634_s22 + $0x160] sm:$0xff]  ;;  %1789 = vmatpush1.bf16.msra.mxu0 %v2315_v28  ;;  %1859 = vmatprep.mubr.bf16.mxu1 %v2663_v36 }
  0x1a   : > { %v379_v25 = vld [vmem:[%s2634_s22 + $0x540] sm:$0xff]  ;;  %v2308_v30 = vcombine.high %v251_v22, %v255_v24  ;;  %1829 = vmatprep.subr.bf16.mxu1 %v2444_v23  ;;  %v2307_v37 = vcombine.low %v251_v22, %v255_v24 }
  0x1b   : > { %v383_v26 = vld [vmem:[%s2634_s22 + $0x560] sm:$0xff]  ;;  %1830 = vmatpush1.bf16.msra.mxu1 %v2443_v29 }
  0x1c   : > { %v2436_v31 = vcombine.high %v379_v25, %v383_v26  ;;  %v243_v32 = vld [vmem:[%s2634_s22 + $0x100] sm:$0xff]  ;;  %1790 = vmatprep.subr.bf16.mxu0 %v2308_v30  ;;  %v2435_v38 = vcombine.low %v379_v25, %v383_v26 }
  0x1d   : > { %v247_v33 = vld [vmem:[%s2634_s22 + $0x120] sm:$0xff]  ;;  %1791 = vmatpush1.bf16.msra.mxu0 %v2307_v37 }
  0x1e   : > { %v371_v34 = vld [vmem:[%s2634_s22 + $0x500] sm:$0xff]  ;;  %v2300_v39 = vcombine.high %v243_v32, %v247_v33  ;;  %1831 = vmatprep.subr.bf16.mxu1 %v2436_v31  ;;  %v2299_v46 = vcombine.low %v243_v32, %v247_v33 }
  0x1f   : > { %v375_v35 = vld [vmem:[%s2634_s22 + $0x520] sm:$0xff]  ;;  %1832 = vmatpush1.bf16.msra.mxu1 %v2435_v38 }
  0x20   : > { %v2428_v40 = vcombine.high %v371_v34, %v375_v35  ;;  %v235_v41 = vld [vmem:[%s2634_s22 + $0xc0] sm:$0xff]  ;;  %1792 = vmatprep.subr.bf16.mxu0 %v2300_v39  ;;  %v2427_v47 = vcombine.low %v371_v34, %v375_v35 }
  0x21   : > { %v239_v42 = vld [vmem:[%s2634_s22 + $0xe0] sm:$0xff]  ;;  %1793 = vmatpush1.bf16.msra.mxu0 %v2299_v46 }
  0x22   : > { %v363_v43 = vld [vmem:[%s2634_s22 + $0x4c0] sm:$0xff]  ;;  %v2292_v48 = vcombine.high %v235_v41, %v239_v42  ;;  %1833 = vmatprep.subr.bf16.mxu1 %v2428_v40  ;;  %v2291_v54 = vcombine.low %v235_v41, %v239_v42 }
  0x23   : > { %v367_v44 = vld [vmem:[%s2634_s22 + $0x4e0] sm:$0xff]  ;;  %1834 = vmatpush1.bf16.msra.mxu1 %v2427_v47 }
  0x24   : > { %v2420_v49 = vcombine.high %v363_v43, %v367_v44  ;;  %v227_v50 = vld [vmem:[%s2634_s22 + $0x80] sm:$0xff]  ;;  %1794 = vmatprep.subr.bf16.mxu0 %v2292_v48  ;;  %v2419_v55 = vcombine.low %v363_v43, %v367_v44 }
  0x25   : > { %v231_v51 = vld [vmem:[%s2634_s22 + $0xa0] sm:$0xff]  ;;  %1795 = vmatpush1.bf16.msra.mxu0 %v2291_v54 }
  0x26   : > { %v355_v52 = vld [vmem:[%s2634_s22 + $0x480] sm:$0xff]  ;;  %v2284_v56 = vcombine.high %v227_v50, %v231_v51  ;;  %1835 = vmatprep.subr.bf16.mxu1 %v2420_v49  ;;  %v2283_v62 = vcombine.low %v227_v50, %v231_v51 }
  0x27   : > { %v359_v53 = vld [vmem:[%s2634_s22 + $0x4a0] sm:$0xff]  ;;  %1836 = vmatpush1.bf16.msra.mxu1 %v2419_v55 }
  0x28   : > { %v2412_v57 = vcombine.high %v355_v52, %v359_v53  ;;  %v219_v58 = vld [vmem:[%s2634_s22 + $0x40] sm:$0xff]  ;;  %1796 = vmatprep.subr.bf16.mxu0 %v2284_v56  ;;  %v2411_v63 = vcombine.low %v355_v52, %v359_v53 }
  0x29   : > { %v223_v59 = vld [vmem:[%s2634_s22 + $0x60] sm:$0xff]  ;;  %1797 = vmatpush1.bf16.msra.mxu0 %v2283_v62 }
  0x2a   : > { %v347_v60 = vld [vmem:[%s2634_s22 + $0x440] sm:$0xff]  ;;  %v2276_v0 = vcombine.high %v219_v58, %v223_v59  ;;  %1837 = vmatprep.subr.bf16.mxu1 %v2412_v57  ;;  %v2275_v9 = vcombine.low %v219_v58, %v223_v59 }
  0x2b   : > { %v351_v61 = vld [vmem:[%s2634_s22 + $0x460] sm:$0xff]  ;;  %1838 = vmatpush1.bf16.msra.mxu1 %v2411_v63 }
  0x2c   : > { %v2404_v4 = vcombine.high %v347_v60, %v351_v61  ;;  %v211_v5 = vld [vmem:[%s2634_s22] sm:$0xff]  ;;  %1798 = vmatprep.subr.bf16.mxu0 %v2276_v0  ;;  %v2403_v10 = vcombine.low %v347_v60, %v351_v61 }
  0x2d   : > { %v215_v6 = vld [vmem:[%s2634_s22 + $0x20] sm:$0xff]  ;;  %1799 = vmatpush1.bf16.msra.mxu0 %v2275_v9 }
  0x2e   : > { %v339_v7 = vld [vmem:[%s2634_s22 + $0x400] sm:$0xff]  ;;  %v2268_v12 = vcombine.high %v211_v5, %v215_v6  ;;  %1839 = vmatprep.subr.bf16.mxu1 %v2404_v4  ;;  %v2267_v18 = vcombine.low %v211_v5, %v215_v6 }
  0x2f   : > { %v343_v8 = vld [vmem:[%s2634_s22 + $0x420] sm:$0xff]  ;;  %1840 = vmatpush1.bf16.msra.mxu1 %v2403_v10 }
  0x30   : > { %v2396_v13 = vcombine.high %v339_v7, %v343_v8  ;;  %v331_v14 = vld [vmem:[%s2634_s22 + $0x3c0] sm:$0xff]  ;;  %1800 = vmatprep.subr.bf16.mxu0 %v2268_v12  ;;  %v2395_v19 = vcombine.low %v339_v7, %v343_v8 }
  0x31   : > { %v335_v15 = vld [vmem:[%s2634_s22 + $0x3e0] sm:$0xff]  ;;  %1801 = vmatpush1.bf16.msra.mxu0 %v2267_v18 }
  0x32   : > { %v459_v16 = vld [vmem:[%s2634_s22 + $0x7c0] sm:$0xff]  ;;  %v2388_v20 = vcombine.high %v331_v14, %v335_v15  ;;  %1841 = vmatprep.subr.bf16.mxu1 %v2396_v13  ;;  %v2387_v26 = vcombine.low %v331_v14, %v335_v15 }
  0x33   : > { %v463_v17 = vld [vmem:[%s2634_s22 + $0x7e0] sm:$0xff]  ;;  %1842 = vmatpush1.bf16.msra.mxu1 %v2395_v19 }
  0x34   : > { %v2516_v21 = vcombine.high %v459_v16, %v463_v17  ;;  %v323_v22 = vld [vmem:[%s2634_s22 + $0x380] sm:$0xff]  ;;  %1802 = vmatprep.subr.bf16.mxu0 %v2388_v20  ;;  %v2515_v28 = vcombine.low %v459_v16, %v463_v17 }
  0x35   : > { %v327_v23 = vld [vmem:[%s2634_s22 + $0x3a0] sm:$0xff]  ;;  %1803 = vmatpush2.bf16.msra.mxu0 %v2387_v26  ;;  %v2720_v26 = vrot.slane %v2625_v2, %v2642_v11 }
  0x36   : > { %v451_v24 = vld [vmem:[%s2634_s22 + $0x780] sm:$0xff]  ;;  %v2380_v29 = vcombine.high %v323_v22, %v327_v23  ;;  %1843 = vmatprep.subr.bf16.mxu1 %v2516_v21  ;;  %v2379_v35 = vcombine.low %v323_v22, %v327_v23  ;;  %v268_v21 = vld [vmem:[%s2634_s22 + $0x1c8] sm:$0xff] }
  0x37   : > { %v455_v25 = vld [vmem:[%s2634_s22 + $0x7a0] sm:$0xff]  ;;  %1844 = vmatpush2.bf16.msra.mxu1 %v2515_v28  ;;  %v272_v22 = vld [vmem:[%s2634_s22 + $0x1e8] sm:$0xff] }
  0x38   : > { %v2508_v30 = vcombine.high %v451_v24, %v455_v25  ;;  %v315_v31 = vld [vmem:[%s2634_s22 + $0x340] sm:$0xff]  ;;  %1804 = vmatprep.subr.bf16.mxu0 %v2380_v29  ;;  %v2507_v37 = vcombine.low %v451_v24, %v455_v25  ;;  %v396_v23 = vld [vmem:[%s2634_s22 + $0x5c8] sm:$0xff]  ;;  %v2326_v29 = vcombine.high %v268_v21, %v272_v22  ;;  %v2325_v2 = vcombine.low %v268_v21, %v272_v22 }
  0x39   : > { %v319_v32 = vld [vmem:[%s2634_s22 + $0x360] sm:$0xff]  ;;  %1805 = vmatpush2.bf16.msra.mxu0 %v2379_v35  ;;  %v400_v24 = vld [vmem:[%s2634_s22 + $0x5e8] sm:$0xff]  ;;  %v2728_v35 = vcombine.high %v2720_v26, %v2720_v26 }
  0x3a   : > { %v443_v33 = vld [vmem:[%s2634_s22 + $0x740] sm:$0xff]  ;;  %v2372_v38 = vcombine.high %v315_v31, %v319_v32  ;;  %1845 = vmatprep.subr.bf16.mxu1 %v2508_v30  ;;  %v2371_v44 = vcombine.low %v315_v31, %v319_v32  ;;  %v2454_v30 = vcombine.high %v396_v23, %v400_v24  ;;  %v260_v31 = vld [vmem:[%s2634_s22 + $0x188] sm:$0xff] }
  0x3b   : > { %v447_v34 = vld [vmem:[%s2634_s22 + $0x760] sm:$0xff]  ;;  %1846 = vmatpush2.bf16.msra.mxu1 %v2507_v37  ;;  %v264_v32 = vld [vmem:[%s2634_s22 + $0x1a8] sm:$0xff]  ;;  %v2453_v37 = vcombine.low %v396_v23, %v400_v24 }
  0x3c   : > { %v2500_v39 = vcombine.high %v443_v33, %v447_v34  ;;  %v307_v40 = vld [vmem:[%s2634_s22 + $0x300] sm:$0xff]  ;;  %1806 = vmatprep.subr.bf16.mxu0 %v2372_v38  ;;  %v2499_v45 = vcombine.low %v443_v33, %v447_v34  ;;  %v388_v33 = vld [vmem:[%s2634_s22 + $0x588] sm:$0xff]  ;;  %v2318_v38 = vcombine.high %v260_v31, %v264_v32 }
  0x3d   : > { %v311_v41 = vld [vmem:[%s2634_s22 + $0x320] sm:$0xff]  ;;  %1807 = vmatpush2.bf16.msra.mxu0 %v2371_v44  ;;  %v392_v34 = vld [vmem:[%s2634_s22 + $0x5a8] sm:$0xff]  ;;  %v2317_v44 = vcombine.low %v260_v31, %v264_v32 }
  0x3e   : > { %v435_v42 = vld [vmem:[%s2634_s22 + $0x700] sm:$0xff]  ;;  %v2364_v46 = vcombine.high %v307_v40, %v311_v41  ;;  %1847 = vmatprep.subr.bf16.mxu1 %v2500_v39  ;;  %v2363_v52 = vcombine.low %v307_v40, %v311_v41  ;;  %v2446_v39 = vcombine.high %v388_v33, %v392_v34  ;;  %v252_v40 = vld [vmem:[%s2634_s22 + $0x148] sm:$0xff] }
  0x3f   : > { %v439_v43 = vld [vmem:[%s2634_s22 + $0x720] sm:$0xff]  ;;  %1848 = vmatpush2.bf16.msra.mxu1 %v2499_v45  ;;  %v256_v41 = vld [vmem:[%s2634_s22 + $0x168] sm:$0xff]  ;;  %v2445_v45 = vcombine.low %v388_v33, %v392_v34 }
  0x40   : > { %v2492_v47 = vcombine.high %v435_v42, %v439_v43  ;;  %v299_v48 = vld [vmem:[%s2634_s22 + $0x2c0] sm:$0xff]  ;;  %1808 = vmatprep.subr.bf16.mxu0 %v2364_v46  ;;  %v2491_v54 = vcombine.low %v435_v42, %v439_v43  ;;  %v380_v42 = vld [vmem:[%s2634_s22 + $0x548] sm:$0xff]  ;;  %v2310_v46 = vcombine.high %v252_v40, %v256_v41 }
  0x41   : > { %v303_v49 = vld [vmem:[%s2634_s22 + $0x2e0] sm:$0xff]  ;;  %1809 = vmatpush2.bf16.msra.mxu0 %v2363_v52  ;;  %v384_v43 = vld [vmem:[%s2634_s22 + $0x568] sm:$0xff]  ;;  %v2309_v52 = vcombine.low %v252_v40, %v256_v41 }
  0x42   : > { %v427_v50 = vld [vmem:[%s2634_s22 + $0x6c0] sm:$0xff]  ;;  %v2356_v55 = vcombine.high %v299_v48, %v303_v49  ;;  %1849 = vmatprep.subr.bf16.mxu1 %v2492_v47  ;;  %v2355_v61 = vcombine.low %v299_v48, %v303_v49  ;;  %v2438_v47 = vcombine.high %v380_v42, %v384_v43  ;;  %v244_v48 = vld [vmem:[%s2634_s22 + $0x108] sm:$0xff] }
  0x43   : > { %v431_v51 = vld [vmem:[%s2634_s22 + $0x6e0] sm:$0xff]  ;;  %1850 = vmatpush2.bf16.msra.mxu1 %v2491_v54  ;;  %v248_v49 = vld [vmem:[%s2634_s22 + $0x128] sm:$0xff] }
  0x44   : > { %v467_v53 = vld [vmem:[#allocation2] sm:$0x1]  ;;  %v2484_v56 = vcombine.high %v427_v50, %v431_v51  ;;  %1810 = vmatprep.subr.bf16.mxu0 %v2356_v55  ;;  %v2483_v62 = vcombine.low %v427_v50, %v431_v51  ;;  %v372_v50 = vld [vmem:[%s2634_s22 + $0x508] sm:$0xff]  ;;  %v2302_v54 = vcombine.high %v244_v48, %v248_v49 }
  0x45   : > { %v291_v57 = vld [vmem:[%s2634_s22 + $0x280] sm:$0xff]  ;;  %470 = vperm.xlu0 %2552, %v467_v53   ;;  %1811 = vmatpush2.bf16.msra.mxu0 %v2355_v61  ;;  %v376_v51 = vld [vmem:[%s2634_s22 + $0x528] sm:$0xff]  ;;  %v2437_v53 = vcombine.low %v380_v42, %v384_v43 }
  0x46   : > { %v295_v58 = vld [vmem:[%s2634_s22 + $0x2a0] sm:$0xff]  ;;  %1851 = vmatprep.subr.bf16.mxu1 %v2484_v56  ;;  %v2430_v55 = vcombine.high %v372_v50, %v376_v51  ;;  %v236_v56 = vld [vmem:[%s2634_s22 + $0xc8] sm:$0xff]  ;;  %v2429_v61 = vcombine.low %v372_v50, %v376_v51 }
  0x47   : > { %v419_v59 = vld [vmem:[%s2634_s22 + $0x680] sm:$0xff]  ;;  %v2348_v63 = vcombine.high %v291_v57, %v295_v58  ;;  %v2347_v8 = vcombine.low %v291_v57, %v295_v58  ;;  %1852 = vmatpush2.bf16.msra.mxu1 %v2483_v62  ;;  %v240_v57 = vld [vmem:[%s2634_s22 + $0xe8] sm:$0xff] }
  0x48   : > { %v423_v60 = vld [vmem:[%s2634_s22 + $0x6a0] sm:$0xff]  ;;  %v364_v58 = vld [vmem:[%s2634_s22 + $0x4c8] sm:$0xff]  ;;  %v2294_v62 = vcombine.high %v236_v56, %v240_v57 }
  0x49   : > { %v2476_v0 = vcombine.high %v419_v59, %v423_v60  ;;  %v283_v4 = vld [vmem:[%s2634_s22 + $0x240] sm:$0xff]  ;;  %1812 = vmatprep.subr.bf16.mxu0 %v2348_v63  ;;  %v2475_v9 = vcombine.low %v419_v59, %v423_v60  ;;  %v368_v59 = vld [vmem:[%s2634_s22 + $0x4e8] sm:$0xff]  ;;  %v2301_v60 = vcombine.low %v244_v48, %v248_v49 }
  0x4a   : > { %v287_v5 = vld [vmem:[%s2634_s22 + $0x260] sm:$0xff]  ;;  %1813 = vmatpush2.bf16.msra.mxu0 %v2347_v8  ;;  %v2422_v63 = vcombine.high %v364_v58, %v368_v59  ;;  %v2421_v8 = vcombine.low %v364_v58, %v368_v59  ;;  %v216_v21 = vld [vmem:[%s2634_s22 + $0x28] sm:$0xff] }
  0x4b   : > { %v411_v6 = vld [vmem:[%s2634_s22 + $0x640] sm:$0xff]  ;;  %v2340_v10 = vcombine.high %v283_v4, %v287_v5  ;;  %1853 = vmatprep.subr.bf16.mxu1 %v2476_v0  ;;  %v2339_v17 = vcombine.low %v283_v4, %v287_v5  ;;  %v228_v0 = vld [vmem:[%s2634_s22 + $0x88] sm:$0xff] }
  0x4c   : > { %v415_v7 = vld [vmem:[%s2634_s22 + $0x660] sm:$0xff]  ;;  %1854 = vmatpush2.bf16.msra.mxu1 %v2475_v9  ;;  %v232_v4 = vld [vmem:[%s2634_s22 + $0xa8] sm:$0xff] }
  0x4d   : > { %v2468_v12 = vcombine.high %v411_v6, %v415_v7  ;;  %v275_v13 = vld [vmem:[%s2634_s22 + $0x200] sm:$0xff]  ;;  %1814 = vmatprep.subr.bf16.mxu0 %v2340_v10  ;;  %v2467_v18 = vcombine.low %v411_v6, %v415_v7  ;;  %v356_v5 = vld [vmem:[%s2634_s22 + $0x488] sm:$0xff]  ;;  %v2293_v7 = vcombine.low %v236_v56, %v240_v57  ;;  %v2286_v9 = vcombine.high %v228_v0, %v232_v4 }
  0x4e   : > { %v279_v14 = vld [vmem:[%s2634_s22 + $0x220] sm:$0xff]  ;;  %1815 = vmatpush2.bf16.msra.mxu0 %v2339_v17  ;;  %v360_v6 = vld [vmem:[%s2634_s22 + $0x4a8] sm:$0xff] }
  0x4f   : > { %v403_v15 = vld [vmem:[%s2634_s22 + $0x600] sm:$0xff]  ;;  %v2332_v19 = vcombine.high %v275_v13, %v279_v14  ;;  %1855 = vmatprep.subr.bf16.mxu1 %v2468_v12  ;;  %v2331_v25 = vcombine.low %v275_v13, %v279_v14  ;;  %v2414_v10 = vcombine.high %v356_v5, %v360_v6  ;;  %v220_v12 = vld [vmem:[%s2634_s22 + $0x48] sm:$0xff]  ;;  %v2413_v17 = vcombine.low %v356_v5, %v360_v6 }
  0x50   : > { %v407_v16 = vld [vmem:[%s2634_s22 + $0x620] sm:$0xff]  ;;  %1856 = vmatpush2.bf16.msra.mxu1 %v2467_v18  ;;  %v224_v13 = vld [vmem:[%s2634_s22 + $0x68] sm:$0xff] }
  0x51   : > { %v2460_v20 = vcombine.high %v403_v15, %v407_v16  ;;  %1816 = vmatprep.subr.bf16.mxu0 %v2332_v19  ;;  %v2459_v28 = vcombine.low %v403_v15, %v407_v16  ;;  %v348_v14 = vld [vmem:[%s2634_s22 + $0x448] sm:$0xff]  ;;  %v2285_v16 = vcombine.low %v228_v0, %v232_v4  ;;  %v2278_v18 = vcombine.high %v220_v12, %v224_v13 }
  0x52   : > { %1817 = vmatpush2.bf16.msra.mxu0 %v2331_v25  ;;  %v352_v15 = vld [vmem:[%s2634_s22 + $0x468] sm:$0xff]  ;;  %v2277_v24 = vcombine.low %v220_v12, %v224_v13 }
  0x53   : > { %1857 = vmatprep.subr.bf16.mxu1 %v2460_v20  ;;  %1868 = vmatprep.subr.bf16.mxu0 %v2326_v29  ;;  %v2406_v19 = vcombine.high %v348_v14, %v352_v15  ;;  %v212_v20 = vld [vmem:[%s2634_s22 + $0x8] sm:$0xff]  ;;  %v2405_v25 = vcombine.low %v348_v14, %v352_v15 }
  0x54   : > { %1858 = vmatpush2.bf16.msra.mxu1 %v2459_v28  ;;  %v340_v22 = vld [vmem:[%s2634_s22 + $0x408] sm:$0xff]  ;;  %v2270_v28 = vcombine.high %v212_v20, %v216_v21  ;;  %v2269_v34 = vcombine.low %v212_v20, %v216_v21 }
  0x55   : > { %1909 = vmatprep.subr.bf16.mxu1 %v2454_v30  ;;  %1819 = vmatmul.mubr.bf16.vlgmr.msra.gmra.mxu0 %v2720_v26  ;;  %v344_v23 = vld [vmem:[%s2634_s22 + $0x428] sm:$0xff] }
  0x56   : > { %1869 = vmatpush1.bf16.msra.mxu0 %v2325_v2  ;;  %1900 = vmatprep.mubr.bf16.mxu0 %v2654_v27  ;;  %v2398_v29 = vcombine.high %v340_v22, %v344_v23  ;;  %v332_v30 = vld [vmem:[%s2634_s22 + $0x3c8] sm:$0xff]  ;;  %v2397_v2 = vcombine.low %v340_v22, %v344_v23 }
  0x57   : > { %1860 = vmatmul.mubr.bf16.vlgmr.msra.gmra.mxu1 %v2728_v35  ;;  %1870 = vmatprep.subr.bf16.mxu0 %v2318_v38  ;;  %v336_v31 = vld [vmem:[%s2634_s22 + $0x3e8] sm:$0xff] }
  0x58   : > { %1910 = vmatpush1.bf16.msra.mxu1 %v2453_v37  ;;  %1941 = vmatprep.mubr.bf16.mxu1 %v2663_v36  ;;  %v460_v32 = vld [vmem:[%s2634_s22 + $0x7c8] sm:$0xff]  ;;  %v2390_v37 = vcombine.high %v332_v30, %v336_v31  ;;  %v2389_v43 = vcombine.low %v332_v30, %v336_v31 }
  0x59   : > { %1911 = vmatprep.subr.bf16.mxu1 %v2446_v39  ;;  %v464_v33 = vld [vmem:[%s2634_s22 + $0x7e8] sm:$0xff] }
  0x5a   : > { %1871 = vmatpush1.bf16.msra.mxu0 %v2317_v44  ;;  %v2518_v38 = vcombine.high %v460_v32, %v464_v33  ;;  %v324_v39 = vld [vmem:[%s2634_s22 + $0x388] sm:$0xff]  ;;  %v2517_v44 = vcombine.low %v460_v32, %v464_v33 }
  0x5b   : > { %1872 = vmatprep.subr.bf16.mxu0 %v2310_v46  ;;  %v328_v40 = vld [vmem:[%s2634_s22 + $0x3a8] sm:$0xff] }
  0x5c   : > { %1912 = vmatpush1.bf16.msra.mxu1 %v2445_v45  ;;  %v452_v41 = vld [vmem:[%s2634_s22 + $0x788] sm:$0xff]  ;;  %v2382_v45 = vcombine.high %v324_v39, %v328_v40  ;;  %v2381_v51 = vcombine.low %v324_v39, %v328_v40  ;;  %v273_v39 = vld [vmem:[%s2634_s22 + $0x1f0] sm:$0xff] }
  0x5d   : > { %1913 = vmatprep.subr.bf16.mxu1 %v2438_v47  ;;  %v456_v42 = vld [vmem:[%s2634_s22 + $0x7a8] sm:$0xff]  ;;  %v397_v40 = vld [vmem:[%s2634_s22 + $0x5d0] sm:$0xff] }
  0x5e   : > { %1873 = vmatpush1.bf16.msra.mxu0 %v2309_v52  ;;  %v2510_v46 = vcombine.high %v452_v41, %v456_v42  ;;  %v316_v47 = vld [vmem:[%s2634_s22 + $0x348] sm:$0xff]  ;;  %v2509_v52 = vcombine.low %v452_v41, %v456_v42  ;;  %v401_v41 = vld [vmem:[%s2634_s22 + $0x5f0] sm:$0xff] }
  0x5f   : > { %1874 = vmatprep.subr.bf16.mxu0 %v2302_v54  ;;  %v320_v48 = vld [vmem:[%s2634_s22 + $0x368] sm:$0xff] }
  0x60   : > { %1914 = vmatpush1.bf16.msra.mxu1 %v2437_v53  ;;  %v444_v49 = vld [vmem:[%s2634_s22 + $0x748] sm:$0xff]  ;;  %v2374_v53 = vcombine.high %v316_v47, %v320_v48  ;;  %v2373_v59 = vcombine.low %v316_v47, %v320_v48  ;;  %v265_v47 = vld [vmem:[%s2634_s22 + $0x1b0] sm:$0xff] }
  0x61   : > { %1915 = vmatprep.subr.bf16.mxu1 %v2430_v55  ;;  %v448_v50 = vld [vmem:[%s2634_s22 + $0x768] sm:$0xff]  ;;  %v389_v48 = vld [vmem:[%s2634_s22 + $0x590] sm:$0xff] }
  0x62   : > { %1875 = vmatpush1.bf16.msra.mxu0 %v2301_v60  ;;  %v2502_v54 = vcombine.high %v444_v49, %v448_v50  ;;  %v308_v55 = vld [vmem:[%s2634_s22 + $0x308] sm:$0xff]  ;;  %v2501_v60 = vcombine.low %v444_v49, %v448_v50  ;;  %v393_v49 = vld [vmem:[%s2634_s22 + $0x5b0] sm:$0xff] }
  0x63   : > { %1876 = vmatprep.subr.bf16.mxu0 %v2294_v62  ;;  %v312_v56 = vld [vmem:[%s2634_s22 + $0x328] sm:$0xff] }
  0x64   : > { %1916 = vmatpush1.bf16.msra.mxu1 %v2429_v61  ;;  %v436_v57 = vld [vmem:[%s2634_s22 + $0x708] sm:$0xff]  ;;  %v2366_v61 = vcombine.high %v308_v55, %v312_v56  ;;  %v2365_v6 = vcombine.low %v308_v55, %v312_v56  ;;  %v257_v55 = vld [vmem:[%s2634_s22 + $0x170] sm:$0xff] }
  0x65   : > { %1917 = vmatprep.subr.bf16.mxu1 %v2422_v63  ;;  %v440_v58 = vld [vmem:[%s2634_s22 + $0x728] sm:$0xff]  ;;  %v381_v56 = vld [vmem:[%s2634_s22 + $0x550] sm:$0xff] }
  0x66   : > { %1877 = vmatpush1.bf16.msra.mxu0 %v2293_v7  ;;  %v2494_v62 = vcombine.high %v436_v57, %v440_v58  ;;  %v300_v63 = vld [vmem:[%s2634_s22 + $0x2c8] sm:$0xff]  ;;  %v2493_v7 = vcombine.low %v436_v57, %v440_v58  ;;  %v385_v57 = vld [vmem:[%s2634_s22 + $0x570] sm:$0xff] }
  0x67   : > { %1878 = vmatprep.subr.bf16.mxu0 %v2286_v9  ;;  %v304_v0 = vld [vmem:[%s2634_s22 + $0x2e8] sm:$0xff] }
  0x68   : > { %1918 = vmatpush1.bf16.msra.mxu1 %v2421_v8  ;;  %v428_v4 = vld [vmem:[%s2634_s22 + $0x6c8] sm:$0xff]  ;;  %v2358_v8 = vcombine.high %v300_v63, %v304_v0  ;;  %v2357_v15 = vcombine.low %v300_v63, %v304_v0  ;;  %v249_v63 = vld [vmem:[%s2634_s22 + $0x130] sm:$0xff] }
  0x69   : > { %1919 = vmatprep.subr.bf16.mxu1 %v2414_v10  ;;  %v432_v5 = vld [vmem:[%s2634_s22 + $0x6e8] sm:$0xff]  ;;  %v373_v0 = vld [vmem:[%s2634_s22 + $0x510] sm:$0xff] }
  0x6a   : > { %1879 = vmatpush1.bf16.msra.mxu0 %v2285_v16  ;;  %v2486_v9 = vcombine.high %v428_v4, %v432_v5  ;;  %v292_v10 = vld [vmem:[%s2634_s22 + $0x288] sm:$0xff]  ;;  %v2485_v16 = vcombine.low %v428_v4, %v432_v5  ;;  %v377_v4 = vld [vmem:[%s2634_s22 + $0x530] sm:$0xff] }
  0x6b   : > { %1880 = vmatprep.subr.bf16.mxu0 %v2278_v18  ;;  %v296_v12 = vld [vmem:[%s2634_s22 + $0x2a8] sm:$0xff] }
  0x6c   : > { %1920 = vmatpush1.bf16.msra.mxu1 %v2413_v17  ;;  %v420_v13 = vld [vmem:[%s2634_s22 + $0x688] sm:$0xff]  ;;  %v2350_v17 = vcombine.high %v292_v10, %v296_v12  ;;  %v2349_v23 = vcombine.low %v292_v10, %v296_v12  ;;  %v241_v10 = vld [vmem:[%s2634_s22 + $0xf0] sm:$0xff] }
  0x6d   : > { %1921 = vmatprep.subr.bf16.mxu1 %v2406_v19  ;;  %v424_v14 = vld [vmem:[%s2634_s22 + $0x6a8] sm:$0xff]  ;;  %v365_v12 = vld [vmem:[%s2634_s22 + $0x4d0] sm:$0xff] }
  0x6e   : > { %1881 = vmatpush1.bf16.msra.mxu0 %v2277_v24  ;;  %v2478_v18 = vcombine.high %v420_v13, %v424_v14  ;;  %v284_v19 = vld [vmem:[%s2634_s22 + $0x248] sm:$0xff]  ;;  %v2477_v24 = vcombine.low %v420_v13, %v424_v14  ;;  %v369_v13 = vld [vmem:[%s2634_s22 + $0x4f0] sm:$0xff] }
  0x6f   : > { %1882 = vmatprep.subr.bf16.mxu0 %v2270_v28  ;;  %v288_v20 = vld [vmem:[%s2634_s22 + $0x268] sm:$0xff] }
  0x70   : > { %1922 = vmatpush1.bf16.msra.mxu1 %v2405_v25  ;;  %v412_v21 = vld [vmem:[%s2634_s22 + $0x648] sm:$0xff]  ;;  %v2342_v25 = vcombine.high %v284_v19, %v288_v20  ;;  %v2341_v33 = vcombine.low %v284_v19, %v288_v20  ;;  %v233_v19 = vld [vmem:[%s2634_s22 + $0xb0] sm:$0xff] }
  0x71   : > { %1923 = vmatprep.subr.bf16.mxu1 %v2398_v29  ;;  %v416_v22 = vld [vmem:[%s2634_s22 + $0x668] sm:$0xff]  ;;  %v357_v20 = vld [vmem:[%s2634_s22 + $0x490] sm:$0xff] }
  0x72   : > { %1883 = vmatpush1.bf16.msra.mxu0 %v2269_v34  ;;  %v2470_v28 = vcombine.high %v412_v21, %v416_v22  ;;  %v276_v29 = vld [vmem:[%s2634_s22 + $0x208] sm:$0xff]  ;;  %v2469_v34 = vcombine.low %v412_v21, %v416_v22  ;;  %v361_v21 = vld [vmem:[%s2634_s22 + $0x4b0] sm:$0xff] }
  0x73   : > { %1884 = vmatprep.subr.bf16.mxu0 %v2390_v37  ;;  %v280_v30 = vld [vmem:[%s2634_s22 + $0x228] sm:$0xff] }
  0x74   : > { %1924 = vmatpush1.bf16.msra.mxu1 %v2397_v2  ;;  %v404_v31 = vld [vmem:[%s2634_s22 + $0x608] sm:$0xff]  ;;  %v2334_v2 = vcombine.high %v276_v29, %v280_v30  ;;  %v2333_v42 = vcombine.low %v276_v29, %v280_v30  ;;  %v225_v29 = vld [vmem:[%s2634_s22 + $0x70] sm:$0xff] }
  0x75   : > { %1925 = vmatprep.subr.bf16.mxu1 %v2518_v38  ;;  %v408_v32 = vld [vmem:[%s2634_s22 + $0x628] sm:$0xff]  ;;  %v269_v38 = vld [vmem:[%s2634_s22 + $0x1d0] sm:$0xff] }
  0x76   : > { %1885 = vmatpush2.bf16.msra.mxu0 %v2389_v43  ;;  %v2462_v37 = vcombine.high %v404_v31, %v408_v32  ;;  %v2461_v43 = vcombine.low %v404_v31, %v408_v32  ;;  %v2327_v50 = vcombine.low %v269_v38, %v273_v39  ;;  %v349_v30 = vld [vmem:[%s2634_s22 + $0x450] sm:$0xff] }
  0x77   : > { %1886 = vmatprep.subr.bf16.mxu0 %v2382_v45  ;;  %v2456_v45 = vcombine.high %v397_v40, %v401_v41  ;;  %v353_v31 = vld [vmem:[%s2634_s22 + $0x470] sm:$0xff] }
  0x78   : > { %1926 = vmatpush2.bf16.msra.mxu1 %v2517_v44  ;;  %v2328_v44 = vcombine.high %v269_v38, %v273_v39  ;;  %v217_v38 = vld [vmem:[%s2634_s22 + $0x30] sm:$0xff] }
  0x79   : > { %1927 = vmatprep.subr.bf16.mxu1 %v2510_v46  ;;  %v261_v46 = vld [vmem:[%s2634_s22 + $0x190] sm:$0xff] }
  0x7a   : > { %1887 = vmatpush2.bf16.msra.mxu0 %v2381_v51  ;;  %v2455_v51 = vcombine.low %v397_v40, %v401_v41  ;;  %v2319_v58 = vcombine.low %v261_v46, %v265_v47  ;;  %v341_v39 = vld [vmem:[%s2634_s22 + $0x410] sm:$0xff] }
  0x7b   : > { %1888 = vmatprep.subr.bf16.mxu0 %v2374_v53  ;;  %v2448_v53 = vcombine.high %v389_v48, %v393_v49  ;;  %v345_v40 = vld [vmem:[%s2634_s22 + $0x430] sm:$0xff] }
  0x7c   : > { %1928 = vmatpush2.bf16.msra.mxu1 %v2509_v52  ;;  %v2320_v52 = vcombine.high %v261_v46, %v265_v47  ;;  %v337_v46 = vld [vmem:[%s2634_s22 + $0x3f0] sm:$0xff] }
  0x7d   : > { %1929 = vmatprep.subr.bf16.mxu1 %v2502_v54  ;;  %v253_v54 = vld [vmem:[%s2634_s22 + $0x150] sm:$0xff] }
  0x7e   : > { %1889 = vmatpush2.bf16.msra.mxu0 %v2373_v59  ;;  %v2447_v59 = vcombine.low %v389_v48, %v393_v49  ;;  %v2311_v5 = vcombine.low %v253_v54, %v257_v55  ;;  %v461_v47 = vld [vmem:[%s2634_s22 + $0x7d0] sm:$0xff] }
  0x7f   : > { %1890 = vmatprep.subr.bf16.mxu0 %v2366_v61  ;;  %v2440_v61 = vcombine.high %v381_v56, %v385_v57  ;;  %v465_v48 = vld [vmem:[%s2634_s22 + $0x7f0] sm:$0xff] }
  0x80   : > { %1930 = vmatpush2.bf16.msra.mxu1 %v2501_v60  ;;  %v2312_v60 = vcombine.high %v253_v54, %v257_v55  ;;  %v329_v54 = vld [vmem:[%s2634_s22 + $0x3b0] sm:$0xff] }
  0x81   : > { %1931 = vmatprep.subr.bf16.mxu1 %v2494_v62  ;;  %v245_v62 = vld [vmem:[%s2634_s22 + $0x110] sm:$0xff] }
  0x82   : > { %1891 = vmatpush2.bf16.msra.mxu0 %v2365_v6  ;;  %v2439_v6 = vcombine.low %v381_v56, %v385_v57  ;;  %v2303_v14 = vcombine.low %v245_v62, %v249_v63  ;;  %v453_v55 = vld [vmem:[%s2634_s22 + $0x790] sm:$0xff] }
  0x83   : > { %1892 = vmatprep.subr.bf16.mxu0 %v2358_v8  ;;  %v2432_v8 = vcombine.high %v373_v0, %v377_v4  ;;  %v457_v56 = vld [vmem:[%s2634_s22 + $0x7b0] sm:$0xff] }
  0x84   : > { %1932 = vmatpush2.bf16.msra.mxu1 %v2493_v7  ;;  %v2304_v7 = vcombine.high %v245_v62, %v249_v63  ;;  %v321_v62 = vld [vmem:[%s2634_s22 + $0x370] sm:$0xff] }
  0x85   : > { %1933 = vmatprep.subr.bf16.mxu1 %v2486_v9  ;;  %v237_v9 = vld [vmem:[%s2634_s22 + $0xd0] sm:$0xff] }
  0x86   : > { %1893 = vmatpush2.bf16.msra.mxu0 %v2357_v15  ;;  %v2431_v15 = vcombine.low %v373_v0, %v377_v4  ;;  %v2295_v22 = vcombine.low %v237_v9, %v241_v10  ;;  %v445_v63 = vld [vmem:[%s2634_s22 + $0x750] sm:$0xff] }
  0x87   : > { %1894 = vmatprep.subr.bf16.mxu0 %v2350_v17  ;;  %v2424_v17 = vcombine.high %v365_v12, %v369_v13  ;;  %v449_v0 = vld [vmem:[%s2634_s22 + $0x770] sm:$0xff] }
  0x88   : > { %1934 = vmatpush2.bf16.msra.mxu1 %v2485_v16  ;;  %v2296_v16 = vcombine.high %v237_v9, %v241_v10  ;;  %v313_v9 = vld [vmem:[%s2634_s22 + $0x330] sm:$0xff] }
  0x89   : > { %1935 = vmatprep.subr.bf16.mxu1 %v2478_v18  ;;  %v229_v18 = vld [vmem:[%s2634_s22 + $0x90] sm:$0xff] }
  0x8a   : > { %1895 = vmatpush2.bf16.msra.mxu0 %v2349_v23  ;;  %v2423_v23 = vcombine.low %v365_v12, %v369_v13  ;;  %v2287_v32 = vcombine.low %v229_v18, %v233_v19  ;;  %v437_v10 = vld [vmem:[%s2634_s22 + $0x710] sm:$0xff] }
  0x8b   : > { %1896 = vmatprep.subr.bf16.mxu0 %v2342_v25  ;;  %v2416_v25 = vcombine.high %v357_v20, %v361_v21  ;;  %v441_v12 = vld [vmem:[%s2634_s22 + $0x730] sm:$0xff] }
  0x8c   : > { %1936 = vmatpush2.bf16.msra.mxu1 %v2477_v24  ;;  %v2288_v24 = vcombine.high %v229_v18, %v233_v19  ;;  %v305_v18 = vld [vmem:[%s2634_s22 + $0x2f0] sm:$0xff] }
  0x8d   : > { %1937 = vmatprep.subr.bf16.mxu1 %v2470_v28  ;;  %v221_v28 = vld [vmem:[%s2634_s22 + $0x50] sm:$0xff] }
  0x8e   : > { %1897 = vmatpush2.bf16.msra.mxu0 %v2341_v33  ;;  %v2415_v33 = vcombine.low %v357_v20, %v361_v21  ;;  %v2279_v41 = vcombine.low %v221_v28, %v225_v29  ;;  %v429_v19 = vld [vmem:[%s2634_s22 + $0x6d0] sm:$0xff] }
  0x8f   : > { %1898 = vmatprep.subr.bf16.mxu0 %v2334_v2  ;;  %v2408_v2 = vcombine.high %v349_v30, %v353_v31  ;;  %v433_v20 = vld [vmem:[%s2634_s22 + $0x6f0] sm:$0xff] }
  0x90   : > { %1938 = vmatpush2.bf16.msra.mxu1 %v2469_v34  ;;  %v2280_v34 = vcombine.high %v221_v28, %v225_v29  ;;  %v297_v28 = vld [vmem:[%s2634_s22 + $0x2b0] sm:$0xff] }
  0x91   : > { %1939 = vmatprep.subr.bf16.mxu1 %v2462_v37  ;;  %v213_v37 = vld [vmem:[%s2634_s22 + $0x10] sm:$0xff] }
  0x92   : > { %1899 = vmatpush2.bf16.msra.mxu0 %v2333_v42  ;;  %v2407_v42 = vcombine.low %v349_v30, %v353_v31  ;;  %v2271_v49 = vcombine.low %v213_v37, %v217_v38  ;;  %v421_v29 = vld [vmem:[%s2634_s22 + $0x690] sm:$0xff] }
  0x93   : > { %1950 = vmatprep.subr.bf16.mxu0 %v2328_v44  ;;  %v2400_v44 = vcombine.high %v341_v39, %v345_v40  ;;  %v425_v30 = vld [vmem:[%s2634_s22 + $0x6b0] sm:$0xff] }
  0x94   : > { %1940 = vmatpush2.bf16.msra.mxu1 %v2461_v43  ;;  %v2272_v43 = vcombine.high %v213_v37, %v217_v38  ;;  %v289_v37 = vld [vmem:[%s2634_s22 + $0x270] sm:$0xff] }
  0x95   : > { %1991 = vmatprep.subr.bf16.mxu1 %v2456_v45  ;;  %1901 = vmatmul.mubr.bf16.vlgmr.msra.gmra.mxu0 %v2720_v26  ;;  %v333_v45 = vld [vmem:[%s2634_s22 + $0x3d0] sm:$0xff] }
  0x96   : > { %1951 = vmatpush1.bf16.msra.mxu0 %v2327_v50  ;;  %1982 = vmatprep.mubr.bf16.mxu0 %v2654_v27  ;;  %v2399_v50 = vcombine.low %v341_v39, %v345_v40  ;;  %v2391_v57 = vcombine.low %v333_v45, %v337_v46  ;;  %v413_v38 = vld [vmem:[%s2634_s22 + $0x650] sm:$0xff] }
  0x97   : > { %1942 = vmatmul.mubr.bf16.vlgmr.msra.gmra.mxu1 %v2728_v35  ;;  %1952 = vmatprep.subr.bf16.mxu0 %v2320_v52  ;;  %v2520_v52 = vcombine.high %v461_v47, %v465_v48  ;;  %v417_v39 = vld [vmem:[%s2634_s22 + $0x670] sm:$0xff] }
  0x98   : > { %1992 = vmatpush1.bf16.msra.mxu1 %v2455_v51  ;;  %2023 = vmatprep.mubr.bf16.mxu1 %v2663_v36  ;;  %v2392_v51 = vcombine.high %v333_v45, %v337_v46  ;;  %v281_v45 = vld [vmem:[%s2634_s22 + $0x230] sm:$0xff] }
  0x99   : > { %1993 = vmatprep.subr.bf16.mxu1 %v2448_v53  ;;  %v325_v53 = vld [vmem:[%s2634_s22 + $0x390] sm:$0xff] }
  0x9a   : > { %1953 = vmatpush1.bf16.msra.mxu0 %v2319_v58  ;;  %v2519_v58 = vcombine.low %v461_v47, %v465_v48  ;;  %v2383_v4 = vcombine.low %v325_v53, %v329_v54  ;;  %v405_v46 = vld [vmem:[%s2634_s22 + $0x610] sm:$0xff] }
  0x9b   : > { %1954 = vmatprep.subr.bf16.mxu0 %v2312_v60  ;;  %v2512_v60 = vcombine.high %v453_v55, %v457_v56  ;;  %v409_v47 = vld [vmem:[%s2634_s22 + $0x630] sm:$0xff] }
  0x9c   : > { %1994 = vmatpush1.bf16.msra.mxu1 %v2447_v59  ;;  %v2384_v59 = vcombine.high %v325_v53, %v329_v54  ;;  %v274_v53 = vld [vmem:[%s2634_s22 + $0x1f8] sm:$0xff] }
  0x9d   : > { %1995 = vmatprep.subr.bf16.mxu1 %v2440_v61  ;;  %v317_v61 = vld [vmem:[%s2634_s22 + $0x350] sm:$0xff]  ;;  %v398_v54 = vld [vmem:[%s2634_s22 + $0x5d8] sm:$0xff] }
  0x9e   : > { %1955 = vmatpush1.bf16.msra.mxu0 %v2311_v5  ;;  %v2511_v5 = vcombine.low %v453_v55, %v457_v56  ;;  %v2375_v13 = vcombine.low %v317_v61, %v321_v62  ;;  %v402_v55 = vld [vmem:[%s2634_s22 + $0x5f8] sm:$0xff] }
  0x9f   : > { %1956 = vmatprep.subr.bf16.mxu0 %v2304_v7  ;;  %v2504_v7 = vcombine.high %v445_v63, %v449_v0 }
  0xa0   : > { %1996 = vmatpush1.bf16.msra.mxu1 %v2439_v6  ;;  %v2376_v6 = vcombine.high %v317_v61, %v321_v62  ;;  %v266_v61 = vld [vmem:[%s2634_s22 + $0x1b8] sm:$0xff] }
  0xa1   : > { %1997 = vmatprep.subr.bf16.mxu1 %v2432_v8  ;;  %v309_v8 = vld [vmem:[%s2634_s22 + $0x310] sm:$0xff]  ;;  %v390_v62 = vld [vmem:[%s2634_s22 + $0x598] sm:$0xff] }
  0xa2   : > { %1957 = vmatpush1.bf16.msra.mxu0 %v2303_v14  ;;  %v2503_v14 = vcombine.low %v445_v63, %v449_v0  ;;  %v2367_v21 = vcombine.low %v309_v8, %v313_v9  ;;  %v394_v63 = vld [vmem:[%s2634_s22 + $0x5b8] sm:$0xff] }
  0xa3   : > { %1958 = vmatprep.subr.bf16.mxu0 %v2296_v16  ;;  %v2496_v16 = vcombine.high %v437_v10, %v441_v12 }
  0xa4   : > { %1998 = vmatpush1.bf16.msra.mxu1 %v2431_v15  ;;  %v2368_v15 = vcombine.high %v309_v8, %v313_v9  ;;  %v258_v8 = vld [vmem:[%s2634_s22 + $0x178] sm:$0xff] }
  0xa5   : > { %1999 = vmatprep.subr.bf16.mxu1 %v2424_v17  ;;  %v301_v17 = vld [vmem:[%s2634_s22 + $0x2d0] sm:$0xff]  ;;  %v382_v9 = vld [vmem:[%s2634_s22 + $0x558] sm:$0xff] }
  0xa6   : > { %1959 = vmatpush1.bf16.msra.mxu0 %v2295_v22  ;;  %v2495_v22 = vcombine.low %v437_v10, %v441_v12  ;;  %v2359_v31 = vcombine.low %v301_v17, %v305_v18  ;;  %v386_v10 = vld [vmem:[%s2634_s22 + $0x578] sm:$0xff] }
  0xa7   : > { %1960 = vmatprep.subr.bf16.mxu0 %v2288_v24  ;;  %v2488_v24 = vcombine.high %v429_v19, %v433_v20 }
  0xa8   : > { %2000 = vmatpush1.bf16.msra.mxu1 %v2423_v23  ;;  %v2360_v23 = vcombine.high %v301_v17, %v305_v18  ;;  %v250_v17 = vld [vmem:[%s2634_s22 + $0x138] sm:$0xff] }
  0xa9   : > { %2001 = vmatprep.subr.bf16.mxu1 %v2416_v25  ;;  %v293_v25 = vld [vmem:[%s2634_s22 + $0x290] sm:$0xff]  ;;  %v374_v18 = vld [vmem:[%s2634_s22 + $0x518] sm:$0xff] }
  0xaa   : > { %1961 = vmatpush1.bf16.msra.mxu0 %v2287_v32  ;;  %v2487_v32 = vcombine.low %v429_v19, %v433_v20  ;;  %v2351_v40 = vcombine.low %v293_v25, %v297_v28  ;;  %v378_v19 = vld [vmem:[%s2634_s22 + $0x538] sm:$0xff] }
  0xab   : > { %1962 = vmatprep.subr.bf16.mxu0 %v2280_v34  ;;  %v2480_v34 = vcombine.high %v421_v29, %v425_v30 }
  0xac   : > { %2002 = vmatpush1.bf16.msra.mxu1 %v2415_v33  ;;  %v2352_v33 = vcombine.high %v293_v25, %v297_v28  ;;  %v242_v25 = vld [vmem:[%s2634_s22 + $0xf8] sm:$0xff] }
  0xad   : > { %2003 = vmatprep.subr.bf16.mxu1 %v2408_v2  ;;  %v285_v2 = vld [vmem:[%s2634_s22 + $0x250] sm:$0xff]  ;;  %v366_v28 = vld [vmem:[%s2634_s22 + $0x4d8] sm:$0xff] }
  0xae   : > { %1963 = vmatpush1.bf16.msra.mxu0 %v2279_v41  ;;  %v2479_v41 = vcombine.low %v421_v29, %v425_v30  ;;  %v2343_v48 = vcombine.low %v285_v2, %v289_v37 }
  0xaf   : > { %1964 = vmatprep.subr.bf16.mxu0 %v2272_v43  ;;  %v2472_v43 = vcombine.high %v413_v38, %v417_v39 }
  0xb0   : > { %2004 = vmatpush1.bf16.msra.mxu1 %v2407_v42  ;;  %v2344_v42 = vcombine.high %v285_v2, %v289_v37  ;;  %v362_v2 = vld [vmem:[%s2634_s22 + $0x4b8] sm:$0xff] }
  0xb1   : > { %2005 = vmatprep.subr.bf16.mxu1 %v2400_v44  ;;  %v277_v44 = vld [vmem:[%s2634_s22 + $0x210] sm:$0xff] }
  0xb2   : > { %1965 = vmatpush1.bf16.msra.mxu0 %v2271_v49  ;;  %v2471_v49 = vcombine.low %v413_v38, %v417_v39  ;;  %v2335_v56 = vcombine.low %v277_v44, %v281_v45 }
  0xb3   : > { %1966 = vmatprep.subr.bf16.mxu0 %v2392_v51  ;;  %v2464_v51 = vcombine.high %v405_v46, %v409_v47 }
  0xb4   : > { %2006 = vmatpush1.bf16.msra.mxu1 %v2399_v50  ;;  %v2336_v50 = vcombine.high %v277_v44, %v281_v45  ;;  %v354_v44 = vld [vmem:[%s2634_s22 + $0x478] sm:$0xff] }
  0xb5   : > { %2007 = vmatprep.subr.bf16.mxu1 %v2520_v52  ;;  %v270_v52 = vld [vmem:[%s2634_s22 + $0x1d8] sm:$0xff] }
  0xb6   : > { %1967 = vmatpush2.bf16.msra.mxu0 %v2391_v57  ;;  %v2463_v57 = vcombine.low %v405_v46, %v409_v47  ;;  %v2329_v0 = vcombine.low %v270_v52, %v274_v53 }
  0xb7   : > { %1968 = vmatprep.subr.bf16.mxu0 %v2384_v59  ;;  %v2458_v59 = vcombine.high %v398_v54, %v402_v55 }
  0xb8   : > { %2008 = vmatpush2.bf16.msra.mxu1 %v2519_v58  ;;  %v2330_v58 = vcombine.high %v270_v52, %v274_v53  ;;  %v346_v52 = vld [vmem:[%s2634_s22 + $0x438] sm:$0xff] }
  0xb9   : > { %2009 = vmatprep.subr.bf16.mxu1 %v2512_v60  ;;  %v262_v60 = vld [vmem:[%s2634_s22 + $0x198] sm:$0xff] }
  0xba   : > { %1969 = vmatpush2.bf16.msra.mxu0 %v2383_v4  ;;  %v2457_v4 = vcombine.low %v398_v54, %v402_v55  ;;  %v2321_v12 = vcombine.low %v262_v60, %v266_v61 }
  0xbb   : > { %1970 = vmatprep.subr.bf16.mxu0 %v2376_v6  ;;  %v2450_v6 = vcombine.high %v390_v62, %v394_v63 }
  0xbc   : > { %2010 = vmatpush2.bf16.msra.mxu1 %v2511_v5  ;;  %v2322_v5 = vcombine.high %v262_v60, %v266_v61  ;;  %v466_v60 = vld [vmem:[%s2634_s22 + $0x7f8] sm:$0xff] }
  0xbd   : > { %2011 = vmatprep.subr.bf16.mxu1 %v2504_v7  ;;  %v254_v7 = vld [vmem:[%s2634_s22 + $0x158] sm:$0xff] }
  0xbe   : > { %1971 = vmatpush2.bf16.msra.mxu0 %v2375_v13  ;;  %v2449_v13 = vcombine.low %v390_v62, %v394_v63  ;;  %v2313_v20 = vcombine.low %v254_v7, %v258_v8 }
  0xbf   : > { %1972 = vmatprep.subr.bf16.mxu0 %v2368_v15  ;;  %v2442_v15 = vcombine.high %v382_v9, %v386_v10 }
  0xc0   : > { %2012 = vmatpush2.bf16.msra.mxu1 %v2503_v14  ;;  %v2314_v14 = vcombine.high %v254_v7, %v258_v8  ;;  %v458_v7 = vld [vmem:[%s2634_s22 + $0x7b8] sm:$0xff] }
  0xc1   : > { %2013 = vmatprep.subr.bf16.mxu1 %v2496_v16  ;;  %v246_v16 = vld [vmem:[%s2634_s22 + $0x118] sm:$0xff] }
  0xc2   : > { %1973 = vmatpush2.bf16.msra.mxu0 %v2367_v21  ;;  %v2441_v21 = vcombine.low %v382_v9, %v386_v10  ;;  %v2305_v29 = vcombine.low %v246_v16, %v250_v17 }
  0xc3   : > { %1974 = vmatprep.subr.bf16.mxu0 %v2360_v23  ;;  %v2434_v23 = vcombine.high %v374_v18, %v378_v19 }
  0xc4   : > { %2014 = vmatpush2.bf16.msra.mxu1 %v2495_v22  ;;  %v2306_v22 = vcombine.high %v246_v16, %v250_v17  ;;  %v450_v16 = vld [vmem:[%s2634_s22 + $0x778] sm:$0xff] }
  0xc5   : > { %2015 = vmatprep.subr.bf16.mxu1 %v2488_v24  ;;  %v238_v24 = vld [vmem:[%s2634_s22 + $0xd8] sm:$0xff] }
  0xc6   : > { %1975 = vmatpush2.bf16.msra.mxu0 %v2359_v31  ;;  %v2298_v30 = vcombine.high %v238_v24, %v242_v25  ;;  %v2297_v37 = vcombine.low %v238_v24, %v242_v25  ;;  %v442_v24 = vld [vmem:[%s2634_s22 + $0x738] sm:$0xff] }
  0xc7   : > { %1976 = vmatprep.subr.bf16.mxu0 %v2352_v33  ;;  %v234_v33 = vld [vmem:[%s2634_s22 + $0xb8] sm:$0xff] }
  0xc8   : > { %2016 = vmatpush2.bf16.msra.mxu1 %v2487_v32  ;;  %v230_v32 = vld [vmem:[%s2634_s22 + $0x98] sm:$0xff] }
  0xc9   : > { %2017 = vmatprep.subr.bf16.mxu1 %v2480_v34  ;;  %v358_v34 = vld [vmem:[%s2634_s22 + $0x498] sm:$0xff]  ;;  %v2290_v39 = vcombine.high %v230_v32, %v234_v33  ;;  %v2289_v45 = vcombine.low %v230_v32, %v234_v33 }
  0xca   : > { %1977 = vmatpush2.bf16.msra.mxu0 %v2351_v40  ;;  %v2418_v40 = vcombine.high %v358_v34, %v362_v2  ;;  %v2417_v46 = vcombine.low %v358_v34, %v362_v2  ;;  %v434_v32 = vld [vmem:[%s2634_s22 + $0x6f8] sm:$0xff] }
  0xcb   : > { %1978 = vmatprep.subr.bf16.mxu0 %v2344_v42  ;;  %v226_v42 = vld [vmem:[%s2634_s22 + $0x78] sm:$0xff] }
  0xcc   : > { %2018 = vmatpush2.bf16.msra.mxu1 %v2479_v41  ;;  %v222_v41 = vld [vmem:[%s2634_s22 + $0x58] sm:$0xff] }
  0xcd   : > { %2019 = vmatprep.subr.bf16.mxu1 %v2472_v43  ;;  %v350_v43 = vld [vmem:[%s2634_s22 + $0x458] sm:$0xff]  ;;  %v2282_v47 = vcombine.high %v222_v41, %v226_v42  ;;  %v2281_v53 = vcombine.low %v222_v41, %v226_v42 }
  0xce   : > { %1979 = vmatpush2.bf16.msra.mxu0 %v2343_v48  ;;  %v2410_v48 = vcombine.high %v350_v43, %v354_v44  ;;  %v2409_v54 = vcombine.low %v350_v43, %v354_v44  ;;  %v426_v41 = vld [vmem:[%s2634_s22 + $0x6b8] sm:$0xff] }
  0xcf   : > { %1980 = vmatprep.subr.bf16.mxu0 %v2336_v50  ;;  %v218_v50 = vld [vmem:[%s2634_s22 + $0x38] sm:$0xff] }
  0xd0   : > { %2020 = vmatpush2.bf16.msra.mxu1 %v2471_v49  ;;  %v214_v49 = vld [vmem:[%s2634_s22 + $0x18] sm:$0xff] }
  0xd1   : > { %2021 = vmatprep.subr.bf16.mxu1 %v2464_v51  ;;  %v342_v51 = vld [vmem:[%s2634_s22 + $0x418] sm:$0xff]  ;;  %v2274_v55 = vcombine.high %v214_v49, %v218_v50  ;;  %v2273_v61 = vcombine.low %v214_v49, %v218_v50 }
  0xd2   : > { %1981 = vmatpush2.bf16.msra.mxu0 %v2335_v56  ;;  %v2402_v56 = vcombine.high %v342_v51, %v346_v52  ;;  %v2401_v62 = vcombine.low %v342_v51, %v346_v52  ;;  %v418_v49 = vld [vmem:[%s2634_s22 + $0x678] sm:$0xff] }
  0xd3   : > { %2032 = vmatprep.subr.bf16.mxu0 %v2330_v58  ;;  %v338_v58 = vld [vmem:[%s2634_s22 + $0x3f8] sm:$0xff] }
  0xd4   : > { %2022 = vmatpush2.bf16.msra.mxu1 %v2463_v57  ;;  %v334_v57 = vld [vmem:[%s2634_s22 + $0x3d8] sm:$0xff] }
  0xd5   : > { %2073 = vmatprep.subr.bf16.mxu1 %v2458_v59  ;;  %1983 = vmatmul.mubr.bf16.vlgmr.msra.gmra.mxu0 %v2720_v26  ;;  %v462_v59 = vld [vmem:[%s2634_s22 + $0x7d8] sm:$0xff]  ;;  %v2394_v63 = vcombine.high %v334_v57, %v338_v58  ;;  %v2393_v8 = vcombine.low %v334_v57, %v338_v58 }
  0xd6   : > { %2033 = vmatpush1.bf16.msra.mxu0 %v2329_v0  ;;  %2064 = vmatprep.mubr.bf16.mxu0 %v2654_v27  ;;  %v370_v27 = vld [vmem:[%s2634_s22 + $0x4f8] sm:$0xff]  ;;  %v2522_v0 = vcombine.high %v462_v59, %v466_v60  ;;  %v2521_v9 = vcombine.low %v462_v59, %v466_v60 }
  0xd7   : > { %2024 = vmatmul.mubr.bf16.vlgmr.msra.gmra.mxu1 %v2728_v35  ;;  %2034 = vmatprep.subr.bf16.mxu0 %v2322_v5  ;;  %v2426_v31 = vcombine.high %v366_v28, %v370_v27  ;;  %v2425_v38 = vcombine.low %v366_v28, %v370_v27  ;;  %v330_v5 = vld [vmem:[%s2634_s22 + $0x3b8] sm:$0xff] }
  0xd8   : > { %2074 = vmatpush1.bf16.msra.mxu1 %v2457_v4  ;;  %2105 = vmatprep.mubr.bf16.mxu1 %v2663_v36  ;;  %v2433_v36 = vcombine.low %v374_v18, %v378_v19  ;;  %v326_v4 = vld [vmem:[%s2634_s22 + $0x398] sm:$0xff] }
  0xd9   : > { %2075 = vmatprep.subr.bf16.mxu1 %v2450_v6  ;;  %v454_v6 = vld [vmem:[%s2634_s22 + $0x798] sm:$0xff]  ;;  %v2386_v10 = vcombine.high %v326_v4, %v330_v5  ;;  %v2385_v17 = vcombine.low %v326_v4, %v330_v5  ;;  %v471_v4 = vpop.permute.xlu0 %470 }
  0xda   : > { %2035 = vmatpush1.bf16.msra.mxu0 %v2321_v12  ;;  %v2514_v12 = vcombine.high %v454_v6, %v458_v7  ;;  %v2513_v18 = vcombine.low %v454_v6, %v458_v7  ;;  %v410_v57 = vld [vmem:[%s2634_s22 + $0x638] sm:$0xff] }
  0xdb   : > { %2036 = vmatprep.subr.bf16.mxu0 %v2314_v14  ;;  %v322_v14 = vld [vmem:[%s2634_s22 + $0x378] sm:$0xff] }
  0xdc   : > { %2076 = vmatpush1.bf16.msra.mxu1 %v2449_v13  ;;  %v318_v13 = vld [vmem:[%s2634_s22 + $0x358] sm:$0xff] }
  0xdd   : > { %2077 = vmatprep.subr.bf16.mxu1 %v2442_v15  ;;  %v446_v15 = vld [vmem:[%s2634_s22 + $0x758] sm:$0xff]  ;;  %v2378_v19 = vcombine.high %v318_v13, %v322_v14  ;;  %v2377_v25 = vcombine.low %v318_v13, %v322_v14 }
  0xde   : > { %2037 = vmatpush1.bf16.msra.mxu0 %v2313_v20  ;;  %v2506_v20 = vcombine.high %v446_v15, %v450_v16  ;;  %v2505_v28 = vcombine.low %v446_v15, %v450_v16 }
  0xdf   : > { %2038 = vmatprep.subr.bf16.mxu0 %v2306_v22  ;;  %v314_v22 = vld [vmem:[%s2634_s22 + $0x338] sm:$0xff] }
  0xe0   : > { %2078 = vmatpush1.bf16.msra.mxu1 %v2441_v21  ;;  %v310_v21 = vld [vmem:[%s2634_s22 + $0x318] sm:$0xff] }
  0xe1   : > { %2079 = vmatprep.subr.bf16.mxu1 %v2434_v23  ;;  %v438_v23 = vld [vmem:[%s2634_s22 + $0x718] sm:$0xff]  ;;  %v2370_v27 = vcombine.high %v310_v21, %v314_v22  ;;  %v2369_v33 = vcombine.low %v310_v21, %v314_v22 }
  0xe2   : > { %2039 = vmatpush1.bf16.msra.mxu0 %v2305_v29  ;;  %v2498_v29 = vcombine.high %v438_v23, %v442_v24  ;;  %v2497_v34 = vcombine.low %v438_v23, %v442_v24 }
  0xe3   : > { %2040 = vmatprep.subr.bf16.mxu0 %v2298_v30  ;;  %v306_v30 = vld [vmem:[%s2634_s22 + $0x2f8] sm:$0xff] }
  0xe4   : > { %2080 = vmatpush1.bf16.msra.mxu1 %v2433_v36  ;;  %v302_v36 = vld [vmem:[%s2634_s22 + $0x2d8] sm:$0xff] }
  0xe5   : > { %2081 = vmatprep.subr.bf16.mxu1 %v2426_v31  ;;  %v430_v31 = vld [vmem:[%s2634_s22 + $0x6d8] sm:$0xff]  ;;  %v2362_v2 = vcombine.high %v302_v36, %v306_v30  ;;  %v2361_v42 = vcombine.low %v302_v36, %v306_v30 }
  0xe6   : > { %2041 = vmatpush1.bf16.msra.mxu0 %v2297_v37  ;;  %v2490_v37 = vcombine.high %v430_v31, %v434_v32  ;;  %v2489_v43 = vcombine.low %v430_v31, %v434_v32 }
  0xe7   : > { %2042 = vmatprep.subr.bf16.mxu0 %v2290_v39  ;;  %v298_v39 = vld [vmem:[%s2634_s22 + $0x2b8] sm:$0xff] }
  0xe8   : > { %2082 = vmatpush1.bf16.msra.mxu1 %v2425_v38  ;;  %v294_v38 = vld [vmem:[%s2634_s22 + $0x298] sm:$0xff] }
  0xe9   : > { %2083 = vmatprep.subr.bf16.mxu1 %v2418_v40  ;;  %v422_v40 = vld [vmem:[%s2634_s22 + $0x698] sm:$0xff]  ;;  %v2354_v44 = vcombine.high %v294_v38, %v298_v39  ;;  %v2353_v50 = vcombine.low %v294_v38, %v298_v39 }
  0xea   : > { %2043 = vmatpush1.bf16.msra.mxu0 %v2289_v45  ;;  %v2482_v45 = vcombine.high %v422_v40, %v426_v41  ;;  %v2481_v51 = vcombine.low %v422_v40, %v426_v41 }
  0xeb   : > { %2044 = vmatprep.subr.bf16.mxu0 %v2282_v47  ;;  %v290_v47 = vld [vmem:[%s2634_s22 + $0x278] sm:$0xff] }
  0xec   : > { %2084 = vmatpush1.bf16.msra.mxu1 %v2417_v46  ;;  %v286_v46 = vld [vmem:[%s2634_s22 + $0x258] sm:$0xff] }
  0xed   : > { %2085 = vmatprep.subr.bf16.mxu1 %v2410_v48  ;;  %v414_v48 = vld [vmem:[%s2634_s22 + $0x658] sm:$0xff]  ;;  %v2346_v52 = vcombine.high %v286_v46, %v290_v47  ;;  %v2345_v58 = vcombine.low %v286_v46, %v290_v47 }
  0xee   : > { %2045 = vmatpush1.bf16.msra.mxu0 %v2281_v53  ;;  %v2474_v53 = vcombine.high %v414_v48, %v418_v49  ;;  %v2473_v59 = vcombine.low %v414_v48, %v418_v49 }
  0xef   : > { %2046 = vmatprep.subr.bf16.mxu0 %v2274_v55  ;;  %v282_v55 = vld [vmem:[%s2634_s22 + $0x238] sm:$0xff] }
  0xf0   : > { %2086 = vmatpush1.bf16.msra.mxu1 %v2409_v54  ;;  %v278_v54 = vld [vmem:[%s2634_s22 + $0x218] sm:$0xff] }
  0xf1   : > { %2087 = vmatprep.subr.bf16.mxu1 %v2402_v56  ;;  %v406_v56 = vld [vmem:[%s2634_s22 + $0x618] sm:$0xff]  ;;  %v2338_v60 = vcombine.high %v278_v54, %v282_v55 }
  0xf2   : > { %2047 = vmatpush1.bf16.msra.mxu0 %v2273_v61  ;;  %v2466_v61 = vcombine.high %v406_v56, %v410_v57 }
  0xf3   : > { %2048 = vmatprep.subr.bf16.mxu0 %v2394_v63  ;;  %v475_v63 = vsub.s32 0, %v2628_v3 }
  0xf4   : > { %2088 = vmatpush1.bf16.msra.mxu1 %v2401_v62  ;;  %v2337_v62 = vcombine.low %v278_v54, %v282_v55 }
  0xf5   : > { %2089 = vmatprep.subr.bf16.mxu1 %v2522_v0  ;;  %v2465_v0 = vcombine.low %v406_v56, %v410_v57  ;;  %v476_v5 = vrot.slane %v471_v4, %v475_v63 }
  0xf6   : > { %2049 = vmatpush2.bf16.msra.mxu0 %v2393_v8 }
  0xf7   : > { %2050 = vmatprep.subr.bf16.mxu0 %v2386_v10 }
  0xf8   : > { %2090 = vmatpush2.bf16.msra.mxu1 %v2521_v9 }
  0xf9   : > { %2091 = vmatprep.subr.bf16.mxu1 %v2514_v12 }
  0xfa   : > { %2051 = vmatpush2.bf16.msra.mxu0 %v2385_v17 }
  0xfb   : > { %2052 = vmatprep.subr.bf16.mxu0 %v2378_v19 }
  0xfc   : > { %2092 = vmatpush2.bf16.msra.mxu1 %v2513_v18 }
  0xfd   : > { %2093 = vmatprep.subr.bf16.mxu1 %v2506_v20 }
  0xfe   : > { %2053 = vmatpush2.bf16.msra.mxu0 %v2377_v25 }
  0xff   : > { %2054 = vmatprep.subr.bf16.mxu0 %v2370_v27 }
 0x100   : > { %2094 = vmatpush2.bf16.msra.mxu1 %v2505_v28 }
 0x101   : > { %2095 = vmatprep.subr.bf16.mxu1 %v2498_v29 }
 0x102   : > { %2055 = vmatpush2.bf16.msra.mxu0 %v2369_v33 }
 0x103   : > { %2056 = vmatprep.subr.bf16.mxu0 %v2362_v2 }
 0x104   : > { %2096 = vmatpush2.bf16.msra.mxu1 %v2497_v34 }
 0x105   : > { %2097 = vmatprep.subr.bf16.mxu1 %v2490_v37 }
 0x106   : > { %2057 = vmatpush2.bf16.msra.mxu0 %v2361_v42 }
 0x107   : > { %2058 = vmatprep.subr.bf16.mxu0 %v2354_v44 }
 0x108   : > { %2098 = vmatpush2.bf16.msra.mxu1 %v2489_v43 }
 0x109   : > { %2099 = vmatprep.subr.bf16.mxu1 %v2482_v45 }
 0x10a   : > { %2059 = vmatpush2.bf16.msra.mxu0 %v2353_v50 }
 0x10b   : > { %2060 = vmatprep.subr.bf16.mxu0 %v2346_v52 }
 0x10c   : > { %2100 = vmatpush2.bf16.msra.mxu1 %v2481_v51 }
 0x10d   : > { %2101 = vmatprep.subr.bf16.mxu1 %v2474_v53 }
 0x10e   : > { %2061 = vmatpush2.bf16.msra.mxu0 %v2345_v58 }
 0x10f   : > { %2062 = vmatprep.subr.bf16.mxu0 %v2338_v60 }
 0x110   : > { %2102 = vmatpush2.bf16.msra.mxu1 %v2473_v59 }
 0x111   : > { %2103 = vmatprep.subr.bf16.mxu1 %v2466_v61 }
 0x112   : > { %2063 = vmatpush2.bf16.msra.mxu0 %v2337_v62 }
 0x114   : > { %2104 = vmatpush2.bf16.msra.mxu1 %v2465_v0 }
 0x115   : > { %v1820_v6 = vpop.f32.mrf.mxu0  ;;  %2065 = vmatmul.mubr.bf16.vlgmr.msra.gmra.mxu0 %v2720_v26 }
 0x116   : > { %v1821_v7 = vadd.f32 %v1820_v6, %v476_v5 }
 0x117   : > { %v1861_v8 = vpop.f32.mrf.mxu1  ;;  %2106 = vmatmul.mubr.bf16.vlgmr.msra.gmra.mxu1 %v2728_v35  ;;  %v1822_v9 = vpop.f32.mrf.mxu0 }
 0x118   : > { %v1862_v10 = vadd.f32 %v1861_v8, %v1821_v7  ;;  %v1823_v12 = vadd.f32 %v1822_v9, %v476_v5 }
 0x119   : > { %v1863_v13 = vpop.f32.mrf.mxu1  ;;  %v1824_v3 = vpop.f32.mrf.mxu0 }
 0x11a   : > { %v1864_v14 = vadd.f32 %v1863_v13, %v1823_v12 }
 0x11b   : > { %v1865_v15 = vpop.f32.mrf.mxu1  ;;  %v1825_v16 = vpop.f32.mrf.mxu0 }
 0x11c   : > { %v2122_v17 = vcombine.low %v1862_v10, %v1864_v14 }
 0x11d   : > { %v1866_v18 = vpop.f32.mrf.mxu1 }
 0x11e   : > { %v2132_v30 = vrot.slane %v2122_v17, %v2642_v11 }
 0x155   : > { %v1902_v19 = vpop.f32.mrf.mxu0 }
 0x156   : > { %v1903_v20 = vadd.f32 %v1902_v19, %v476_v5 }
 0x157   : > { %v1943_v21 = vpop.f32.mrf.mxu1  ;;  %v1904_v22 = vpop.f32.mrf.mxu0 }
 0x158   : > { %v1944_v23 = vadd.f32 %v1943_v21, %v1903_v20  ;;  %v1905_v26 = vadd.f32 %v1904_v22, %v476_v5 }
 0x159   : > { %v1945_v24 = vpop.f32.mrf.mxu1  ;;  %v1906_v25 = vpop.f32.mrf.mxu0 }
 0x15a   : > { %v1946_v28 = vadd.f32 %v1945_v24, %v1905_v26 }
 0x15b   : > { %v1947_v35 = vpop.f32.mrf.mxu1  ;;  %v1907_v27 = vpop.f32.mrf.mxu0 }
 0x15c   : > { %v2123_v29 = vcombine.low %v1944_v23, %v1946_v28 }
 0x15d   : > { %v1948_v36 = vpop.f32.mrf.mxu1 }
 0x15e   : > { %v2139_v31 = vrot.slane %v2123_v29, %v2642_v11 }
 0x160   : > { %v2154_v32 = vcombine.low %v2132_v30, %v2139_v31 }
 0x162   : > { %v2162_v63 = vrot.slane %v2154_v32, %v2642_v11 }
 0x195   : > { %v1984_v33 = vpop.f32.mrf.mxu0 }
 0x196   : > { %v1985_v34 = vadd.f32 %v1984_v33, %v476_v5 }
 0x197   : > { %v2025_v2 = vpop.f32.mrf.mxu1  ;;  %v1986_v37 = vpop.f32.mrf.mxu0 }
 0x198   : > { %v2026_v38 = vadd.f32 %v2025_v2, %v1985_v34  ;;  %v1987_v39 = vadd.f32 %v1986_v37, %v476_v5 }
 0x199   : > { %v2027_v40 = vpop.f32.mrf.mxu1  ;;  %v1988_v41 = vpop.f32.mrf.mxu0 }
 0x19a   : > { %v2028_v42 = vadd.f32 %v2027_v40, %v1987_v39 }
 0x19b   : > { %v2029_v43 = vpop.f32.mrf.mxu1  ;;  %v1989_v44 = vpop.f32.mrf.mxu0 }
 0x19c   : > { %v2124_v45 = vcombine.low %v2026_v38, %v2028_v42 }
 0x19d   : > { %v2030_v46 = vpop.f32.mrf.mxu1 }
 0x19e   : > { %v2146_v60 = vrot.slane %v2124_v45, %v2642_v11 }
 0x1d5   : > { %v2066_v47 = vpop.f32.mrf.mxu0 }
 0x1d6   : > { %v2067_v48 = vadd.f32 %v2066_v47, %v476_v5 }
 0x1d7   : > { %v2107_v49 = vpop.f32.mrf.mxu1  ;;  %v2068_v50 = vpop.f32.mrf.mxu0 }
 0x1d8   : > { %v2069_v51 = vadd.f32 %v2068_v50, %v476_v5  ;;  %v2108_v54 = vadd.f32 %v2107_v49, %v2067_v48 }
 0x1d9   : > { %v2109_v52 = vpop.f32.mrf.mxu1  ;;  %v2070_v53 = vpop.f32.mrf.mxu0 }
 0x1da   : > { %v2110_v55 = vadd.f32 %v2109_v52, %v2069_v51 }
 0x1db   : > { %v2111_v56 = vpop.f32.mrf.mxu1  ;;  %v2071_v57 = vpop.f32.mrf.mxu0 }
 0x1dc   : > { %v2125_v58 = vcombine.low %v2108_v54, %v2110_v55 }
 0x1dd   : > { %v2112_v59 = vpop.f32.mrf.mxu1 }
 0x1de   : > { %v2153_v61 = vrot.slane %v2125_v58, %v2642_v11 }
 0x1e0   : > { %v2155_v62 = vcombine.low %v2146_v60, %v2153_v61 }
 0x1e2   : > { %v2169_v0 = vrot.slane %v2155_v62, %v2642_v11 }
 0x1e4   : > { %v2170_v4 = vcombine.low %v2162_v63, %v2169_v0 }
 0x1e6   : > { %2176 = vst.msk [vmem:[%s208_s26] sm:$0xff] %vm2174_vm0, %v2170_v4 }
 0x1e7 PF: > { %s15_s16 = sadd.s32 1, %s2575_s16   ;;  %s2953_s14 = smov %s2571_s15 }
 0x1e8   : > { %p12_p5 = scmp.ge.s32.totalorder %s15_s16, 4   ;;  %s2954_s15 = smov %s2956_s2 }
 0x1ea   :  { %14 = sbr.rel (!%p12_p5) target bundleno = 3 (0x3), region = 62 }

</bundles_post_ra>
